<compile_context>
chip_gen: v7x
topology: tpu7x:2x2x1
jax: 0.10.0
libtpu: 0.0.40
codegen_flags: <defaults>
</compile_context>

<pallas_src>
import functools

import jax
import jax.numpy as jnp
from jax import lax
from jax.experimental import pallas as pl
from jax.experimental.pallas import tpu as pltpu

_LANE = 128
_MIN_TILE = 1024                       # lane-dense (TILE_N//128, 128) out block
_TARGET_TILE_BYTES = 4 * 1024 * 1024   # raw logits bytes per tile to aim for


def _vmem_limit_bytes():
    """Per-generation scoped-VMEM limit (review #4/#5) with a v7x-safe fallback."""
    try:
        cap = int(pltpu.get_tpu_info().vmem_capacity_bytes)
    except Exception:                  # robust off-TPU / older attribute names
        cap = 64 * 1024 * 1024
    return max(32 * 1024 * 1024, int(cap * 0.7))


def _choose_tile_n(n, c, in_itemsize, vmem_limit):
    """Bytes-targeted row-tile size; always a multiple of 1024 rows."""
    if n <= _MIN_TILE:
        return _MIN_TILE
    # Working set per row: 2x double-buffered input block (native dtype) plus
    # ~3 full-tile 32-bit temporaries (shifted logits, exp, class iota) plus
    # the double-buffered lane-dense output block.
    per_row = c * (2 * in_itemsize + 3 * 4) + 2 * 4
    cap = max((int(vmem_limit * 0.6) // per_row) // _MIN_TILE * _MIN_TILE, _MIN_TILE)
    want = max((_TARGET_TILE_BYTES // max(c * in_itemsize, 1))
               // _MIN_TILE * _MIN_TILE, _MIN_TILE)
    # Never exceed N rows per tile: that keeps every block a standard
    # (possibly ragged-at-the-end) block of the unpadded logits.
    return min(want, cap, (n // _MIN_TILE) * _MIN_TILE)


def _ce_loss_kernel(predict_ref, target_ref, loss_ref, *, r, c):
    """Per-sample CE for one row tile -> one lane-dense (r, 128) loss block."""
    # (tile_n, c) -> (r, 128, c) and (tile_n, 1) -> (r, 128, 1) are pure
    # major-dim splits (minor dims unchanged): free, no data movement.
    x = predict_ref[...].reshape(r, _LANE, c)            # caller's dtype
    t = target_ref[...].reshape(r, _LANE, 1)             # int32; -1 = ignore / pad

    m = jnp.max(x, axis=-1, keepdims=True)                               # (r,128,1)
    xm = x.astype(jnp.float32) - m.astype(jnp.float32)                   # (r,128,c)

    col = lax.broadcasted_iota(jnp.int32, (r, _LANE, c), 2)
    # Both per-row reductions come from the same shifted values xm:
    #   loss = logsumexp(x) - x[t] = log(sum(exp(xm))) - xm[t]
    tgt_xm = jnp.sum(jnp.where(col == t, xm, 0.0), axis=-1, keepdims=True)
    sumexp = jnp.sum(jnp.exp(xm), axis=-1, keepdims=True)

    loss = jnp.log(sumexp) - tgt_xm                                      # (r,128,1)
    # t == -1 selects 0.0 both for ignored samples and for the ragged-tile
    # padding rows (whose un-DMA'd garbage may be NaN/Inf: where() discards
    # the unselected branch).  The clamp keeps losses >= 0 so that phase 2's
    # bit-pattern ordering stays monotone.
    loss = jnp.where(t == -1, 0.0, jnp.maximum(loss, 0.0))
    # Drop the unit class axis -> lane-dense (r, 128) block.
    loss_ref[...] = jnp.sum(loss, axis=-1)


def _topk_sum_kernel(loss_ref, out_ref, *, keep_num, reduction):
    """Sum of the keep_num largest losses (exact, tie-aware)."""
    l = loss_ref[...]                          # (R, 128) f32, all >= 0
    bits = pltpu.bitcast(l, jnp.int32)         # monotone ordering for x >= 0
    k = jnp.int32(keep_num)

    # 2-bit radix descent from the MSB.  Invariant: count(bits >= p) >= k.
    # After the last round p is the largest int32 with count(bits >= p) >= k,
    # i.e. exactly the bit pattern of the keep_num-th largest loss.  The <= 3
    # candidate counts inside a round all use the round-start prefix, so they
    # are independent and their compare+reduce sweeps overlap; 16 rounds
    # replace the 32 serially dependent bisection steps.  The sign bit is
    # never set (losses are clamped >= 0), so no int32 overflow is possible.
    p = jnp.int32(0)
    for shift in range(30, -2, -2):
        base = p
        top = 1 if shift == 30 else 3          # bit 31 is always 0
        for v in range(1, top + 1):
            cand = base | jnp.int32(v << shift)
            cnt = jnp.sum((bits >= cand).astype(jnp.int32))
            p = jnp.where(cnt >= k, cand, p)

    gt = bits > p                                            # strictly above threshold
    count_gt = jnp.sum(gt.astype(jnp.int32))
    sum_gt = jnp.sum(jnp.where(gt, l, 0.0))
    eq = (bits >= p) & jnp.logical_not(gt)                   # reuse gt for the tie mask
    tau = jnp.max(jnp.where(eq, l, 0.0))                     # the threshold value
    total = sum_gt + (k - count_gt).astype(jnp.float32) * tau

    if reduction == 'mean':
        total = total / jnp.float32(keep_num)
    out_ref[0, 0] = total


def ohem_loss(predict, target, keep_rate, reduction='sum'):
    """Pallas TPU implementation of OHEMLoss.forward(predict, target).

    predict: (N, C) logits (any float dtype; streamed in that dtype).
    target:  (N,) int class ids, -1 = ignore_index.
    Note: keep_num is clamped to >= 1 (PyTorch would produce 0/NaN there).
    """
    n, c = predict.shape
    keep_num = min(n, int(n * keep_rate))        # static, like the PyTorch code
    keep_num = max(keep_num, 1)

    in_itemsize = jnp.dtype(predict.dtype).itemsize
    vmem_limit = _vmem_limit_bytes()
    tile_n = _choose_tile_n(n, c, in_itemsize, vmem_limit)
    num_tiles = pl.cdiv(n, tile_n)
    n_pad = num_tiles * tile_n
    r = tile_n // _LANE

    if n < tile_n:
        # Sub-tile batch only: pad the (tiny) logits so the single block covers
        # the array.  Large inputs are never copied; their ragged last tile is
        # masked in-kernel via the -1 padding of the target vector below.
        predict = jnp.pad(predict, ((0, tile_n - n), (0, 0)))

    # Only the tiny target vector is padded.  Pad rows get -1 -> loss 0, which
    # can never displace a real top-k candidate (losses >= 0, keep_num <= N).
    tgt = target.astype(jnp.int32)
    if n_pad != n:
        tgt = jnp.pad(tgt, (0, n_pad - n), constant_values=-1)
    tgt_col = tgt.reshape(n_pad, 1)

    # Phase 1: per-sample CE, pipelined over row tiles, lane-dense loss slab.
    loss = pl.pallas_call(
        functools.partial(_ce_loss_kernel, r=r, c=c),
        out_shape=jax.ShapeDtypeStruct((n_pad // _LANE, _LANE), jnp.float32),
        grid=(num_tiles,),
        in_specs=[
            pl.BlockSpec((tile_n, c), lambda i: (i, 0)),    # logits (caller's dtype)
            pl.BlockSpec((tile_n, 1), lambda i: (i, 0)),    # targets
        ],
        out_specs=pl.BlockSpec((r, _LANE), lambda i: (i, 0)),
        compiler_params=pltpu.CompilerParams(
            dimension_semantics=("parallel",),
            vmem_limit_bytes=vmem_limit),
        cost_estimate=pl.CostEstimate(
            flops=6 * n * c,
            transcendentals=n * (c + 1),
            bytes_accessed=n * c * in_itemsize + 8 * n_pad),
    )(predict, tgt_col)

    # Phase 2: exact top-k sum + final reduction on the tiny loss slab.
    out = pl.pallas_call(
        functools.partial(_topk_sum_kernel, keep_num=keep_num, reduction=reduction),
        out_shape=jax.ShapeDtypeStruct((1, 1), jnp.float32),
        in_specs=[pl.BlockSpec(memory_space=pltpu.MemorySpace.VMEM)],
        out_specs=pl.BlockSpec(memory_space=pltpu.MemorySpace.SMEM),
        compiler_params=pltpu.CompilerParams(vmem_limit_bytes=vmem_limit),
    )(loss)
    return out[0, 0]


def _ohem_loss_reference(predict, target, keep_rate, reduction='sum'):
    """Plain-JAX reference used for a sanity check."""
    n = predict.shape[0]
    logp = jax.nn.log_softmax(predict.astype(jnp.float32), axis=-1)
    safe_t = jnp.maximum(target, 0)
    loss = -jnp.take_along_axis(logp, safe_t[:, None], axis=1)[:, 0]
    loss = jnp.where(target == -1, 0.0, loss)
    keep_num = max(1, min(n, int(n * keep_rate)))
    top = lax.top_k(loss, keep_num)[0]
    s = jnp.sum(top)
    return s / keep_num if reduction == 'mean' else s


if __name__ == "__main__":
    key = jax.random.PRNGKey(0)
    k1, k2, k3, k4 = jax.random.split(key, 4)

    # Case 1: small batch, reduction='sum', with an ignored sample.
    N, C = 8, 32
    predict = jax.random.normal(k1, (N, C), dtype=jnp.float32)
    target = jax.random.randint(k2, (N,), 0, C, dtype=jnp.int32)
    target = target.at[3].set(-1)                 # exercise ignore_index=-1
    out = jax.block_until_ready(ohem_loss(predict, target, 0.7, 'sum'))
    ref = _ohem_loss_reference(predict, target, 0.7, 'sum')
    assert jnp.allclose(out, ref, rtol=2e-5, atol=1e-4), (out, ref)

    # Case 2: ragged row count (not a multiple of the tile), reduction='mean'.
    N2, C2 = 2200, 48
    predict2 = jax.random.normal(k3, (N2, C2), dtype=jnp.float32)
    target2 = jax.random.randint(k4, (N2,), 0, C2, dtype=jnp.int32)
    target2 = target2.at[10].set(-1)
    out2 = jax.block_until_ready(ohem_loss(predict2, target2, 0.5, 'mean'))
    ref2 = _ohem_loss_reference(predict2, target2, 0.5, 'mean')
    assert jnp.allclose(out2, ref2, rtol=2e-5, atol=1e-4), (out2, ref2)

    print("KERNEL_OK")
</pallas_src>

<mosaic_0001>
module attributes {stable_mosaic.version = 11 : i64} {
  func.func @_ce_loss_kernel(%arg0: i32, %arg1: memref<1024x32xf32, #tpu.memory_space<vmem>>, %arg2: memref<1024x1xi32, #tpu.memory_space<vmem>>, %arg3: memref<8x128xf32, #tpu.memory_space<vmem>>) attributes {dimension_semantics = [#tpu.dimension_semantics<parallel>], iteration_bounds = array<i64: 1>, scalar_prefetch = 0 : i64, scratch_operands = 0 : i64, tpu.core_type = #tpu.core_type<tc>, window_params = [{transform_indices = @transform_0, window_bounds = array<i64: 1024, 32>}, {transform_indices = @transform_1, window_bounds = array<i64: 1024, 1>}, {transform_indices = @transform_2, window_bounds = array<i64: 8, 128>}]} {
    %c0 = arith.constant 0 : index
    %c0_0 = arith.constant 0 : index
    %0 = vector.load %arg1[%c0, %c0_0] : memref<1024x32xf32, #tpu.memory_space<vmem>>, vector<1024x32xf32>
    %1 = vector.shape_cast %0 : vector<1024x32xf32> to vector<8x128x32xf32>
    %c0_1 = arith.constant 0 : index
    %c0_2 = arith.constant 0 : index
    %2 = vector.load %arg2[%c0_1, %c0_2] : memref<1024x1xi32, #tpu.memory_space<vmem>>, vector<1024x1xi32>
    %3 = vector.shape_cast %2 : vector<1024x1xi32> to vector<8x128x1xi32>
    %cst = arith.constant dense<0xFF800000> : vector<8x128xf32>
    %4 = vector.multi_reduction <maximumf>, %1, %cst [2] : vector<8x128x32xf32> to vector<8x128xf32>
    %5 = vector.shape_cast %4 : vector<8x128xf32> to vector<8x128x1xf32>
    %6 = vector.broadcast %5 : vector<8x128x1xf32> to vector<8x128x32xf32>
    %7 = arith.subf %1, %6 : vector<8x128x32xf32>
    %8 = tpu.iota {dimensions = array<i32: 2>} : vector<8x128x32xi32>
    %9 = vector.broadcast %3 : vector<8x128x1xi32> to vector<8x128x32xi32>
    %10 = arith.cmpi eq, %8, %9 : vector<8x128x32xi32>
    %cst_3 = arith.constant 0.000000e+00 : f32
    %11 = vector.broadcast %cst_3 : f32 to vector<8x128x32xf32>
    %12 = arith.select %10, %7, %11 : vector<8x128x32xi1>, vector<8x128x32xf32>
    %cst_4 = arith.constant dense<0.000000e+00> : vector<8x128xf32>
    %13 = vector.multi_reduction <add>, %12, %cst_4 [2] : vector<8x128x32xf32> to vector<8x128xf32>
    %14 = vector.shape_cast %13 : vector<8x128xf32> to vector<8x128x1xf32>
    %15 = math.exp %7 : vector<8x128x32xf32>
    %cst_5 = arith.constant dense<0.000000e+00> : vector<8x128xf32>
    %16 = vector.multi_reduction <add>, %15, %cst_5 [2] : vector<8x128x32xf32> to vector<8x128xf32>
    %17 = vector.shape_cast %16 : vector<8x128xf32> to vector<8x128x1xf32>
    %18 = math.log %17 : vector<8x128x1xf32>
    %19 = arith.subf %18, %14 : vector<8x128x1xf32>
    %c-1_i32 = arith.constant -1 : i32
    %20 = vector.broadcast %c-1_i32 : i32 to vector<8x128x1xi32>
    %21 = arith.cmpi eq, %3, %20 : vector<8x128x1xi32>
    %cst_6 = arith.constant 0.000000e+00 : f32
    %22 = vector.broadcast %cst_6 : f32 to vector<8x128x1xf32>
    %23 = arith.maximumf %19, %22 : vector<8x128x1xf32>
    %cst_7 = arith.constant 0.000000e+00 : f32
    %24 = vector.broadcast %cst_7 : f32 to vector<8x128x1xf32>
    %25 = arith.select %21, %24, %23 : vector<8x128x1xi1>, vector<8x128x1xf32>
    %cst_8 = arith.constant dense<0.000000e+00> : vector<8x128xf32>
    %26 = vector.multi_reduction <add>, %25, %cst_8 [2] : vector<8x128x1xf32> to vector<8x128xf32>
    %c0_9 = arith.constant 0 : index
    %c0_10 = arith.constant 0 : index
    %27 = vector.load %arg3[%c0_9, %c0_10] : memref<8x128xf32, #tpu.memory_space<vmem>>, vector<8x128xf32>
    tpu.vector_store %arg3[%c0_9, %c0_10], %26 {strides = array<i32>} : memref<8x128xf32, #tpu.memory_space<vmem>>, vector<8x128xf32>,
    return
  }
  func.func @transform_0(%arg0: i32) -> (i32, i32) {
    %c0_i32 = arith.constant 0 : i32
    %c0_i32_0 = arith.constant 0 : i32
    return %arg0, %c0_i32 : i32, i32
  }
  func.func @transform_1(%arg0: i32) -> (i32, i32) {
    %c0_i32 = arith.constant 0 : i32
    %c0_i32_0 = arith.constant 0 : i32
    return %arg0, %c0_i32 : i32, i32
  }
  func.func @transform_2(%arg0: i32) -> (i32, i32) {
    %c0_i32 = arith.constant 0 : i32
    %c0_i32_0 = arith.constant 0 : i32
    return %arg0, %c0_i32 : i32, i32
  }
}

</mosaic_0001>

<bundles_post_ra>
// kernel: tpu_custom_call.1
= control target key start
LH: loop header
LB: loop body
LE: loop exit
PB: predicated region body
PF: predicated region fallthrough
CT: control target
= control target key end

     0   :  { %vm268_vm0 = vcmask 261120   ;;  %s10188_s0 = inlined_call_operand.vmem [shape: f32[1024,32], index: 0, kind: input, shape index: {}]   ;;  %s10189_s1 = inlined_call_operand.vmem [shape: s32[1024,1], index: 1, kind: input, shape index: {}]   ;;  %s10190_s2 = inlined_call_operand.hbm [shape: f32[8,128], index: 2, kind: output, shape index: {}]  }
   0x1   :  { %v14_v0 = vld [vmem:[%s10188_s0 + $0x10] sm:$0xff]  ;;  %v12_v1 = vld [vmem:[%s10188_s0] sm:$0xff]  ;;  %v15_v2 = vld [vmem:[%s10188_s0 + $0x18] sm:$0xff] }
   0x2   :  { %v275_v3 = vsel %vm268_vm0, %v14_v0, -inf  ;;  %v269_v4 = vsel %vm268_vm0, %v12_v1, -inf  ;;  %v13_v5 = vld [vmem:[%s10188_s0 + $0x8] sm:$0xff]  ;;  %v278_v6 = vsel %vm268_vm0, %v15_v2, -inf  ;;  %v16_v9 = vld [vmem:[%s10188_s0 + $0x20] sm:$0xff]  ;;  %v19_v12 = vld [vmem:[%s10188_s0 + $0x38] sm:$0xff] }
   0x3   :  { %276 = vmax.xlane.f32.xlu1 %v275_v3  ;;  %270 = vmax.xlane.f32.xlu0 %v269_v4  ;;  %v272_v7 = vsel %vm268_vm0, %v13_v5, -inf  ;;  %v17_v8 = vld [vmem:[%s10188_s0 + $0x28] sm:$0xff]  ;;  %v281_v11 = vsel %vm268_vm0, %v16_v9, -inf  ;;  %v18_v13 = vld [vmem:[%s10188_s0 + $0x30] sm:$0xff]  ;;  %v290_v14 = vsel %vm268_vm0, %v19_v12, -inf  ;;  %v20_v17 = vld [vmem:[%s10188_s0 + $0x40] sm:$0xff] }
   0x4   :  { %v284_v10 = vsel %vm268_vm0, %v17_v8, -inf  ;;  %v287_v15 = vsel %vm268_vm0, %v18_v13, -inf  ;;  %v21_v16 = vld [vmem:[%s10188_s0 + $0x48] sm:$0xff]  ;;  %v293_v19 = vsel %vm268_vm0, %v20_v17, -inf  ;;  %v23_v20 = vld [vmem:[%s10188_s0 + $0x58] sm:$0xff]  ;;  %v22_v21 = vld [vmem:[%s10188_s0 + $0x50] sm:$0xff] }
   0x5   :  { %v296_v18 = vsel %vm268_vm0, %v21_v16, -inf  ;;  %v302_v22 = vsel %vm268_vm0, %v23_v20, -inf  ;;  %v299_v23 = vsel %vm268_vm0, %v22_v21, -inf  ;;  %v25_v24 = vld [vmem:[%s10188_s0 + $0x68] sm:$0xff]  ;;  %v24_v25 = vld [vmem:[%s10188_s0 + $0x60] sm:$0xff]  ;;  %v27_v28 = vld [vmem:[%s10188_s0 + $0x78] sm:$0xff] }
   0x6   :  { %v308_v26 = vsel %vm268_vm0, %v25_v24, -inf  ;;  %v305_v27 = vsel %vm268_vm0, %v24_v25, -inf  ;;  %v26_v29 = vld [vmem:[%s10188_s0 + $0x70] sm:$0xff] }
   0x7   :  { %279 = vmax.xlane.f32.xlu1 %v278_v6  ;;  %273 = vmax.xlane.f32.xlu0 %v272_v7 }
   0xb   :  { %285 = vmax.xlane.f32.xlu1 %v284_v10  ;;  %282 = vmax.xlane.f32.xlu0 %v281_v11 }
   0xf   :  { %291 = vmax.xlane.f32.xlu1 %v290_v14  ;;  %288 = vmax.xlane.f32.xlu0 %v287_v15 }
  0x13   :  { %297 = vmax.xlane.f32.xlu1 %v296_v18  ;;  %294 = vmax.xlane.f32.xlu0 %v293_v19 }
  0x17   :  { %303 = vmax.xlane.f32.xlu1 %v302_v22  ;;  %300 = vmax.xlane.f32.xlu0 %v299_v23 }
  0x1b   :  { %309 = vmax.xlane.f32.xlu1 %v308_v26  ;;  %306 = vmax.xlane.f32.xlu0 %v305_v27 }
  0x1c   :  { %7 = vsyncpa [#allocation3], 0  ;;  %v314_v30 = vsel %vm268_vm0, %v27_v28, -inf  ;;  %v311_v31 = vsel %vm268_vm0, %v26_v29, -inf  ;;  %v29_v32 = vld [vmem:[%s10188_s0 + $0x88] sm:$0xff]  ;;  %v28_v33 = vld [vmem:[%s10188_s0 + $0x80] sm:$0xff] }
  0x1d   :  { %v320_v34 = vsel %vm268_vm0, %v29_v32, -inf  ;;  %v317_v35 = vsel %vm268_vm0, %v28_v33, -inf  ;;  %v31_v36 = vld [vmem:[%s10188_s0 + $0x98] sm:$0xff]  ;;  %v30_v37 = vld [vmem:[%s10188_s0 + $0x90] sm:$0xff]  ;;  %v33_v40 = vld [vmem:[%s10188_s0 + $0xa8] sm:$0xff] }
  0x1e   :  { %v326_v38 = vsel %vm268_vm0, %v31_v36, -inf  ;;  %v323_v39 = vsel %vm268_vm0, %v30_v37, -inf  ;;  %v32_v41 = vld [vmem:[%s10188_s0 + $0xa0] sm:$0xff]  ;;  %v332_v42 = vsel %vm268_vm0, %v33_v40, -inf  ;;  %v35_v44 = vld [vmem:[%s10188_s0 + $0xb8] sm:$0xff]  ;;  %v34_v45 = vld [vmem:[%s10188_s0 + $0xb0] sm:$0xff] }
  0x1f   :  { %315 = vmax.xlane.f32.xlu1 %v314_v30  ;;  %312 = vmax.xlane.f32.xlu0 %v311_v31  ;;  %v329_v43 = vsel %vm268_vm0, %v32_v41, -inf  ;;  %v338_v46 = vsel %vm268_vm0, %v35_v44, -inf  ;;  %v335_v47 = vsel %vm268_vm0, %v34_v45, -inf  ;;  %v37_v48 = vld [vmem:[%s10188_s0 + $0xc8] sm:$0xff]  ;;  %v36_v49 = vld [vmem:[%s10188_s0 + $0xc0] sm:$0xff]  ;;  %v39_v52 = vld [vmem:[%s10188_s0 + $0xd8] sm:$0xff] }
  0x20   :  { %v344_v50 = vsel %vm268_vm0, %v37_v48, -inf  ;;  %v341_v51 = vsel %vm268_vm0, %v36_v49, -inf  ;;  %v38_v53 = vld [vmem:[%s10188_s0 + $0xd0] sm:$0xff]  ;;  %v350_v54 = vsel %vm268_vm0, %v39_v52, -inf  ;;  %v41_v56 = vld [vmem:[%s10188_s0 + $0xe8] sm:$0xff]  ;;  %v40_v57 = vld [vmem:[%s10188_s0 + $0xe0] sm:$0xff] }
  0x21   :  { %v347_v55 = vsel %vm268_vm0, %v38_v53, -inf  ;;  %v356_v58 = vsel %vm268_vm0, %v41_v56, -inf  ;;  %v353_v59 = vsel %vm268_vm0, %v40_v57, -inf  ;;  %v43_v60 = vld [vmem:[%s10188_s0 + $0xf8] sm:$0xff]  ;;  %v42_v61 = vld [vmem:[%s10188_s0 + $0xf0] sm:$0xff]  ;;  %v45_v0 = vld [vmem:[%s10188_s0 + $0x108] sm:$0xff] }
  0x22   :  { %v362_v62 = vsel %vm268_vm0, %v43_v60, -inf  ;;  %v359_v63 = vsel %vm268_vm0, %v42_v61, -inf  ;;  %v44_v1 = vld [vmem:[%s10188_s0 + $0x100] sm:$0xff]  ;;  %v368_v2 = vsel %vm268_vm0, %v45_v0, -inf  ;;  %v47_v4 = vld [vmem:[%s10188_s0 + $0x118] sm:$0xff]  ;;  %v46_v5 = vld [vmem:[%s10188_s0 + $0x110] sm:$0xff] }
  0x23   :  { %321 = vmax.xlane.f32.xlu1 %v320_v34  ;;  %318 = vmax.xlane.f32.xlu0 %v317_v35  ;;  %v365_v3 = vsel %vm268_vm0, %v44_v1, -inf  ;;  %v374_v6 = vsel %vm268_vm0, %v47_v4, -inf  ;;  %v371_v7 = vsel %vm268_vm0, %v46_v5, -inf  ;;  %v49_v8 = vld [vmem:[%s10188_s0 + $0x128] sm:$0xff]  ;;  %v48_v9 = vld [vmem:[%s10188_s0 + $0x120] sm:$0xff]  ;;  %v51_v12 = vld [vmem:[%s10188_s0 + $0x138] sm:$0xff] }
  0x24   :  { %v380_v10 = vsel %vm268_vm0, %v49_v8, -inf  ;;  %v377_v11 = vsel %vm268_vm0, %v48_v9, -inf  ;;  %v50_v13 = vld [vmem:[%s10188_s0 + $0x130] sm:$0xff]  ;;  %v386_v14 = vsel %vm268_vm0, %v51_v12, -inf  ;;  %v53_v16 = vld [vmem:[%s10188_s0 + $0x148] sm:$0xff]  ;;  %v52_v17 = vld [vmem:[%s10188_s0 + $0x140] sm:$0xff] }
  0x25   :  { %v383_v15 = vsel %vm268_vm0, %v50_v13, -inf  ;;  %v392_v18 = vsel %vm268_vm0, %v53_v16, -inf  ;;  %v389_v19 = vsel %vm268_vm0, %v52_v17, -inf  ;;  %v55_v20 = vld [vmem:[%s10188_s0 + $0x158] sm:$0xff]  ;;  %v54_v21 = vld [vmem:[%s10188_s0 + $0x150] sm:$0xff]  ;;  %v57_v24 = vld [vmem:[%s10188_s0 + $0x168] sm:$0xff] }
  0x26   :  { %v398_v22 = vsel %vm268_vm0, %v55_v20, -inf  ;;  %v395_v23 = vsel %vm268_vm0, %v54_v21, -inf  ;;  %v56_v25 = vld [vmem:[%s10188_s0 + $0x160] sm:$0xff]  ;;  %v404_v26 = vsel %vm268_vm0, %v57_v24, -inf  ;;  %v59_v28 = vld [vmem:[%s10188_s0 + $0x178] sm:$0xff]  ;;  %v58_v29 = vld [vmem:[%s10188_s0 + $0x170] sm:$0xff] }
  0x27   :  { %327 = vmax.xlane.f32.xlu1 %v326_v38  ;;  %324 = vmax.xlane.f32.xlu0 %v323_v39  ;;  %v401_v27 = vsel %vm268_vm0, %v56_v25, -inf  ;;  %v410_v30 = vsel %vm268_vm0, %v59_v28, -inf  ;;  %v407_v31 = vsel %vm268_vm0, %v58_v29, -inf  ;;  %v61_v32 = vld [vmem:[%s10188_s0 + $0x188] sm:$0xff]  ;;  %v60_v33 = vld [vmem:[%s10188_s0 + $0x180] sm:$0xff]  ;;  %v63_v36 = vld [vmem:[%s10188_s0 + $0x198] sm:$0xff] }
  0x28   :  { %v416_v34 = vsel %vm268_vm0, %v61_v32, -inf  ;;  %v413_v35 = vsel %vm268_vm0, %v60_v33, -inf  ;;  %v62_v37 = vld [vmem:[%s10188_s0 + $0x190] sm:$0xff]  ;;  %v422_v38 = vsel %vm268_vm0, %v63_v36, -inf  ;;  %v65_v40 = vld [vmem:[%s10188_s0 + $0x1a8] sm:$0xff]  ;;  %v64_v41 = vld [vmem:[%s10188_s0 + $0x1a0] sm:$0xff] }
  0x29   :  { %v419_v39 = vsel %vm268_vm0, %v62_v37, -inf  ;;  %v67_v44 = vld [vmem:[%s10188_s0 + $0x1b8] sm:$0xff]  ;;  %v66_v45 = vld [vmem:[%s10188_s0 + $0x1b0] sm:$0xff]  ;;  %v69_v48 = vld [vmem:[%s10188_s0 + $0x1c8] sm:$0xff] }
  0x2a   :  { %v68_v49 = vld [vmem:[%s10188_s0 + $0x1c0] sm:$0xff]  ;;  %v71_v52 = vld [vmem:[%s10188_s0 + $0x1d8] sm:$0xff]  ;;  %v70_v53 = vld [vmem:[%s10188_s0 + $0x1d0] sm:$0xff] }
  0x2b   :  { %333 = vmax.xlane.f32.xlu1 %v332_v42  ;;  %330 = vmax.xlane.f32.xlu0 %v329_v43  ;;  %v428_v42 = vsel %vm268_vm0, %v65_v40, -inf  ;;  %v425_v43 = vsel %vm268_vm0, %v64_v41, -inf  ;;  %v73_v56 = vld [vmem:[%s10188_s0 + $0x1e8] sm:$0xff]  ;;  %v72_v57 = vld [vmem:[%s10188_s0 + $0x1e0] sm:$0xff]  ;;  %v75_v60 = vld [vmem:[%s10188_s0 + $0x1f8] sm:$0xff] }
  0x2c   :  { %v74_v61 = vld [vmem:[%s10188_s0 + $0x1f0] sm:$0xff]  ;;  %v77_v0 = vld [vmem:[%s10188_s0 + $0x208] sm:$0xff]  ;;  %v76_v1 = vld [vmem:[%s10188_s0 + $0x200] sm:$0xff] }
  0x2d   :  { %v79_v4 = vld [vmem:[%s10188_s0 + $0x218] sm:$0xff]  ;;  %v78_v5 = vld [vmem:[%s10188_s0 + $0x210] sm:$0xff]  ;;  %v81_v8 = vld [vmem:[%s10188_s0 + $0x228] sm:$0xff] }
  0x2e   :  { %v80_v9 = vld [vmem:[%s10188_s0 + $0x220] sm:$0xff]  ;;  %v83_v12 = vld [vmem:[%s10188_s0 + $0x238] sm:$0xff]  ;;  %v82_v13 = vld [vmem:[%s10188_s0 + $0x230] sm:$0xff] }
  0x2f   :  { %339 = vmax.xlane.f32.xlu1 %v338_v46  ;;  %336 = vmax.xlane.f32.xlu0 %v335_v47  ;;  %v434_v46 = vsel %vm268_vm0, %v67_v44, -inf  ;;  %v431_v47 = vsel %vm268_vm0, %v66_v45, -inf  ;;  %v85_v16 = vld [vmem:[%s10188_s0 + $0x248] sm:$0xff]  ;;  %v84_v17 = vld [vmem:[%s10188_s0 + $0x240] sm:$0xff]  ;;  %v86_v24 = vld [vmem:[%s10188_s0 + $0x250] sm:$0xff] }
  0x30   :  { %v485_v20 = vsel %vm268_vm0, %v84_v17, -inf  ;;  %v89_v29 = vld [vmem:[%s10188_s0 + $0x268] sm:$0xff]  ;;  %v90_v36 = vld [vmem:[%s10188_s0 + $0x270] sm:$0xff] }
  0x31   :  { %v500_v32 = vsel %vm268_vm0, %v89_v29, -inf  ;;  %v93_v41 = vld [vmem:[%s10188_s0 + $0x288] sm:$0xff] }
  0x32   :  { %v512_v44 = vsel %vm268_vm0, %v93_v41, -inf  ;;  %v109_v29 = vld [vmem:[%s10188_s0 + $0x308] sm:$0xff] }
  0x33   :  { %345 = vmax.xlane.f32.xlu1 %v344_v50  ;;  %342 = vmax.xlane.f32.xlu0 %v341_v51  ;;  %v440_v50 = vsel %vm268_vm0, %v69_v48, -inf  ;;  %v437_v51 = vsel %vm268_vm0, %v68_v49, -inf  ;;  %v94_v48 = vld [vmem:[%s10188_s0 + $0x290] sm:$0xff] }
  0x37   :  { %351 = vmax.xlane.f32.xlu1 %v350_v54  ;;  %348 = vmax.xlane.f32.xlu0 %v347_v55  ;;  %v446_v54 = vsel %vm268_vm0, %v71_v52, -inf  ;;  %v443_v55 = vsel %vm268_vm0, %v70_v53, -inf  ;;  %v97_v53 = vld [vmem:[%s10188_s0 + $0x2a8] sm:$0xff] }
  0x3b   :  { %357 = vmax.xlane.f32.xlu1 %v356_v58  ;;  %354 = vmax.xlane.f32.xlu0 %v353_v59  ;;  %v452_v58 = vsel %vm268_vm0, %v73_v56, -inf  ;;  %v449_v59 = vsel %vm268_vm0, %v72_v57, -inf  ;;  %v524_v56 = vsel %vm268_vm0, %v97_v53, -inf }
  0x3f   :  { %363 = vmax.xlane.f32.xlu1 %v362_v62  ;;  %360 = vmax.xlane.f32.xlu0 %v359_v63  ;;  %v458_v62 = vsel %vm268_vm0, %v75_v60, -inf  ;;  %v455_v63 = vsel %vm268_vm0, %v74_v61, -inf  ;;  %v98_v60 = vld [vmem:[%s10188_s0 + $0x2b0] sm:$0xff] }
  0x43   :  { %369 = vmax.xlane.f32.xlu1 %v368_v2  ;;  %366 = vmax.xlane.f32.xlu0 %v365_v3  ;;  %v464_v2 = vsel %vm268_vm0, %v77_v0, -inf  ;;  %v461_v3 = vsel %vm268_vm0, %v76_v1, -inf  ;;  %v101_v1 = vld [vmem:[%s10188_s0 + $0x2c8] sm:$0xff] }
  0x47   :  { %375 = vmax.xlane.f32.xlu1 %v374_v6  ;;  %372 = vmax.xlane.f32.xlu0 %v371_v7  ;;  %v470_v6 = vsel %vm268_vm0, %v79_v4, -inf  ;;  %v467_v7 = vsel %vm268_vm0, %v78_v5, -inf  ;;  %v536_v4 = vsel %vm268_vm0, %v101_v1, -inf  ;;  %v117_v1 = vld [vmem:[%s10188_s0 + $0x348] sm:$0xff] }
  0x4b   :  { %381 = vmax.xlane.f32.xlu1 %v380_v10  ;;  %378 = vmax.xlane.f32.xlu0 %v377_v11  ;;  %v476_v10 = vsel %vm268_vm0, %v81_v8, -inf  ;;  %v473_v11 = vsel %vm268_vm0, %v80_v9, -inf  ;;  %v102_v8 = vld [vmem:[%s10188_s0 + $0x2d0] sm:$0xff] }
  0x4f   :  { %387 = vmax.xlane.f32.xlu1 %v386_v14  ;;  %384 = vmax.xlane.f32.xlu0 %v383_v15  ;;  %v482_v14 = vsel %vm268_vm0, %v83_v12, -inf  ;;  %v479_v15 = vsel %vm268_vm0, %v82_v13, -inf  ;;  %v105_v13 = vld [vmem:[%s10188_s0 + $0x2e8] sm:$0xff] }
  0x53   :  { %393 = vmax.xlane.f32.xlu1 %v392_v18  ;;  %390 = vmax.xlane.f32.xlu0 %v389_v19  ;;  %v488_v19 = vsel %vm268_vm0, %v85_v16, -inf  ;;  %v548_v16 = vsel %vm268_vm0, %v105_v13, -inf }
  0x57   :  { %399 = vmax.xlane.f32.xlu1 %v398_v22  ;;  %396 = vmax.xlane.f32.xlu0 %v395_v23  ;;  %v5343_v22 = vmov 0   ;;  %v87_v23 = vld [vmem:[%s10188_s0 + $0x258] sm:$0xff] }
  0x58   :  { %4550 = vset.pattern.permute.xlu1 %v5343_v22  ;;  %4549 = vset.pattern.permute.xlu0 %v5343_v22  ;;  %v106_v22 = vld [vmem:[%s10188_s0 + $0x2f0] sm:$0xff] }
  0x5b   :  { %405 = vmax.xlane.f32.xlu1 %v404_v26  ;;  %402 = vmax.xlane.f32.xlu0 %v401_v27  ;;  %v494_v26 = vsel %vm268_vm0, %v87_v23, -inf  ;;  %v491_v27 = vsel %vm268_vm0, %v86_v24, -inf }
  0x5f   :  { %411 = vmax.xlane.f32.xlu1 %v410_v30  ;;  %408 = vmax.xlane.f32.xlu0 %v407_v31  ;;  %v88_v30 = vld [vmem:[%s10188_s0 + $0x260] sm:$0xff] }
  0x60   :  { %v497_v33 = vsel %vm268_vm0, %v88_v30, -inf  ;;  %v108_v30 = vld [vmem:[%s10188_s0 + $0x300] sm:$0xff] }
  0x63   :  { %417 = vmax.xlane.f32.xlu1 %v416_v34  ;;  %414 = vmax.xlane.f32.xlu0 %v413_v35  ;;  %v91_v35 = vld [vmem:[%s10188_s0 + $0x278] sm:$0xff] }
  0x67   :  { %423 = vmax.xlane.f32.xlu1 %v422_v38  ;;  %420 = vmax.xlane.f32.xlu0 %v419_v39  ;;  %v506_v38 = vsel %vm268_vm0, %v91_v35, -inf  ;;  %v503_v39 = vsel %vm268_vm0, %v90_v36, -inf  ;;  %v557_v35 = vsel %vm268_vm0, %v108_v30, -inf }
  0x6b   :  { %429 = vmax.xlane.f32.xlu1 %v428_v42  ;;  %426 = vmax.xlane.f32.xlu0 %v425_v43  ;;  %v92_v42 = vld [vmem:[%s10188_s0 + $0x280] sm:$0xff] }
  0x6c   :  { %v509_v45 = vsel %vm268_vm0, %v92_v42, -inf }
  0x6f   :  { %435 = vmax.xlane.f32.xlu1 %v434_v46  ;;  %432 = vmax.xlane.f32.xlu0 %v431_v47  ;;  %v95_v47 = vld [vmem:[%s10188_s0 + $0x298] sm:$0xff] }
  0x73   :  { %441 = vmax.xlane.f32.xlu1 %v440_v50  ;;  %438 = vmax.xlane.f32.xlu0 %v437_v51  ;;  %v518_v50 = vsel %vm268_vm0, %v95_v47, -inf  ;;  %v515_v51 = vsel %vm268_vm0, %v94_v48, -inf  ;;  %v113_v47 = vld [vmem:[%s10188_s0 + $0x328] sm:$0xff]  ;;  %v112_v48 = vld [vmem:[%s10188_s0 + $0x320] sm:$0xff] }
  0x74   :  { %v569_v53 = vsel %vm268_vm0, %v112_v48, -inf  ;;  %v124_v48 = vld [vmem:[%s10188_s0 + $0x380] sm:$0xff] }
  0x77   :  { %447 = vmax.xlane.f32.xlu1 %v446_v54  ;;  %444 = vmax.xlane.f32.xlu0 %v443_v55  ;;  %v96_v54 = vld [vmem:[%s10188_s0 + $0x2a0] sm:$0xff] }
  0x78   :  { %v521_v57 = vsel %vm268_vm0, %v96_v54, -inf }
  0x7b   :  { %453 = vmax.xlane.f32.xlu1 %v452_v58  ;;  %450 = vmax.xlane.f32.xlu0 %v449_v59  ;;  %v99_v59 = vld [vmem:[%s10188_s0 + $0x2b8] sm:$0xff] }
  0x7f   :  { %459 = vmax.xlane.f32.xlu1 %v458_v62  ;;  %456 = vmax.xlane.f32.xlu0 %v455_v63  ;;  %v530_v62 = vsel %vm268_vm0, %v99_v59, -inf  ;;  %v527_v63 = vsel %vm268_vm0, %v98_v60, -inf }
  0x83   :  { %465 = vmax.xlane.f32.xlu1 %v464_v2  ;;  %462 = vmax.xlane.f32.xlu0 %v461_v3  ;;  %v100_v2 = vld [vmem:[%s10188_s0 + $0x2c0] sm:$0xff] }
  0x84   :  { %v533_v5 = vsel %vm268_vm0, %v100_v2, -inf  ;;  %v116_v2 = vld [vmem:[%s10188_s0 + $0x340] sm:$0xff] }
  0x87   :  { %471 = vmax.xlane.f32.xlu1 %v470_v6  ;;  %468 = vmax.xlane.f32.xlu0 %v467_v7  ;;  %v103_v7 = vld [vmem:[%s10188_s0 + $0x2d8] sm:$0xff] }
  0x8b   :  { %477 = vmax.xlane.f32.xlu1 %v476_v10  ;;  %474 = vmax.xlane.f32.xlu0 %v473_v11  ;;  %v542_v10 = vsel %vm268_vm0, %v103_v7, -inf  ;;  %v539_v11 = vsel %vm268_vm0, %v102_v8, -inf  ;;  %v581_v7 = vsel %vm268_vm0, %v116_v2, -inf }
  0x8f   :  { %483 = vmax.xlane.f32.xlu1 %v482_v14  ;;  %480 = vmax.xlane.f32.xlu0 %v479_v15  ;;  %v104_v14 = vld [vmem:[%s10188_s0 + $0x2e0] sm:$0xff] }
  0x90   :  { %v5654_v18 = vpop.xlane.xlu1 %276  ;;  %v5658_v21 = vpop.xlane.xlu0 %270  ;;  %v545_v17 = vsel %vm268_vm0, %v104_v14, -inf }
  0x93   :  { %489 = vmax.xlane.f32.xlu1 %v488_v19  ;;  %486 = vmax.xlane.f32.xlu0 %v485_v20  ;;  %v107_v20 = vld [vmem:[%s10188_s0 + $0x2f8] sm:$0xff] }
  0x94   :  { %v5666_v25 = vpop.xlane.xlu1 %279  ;;  %v5670_v28 = vpop.xlane.xlu0 %273  ;;  %v554_v24 = vsel %vm268_vm0, %v107_v20, -inf  ;;  %v121_v20 = vld [vmem:[%s10188_s0 + $0x368] sm:$0xff] }
  0x97   :  { %495 = vmax.xlane.f32.xlu1 %v494_v26  ;;  %492 = vmax.xlane.f32.xlu0 %v491_v27  ;;  %v551_v26 = vsel %vm268_vm0, %v106_v22, -inf  ;;  %v120_v22 = vld [vmem:[%s10188_s0 + $0x360] sm:$0xff] }
  0x98   :  { %v5678_v31 = vpop.xlane.xlu1 %285  ;;  %v5682_v34 = vpop.xlane.xlu0 %282 }
  0x9b   :  { %501 = vmax.xlane.f32.xlu1 %v500_v32  ;;  %498 = vmax.xlane.f32.xlu0 %v497_v33  ;;  %v560_v33 = vsel %vm268_vm0, %v109_v29, -inf  ;;  %v593_v29 = vsel %vm268_vm0, %v120_v22, -inf }
  0x9c   :  { %v5690_v37 = vpop.xlane.xlu1 %291  ;;  %v5694_v40 = vpop.xlane.xlu0 %288 }
  0x9f   :  { %507 = vmax.xlane.f32.xlu1 %v506_v38  ;;  %504 = vmax.xlane.f32.xlu0 %v503_v39  ;;  %v111_v38 = vld [vmem:[%s10188_s0 + $0x318] sm:$0xff]  ;;  %v110_v39 = vld [vmem:[%s10188_s0 + $0x310] sm:$0xff] }
  0xa0   :  { %v5702_v43 = vpop.xlane.xlu1 %297  ;;  %v5706_v46 = vpop.xlane.xlu0 %294  ;;  %v566_v42 = vsel %vm268_vm0, %v111_v38, -inf }
  0xa3   :  { %513 = vmax.xlane.f32.xlu1 %v512_v44  ;;  %510 = vmax.xlane.f32.xlu0 %v509_v45  ;;  %v563_v44 = vsel %vm268_vm0, %v110_v39, -inf }
  0xa4   :  { %v5714_v49 = vpop.xlane.xlu1 %303  ;;  %v5718_v52 = vpop.xlane.xlu0 %300 }
  0xa7   :  { %519 = vmax.xlane.f32.xlu1 %v518_v50  ;;  %516 = vmax.xlane.f32.xlu0 %v515_v51  ;;  %v572_v51 = vsel %vm268_vm0, %v113_v47, -inf  ;;  %v125_v47 = vld [vmem:[%s10188_s0 + $0x388] sm:$0xff] }
  0xa8   :  { %v5726_v55 = vpop.xlane.xlu1 %309  ;;  %v5730_v58 = vpop.xlane.xlu0 %306 }
  0xab   :  { %525 = vmax.xlane.f32.xlu1 %v524_v56  ;;  %522 = vmax.xlane.f32.xlu0 %v521_v57  ;;  %v115_v56 = vld [vmem:[%s10188_s0 + $0x338] sm:$0xff]  ;;  %v114_v57 = vld [vmem:[%s10188_s0 + $0x330] sm:$0xff] }
  0xac   :  { %v5738_v61 = vpop.xlane.xlu1 %315  ;;  %v5742_v0 = vpop.xlane.xlu0 %312  ;;  %v578_v60 = vsel %vm268_vm0, %v115_v56, -inf  ;;  %v605_v56 = vsel %vm268_vm0, %v124_v48, -inf  ;;  %v132_v48 = vld [vmem:[%s10188_s0 + $0x3c0] sm:$0xff] }
  0xaf   :  { %531 = vmax.xlane.f32.xlu1 %v530_v62  ;;  %528 = vmax.xlane.f32.xlu0 %v527_v63  ;;  %v575_v62 = vsel %vm268_vm0, %v114_v57, -inf }
  0xb0   :  { %v5750_v3 = vpop.xlane.xlu1 %321  ;;  %v5754_v6 = vpop.xlane.xlu0 %318 }
  0xb3   :  { %537 = vmax.xlane.f32.xlu1 %v536_v4  ;;  %534 = vmax.xlane.f32.xlu0 %v533_v5  ;;  %v584_v5 = vsel %vm268_vm0, %v117_v1, -inf }
  0xb4   :  { %v5762_v9 = vpop.xlane.xlu1 %327  ;;  %v5766_v12 = vpop.xlane.xlu0 %324 }
  0xb7   :  { %543 = vmax.xlane.f32.xlu1 %v542_v10  ;;  %540 = vmax.xlane.f32.xlu0 %v539_v11  ;;  %v119_v10 = vld [vmem:[%s10188_s0 + $0x358] sm:$0xff]  ;;  %v118_v11 = vld [vmem:[%s10188_s0 + $0x350] sm:$0xff] }
  0xb8   :  { %v5774_v15 = vpop.xlane.xlu1 %333  ;;  %v5778_v19 = vpop.xlane.xlu0 %330  ;;  %v590_v14 = vsel %vm268_vm0, %v119_v10, -inf  ;;  %v129_v10 = vld [vmem:[%s10188_s0 + $0x3a8] sm:$0xff] }
  0xbb   :  { %549 = vmax.xlane.f32.xlu1 %v548_v16  ;;  %546 = vmax.xlane.f32.xlu0 %v545_v17  ;;  %v587_v16 = vsel %vm268_vm0, %v118_v11, -inf  ;;  %v128_v11 = vld [vmem:[%s10188_s0 + $0x3a0] sm:$0xff] }
  0xbc   :  { %v5786_v23 = vpop.xlane.xlu1 %339  ;;  %v5790_v27 = vpop.xlane.xlu0 %336 }
  0xbd   :  { %10281 = vst [vmem:[#allocation5_spill] sm:$0xff] %v5786_v23 }
  0xbf   :  { %555 = vmax.xlane.f32.xlu1 %v554_v24  ;;  %552 = vmax.xlane.f32.xlu0 %v551_v26  ;;  %v596_v26 = vsel %vm268_vm0, %v121_v20, -inf  ;;  %v617_v20 = vsel %vm268_vm0, %v128_v11, -inf }
  0xc0   :  { %v5798_v32 = vpop.xlane.xlu1 %345  ;;  %v5802_v36 = vpop.xlane.xlu0 %342 }
  0xc1   :  { %10282 = vst [vmem:[#allocation6_spill] sm:$0xff] %v5798_v32 }
  0xc3   :  { %561 = vmax.xlane.f32.xlu1 %v560_v33  ;;  %558 = vmax.xlane.f32.xlu0 %v557_v35  ;;  %v123_v33 = vld [vmem:[%s10188_s0 + $0x378] sm:$0xff]  ;;  %v122_v35 = vld [vmem:[%s10188_s0 + $0x370] sm:$0xff] }
  0xc4   :  { %v5810_v41 = vpop.xlane.xlu1 %351  ;;  %v5814_v45 = vpop.xlane.xlu0 %348  ;;  %v602_v39 = vsel %vm268_vm0, %v123_v33, -inf }
  0xc5   :  { %10283 = vst [vmem:[#allocation7_spill] sm:$0xff] %v5810_v41 }
  0xc7   :  { %567 = vmax.xlane.f32.xlu1 %v566_v42  ;;  %564 = vmax.xlane.f32.xlu0 %v563_v44  ;;  %v599_v42 = vsel %vm268_vm0, %v122_v35, -inf }
  0xc8   :  { %v5822_v50 = vpop.xlane.xlu1 %357  ;;  %v5826_v54 = vpop.xlane.xlu0 %354 }
  0xc9   :  { %10284 = vst [vmem:[#allocation8_spill] sm:$0xff] %v5822_v50 }
  0xcb   :  { %573 = vmax.xlane.f32.xlu1 %v572_v51  ;;  %570 = vmax.xlane.f32.xlu0 %v569_v53  ;;  %v608_v53 = vsel %vm268_vm0, %v125_v47, -inf  ;;  %v133_v47 = vld [vmem:[%s10188_s0 + $0x3c8] sm:$0xff] }
  0xcc   :  { %v5834_v59 = vpop.xlane.xlu1 %363  ;;  %v5838_v63 = vpop.xlane.xlu0 %360 }
  0xcd   :  { %10285 = vst [vmem:[#allocation9_spill] sm:$0xff] %v5834_v59 }
  0xcf   :  { %579 = vmax.xlane.f32.xlu1 %v578_v60  ;;  %576 = vmax.xlane.f32.xlu0 %v575_v62  ;;  %v127_v60 = vld [vmem:[%s10188_s0 + $0x398] sm:$0xff]  ;;  %v126_v62 = vld [vmem:[%s10188_s0 + $0x390] sm:$0xff] }
  0xd0   :  { %v5846_v4 = vpop.xlane.xlu1 %369  ;;  %v5850_v8 = vpop.xlane.xlu0 %366  ;;  %v614_v2 = vsel %vm268_vm0, %v127_v60, -inf  ;;  %v629_v60 = vsel %vm268_vm0, %v132_v48, -inf }
  0xd1   :  { %10286 = vst [vmem:[#allocation10_spill] sm:$0xff] %v5846_v4  ;;  %10287 = vst [vmem:[#allocation11_spill] sm:$0xff] %v5850_v8 }
  0xd3   :  { %585 = vmax.xlane.f32.xlu1 %v584_v5  ;;  %582 = vmax.xlane.f32.xlu0 %v581_v7  ;;  %v611_v5 = vsel %vm268_vm0, %v126_v62, -inf }
  0xd4   :  { %v5858_v13 = vpop.xlane.xlu1 %375  ;;  %v5862_v17 = vpop.xlane.xlu0 %372 }
  0xd5   :  { %10288 = vst [vmem:[#allocation12_spill] sm:$0xff] %v5858_v13  ;;  %10289 = vst [vmem:[#allocation13_spill] sm:$0xff] %v5862_v17 }
  0xd7   :  { %591 = vmax.xlane.f32.xlu1 %v590_v14  ;;  %588 = vmax.xlane.f32.xlu0 %v587_v16  ;;  %v620_v16 = vsel %vm268_vm0, %v129_v10, -inf }
  0xd8   :  { %v5870_v24 = vpop.xlane.xlu1 %381  ;;  %v5874_v30 = vpop.xlane.xlu0 %378 }
  0xd9   :  { %10290 = vst [vmem:[#allocation14_spill] sm:$0xff] %v5870_v24  ;;  %10291 = vst [vmem:[#allocation15_spill] sm:$0xff] %v5874_v30 }
  0xdb   :  { %597 = vmax.xlane.f32.xlu1 %v596_v26  ;;  %594 = vmax.xlane.f32.xlu0 %v593_v29  ;;  %v131_v26 = vld [vmem:[%s10188_s0 + $0x3b8] sm:$0xff]  ;;  %v130_v29 = vld [vmem:[%s10188_s0 + $0x3b0] sm:$0xff] }
  0xdc   :  { %v5882_v38 = vpop.xlane.xlu1 %387  ;;  %v5886_v44 = vpop.xlane.xlu0 %384  ;;  %v626_v35 = vsel %vm268_vm0, %v131_v26, -inf  ;;  %v137_v26 = vld [vmem:[%s10188_s0 + $0x3e8] sm:$0xff] }
  0xdd   :  { %10292 = vst [vmem:[#allocation16_spill] sm:$0xff] %v5882_v38  ;;  %10293 = vst [vmem:[#allocation17_spill] sm:$0xff] %v5886_v44 }
  0xdf   :  { %603 = vmax.xlane.f32.xlu1 %v602_v39  ;;  %600 = vmax.xlane.f32.xlu0 %v599_v42  ;;  %v623_v39 = vsel %vm268_vm0, %v130_v29, -inf  ;;  %v136_v29 = vld [vmem:[%s10188_s0 + $0x3e0] sm:$0xff] }
  0xe0   :  { %v5894_v51 = vpop.xlane.xlu1 %393  ;;  %v5898_v57 = vpop.xlane.xlu0 %390 }
  0xe1   :  { %10294 = vst [vmem:[#allocation18_spill] sm:$0xff] %v5894_v51  ;;  %10295 = vst [vmem:[#allocation19_spill] sm:$0xff] %v5898_v57 }
  0xe3   :  { %609 = vmax.xlane.f32.xlu1 %v608_v53  ;;  %606 = vmax.xlane.f32.xlu0 %v605_v56  ;;  %v632_v56 = vsel %vm268_vm0, %v133_v47, -inf  ;;  %v641_v47 = vsel %vm268_vm0, %v136_v29, -inf }
  0xe4   :  { %v5906_v1 = vpop.xlane.xlu1 %399  ;;  %v5910_v7 = vpop.xlane.xlu0 %396 }
  0xe5   :  { %10296 = vst [vmem:[#allocation20_spill] sm:$0xff] %v5906_v1  ;;  %10297 = vst [vmem:[#allocation21_spill] sm:$0xff] %v5910_v7 }
  0xe7   :  { %615 = vmax.xlane.f32.xlu1 %v614_v2  ;;  %612 = vmax.xlane.f32.xlu0 %v611_v5  ;;  %v135_v2 = vld [vmem:[%s10188_s0 + $0x3d8] sm:$0xff]  ;;  %v134_v5 = vld [vmem:[%s10188_s0 + $0x3d0] sm:$0xff] }
  0xe8   :  { %v5918_v14 = vpop.xlane.xlu1 %405  ;;  %v5922_v22 = vpop.xlane.xlu0 %402  ;;  %v638_v11 = vsel %vm268_vm0, %v135_v2, -inf }
  0xe9   :  { %10298 = vst [vmem:[#allocation22_spill] sm:$0xff] %v5918_v14  ;;  %10299 = vst [vmem:[#allocation23_spill] sm:$0xff] %v5922_v22 }
  0xeb   :  { %621 = vmax.xlane.f32.xlu1 %v620_v16  ;;  %618 = vmax.xlane.f32.xlu0 %v617_v20  ;;  %v635_v16 = vsel %vm268_vm0, %v134_v5, -inf }
  0xec   :  { %v5930_v33 = vpop.xlane.xlu1 %411  ;;  %v5934_v42 = vpop.xlane.xlu0 %408 }
  0xed   :  { %10300 = vst [vmem:[#allocation24_spill] sm:$0xff] %v5930_v33  ;;  %10301 = vst [vmem:[#allocation25_spill] sm:$0xff] %v5934_v42 }
  0xef   :  { %627 = vmax.xlane.f32.xlu1 %v626_v35  ;;  %624 = vmax.xlane.f32.xlu0 %v623_v39  ;;  %v644_v39 = vsel %vm268_vm0, %v137_v26, -inf }
  0xf0   :  { %v5942_v53 = vpop.xlane.xlu1 %417  ;;  %v5946_v62 = vpop.xlane.xlu0 %414 }
  0xf1   :  { %10302 = vst [vmem:[#allocation26_spill] sm:$0xff] %v5942_v53  ;;  %10303 = vst [vmem:[#allocation27_spill] sm:$0xff] %v5946_v62 }
  0xf3   :  { %633 = vmax.xlane.f32.xlu1 %v632_v56  ;;  %630 = vmax.xlane.f32.xlu0 %v629_v60  ;;  %v139_v56 = vld [vmem:[%s10188_s0 + $0x3f8] sm:$0xff]  ;;  %v138_v60 = vld [vmem:[%s10188_s0 + $0x3f0] sm:$0xff] }
  0xf4   :  { %v5954_v10 = vpop.xlane.xlu1 %423  ;;  %v5958_v20 = vpop.xlane.xlu0 %420  ;;  %v650_v5 = vsel %vm268_vm0, %v139_v56, -inf }
  0xf5   :  { %10304 = vst [vmem:[#allocation28_spill] sm:$0xff] %v5954_v10  ;;  %10305 = vst [vmem:[#allocation29_spill] sm:$0xff] %v5958_v20 }
  0xf7   :  { %639 = vmax.xlane.f32.xlu1 %v638_v11  ;;  %636 = vmax.xlane.f32.xlu0 %v635_v16  ;;  %v647_v11 = vsel %vm268_vm0, %v138_v60, -inf  ;;  %v141_v60 = vld [vmem:[%s10189_s1 + $0x8] sm:$0xff] }
  0xf8   :  { %v5966_v35 = vpop.xlane.xlu1 %429  ;;  %v5970_v48 = vpop.xlane.xlu0 %426 }
  0xf9   :  { %10306 = vst [vmem:[#allocation30_spill] sm:$0xff] %v5966_v35  ;;  %10307 = vst [vmem:[#allocation31_spill] sm:$0xff] %v5970_v48 }
  0xfb   :  { %645 = vmax.xlane.f32.xlu1 %v644_v39  ;;  %642 = vmax.xlane.f32.xlu0 %v641_v47 }
  0xfc   :  { %v5978_v2 = vpop.xlane.xlu1 %435  ;;  %v5982_v16 = vpop.xlane.xlu0 %432 }
  0xfd   :  { %10308 = vst [vmem:[#allocation32_spill] sm:$0xff] %v5978_v2  ;;  %10309 = vst [vmem:[#allocation33_spill] sm:$0xff] %v5982_v16 }
  0xff   :  { %651 = vmax.xlane.f32.xlu1 %v650_v5  ;;  %648 = vmax.xlane.f32.xlu0 %v647_v11 }
 0x100   :  { %v5984_v26 = vpop.xlane.xlu1 %441  ;;  %v5986_v29 = vpop.xlane.xlu0 %438 }
 0x101   :  { %10310 = vst [vmem:[#allocation34_spill] sm:$0xff] %v5984_v26  ;;  %10311 = vst [vmem:[#allocation35_spill] sm:$0xff] %v5986_v29 }
 0x104   :  { %v5988_v35 = vpop.xlane.xlu1 %447  ;;  %v5990_v10 = vpop.xlane.xlu0 %444 }
 0x105   :  { %10312 = vst [vmem:[#allocation36_spill] sm:$0xff] %v5988_v35  ;;  %10313 = vst [vmem:[#allocation37_spill] sm:$0xff] %v5990_v10  ;;  %v142_v35 = vld [vmem:[%s10189_s1 + $0x10] sm:$0xff] }
 0x108   :  { %v5992_v39 = vpop.xlane.xlu1 %453  ;;  %v5994_v47 = vpop.xlane.xlu0 %450 }
 0x109   :  { %10314 = vst [vmem:[#allocation38_spill] sm:$0xff] %v5992_v39  ;;  %10315 = vst [vmem:[#allocation39_spill] sm:$0xff] %v5994_v47  ;;  %v140_v39 = vld [vmem:[%s10189_s1] sm:$0xff] }
 0x10c   :  { %v5996_v2 = vpop.xlane.xlu1 %459  ;;  %v5998_v56 = vpop.xlane.xlu0 %456 }
 0x10d   :  { %10316 = vst [vmem:[#allocation40_spill] sm:$0xff] %v5996_v2  ;;  %10317 = vst [vmem:[#allocation41_spill] sm:$0xff] %v5998_v56 }
 0x110   :  { %787 = vperm.xlu1 %4550, %v141_v60   ;;  %v6003_v5 = vpop.xlane.xlu1 %465  ;;  %v6005_v11 = vpop.xlane.xlu0 %462  ;;  %v143_v60 = vld [vmem:[%s10189_s1 + $0x18] sm:$0xff] }
 0x111   :  { %10318 = vst [vmem:[#allocation42_spill] sm:$0xff] %v6003_v5  ;;  %10319 = vst [vmem:[#allocation43_spill] sm:$0xff] %v6005_v11  ;;  %v149_v5 = vld [vmem:[%s10189_s1 + $0x48] sm:$0xff] }
 0x114   :  { %790 = vperm.xlu1 %4550, %v142_v35   ;;  %v6013_v2 = vpop.xlane.xlu1 %471  ;;  %v6015_v26 = vpop.xlane.xlu0 %468  ;;  %v144_v35 = vld [vmem:[%s10189_s1 + $0x20] sm:$0xff] }
 0x115   :  { %10320 = vst [vmem:[#allocation44_spill] sm:$0xff] %v6013_v2  ;;  %10321 = vst [vmem:[#allocation45_spill] sm:$0xff] %v6015_v26  ;;  %784 = vperm.xlu0 %4549, %v140_v39   ;;  %v151_v39 = vld [vmem:[%s10189_s1 + $0x58] sm:$0xff] }
 0x118   :  { %793 = vperm.xlu1 %4550, %v143_v60   ;;  %v6023_v11 = vpop.xlane.xlu1 %477  ;;  %v6025_v56 = vpop.xlane.xlu0 %474  ;;  %v145_v60 = vld [vmem:[%s10189_s1 + $0x28] sm:$0xff] }
 0x119   :  { %10322 = vst [vmem:[#allocation46_spill] sm:$0xff] %v6023_v11  ;;  %10323 = vst [vmem:[#allocation47_spill] sm:$0xff] %v6025_v56  ;;  %811 = vperm.xlu0 %4549, %v149_v5   ;;  %v153_v5 = vld [vmem:[%s10189_s1 + $0x68] sm:$0xff] }
 0x11c   :  { %796 = vperm.xlu1 %4550, %v144_v35   ;;  %v6033_v2 = vpop.xlane.xlu1 %483  ;;  %v6035_v26 = vpop.xlane.xlu0 %480  ;;  %v146_v35 = vld [vmem:[%s10189_s1 + $0x30] sm:$0xff] }
 0x11d   :  { %10324 = vst [vmem:[#allocation48_spill] sm:$0xff] %v6033_v2  ;;  %10325 = vst [vmem:[#allocation49_spill] sm:$0xff] %v6035_v26  ;;  %817 = vperm.xlu0 %4549, %v151_v39   ;;  %v155_v39 = vld [vmem:[%s10189_s1 + $0x78] sm:$0xff] }
 0x120   :  { %799 = vperm.xlu1 %4550, %v145_v60   ;;  %v6043_v11 = vpop.xlane.xlu1 %489  ;;  %v6045_v56 = vpop.xlane.xlu0 %486  ;;  %v147_v60 = vld [vmem:[%s10189_s1 + $0x38] sm:$0xff] }
 0x121   :  { %10326 = vst [vmem:[#allocation50_spill] sm:$0xff] %v6043_v11  ;;  %10327 = vst [vmem:[#allocation51_spill] sm:$0xff] %v6045_v56  ;;  %823 = vperm.xlu0 %4549, %v153_v5   ;;  %v157_v5 = vld [vmem:[%s10189_s1 + $0x88] sm:$0xff] }
 0x124   :  { %802 = vperm.xlu1 %4550, %v146_v35   ;;  %v6053_v2 = vpop.xlane.xlu1 %495  ;;  %v6055_v26 = vpop.xlane.xlu0 %492  ;;  %v148_v35 = vld [vmem:[%s10189_s1 + $0x40] sm:$0xff] }
 0x125   :  { %10328 = vst [vmem:[#allocation52_spill] sm:$0xff] %v6053_v2  ;;  %10329 = vst [vmem:[#allocation53_spill] sm:$0xff] %v6055_v26  ;;  %829 = vperm.xlu0 %4549, %v155_v39   ;;  %v159_v39 = vld [vmem:[%s10189_s1 + $0x98] sm:$0xff] }
 0x128   :  { %805 = vperm.xlu1 %4550, %v147_v60   ;;  %v6063_v11 = vpop.xlane.xlu1 %501  ;;  %v6065_v56 = vpop.xlane.xlu0 %498  ;;  %v150_v60 = vld [vmem:[%s10189_s1 + $0x50] sm:$0xff] }
 0x129   :  { %10330 = vst [vmem:[#allocation54_spill] sm:$0xff] %v6063_v11  ;;  %10331 = vst [vmem:[#allocation55_spill] sm:$0xff] %v6065_v56  ;;  %835 = vperm.xlu0 %4549, %v157_v5   ;;  %v161_v5 = vld [vmem:[%s10189_s1 + $0xa8] sm:$0xff] }
 0x12c   :  { %808 = vperm.xlu1 %4550, %v148_v35   ;;  %v6073_v2 = vpop.xlane.xlu1 %507  ;;  %v6075_v26 = vpop.xlane.xlu0 %504  ;;  %v152_v35 = vld [vmem:[%s10189_s1 + $0x60] sm:$0xff] }
 0x12d   :  { %10332 = vst [vmem:[#allocation56_spill] sm:$0xff] %v6073_v2  ;;  %10333 = vst [vmem:[#allocation57_spill] sm:$0xff] %v6075_v26  ;;  %841 = vperm.xlu0 %4549, %v159_v39   ;;  %v163_v39 = vld [vmem:[%s10189_s1 + $0xb8] sm:$0xff] }
 0x130   :  { %814 = vperm.xlu1 %4550, %v150_v60   ;;  %v6083_v11 = vpop.xlane.xlu1 %513  ;;  %v6085_v56 = vpop.xlane.xlu0 %510  ;;  %v154_v60 = vld [vmem:[%s10189_s1 + $0x70] sm:$0xff] }
 0x131   :  { %10334 = vst [vmem:[#allocation58_spill] sm:$0xff] %v6083_v11  ;;  %10335 = vst [vmem:[#allocation59_spill] sm:$0xff] %v6085_v56  ;;  %847 = vperm.xlu0 %4549, %v161_v5   ;;  %v165_v5 = vld [vmem:[%s10189_s1 + $0xc8] sm:$0xff] }
 0x134   :  { %820 = vperm.xlu1 %4550, %v152_v35   ;;  %v6093_v2 = vpop.xlane.xlu1 %519  ;;  %v6095_v26 = vpop.xlane.xlu0 %516  ;;  %v156_v35 = vld [vmem:[%s10189_s1 + $0x80] sm:$0xff] }
 0x135   :  { %10336 = vst [vmem:[#allocation60_spill] sm:$0xff] %v6093_v2  ;;  %10337 = vst [vmem:[#allocation61_spill] sm:$0xff] %v6095_v26  ;;  %853 = vperm.xlu0 %4549, %v163_v39   ;;  %v167_v39 = vld [vmem:[%s10189_s1 + $0xd8] sm:$0xff] }
 0x138   :  { %826 = vperm.xlu1 %4550, %v154_v60   ;;  %v6103_v11 = vpop.xlane.xlu1 %525  ;;  %v6105_v56 = vpop.xlane.xlu0 %522  ;;  %v158_v60 = vld [vmem:[%s10189_s1 + $0x90] sm:$0xff] }
 0x139   :  { %10338 = vst [vmem:[#allocation62_spill] sm:$0xff] %v6103_v11  ;;  %10339 = vst [vmem:[#allocation63_spill] sm:$0xff] %v6105_v56  ;;  %859 = vperm.xlu0 %4549, %v165_v5   ;;  %v169_v5 = vld [vmem:[%s10189_s1 + $0xe8] sm:$0xff] }
 0x13c   :  { %832 = vperm.xlu1 %4550, %v156_v35   ;;  %v6113_v2 = vpop.xlane.xlu1 %531  ;;  %v6115_v26 = vpop.xlane.xlu0 %528  ;;  %v160_v35 = vld [vmem:[%s10189_s1 + $0xa0] sm:$0xff] }
 0x13d   :  { %10340 = vst [vmem:[#allocation64_spill] sm:$0xff] %v6113_v2  ;;  %10341 = vst [vmem:[#allocation65_spill] sm:$0xff] %v6115_v26  ;;  %865 = vperm.xlu0 %4549, %v167_v39   ;;  %v171_v39 = vld [vmem:[%s10189_s1 + $0xf8] sm:$0xff] }
 0x140   :  { %838 = vperm.xlu1 %4550, %v158_v60   ;;  %v6123_v11 = vpop.xlane.xlu1 %537  ;;  %v6125_v56 = vpop.xlane.xlu0 %534  ;;  %v162_v60 = vld [vmem:[%s10189_s1 + $0xb0] sm:$0xff] }
 0x141   :  { %10342 = vst [vmem:[#allocation66_spill] sm:$0xff] %v6123_v11  ;;  %10343 = vst [vmem:[#allocation67_spill] sm:$0xff] %v6125_v56  ;;  %871 = vperm.xlu0 %4549, %v169_v5   ;;  %v173_v5 = vld [vmem:[%s10189_s1 + $0x108] sm:$0xff] }
 0x144   :  { %844 = vperm.xlu1 %4550, %v160_v35   ;;  %v6133_v2 = vpop.xlane.xlu1 %543  ;;  %v6135_v26 = vpop.xlane.xlu0 %540  ;;  %v164_v35 = vld [vmem:[%s10189_s1 + $0xc0] sm:$0xff] }
 0x145   :  { %10344 = vst [vmem:[#allocation68_spill] sm:$0xff] %v6133_v2  ;;  %10345 = vst [vmem:[#allocation69_spill] sm:$0xff] %v6135_v26  ;;  %877 = vperm.xlu0 %4549, %v171_v39   ;;  %v175_v39 = vld [vmem:[%s10189_s1 + $0x118] sm:$0xff] }
 0x148   :  { %850 = vperm.xlu1 %4550, %v162_v60   ;;  %v6143_v11 = vpop.xlane.xlu1 %549  ;;  %v6145_v56 = vpop.xlane.xlu0 %546  ;;  %v166_v60 = vld [vmem:[%s10189_s1 + $0xd0] sm:$0xff] }
 0x149   :  { %10346 = vst [vmem:[#allocation70_spill] sm:$0xff] %v6143_v11  ;;  %10347 = vst [vmem:[#allocation71_spill] sm:$0xff] %v6145_v56  ;;  %883 = vperm.xlu0 %4549, %v173_v5   ;;  %v177_v5 = vld [vmem:[%s10189_s1 + $0x128] sm:$0xff] }
 0x14c   :  { %856 = vperm.xlu1 %4550, %v164_v35   ;;  %v6153_v2 = vpop.xlane.xlu1 %555  ;;  %v6155_v26 = vpop.xlane.xlu0 %552  ;;  %v168_v35 = vld [vmem:[%s10189_s1 + $0xe0] sm:$0xff] }
 0x14d   :  { %10348 = vst [vmem:[#allocation72_spill] sm:$0xff] %v6153_v2  ;;  %10349 = vst [vmem:[#allocation73_spill] sm:$0xff] %v6155_v26  ;;  %889 = vperm.xlu0 %4549, %v175_v39   ;;  %v179_v39 = vld [vmem:[%s10189_s1 + $0x138] sm:$0xff] }
 0x150   :  { %862 = vperm.xlu1 %4550, %v166_v60   ;;  %v6163_v11 = vpop.xlane.xlu1 %561  ;;  %v6165_v56 = vpop.xlane.xlu0 %558  ;;  %v170_v60 = vld [vmem:[%s10189_s1 + $0xf0] sm:$0xff] }
 0x151   :  { %10350 = vst [vmem:[#allocation74_spill] sm:$0xff] %v6163_v11  ;;  %10351 = vst [vmem:[#allocation75_spill] sm:$0xff] %v6165_v56  ;;  %895 = vperm.xlu0 %4549, %v177_v5   ;;  %v181_v5 = vld [vmem:[%s10189_s1 + $0x148] sm:$0xff] }
 0x154   :  { %868 = vperm.xlu1 %4550, %v168_v35   ;;  %v6173_v2 = vpop.xlane.xlu1 %567  ;;  %v6175_v26 = vpop.xlane.xlu0 %564  ;;  %v172_v35 = vld [vmem:[%s10189_s1 + $0x100] sm:$0xff] }
 0x155   :  { %10352 = vst [vmem:[#allocation76_spill] sm:$0xff] %v6173_v2  ;;  %10353 = vst [vmem:[#allocation77_spill] sm:$0xff] %v6175_v26  ;;  %901 = vperm.xlu0 %4549, %v179_v39   ;;  %v183_v39 = vld [vmem:[%s10189_s1 + $0x158] sm:$0xff] }
 0x158   :  { %874 = vperm.xlu1 %4550, %v170_v60   ;;  %v6183_v11 = vpop.xlane.xlu1 %573  ;;  %v6185_v56 = vpop.xlane.xlu0 %570  ;;  %v174_v60 = vld [vmem:[%s10189_s1 + $0x110] sm:$0xff] }
 0x159   :  { %10354 = vst [vmem:[#allocation78_spill] sm:$0xff] %v6183_v11  ;;  %10355 = vst [vmem:[#allocation79_spill] sm:$0xff] %v6185_v56  ;;  %907 = vperm.xlu0 %4549, %v181_v5   ;;  %v185_v5 = vld [vmem:[%s10189_s1 + $0x168] sm:$0xff] }
 0x15c   :  { %880 = vperm.xlu1 %4550, %v172_v35   ;;  %v6193_v2 = vpop.xlane.xlu1 %579  ;;  %v6195_v26 = vpop.xlane.xlu0 %576  ;;  %v176_v35 = vld [vmem:[%s10189_s1 + $0x120] sm:$0xff] }
 0x15d   :  { %10356 = vst [vmem:[#allocation80_spill] sm:$0xff] %v6193_v2  ;;  %10357 = vst [vmem:[#allocation81_spill] sm:$0xff] %v6195_v26  ;;  %913 = vperm.xlu0 %4549, %v183_v39   ;;  %v187_v39 = vld [vmem:[%s10189_s1 + $0x178] sm:$0xff] }
 0x160   :  { %886 = vperm.xlu1 %4550, %v174_v60   ;;  %v6203_v11 = vpop.xlane.xlu1 %585  ;;  %v6205_v56 = vpop.xlane.xlu0 %582  ;;  %v178_v60 = vld [vmem:[%s10189_s1 + $0x130] sm:$0xff] }
 0x161   :  { %10358 = vst [vmem:[#allocation82_spill] sm:$0xff] %v6203_v11  ;;  %10359 = vst [vmem:[#allocation83_spill] sm:$0xff] %v6205_v56  ;;  %919 = vperm.xlu0 %4549, %v185_v5   ;;  %v189_v5 = vld [vmem:[%s10189_s1 + $0x188] sm:$0xff] }
 0x164   :  { %892 = vperm.xlu1 %4550, %v176_v35   ;;  %v6213_v2 = vpop.xlane.xlu1 %591  ;;  %v6215_v26 = vpop.xlane.xlu0 %588  ;;  %v180_v35 = vld [vmem:[%s10189_s1 + $0x140] sm:$0xff] }
 0x165   :  { %10360 = vst [vmem:[#allocation84_spill] sm:$0xff] %v6213_v2  ;;  %10361 = vst [vmem:[#allocation85_spill] sm:$0xff] %v6215_v26  ;;  %925 = vperm.xlu0 %4549, %v187_v39   ;;  %v191_v39 = vld [vmem:[%s10189_s1 + $0x198] sm:$0xff] }
 0x168   :  { %898 = vperm.xlu1 %4550, %v178_v60   ;;  %v6223_v11 = vpop.xlane.xlu1 %597  ;;  %v6225_v56 = vpop.xlane.xlu0 %594  ;;  %v182_v60 = vld [vmem:[%s10189_s1 + $0x150] sm:$0xff] }
 0x169   :  { %10362 = vst [vmem:[#allocation86_spill] sm:$0xff] %v6223_v11  ;;  %10363 = vst [vmem:[#allocation87_spill] sm:$0xff] %v6225_v56  ;;  %931 = vperm.xlu0 %4549, %v189_v5   ;;  %v193_v5 = vld [vmem:[%s10189_s1 + $0x1a8] sm:$0xff] }
 0x16c   :  { %904 = vperm.xlu1 %4550, %v180_v35   ;;  %v6233_v2 = vpop.xlane.xlu1 %603  ;;  %v6235_v26 = vpop.xlane.xlu0 %600  ;;  %v184_v35 = vld [vmem:[%s10189_s1 + $0x160] sm:$0xff] }
 0x16d   :  { %10364 = vst [vmem:[#allocation88_spill] sm:$0xff] %v6233_v2  ;;  %10365 = vst [vmem:[#allocation89_spill] sm:$0xff] %v6235_v26  ;;  %937 = vperm.xlu0 %4549, %v191_v39   ;;  %v195_v39 = vld [vmem:[%s10189_s1 + $0x1b8] sm:$0xff] }
 0x170   :  { %910 = vperm.xlu1 %4550, %v182_v60   ;;  %v6243_v11 = vpop.xlane.xlu1 %609  ;;  %v6245_v56 = vpop.xlane.xlu0 %606  ;;  %v186_v60 = vld [vmem:[%s10189_s1 + $0x170] sm:$0xff] }
 0x171   :  { %10366 = vst [vmem:[#allocation90_spill] sm:$0xff] %v6243_v11  ;;  %10367 = vst [vmem:[#allocation91_spill] sm:$0xff] %v6245_v56  ;;  %943 = vperm.xlu0 %4549, %v193_v5   ;;  %v197_v5 = vld [vmem:[%s10189_s1 + $0x1c8] sm:$0xff] }
 0x174   :  { %916 = vperm.xlu1 %4550, %v184_v35   ;;  %v6253_v2 = vpop.xlane.xlu1 %615  ;;  %v6255_v26 = vpop.xlane.xlu0 %612  ;;  %v188_v35 = vld [vmem:[%s10189_s1 + $0x180] sm:$0xff] }
 0x175   :  { %10368 = vst [vmem:[#allocation92_spill] sm:$0xff] %v6253_v2  ;;  %10369 = vst [vmem:[#allocation93_spill] sm:$0xff] %v6255_v26  ;;  %949 = vperm.xlu0 %4549, %v195_v39   ;;  %v199_v39 = vld [vmem:[%s10189_s1 + $0x1d8] sm:$0xff] }
 0x178   :  { %922 = vperm.xlu1 %4550, %v186_v60   ;;  %v6263_v11 = vpop.xlane.xlu1 %621  ;;  %v6265_v56 = vpop.xlane.xlu0 %618  ;;  %v190_v60 = vld [vmem:[%s10189_s1 + $0x190] sm:$0xff] }
 0x179   :  { %10370 = vst [vmem:[#allocation94_spill] sm:$0xff] %v6263_v11  ;;  %10371 = vst [vmem:[#allocation95_spill] sm:$0xff] %v6265_v56  ;;  %955 = vperm.xlu0 %4549, %v197_v5   ;;  %v201_v5 = vld [vmem:[%s10189_s1 + $0x1e8] sm:$0xff] }
 0x17c   :  { %928 = vperm.xlu1 %4550, %v188_v35   ;;  %v6273_v2 = vpop.xlane.xlu1 %627  ;;  %v6275_v26 = vpop.xlane.xlu0 %624  ;;  %v192_v35 = vld [vmem:[%s10189_s1 + $0x1a0] sm:$0xff] }
 0x17d   :  { %10372 = vst [vmem:[#allocation96_spill] sm:$0xff] %v6273_v2  ;;  %10373 = vst [vmem:[#allocation97_spill] sm:$0xff] %v6275_v26  ;;  %961 = vperm.xlu0 %4549, %v199_v39   ;;  %v203_v39 = vld [vmem:[%s10189_s1 + $0x1f8] sm:$0xff] }
 0x180   :  { %934 = vperm.xlu1 %4550, %v190_v60   ;;  %v6283_v11 = vpop.xlane.xlu1 %633  ;;  %v6285_v56 = vpop.xlane.xlu0 %630  ;;  %v194_v60 = vld [vmem:[%s10189_s1 + $0x1b0] sm:$0xff] }
 0x181   :  { %10374 = vst [vmem:[#allocation98_spill] sm:$0xff] %v6283_v11  ;;  %10375 = vst [vmem:[#allocation99_spill] sm:$0xff] %v6285_v56  ;;  %967 = vperm.xlu0 %4549, %v201_v5   ;;  %v205_v5 = vld [vmem:[%s10189_s1 + $0x208] sm:$0xff] }
 0x184   :  { %940 = vperm.xlu1 %4550, %v192_v35   ;;  %v6293_v2 = vpop.xlane.xlu1 %639  ;;  %v6295_v26 = vpop.xlane.xlu0 %636  ;;  %v196_v35 = vld [vmem:[%s10189_s1 + $0x1c0] sm:$0xff] }
 0x185   :  { %10376 = vst [vmem:[#allocation100_spill] sm:$0xff] %v6293_v2  ;;  %10377 = vst [vmem:[#allocation101_spill] sm:$0xff] %v6295_v26  ;;  %973 = vperm.xlu0 %4549, %v203_v39   ;;  %v207_v39 = vld [vmem:[%s10189_s1 + $0x218] sm:$0xff] }
 0x188   :  { %946 = vperm.xlu1 %4550, %v194_v60   ;;  %v6303_v11 = vpop.xlane.xlu1 %645  ;;  %v6305_v56 = vpop.xlane.xlu0 %642  ;;  %v198_v60 = vld [vmem:[%s10189_s1 + $0x1d0] sm:$0xff] }
 0x189   :  { %10378 = vst [vmem:[#allocation102_spill] sm:$0xff] %v6303_v11  ;;  %10379 = vst [vmem:[#allocation103_spill] sm:$0xff] %v6305_v56  ;;  %979 = vperm.xlu0 %4549, %v205_v5   ;;  %v209_v5 = vld [vmem:[%s10189_s1 + $0x228] sm:$0xff] }
 0x18c   :  { %952 = vperm.xlu1 %4550, %v196_v35   ;;  %v6313_v2 = vpop.xlane.xlu1 %651  ;;  %v6318_v11 = vpop.xlane.xlu0 %648  ;;  %v200_v35 = vld [vmem:[%s10189_s1 + $0x1e0] sm:$0xff] }
 0x18d   :  { %10380 = vst [vmem:[#allocation104_spill] sm:$0xff] %v6313_v2  ;;  %985 = vperm.xlu0 %4549, %v207_v39   ;;  %10381 = vst [vmem:[#allocation105_spill] sm:$0xff] %v6318_v11  ;;  %v211_v39 = vld [vmem:[%s10189_s1 + $0x238] sm:$0xff] }
 0x190   :  { %958 = vperm.xlu1 %4550, %v198_v60   ;;  %v6323_v56 = vpop.permute.xlu1 %787  ;;  %v202_v60 = vld [vmem:[%s10189_s1 + $0x1f0] sm:$0xff] }
 0x191   :  { %991 = vperm.xlu0 %4549, %v209_v5   ;;  %v213_v5 = vld [vmem:[%s10189_s1 + $0x248] sm:$0xff] }
 0x194   :  { %964 = vperm.xlu1 %4550, %v200_v35   ;;  %v6331_v2 = vpop.permute.xlu1 %790  ;;  %v6333_v11 = vpop.permute.xlu0 %784  ;;  %v204_v35 = vld [vmem:[%s10189_s1 + $0x200] sm:$0xff] }
 0x195   :  { %997 = vperm.xlu0 %4549, %v211_v39   ;;  %v215_v39 = vld [vmem:[%s10189_s1 + $0x258] sm:$0xff] }
 0x198   :  { %970 = vperm.xlu1 %4550, %v202_v60   ;;  %v6341_v26 = vpop.permute.xlu1 %793  ;;  %v6343_v47 = vpop.permute.xlu0 %811  ;;  %v206_v60 = vld [vmem:[%s10189_s1 + $0x210] sm:$0xff] }
 0x199   :  { %1003 = vperm.xlu0 %4549, %v213_v5   ;;  %v217_v5 = vld [vmem:[%s10189_s1 + $0x268] sm:$0xff] }
 0x19c   :  { %976 = vperm.xlu1 %4550, %v204_v35   ;;  %v6351_v53 = vpop.permute.xlu1 %796  ;;  %v6353_v10 = vpop.permute.xlu0 %817  ;;  %v208_v35 = vld [vmem:[%s10189_s1 + $0x220] sm:$0xff] }
 0x19d   :  { %1009 = vperm.xlu0 %4549, %v215_v39   ;;  %v219_v39 = vld [vmem:[%s10189_s1 + $0x278] sm:$0xff] }
 0x1a0   :  { %982 = vperm.xlu1 %4550, %v206_v60   ;;  %v6361_v33 = vpop.permute.xlu1 %799  ;;  %v6363_v29 = vpop.permute.xlu0 %823  ;;  %v210_v60 = vld [vmem:[%s10189_s1 + $0x230] sm:$0xff] }
 0x1a1   :  { %1015 = vperm.xlu0 %4549, %v217_v5   ;;  %v221_v5 = vld [vmem:[%s10189_s1 + $0x288] sm:$0xff] }
 0x1a4   :  { %988 = vperm.xlu1 %4550, %v208_v35   ;;  %v6371_v14 = vpop.permute.xlu1 %802  ;;  %v6373_v16 = vpop.permute.xlu0 %829  ;;  %v212_v35 = vld [vmem:[%s10189_s1 + $0x240] sm:$0xff] }
 0x1a5   :  { %1021 = vperm.xlu0 %4549, %v219_v39   ;;  %v223_v39 = vld [vmem:[%s10189_s1 + $0x298] sm:$0xff] }
 0x1a8   :  { %994 = vperm.xlu1 %4550, %v210_v60   ;;  %v6381_v1 = vpop.permute.xlu1 %805  ;;  %v6383_v48 = vpop.permute.xlu0 %835  ;;  %v214_v60 = vld [vmem:[%s10189_s1 + $0x250] sm:$0xff] }
 0x1a9   :  { %1027 = vperm.xlu0 %4549, %v221_v5   ;;  %v225_v5 = vld [vmem:[%s10189_s1 + $0x2a8] sm:$0xff] }
 0x1ac   :  { %1000 = vperm.xlu1 %4550, %v212_v35   ;;  %v6391_v51 = vpop.permute.xlu1 %808  ;;  %v6393_v20 = vpop.permute.xlu0 %841  ;;  %v216_v35 = vld [vmem:[%s10189_s1 + $0x260] sm:$0xff] }
 0x1ad   :  { %1033 = vperm.xlu0 %4549, %v223_v39   ;;  %v227_v39 = vld [vmem:[%s10189_s1 + $0x2b8] sm:$0xff] }
 0x1b0   :  { %1006 = vperm.xlu1 %4550, %v214_v60   ;;  %v6401_v38 = vpop.permute.xlu1 %814  ;;  %v6403_v62 = vpop.permute.xlu0 %847  ;;  %v218_v60 = vld [vmem:[%s10189_s1 + $0x270] sm:$0xff] }
 0x1b1   :  { %1039 = vperm.xlu0 %4549, %v225_v5   ;;  %v229_v5 = vld [vmem:[%s10189_s1 + $0x2c8] sm:$0xff] }
 0x1b4   :  { %1012 = vperm.xlu1 %4550, %v216_v35   ;;  %v6411_v24 = vpop.permute.xlu1 %820  ;;  %v6413_v42 = vpop.permute.xlu0 %853  ;;  %v220_v35 = vld [vmem:[%s10189_s1 + $0x280] sm:$0xff] }
 0x1b5   :  { %10382 = vst [vmem:[#allocation106_spill] sm:$0xff] %v6413_v42  ;;  %1045 = vperm.xlu0 %4549, %v227_v39   ;;  %v231_v39 = vld [vmem:[%s10189_s1 + $0x2d8] sm:$0xff] }
 0x1b8   :  { %1018 = vperm.xlu1 %4550, %v218_v60   ;;  %v6421_v13 = vpop.permute.xlu1 %826  ;;  %v6423_v22 = vpop.permute.xlu0 %859  ;;  %v222_v60 = vld [vmem:[%s10189_s1 + $0x290] sm:$0xff] }
 0x1b9   :  { %10383 = vst [vmem:[#allocation107_spill] sm:$0xff] %v6423_v22  ;;  %1051 = vperm.xlu0 %4549, %v229_v5   ;;  %v233_v5 = vld [vmem:[%s10189_s1 + $0x2e8] sm:$0xff] }
 0x1bc   :  { %1024 = vperm.xlu1 %4550, %v220_v35   ;;  %v6431_v4 = vpop.permute.xlu1 %832  ;;  %v6433_v7 = vpop.permute.xlu0 %865  ;;  %v224_v35 = vld [vmem:[%s10189_s1 + $0x2a0] sm:$0xff] }
 0x1bd   :  { %10384 = vst [vmem:[#allocation108_spill] sm:$0xff] %v6433_v7  ;;  %1057 = vperm.xlu0 %4549, %v231_v39   ;;  %v235_v39 = vld [vmem:[%s10189_s1 + $0x2f8] sm:$0xff] }
 0x1c0   :  { %1030 = vperm.xlu1 %4550, %v222_v60   ;;  %v6441_v59 = vpop.permute.xlu1 %838  ;;  %v6443_v57 = vpop.permute.xlu0 %871  ;;  %v226_v60 = vld [vmem:[%s10189_s1 + $0x2b0] sm:$0xff] }
 0x1c1   :  { %10385 = vst [vmem:[#allocation109_spill] sm:$0xff] %v6443_v57  ;;  %1063 = vperm.xlu0 %4549, %v233_v5   ;;  %v237_v5 = vld [vmem:[%s10189_s1 + $0x308] sm:$0xff] }
 0x1c4   :  { %1036 = vperm.xlu1 %4550, %v224_v35   ;;  %v6451_v50 = vpop.permute.xlu1 %844  ;;  %v6453_v44 = vpop.permute.xlu0 %877  ;;  %v228_v35 = vld [vmem:[%s10189_s1 + $0x2c0] sm:$0xff] }
 0x1c5   :  { %10386 = vst [vmem:[#allocation110_spill] sm:$0xff] %v6453_v44  ;;  %1069 = vperm.xlu0 %4549, %v235_v39   ;;  %v239_v39 = vld [vmem:[%s10189_s1 + $0x318] sm:$0xff] }
 0x1c8   :  { %1042 = vperm.xlu1 %4550, %v226_v60   ;;  %v6461_v57 = vpop.permute.xlu1 %850  ;;  %v6463_v41 = vpop.permute.xlu0 %883  ;;  %v230_v60 = vld [vmem:[%s10189_s1 + $0x2d0] sm:$0xff] }
 0x1c9   :  { %10387 = vst [vmem:[#allocation111_spill] sm:$0xff] %v6463_v41  ;;  %1075 = vperm.xlu0 %4549, %v237_v5   ;;  %v241_v5 = vld [vmem:[%s10189_s1 + $0x328] sm:$0xff] }
 0x1cc   :  { %1048 = vperm.xlu1 %4550, %v228_v35   ;;  %v6471_v44 = vpop.permute.xlu1 %856  ;;  %v6473_v7 = vpop.permute.xlu0 %889  ;;  %v232_v35 = vld [vmem:[%s10189_s1 + $0x2e0] sm:$0xff] }
 0x1cd   :  { %10388 = vst [vmem:[#allocation112_spill] sm:$0xff] %v6473_v7  ;;  %1081 = vperm.xlu0 %4549, %v239_v39   ;;  %v243_v39 = vld [vmem:[%s10189_s1 + $0x338] sm:$0xff] }
 0x1d0   :  { %1054 = vperm.xlu1 %4550, %v230_v60   ;;  %v6481_v41 = vpop.permute.xlu1 %862  ;;  %v6483_v30 = vpop.permute.xlu0 %895  ;;  %v234_v60 = vld [vmem:[%s10189_s1 + $0x2f0] sm:$0xff] }
 0x1d1   :  { %10389 = vst [vmem:[#allocation113_spill] sm:$0xff] %v6483_v30  ;;  %1087 = vperm.xlu0 %4549, %v241_v5   ;;  %v245_v5 = vld [vmem:[%s10189_s1 + $0x348] sm:$0xff] }
 0x1d4   :  { %1060 = vperm.xlu1 %4550, %v232_v35   ;;  %v6491_v7 = vpop.permute.xlu1 %868  ;;  %v6493_v32 = vpop.permute.xlu0 %901  ;;  %v236_v35 = vld [vmem:[%s10189_s1 + $0x300] sm:$0xff] }
 0x1d5   :  { %10390 = vst [vmem:[#allocation114_spill] sm:$0xff] %v6493_v32  ;;  %1093 = vperm.xlu0 %4549, %v243_v39   ;;  %v247_v39 = vld [vmem:[%s10189_s1 + $0x358] sm:$0xff] }
 0x1d8   :  { %1066 = vperm.xlu1 %4550, %v234_v60   ;;  %v6501_v30 = vpop.permute.xlu1 %874  ;;  %v6503_v22 = vpop.permute.xlu0 %907  ;;  %v238_v60 = vld [vmem:[%s10189_s1 + $0x310] sm:$0xff] }
 0x1d9   :  { %10391 = vst [vmem:[#allocation115_spill] sm:$0xff] %v6503_v22  ;;  %1099 = vperm.xlu0 %4549, %v245_v5   ;;  %v249_v5 = vld [vmem:[%s10189_s1 + $0x368] sm:$0xff] }
 0x1dc   :  { %1072 = vperm.xlu1 %4550, %v236_v35   ;;  %v6511_v32 = vpop.permute.xlu1 %880  ;;  %v6513_v17 = vpop.permute.xlu0 %913  ;;  %v240_v35 = vld [vmem:[%s10189_s1 + $0x320] sm:$0xff] }
 0x1dd   :  { %10392 = vst [vmem:[#allocation116_spill] sm:$0xff] %v6513_v17  ;;  %1105 = vperm.xlu0 %4549, %v247_v39   ;;  %v251_v39 = vld [vmem:[%s10189_s1 + $0x378] sm:$0xff] }
 0x1e0   :  { %1078 = vperm.xlu1 %4550, %v238_v60   ;;  %v6521_v22 = vpop.permute.xlu1 %886  ;;  %v6523_v23 = vpop.permute.xlu0 %919  ;;  %v242_v60 = vld [vmem:[%s10189_s1 + $0x330] sm:$0xff] }
 0x1e1   :  { %10393 = vst [vmem:[#allocation117_spill] sm:$0xff] %v6521_v22  ;;  %10394 = vst [vmem:[#allocation118_spill] sm:$0xff] %v6523_v23  ;;  %1111 = vperm.xlu0 %4549, %v249_v5   ;;  %v253_v5 = vld [vmem:[%s10189_s1 + $0x388] sm:$0xff] }
 0x1e4   :  { %1084 = vperm.xlu1 %4550, %v240_v35   ;;  %v6531_v17 = vpop.permute.xlu1 %892  ;;  %v6533_v42 = vpop.permute.xlu0 %925  ;;  %v244_v35 = vld [vmem:[%s10189_s1 + $0x340] sm:$0xff] }
 0x1e5   :  { %10395 = vst [vmem:[#allocation119_spill] sm:$0xff] %v6531_v17  ;;  %10396 = vst [vmem:[#allocation120_spill] sm:$0xff] %v6533_v42  ;;  %1117 = vperm.xlu0 %4549, %v251_v39   ;;  %v255_v39 = vld [vmem:[%s10189_s1 + $0x398] sm:$0xff] }
 0x1e8   :  { %1090 = vperm.xlu1 %4550, %v242_v60   ;;  %v6541_v23 = vpop.permute.xlu1 %898  ;;  %v6543_v22 = vpop.permute.xlu0 %931  ;;  %v246_v60 = vld [vmem:[%s10189_s1 + $0x350] sm:$0xff] }
 0x1e9   :  { %10397 = vst [vmem:[#allocation121_spill] sm:$0xff] %v6541_v23  ;;  %10398 = vst [vmem:[#allocation122_spill] sm:$0xff] %v6543_v22  ;;  %1123 = vperm.xlu0 %4549, %v253_v5   ;;  %v257_v5 = vld [vmem:[%s10189_s1 + $0x3a8] sm:$0xff] }
 0x1ec   :  { %1096 = vperm.xlu1 %4550, %v244_v35   ;;  %v6551_v42 = vpop.permute.xlu1 %904  ;;  %v6553_v17 = vpop.permute.xlu0 %937  ;;  %v248_v35 = vld [vmem:[%s10189_s1 + $0x360] sm:$0xff] }
 0x1ed   :  { %10399 = vst [vmem:[#allocation123_spill] sm:$0xff] %v6551_v42  ;;  %10400 = vst [vmem:[#allocation124_spill] sm:$0xff] %v6553_v17  ;;  %1129 = vperm.xlu0 %4549, %v255_v39   ;;  %v259_v39 = vld [vmem:[%s10189_s1 + $0x3b8] sm:$0xff] }
 0x1f0   :  { %1102 = vperm.xlu1 %4550, %v246_v60   ;;  %v6561_v22 = vpop.permute.xlu1 %910  ;;  %v6563_v23 = vpop.permute.xlu0 %943  ;;  %v250_v60 = vld [vmem:[%s10189_s1 + $0x370] sm:$0xff] }
 0x1f1   :  { %10401 = vst [vmem:[#allocation125_spill] sm:$0xff] %v6561_v22  ;;  %10402 = vst [vmem:[#allocation126_spill] sm:$0xff] %v6563_v23  ;;  %1135 = vperm.xlu0 %4549, %v257_v5   ;;  %v261_v5 = vld [vmem:[%s10189_s1 + $0x3c8] sm:$0xff] }
 0x1f4   :  { %1108 = vperm.xlu1 %4550, %v248_v35   ;;  %v6571_v17 = vpop.permute.xlu1 %916  ;;  %v6573_v42 = vpop.permute.xlu0 %949  ;;  %v252_v35 = vld [vmem:[%s10189_s1 + $0x380] sm:$0xff] }
 0x1f5   :  { %10403 = vst [vmem:[#allocation127_spill] sm:$0xff] %v6571_v17  ;;  %10404 = vst [vmem:[#allocation128_spill] sm:$0xff] %v6573_v42  ;;  %1141 = vperm.xlu0 %4549, %v259_v39   ;;  %v263_v39 = vld [vmem:[%s10189_s1 + $0x3d8] sm:$0xff] }
 0x1f8   :  { %1114 = vperm.xlu1 %4550, %v250_v60   ;;  %v6581_v23 = vpop.permute.xlu1 %922  ;;  %v6583_v22 = vpop.permute.xlu0 %955  ;;  %v254_v60 = vld [vmem:[%s10189_s1 + $0x390] sm:$0xff] }
 0x1f9   :  { %10405 = vst [vmem:[#allocation129_spill] sm:$0xff] %v6581_v23  ;;  %10406 = vst [vmem:[#allocation130_spill] sm:$0xff] %v6583_v22  ;;  %1147 = vperm.xlu0 %4549, %v261_v5   ;;  %v265_v5 = vld [vmem:[%s10189_s1 + $0x3e8] sm:$0xff] }
 0x1fc   :  { %1120 = vperm.xlu1 %4550, %v252_v35   ;;  %v6591_v42 = vpop.permute.xlu1 %928  ;;  %v6593_v17 = vpop.permute.xlu0 %961  ;;  %v256_v35 = vld [vmem:[%s10189_s1 + $0x3a0] sm:$0xff] }
 0x1fd   :  { %10407 = vst [vmem:[#allocation131_spill] sm:$0xff] %v6591_v42  ;;  %10408 = vst [vmem:[#allocation132_spill] sm:$0xff] %v6593_v17  ;;  %1153 = vperm.xlu0 %4549, %v263_v39   ;;  %v267_v39 = vld [vmem:[%s10189_s1 + $0x3f8] sm:$0xff] }
 0x200   :  { %1126 = vperm.xlu1 %4550, %v254_v60   ;;  %v6601_v22 = vpop.permute.xlu1 %934  ;;  %v6603_v23 = vpop.permute.xlu0 %967  ;;  %v258_v60 = vld [vmem:[%s10189_s1 + $0x3b0] sm:$0xff] }
 0x201   :  { %10409 = vst [vmem:[#allocation133_spill] sm:$0xff] %v6601_v22  ;;  %10410 = vst [vmem:[#allocation134_spill] sm:$0xff] %v6603_v23  ;;  %1159 = vperm.xlu0 %4549, %v265_v5   ;;  %v260_v22 = vld [vmem:[%s10189_s1 + $0x3c0] sm:$0xff] }
 0x204   :  { %1132 = vperm.xlu1 %4550, %v256_v35   ;;  %v6611_v17 = vpop.permute.xlu1 %940  ;;  %v6613_v42 = vpop.permute.xlu0 %973 }
 0x205   :  { %10411 = vst [vmem:[#allocation135_spill] sm:$0xff] %v6611_v17  ;;  %10412 = vst [vmem:[#allocation136_spill] sm:$0xff] %v6613_v42  ;;  %1165 = vperm.xlu0 %4549, %v267_v39   ;;  %v262_v39 = vld [vmem:[%s10189_s1 + $0x3d0] sm:$0xff] }
 0x208   :  { %1138 = vperm.xlu1 %4550, %v258_v60   ;;  %v6618_v5 = vpop.permute.xlu1 %946  ;;  %v6620_v23 = vpop.permute.xlu0 %979 }
 0x209   :  { %10413 = vst [vmem:[#allocation137_spill] sm:$0xff] %v6618_v5  ;;  %10414 = vst [vmem:[#allocation138_spill] sm:$0xff] %v6620_v23  ;;  %v264_v23 = vld [vmem:[%s10189_s1 + $0x3e0] sm:$0xff] }
 0x20c   :  { %1144 = vperm.xlu1 %4550, %v260_v22   ;;  %v6625_v35 = vpop.permute.xlu1 %952  ;;  %v6627_v17 = vpop.permute.xlu0 %985 }
 0x20d   :  { %10415 = vst [vmem:[#allocation139_spill] sm:$0xff] %v6625_v35  ;;  %10416 = vst [vmem:[#allocation140_spill] sm:$0xff] %v6627_v17  ;;  %v10191_v35 = vlaneseq  ;;  %v266_v17 = vld [vmem:[%s10189_s1 + $0x3f0] sm:$0xff] }
 0x210   :  { %1150 = vperm.xlu1 %4550, %v262_v39   ;;  %v6632_v42 = vpop.permute.xlu1 %958  ;;  %v6634_v60 = vpop.permute.xlu0 %991 }
 0x211   :  { %10417 = vst [vmem:[#allocation141_spill] sm:$0xff] %v6632_v42  ;;  %10418 = vst [vmem:[#allocation142_spill] sm:$0xff] %v6634_v60  ;;  %v6651_v60 = vand.u32 127, %v10191_v35 }
 0x213   :  { %10422 = vst [vmem:[#allocation146_spill] sm:$0xff] %v6651_v60  ;;  %vm1168_vm1 = vcmp.eq.s32.totalorder %v6651_v60, %v6323_v56  ;;  %vm1169_vm2 = vcmp.eq.s32.totalorder %v6651_v60, %v6331_v2  ;;  %v5064_v56 = vld [vmem:[%s10188_s0 + $0x10] sm:$0xff]  ;;  %vm1171_vm3 = vcmp.eq.s32.totalorder %v6651_v60, %v6351_v53  ;;  %v5065_v2 = vld [vmem:[%s10188_s0 + $0x20] sm:$0xff]  ;;  %vm1173_vm4 = vcmp.eq.s32.totalorder %v6651_v60, %v6371_v14 }
 0x214   :  { %1156 = vperm.xlu1 %4550, %v264_v23   ;;  %v6639_v5 = vpop.permute.xlu1 %964  ;;  %v6641_v22 = vpop.permute.xlu0 %997  ;;  %v5066_v53 = vld [vmem:[%s10188_s0 + $0x30] sm:$0xff]  ;;  %vm1175_vm5 = vcmp.eq.s32.totalorder %v6651_v60, %v6391_v51  ;;  %v5067_v14 = vld [vmem:[%s10188_s0 + $0x40] sm:$0xff]  ;;  %vm1177_vm6 = vcmp.eq.s32.totalorder %v6651_v60, %v6401_v38  ;;  %vm1167_vm7 = vcmp.eq.s32.totalorder %v6651_v60, %v6333_v11  ;;  %vm1179_vm8 = vcmp.eq.s32.totalorder %v6651_v60, %v6411_v24 }
 0x215   :  { %10419 = vst [vmem:[#allocation143_spill] sm:$0xff] %v6641_v22  ;;  %v5063_v22 = vld [vmem:[%s10188_s0 + $0x8] sm:$0xff]  ;;  %v5068_v51 = vld [vmem:[%s10188_s0 + $0x50] sm:$0xff]  ;;  %vm1170_vm9 = vcmp.eq.s32.totalorder %v6651_v60, %v6341_v26  ;;  %vm1181_vm10 = vcmp.eq.s32.totalorder %v6651_v60, %v6421_v13  ;;  %vm1172_vm11 = vcmp.eq.s32.totalorder %v6651_v60, %v6361_v33  ;;  %vm1183_vm12 = vcmp.eq.s32.totalorder %v6651_v60, %v6431_v4 }
 0x216   :  { %vm1174_vm13 = vcmp.eq.s32.totalorder %v6651_v60, %v6381_v1  ;;  %vm1185_vm14 = vcmp.eq.s32.totalorder %v6651_v60, %v6441_v59  ;;  %vm1176_vm15 = vcmp.eq.s32.totalorder %v6651_v60, %v6343_v47 }
 0x218   :  { %1162 = vperm.xlu1 %4550, %v266_v17   ;;  %v6646_v39 = vpop.permute.xlu1 %970  ;;  %v6648_v42 = vpop.permute.xlu0 %1003  ;;  %v6663_v17 = vsub.f32 %v5063_v22, %v5670_v28 }
 0x219   :  { %10420 = vst [vmem:[#allocation144_spill] sm:$0xff] %v6646_v39  ;;  %10421 = vst [vmem:[#allocation145_spill] sm:$0xff] %v6648_v42 }
 0x21a   :  { %10425 = vst [vmem:[#allocation149_spill] sm:$0xff] %v6663_v17  ;;  %v1296_v35 = vsel %vm1168_vm1, %v6663_v17, 0.0  ;;  %v6690_v17 = vsub.f32 %v5065_v2, %v5682_v34  ;;  %vm1187_vm1 = vcmp.eq.s32.totalorder %v6651_v60, %v6451_v50 }
 0x21c   :  { %v6653_v8 = vpop.permute.xlu1 %976  ;;  %v6655_v23 = vpop.permute.xlu0 %1009  ;;  %10428 = vst [vmem:[#allocation152_spill] sm:$0xff] %v6690_v17 }
 0x21d   :  { %10423 = vst [vmem:[#allocation147_spill] sm:$0xff] %v6653_v8  ;;  %10424 = vst [vmem:[#allocation148_spill] sm:$0xff] %v6655_v23  ;;  %v6676_v23 = vsub.f32 %v5064_v56, %v5654_v18  ;;  %v1426_v8 = vsel %vm268_vm0, %v1296_v35, 0.0  ;;  %v1299_v56 = vsel %vm1171_vm3, %v6690_v17, 0.0  ;;  %v6718_v17 = vsub.f32 %v5067_v14, %v5706_v46 }
 0x21e   :  { %v1435_v34 = vsel %vm268_vm0, %v1299_v56, 0.0  ;;  %vm1189_vm3 = vcmp.eq.s32.totalorder %v6651_v60, %v6461_v57 }
 0x21f   :  { %10427 = vst [vmem:[#allocation151_spill] sm:$0xff] %v6676_v23 }
 0x220   :  { %v6665_v39 = vpop.permute.xlu1 %982  ;;  %v6667_v42 = vpop.permute.xlu0 %1015 }
 0x221   :  { %10426 = vst [vmem:[#allocation150_spill] sm:$0xff] %v6667_v42  ;;  %v1297_v42 = vsel %vm1169_vm2, %v6676_v23, 0.0  ;;  %v6704_v23 = vsub.f32 %v5066_v53, %v5694_v40  ;;  %vm1178_vm2 = vcmp.eq.s32.totalorder %v6651_v60, %v6353_v10 }
 0x222   :  { %v1429_v18 = vsel %vm268_vm0, %v1297_v42, 0.0 }
 0x223   :  { %10429 = vst [vmem:[#allocation153_spill] sm:$0xff] %v6704_v23 }
 0x224   :  { %v6679_v28 = vpop.permute.xlu1 %988  ;;  %1427 = vadd.xlane.f32.xlu0 %v1426_v8  ;;  %v6681_v22 = vpop.permute.xlu0 %1021 }
 0x228   :  { %v6693_v35 = vpop.permute.xlu1 %994  ;;  %1430 = vadd.xlane.f32.xlu0 %v1429_v18  ;;  %v6695_v8 = vpop.permute.xlu0 %1027  ;;  %v1301_v18 = vsel %vm1173_vm4, %v6704_v23, 0.0  ;;  %v6732_v23 = vsub.f32 %v5068_v51, %v5718_v52  ;;  %v5069_v52 = vld [vmem:[%s10188_s0] sm:$0xff]  ;;  %vm1180_vm4 = vcmp.eq.s32.totalorder %v6651_v60, %v6363_v29 }
 0x229   :  { %v1441_v40 = vsel %vm268_vm0, %v1301_v18, 0.0 }
 0x22a   :  { %10430 = vst [vmem:[#allocation154_spill] sm:$0xff] %v6732_v23  ;;  %v1305_v14 = vsel %vm1177_vm6, %v6732_v23, 0.0  ;;  %vm1182_vm6 = vcmp.eq.s32.totalorder %v6651_v60, %v6373_v16 }
 0x22b   :  { %v1453_v11 = vsel %vm268_vm0, %v1305_v14, 0.0  ;;  %v5072_v14 = vld [vmem:[%s10188_s0 + $0x70] sm:$0xff] }
 0x22c   :  { %v6707_v42 = vpop.permute.xlu1 %1000  ;;  %1436 = vadd.xlane.f32.xlu0 %v1435_v34  ;;  %v6709_v2 = vpop.permute.xlu0 %1033  ;;  %v1303_v34 = vsel %vm1175_vm5, %v6718_v17, 0.0  ;;  %vm1191_vm5 = vcmp.eq.s32.totalorder %v6651_v60, %v6471_v44 }
 0x22d   :  { %v1447_v46 = vsel %vm268_vm0, %v1303_v34, 0.0  ;;  %v5070_v34 = vld [vmem:[%s10188_s0 + $0x60] sm:$0xff] }
 0x22e   :  { %v6754_v51 = vsub.f32 %v5070_v34, %v5730_v58 }
 0x230   :  { %v6721_v56 = vpop.permute.xlu1 %1006  ;;  %1442 = vadd.xlane.f32.xlu0 %v1441_v40  ;;  %v6723_v53 = vpop.permute.xlu0 %1039  ;;  %v6748_v40 = vsub.f32 %v5069_v52, %v5658_v21  ;;  %v1307_v23 = vsel %vm1179_vm8, %v6754_v51, 0.0  ;;  %v5071_v21 = vld [vmem:[%s10188_s0 + $0x18] sm:$0xff]  ;;  %v6775_v52 = vsub.f32 %v5072_v14, %v5742_v0  ;;  %v5073_v0 = vld [vmem:[%s10188_s0 + $0x28] sm:$0xff]  ;;  %vm1184_vm8 = vcmp.eq.s32.totalorder %v6651_v60, %v6383_v48 }
 0x231   :  { %v6769_v58 = vsub.f32 %v5071_v21, %v5666_v25  ;;  %v1459_v13 = vsel %vm268_vm0, %v1307_v23, 0.0  ;;  %v6793_v23 = vsub.f32 %v5073_v0, %v5678_v31  ;;  %v5076_v0 = vld [vmem:[%s10188_s0 + $0x90] sm:$0xff] }
 0x232   :  { %v1295_v24 = vsel %vm1167_vm7, %v6748_v40, 0.0  ;;  %10432 = vst [vmem:[#allocation156_spill] sm:$0xff] %v6775_v52  ;;  %v1309_v21 = vsel %vm1181_vm10, %v6775_v52, 0.0  ;;  %v6823_v1 = vsub.f32 %v5076_v0, %v5766_v12  ;;  %vm1193_vm7 = vcmp.eq.s32.totalorder %v6651_v60, %v6481_v41  ;;  %v10547_v52 = vld [vmem:[#allocation128_spill] sm:$0xff] }
 0x233   :  { %10431 = vst [vmem:[#allocation155_spill] sm:$0xff] %v6769_v58  ;;  %v1423_v26 = vsel %vm268_vm0, %v1295_v24, 0.0  ;;  %v1298_v25 = vsel %vm1170_vm9, %v6769_v58, 0.0  ;;  %10433 = vst [vmem:[#allocation157_spill] sm:$0xff] %v6793_v23  ;;  %v5074_v24 = vld [vmem:[%s10188_s0 + $0x80] sm:$0xff]  ;;  %v1465_v33 = vsel %vm268_vm0, %v1309_v21, 0.0  ;;  %vm1195_vm9 = vcmp.eq.s32.totalorder %v6651_v60, %v6491_v7 }
 0x234   :  { %v6735_v18 = vpop.permute.xlu1 %1012  ;;  %1448 = vadd.xlane.f32.xlu0 %v1447_v46  ;;  %v6742_v38 = vpop.permute.xlu0 %1045  ;;  %v6799_v14 = vsub.f32 %v5074_v24, %v5754_v6  ;;  %v1300_v4 = vsel %vm1172_vm11, %v6793_v23, 0.0  ;;  %10436 = vst [vmem:[#allocation160_spill] sm:$0xff] %v6823_v1  ;;  %vm1186_vm10 = vcmp.eq.s32.totalorder %v6651_v60, %v6393_v20  ;;  %vm1197_vm11 = vcmp.eq.s32.totalorder %v6651_v60, %v6501_v30  ;;  %v10542_v23 = vld [vmem:[#allocation147_spill] sm:$0xff]  ;;  %v10552_v58 = vld [vmem:[#allocation130_spill] sm:$0xff] }
 0x235   :  { %v1438_v59 = vsel %vm268_vm0, %v1300_v4, 0.0  ;;  %v5078_v4 = vld [vmem:[%s10188_s0 + $0xa0] sm:$0xff] }
 0x236   :  { %10434 = vst [vmem:[#allocation158_spill] sm:$0xff] %v6799_v14 }
 0x238   :  { %v6757_v46 = vpop.permute.xlu1 %1018  ;;  %1454 = vadd.xlane.f32.xlu0 %v1453_v11  ;;  %v6777_v34 = vpop.permute.xlu0 %1051 }
 0x23c   :  { %v6781_v11 = vpop.permute.xlu1 %1024  ;;  %1424 = vadd.xlane.f32.xlu1 %v1423_v26  ;;  %1460 = vadd.xlane.f32.xlu0 %v1459_v13  ;;  %v1432_v26 = vsel %vm268_vm0, %v1298_v25, 0.0  ;;  %v1311_v13 = vsel %vm1183_vm12, %v6799_v14, 0.0  ;;  %v6809_v31 = vpop.permute.xlu0 %1057  ;;  %v5075_v25 = vld [vmem:[%s10188_s0 + $0x38] sm:$0xff]  ;;  %vm1188_vm12 = vcmp.eq.s32.totalorder %v6651_v60, %v6403_v62  ;;  %v10535_v14 = vld [vmem:[#allocation124_spill] sm:$0xff] }
 0x23d   :  { %v6817_v21 = vsub.f32 %v5075_v25, %v5690_v37  ;;  %v1471_v24 = vsel %vm268_vm0, %v1311_v13, 0.0  ;;  %v5077_v37 = vld [vmem:[%s10188_s0 + $0x48] sm:$0xff]  ;;  %v6843_v13 = vsub.f32 %v5078_v4, %v5778_v19  ;;  %v5079_v19 = vld [vmem:[%s10188_s0 + $0x58] sm:$0xff] }
 0x23e   :  { %v6837_v12 = vsub.f32 %v5077_v37, %v5702_v43 }
 0x23f   :  { %10435 = vst [vmem:[#allocation159_spill] sm:$0xff] %v6817_v21  ;;  %10438 = vst [vmem:[#allocation162_spill] sm:$0xff] %v6843_v13 }
 0x240   :  { %1433 = vadd.xlane.f32.xlu1 %v1432_v26  ;;  %1466 = vadd.xlane.f32.xlu0 %v1465_v33  ;;  %v6811_v6 = vpop.permute.xlu1 %1030  ;;  %v1302_v26 = vsel %vm1174_vm13, %v6817_v21, 0.0  ;;  %v1313_v33 = vsel %vm1185_vm14, %v6823_v1, 0.0  ;;  %10437 = vst [vmem:[#allocation161_spill] sm:$0xff] %v6837_v12  ;;  %v6845_v25 = vpop.permute.xlu0 %1063  ;;  %v1304_v43 = vsel %vm1176_vm15, %v6837_v12, 0.0  ;;  %vm1199_vm13 = vcmp.eq.s32.totalorder %v6651_v60, %v6511_v32  ;;  %v10518_v12 = vld [vmem:[#allocation118_spill] sm:$0xff]  ;;  %v10525_v1 = vld [vmem:[#allocation141_spill] sm:$0xff] }
 0x241   :  { %v1444_v50 = vsel %vm268_vm0, %v1302_v26, 0.0  ;;  %v1477_v0 = vsel %vm268_vm0, %v1313_v33, 0.0  ;;  %v5080_v26 = vld [vmem:[%s10188_s0 + $0xb0] sm:$0xff]  ;;  %v1450_v37 = vsel %vm268_vm0, %v1304_v43, 0.0  ;;  %v5082_v43 = vld [vmem:[%s10188_s0 + $0xc0] sm:$0xff] }
 0x242   :  { %v6867_v33 = vsub.f32 %v5080_v26, %v5790_v27  ;;  %v6891_v29 = vsub.f32 %v5082_v43, %v5802_v36  ;;  %v10530_v21 = vld [vmem:[#allocation122_spill] sm:$0xff] }
 0x244   :  { %1439 = vadd.xlane.f32.xlu1 %v1438_v59  ;;  %1472 = vadd.xlane.f32.xlu0 %v1471_v24  ;;  %v6847_v47 = vpop.permute.xlu1 %1036  ;;  %v1315_v59 = vsel %vm1187_vm1, %v6843_v13, 0.0  ;;  %v6861_v24 = vsub.f32 %v5079_v19, %v5714_v49  ;;  %10440 = vst [vmem:[#allocation164_spill] sm:$0xff] %v6867_v33  ;;  %v1317_v4 = vsel %vm1189_vm3, %v6867_v33, 0.0  ;;  %v6877_v49 = vpop.permute.xlu0 %1069  ;;  %10442 = vst [vmem:[#allocation166_spill] sm:$0xff] %v6891_v29  ;;  %v1319_v26 = vsel %vm1191_vm5, %v6891_v29, 0.0  ;;  %v10507_v33 = vld [vmem:[#allocation135_spill] sm:$0xff] }
 0x245   :  { %v1483_v10 = vsel %vm268_vm0, %v1315_v59, 0.0  ;;  %v1489_v59 = vsel %vm268_vm0, %v1317_v4, 0.0  ;;  %v1495_v4 = vsel %vm268_vm0, %v1319_v26, 0.0 }
 0x246   :  { %10439 = vst [vmem:[#allocation163_spill] sm:$0xff] %v6861_v24  ;;  %v1306_v57 = vsel %vm1178_vm2, %v6861_v24, 0.0  ;;  %v10512_v24 = vld [vmem:[#allocation116_spill] sm:$0xff] }
 0x247   :  { %v1456_v44 = vsel %vm268_vm0, %v1306_v57, 0.0 }
 0x248   :  { %1445 = vadd.xlane.f32.xlu1 %v1444_v50  ;;  %1478 = vadd.xlane.f32.xlu0 %v1477_v0  ;;  %v6879_v27 = vpop.permute.xlu1 %1042  ;;  %v5081_v50 = vld [vmem:[%s10188_s0 + $0x68] sm:$0xff]  ;;  %v6913_v57 = vpop.permute.xlu0 %1075 }
 0x249   :  { %v6885_v0 = vsub.f32 %v5081_v50, %v5726_v55  ;;  %v5083_v55 = vld [vmem:[%s10188_s0 + $0x78] sm:$0xff] }
 0x24a   :  { %v6905_v36 = vsub.f32 %v5083_v55, %v5738_v61  ;;  %v5087_v55 = vld [vmem:[%s10188_s0 + $0x98] sm:$0xff] }
 0x24b   :  { %10441 = vst [vmem:[#allocation165_spill] sm:$0xff] %v6885_v0  ;;  %v1308_v19 = vsel %vm1180_vm4, %v6885_v0, 0.0  ;;  %v10500_v0 = vld [vmem:[#allocation114_spill] sm:$0xff] }
 0x24c   :  { %1451 = vadd.xlane.f32.xlu1 %v1450_v37  ;;  %1484 = vadd.xlane.f32.xlu0 %v1483_v10  ;;  %10443 = vst [vmem:[#allocation167_spill] sm:$0xff] %v6905_v36  ;;  %v5084_v37 = vld [vmem:[%s10188_s0 + $0xd0] sm:$0xff]  ;;  %v6915_v16 = vpop.permute.xlu1 %1048  ;;  %v1462_v41 = vsel %vm268_vm0, %v1308_v19, 0.0  ;;  %v1310_v61 = vsel %vm1182_vm6, %v6905_v36, 0.0  ;;  %v10494_v36 = vld [vmem:[#allocation113_spill] sm:$0xff] }
 0x24d   :  { %v6911_v10 = vsub.f32 %v5084_v37, %v5814_v45  ;;  %v5085_v45 = vld [vmem:[%s10188_s0 + $0x88] sm:$0xff]  ;;  %v1468_v19 = vsel %vm268_vm0, %v1310_v61, 0.0  ;;  %v6953_v37 = vsub.f32 %v5087_v55, %v5762_v9  ;;  %v10452_v55 = vld [vmem:[#allocation106_spill] sm:$0xff] }
 0x24e   :  { %v6929_v43 = vsub.f32 %v5085_v45, %v5750_v3  ;;  %v6945_v3 = vpop.permute.xlu0 %1081  ;;  %v5089_v9 = vld [vmem:[%s10188_s0 + $0xa8] sm:$0xff]  ;;  %v5090_v45 = vld [vmem:[%s10188_s0 + $0x100] sm:$0xff]  ;;  %vm1190_vm14 = vcmp.eq.s32.totalorder %v6651_v60, %v10452_v55 }
 0x24f   :  { %10444 = vst [vmem:[#allocation168_spill] sm:$0xff] %v6911_v10  ;;  %v1321_v50 = vsel %vm1193_vm7, %v6911_v10, 0.0  ;;  %10447 = vst [vmem:[#allocation171_spill] sm:$0xff] %v6953_v37  ;;  %v1314_v61 = vsel %vm1186_vm10, %v6953_v37, 0.0  ;;  %v10476_v37 = vld [vmem:[#allocation110_spill] sm:$0xff]  ;;  %v10489_v10 = vld [vmem:[#allocation129_spill] sm:$0xff] }
 0x250   :  { %1457 = vadd.xlane.f32.xlu1 %v1456_v44  ;;  %1490 = vadd.xlane.f32.xlu0 %v1489_v59  ;;  %10445 = vst [vmem:[#allocation169_spill] sm:$0xff] %v6929_v43  ;;  %v5086_v44 = vld [vmem:[%s10188_s0 + $0xe0] sm:$0xff]  ;;  %v1501_v48 = vsel %vm268_vm0, %v1321_v50, 0.0  ;;  %v1312_v7 = vsel %vm1184_vm8, %v6929_v43, 0.0  ;;  %v1480_v32 = vsel %vm268_vm0, %v1314_v61, 0.0  ;;  %vm1198_vm7 = vcmp.eq.s32.totalorder %v6651_v60, %v10476_v37  ;;  %v10482_v43 = vld [vmem:[#allocation111_spill] sm:$0xff] }
 0x251   :  { %v6935_v59 = vsub.f32 %v5086_v44, %v5826_v54  ;;  %v6947_v54 = vpop.permute.xlu1 %1054  ;;  %v1474_v30 = vsel %vm268_vm0, %v1312_v7, 0.0  ;;  %v10450_v44 = vld [vmem:[#allocation11_spill] sm:$0xff] }
 0x253   :  { %10446 = vst [vmem:[#allocation170_spill] sm:$0xff] %v6935_v59  ;;  %v1323_v26 = vsel %vm1195_vm9, %v6935_v59, 0.0  ;;  %vm1200_vm9 = vcmp.eq.s32.totalorder %v6651_v60, %v10482_v43 }
 0x254   :  { %1463 = vadd.xlane.f32.xlu1 %v1462_v41  ;;  %1496 = vadd.xlane.f32.xlu0 %v1495_v4  ;;  %v5088_v41 = vld [vmem:[%s10188_s0 + $0xf0] sm:$0xff]  ;;  %v1507_v4 = vsel %vm268_vm0, %v1323_v26, 0.0 }
 0x255   :  { %v6959_v20 = vsub.f32 %v5088_v41, %v5838_v63  ;;  %v6973_v63 = vsub.f32 %v5089_v9, %v5774_v15  ;;  %v6983_v62 = vpop.permute.xlu1 %1060  ;;  %v10453_v41 = vld [vmem:[#allocation117_spill] sm:$0xff] }
 0x256   :  { %vm1201_vm15 = vcmp.eq.s32.totalorder %v6651_v60, %v10453_v41  ;;  %v10456_v9 = vld [vmem:[#allocation13_spill] sm:$0xff]  ;;  %v10458_v41 = vld [vmem:[#allocation107_spill] sm:$0xff] }
 0x257   :  { %10448 = vst [vmem:[#allocation172_spill] sm:$0xff] %v6959_v20  ;;  %v1325_v50 = vsel %vm1197_vm11, %v6959_v20, 0.0  ;;  %10449 = vst [vmem:[#allocation173_spill] sm:$0xff] %v6973_v63  ;;  %v1316_v15 = vsel %vm1188_vm12, %v6973_v63, 0.0  ;;  %vm1192_vm1 = vcmp.eq.s32.totalorder %v6651_v60, %v10458_v41  ;;  %v10464_v63 = vld [vmem:[#allocation108_spill] sm:$0xff]  ;;  %v10471_v20 = vld [vmem:[#allocation123_spill] sm:$0xff]  ;;  %vm1213_vm12 = vcmp.eq.s32.totalorder %v6651_v60, %v10489_v10 }
 0x258   :  { %1469 = vadd.xlane.f32.xlu1 %v1468_v19  ;;  %1502 = vadd.xlane.f32.xlu0 %v1501_v48  ;;  %v6979_v19 = vsub.f32 %v5090_v45, %v10450_v44  ;;  %v6981_v48 = vpop.permute.xlu0 %1087  ;;  %v1513_v7 = vsel %vm268_vm0, %v1325_v50, 0.0  ;;  %v5092_v50 = vld [vmem:[%s10188_s0 + $0x110] sm:$0xff]  ;;  %v1486_v44 = vsel %vm268_vm0, %v1316_v15, 0.0  ;;  %v5093_v15 = vld [vmem:[%s10188_s0 + $0xc8] sm:$0xff]  ;;  %vm1194_vm3 = vcmp.eq.s32.totalorder %v6651_v60, %v10464_v63 }
 0x259   :  { %v7003_v45 = vsub.f32 %v5092_v50, %v10456_v9  ;;  %v7015_v50 = vpop.permute.xlu1 %1066  ;;  %vm1207_vm6 = vcmp.eq.s32.totalorder %v6651_v60, %v10471_v20 }
 0x25a   :  { %10451 = vst [vmem:[#allocation11_spill] sm:$0xff] %v6979_v19  ;;  %v1327_v26 = vsel %vm1199_vm13, %v6979_v19, 0.0  ;;  %vm1204_vm13 = vcmp.eq.s32.totalorder %v6651_v60, %v10494_v36 }
 0x25b   :  { %10457 = vst [vmem:[#allocation117_spill] sm:$0xff] %v7003_v45  ;;  %v1329_v55 = vsel %vm1201_vm15, %v7003_v45, 0.0  ;;  %vm1206_vm15 = vcmp.eq.s32.totalorder %v6651_v60, %v10500_v0 }
 0x25c   :  { %1475 = vadd.xlane.f32.xlu1 %v1474_v30  ;;  %1508 = vadd.xlane.f32.xlu0 %v1507_v4  ;;  %v5091_v30 = vld [vmem:[%s10188_s0 + $0xb8] sm:$0xff]  ;;  %v10454_v4 = vld [vmem:[#allocation5_spill] sm:$0xff]  ;;  %v1525_v45 = vsel %vm268_vm0, %v1329_v55, 0.0 }
 0x25d   :  { %v6997_v61 = vsub.f32 %v5091_v30, %v10454_v4  ;;  %v10459_v30 = vld [vmem:[#allocation119_spill] sm:$0xff]  ;;  %v7013_v4 = vpop.permute.xlu0 %1093  ;;  %v10468_v55 = vld [vmem:[#allocation17_spill] sm:$0xff]  ;;  %v7051_v63 = vpop.permute.xlu1 %1072 }
 0x25e   :  { %vm1203_vm2 = vcmp.eq.s32.totalorder %v6651_v60, %v10459_v30 }
 0x25f   :  { %10455 = vst [vmem:[#allocation106_spill] sm:$0xff] %v6997_v61 }
 0x260   :  { %1481 = vadd.xlane.f32.xlu1 %v1480_v32  ;;  %1514 = vadd.xlane.f32.xlu0 %v1513_v7  ;;  %v1519_v32 = vsel %vm268_vm0, %v1327_v26, 0.0  ;;  %v1318_v7 = vsel %vm1190_vm14, %v6997_v61, 0.0  ;;  %v10460_v26 = vld [vmem:[#allocation6_spill] sm:$0xff] }
 0x261   :  { %v7021_v9 = vsub.f32 %v5093_v15, %v10460_v26  ;;  %v1492_v30 = vsel %vm268_vm0, %v1318_v7, 0.0  ;;  %v10465_v15 = vld [vmem:[#allocation121_spill] sm:$0xff]  ;;  %v5095_v26 = vld [vmem:[%s10188_s0 + $0xd8] sm:$0xff] }
 0x262   :  { %vm1205_vm4 = vcmp.eq.s32.totalorder %v6651_v60, %v10465_v15 }
 0x263   :  { %10461 = vst [vmem:[#allocation5_spill] sm:$0xff] %v7021_v9  ;;  %v1320_v61 = vsel %vm1192_vm1, %v7021_v9, 0.0  ;;  %v10470_v9 = vld [vmem:[#allocation109_spill] sm:$0xff] }
 0x264   :  { %1487 = vadd.xlane.f32.xlu1 %v1486_v44  ;;  %1520 = vadd.xlane.f32.xlu0 %v1519_v32  ;;  %v5094_v44 = vld [vmem:[%s10188_s0 + $0x120] sm:$0xff]  ;;  %v10462_v32 = vld [vmem:[#allocation15_spill] sm:$0xff]  ;;  %v1498_v15 = vsel %vm268_vm0, %v1320_v61, 0.0  ;;  %vm1196_vm5 = vcmp.eq.s32.totalorder %v6651_v60, %v10470_v9 }
 0x265   :  { %v7027_v41 = vsub.f32 %v5094_v44, %v10462_v32  ;;  %v10466_v44 = vld [vmem:[#allocation7_spill] sm:$0xff] }
 0x266   :  { %v7041_v7 = vsub.f32 %v5095_v26, %v10466_v44 }
 0x267   :  { %10463 = vst [vmem:[#allocation13_spill] sm:$0xff] %v7027_v41  ;;  %v1331_v19 = vsel %vm1203_vm2, %v7027_v41, 0.0 }
 0x268   :  { %1493 = vadd.xlane.f32.xlu1 %v1492_v30  ;;  %1526 = vadd.xlane.f32.xlu0 %v1525_v45  ;;  %10467 = vst [vmem:[#allocation107_spill] sm:$0xff] %v7041_v7  ;;  %v5096_v45 = vld [vmem:[%s10188_s0 + $0x130] sm:$0xff]  ;;  %v7049_v30 = vpop.permute.xlu0 %1099  ;;  %v1531_v41 = vsel %vm268_vm0, %v1331_v19, 0.0  ;;  %v1322_v26 = vsel %vm1194_vm3, %v7041_v7, 0.0  ;;  %v5098_v19 = vld [vmem:[%s10188_s0 + $0x140] sm:$0xff]  ;;  %vm1219_vm3 = vcmp.eq.s32.totalorder %v6651_v60, %v10507_v33 }
 0x269   :  { %v7047_v32 = vsub.f32 %v5096_v45, %v10468_v55  ;;  %v5097_v45 = vld [vmem:[%s10188_s0 + $0xe8] sm:$0xff]  ;;  %v10472_v55 = vld [vmem:[#allocation8_spill] sm:$0xff] }
 0x26a   :  { %v7065_v61 = vsub.f32 %v5097_v45, %v10472_v55  ;;  %v10477_v45 = vld [vmem:[#allocation125_spill] sm:$0xff] }
 0x26b   :  { %10469 = vst [vmem:[#allocation119_spill] sm:$0xff] %v7047_v32  ;;  %v1333_v44 = vsel %vm1205_vm4, %v7047_v32, 0.0  ;;  %v1504_v32 = vsel %vm268_vm0, %v1322_v26, 0.0  ;;  %vm1209_vm8 = vcmp.eq.s32.totalorder %v6651_v60, %v10477_v45  ;;  %v5099_v26 = vld [vmem:[%s10188_s0 + $0xf8] sm:$0xff]  ;;  %vm1210_vm4 = vcmp.eq.s32.totalorder %v6651_v60, %v10512_v24 }
 0x26c   :  { %1499 = vadd.xlane.f32.xlu1 %v1498_v15  ;;  %1532 = vadd.xlane.f32.xlu0 %v1531_v41  ;;  %10473 = vst [vmem:[#allocation6_spill] sm:$0xff] %v7065_v61  ;;  %v10474_v41 = vld [vmem:[#allocation19_spill] sm:$0xff]  ;;  %v1537_v9 = vsel %vm268_vm0, %v1333_v44, 0.0  ;;  %v1324_v20 = vsel %vm1196_vm5, %v7065_v61, 0.0  ;;  %v7081_v55 = vpop.permute.xlu0 %1105 }
 0x26d   :  { %v7071_v15 = vsub.f32 %v5098_v19, %v10474_v41  ;;  %v7083_v19 = vpop.permute.xlu1 %1078  ;;  %v5100_v41 = vld [vmem:[%s10188_s0 + $0x150] sm:$0xff]  ;;  %v1510_v45 = vsel %vm268_vm0, %v1324_v20, 0.0 }
 0x26f   :  { %10475 = vst [vmem:[#allocation15_spill] sm:$0xff] %v7071_v15  ;;  %v1335_v7 = vsel %vm1207_vm6, %v7071_v15, 0.0  ;;  %vm1212_vm6 = vcmp.eq.s32.totalorder %v6651_v60, %v10518_v12 }
 0x270   :  { %1505 = vadd.xlane.f32.xlu1 %v1504_v32  ;;  %1538 = vadd.xlane.f32.xlu0 %v1537_v9  ;;  %v10478_v32 = vld [vmem:[#allocation9_spill] sm:$0xff]  ;;  %v1543_v15 = vsel %vm268_vm0, %v1335_v7, 0.0  ;;  %v5102_v7 = vld [vmem:[%s10188_s0 + $0x160] sm:$0xff] }
 0x271   :  { %v7089_v44 = vsub.f32 %v5099_v26, %v10478_v32  ;;  %v10480_v9 = vld [vmem:[#allocation21_spill] sm:$0xff]  ;;  %v10483_v26 = vld [vmem:[#allocation127_spill] sm:$0xff]  ;;  %v7119_v43 = vpop.permute.xlu1 %1084 }
 0x272   :  { %v7095_v37 = vsub.f32 %v5100_v41, %v10480_v9  ;;  %vm1211_vm10 = vcmp.eq.s32.totalorder %v6651_v60, %v10483_v26  ;;  %v5101_v32 = vld [vmem:[%s10188_s0 + $0x108] sm:$0xff]  ;;  %v10484_v41 = vld [vmem:[#allocation10_spill] sm:$0xff] }
 0x273   :  { %10479 = vst [vmem:[#allocation108_spill] sm:$0xff] %v7089_v44  ;;  %v1326_v61 = vsel %vm1198_vm7, %v7089_v44, 0.0  ;;  %v7109_v20 = vsub.f32 %v5101_v32, %v10484_v41  ;;  %v10488_v44 = vld [vmem:[#allocation112_spill] sm:$0xff] }
 0x274   :  { %10481 = vst [vmem:[#allocation121_spill] sm:$0xff] %v7095_v37  ;;  %1511 = vadd.xlane.f32.xlu1 %v1510_v45  ;;  %1544 = vadd.xlane.f32.xlu0 %v1543_v15  ;;  %v1337_v59 = vsel %vm1209_vm8, %v7095_v37, 0.0  ;;  %v10486_v15 = vld [vmem:[#allocation23_spill] sm:$0xff]  ;;  %v7117_v45 = vpop.permute.xlu0 %1111  ;;  %v1516_v26 = vsel %vm268_vm0, %v1326_v61, 0.0  ;;  %vm1202_vm11 = vcmp.eq.s32.totalorder %v6651_v60, %v10488_v44 }
 0x275   :  { %10485 = vst [vmem:[#allocation7_spill] sm:$0xff] %v7109_v20  ;;  %v7115_v9 = vsub.f32 %v5102_v7, %v10486_v15  ;;  %v1549_v37 = vsel %vm268_vm0, %v1337_v59, 0.0  ;;  %v1328_v32 = vsel %vm1200_vm9, %v7109_v20, 0.0  ;;  %v5103_v7 = vld [vmem:[%s10188_s0 + $0x118] sm:$0xff]  ;;  %v10490_v15 = vld [vmem:[#allocation12_spill] sm:$0xff]  ;;  %v5104_v59 = vld [vmem:[%s10188_s0 + $0x170] sm:$0xff]  ;;  %vm1225_vm9 = vcmp.eq.s32.totalorder %v6651_v60, %v10525_v1 }
 0x276   :  { %v7133_v61 = vsub.f32 %v5103_v7, %v10490_v15  ;;  %v10495_v7 = vld [vmem:[#allocation131_spill] sm:$0xff] }
 0x277   :  { %10487 = vst [vmem:[#allocation17_spill] sm:$0xff] %v7115_v9  ;;  %v1339_v41 = vsel %vm1211_vm10, %v7115_v9, 0.0  ;;  %v1522_v9 = vsel %vm268_vm0, %v1328_v32, 0.0  ;;  %vm1215_vm14 = vcmp.eq.s32.totalorder %v6651_v60, %v10495_v7  ;;  %v5105_v32 = vld [vmem:[%s10188_s0 + $0x128] sm:$0xff]  ;;  %vm1216_vm10 = vcmp.eq.s32.totalorder %v6651_v60, %v10530_v21 }
 0x278   :  { %1517 = vadd.xlane.f32.xlu1 %v1516_v26  ;;  %1550 = vadd.xlane.f32.xlu0 %v1549_v37  ;;  %10491 = vst [vmem:[#allocation109_spill] sm:$0xff] %v7133_v61  ;;  %v10492_v37 = vld [vmem:[#allocation25_spill] sm:$0xff]  ;;  %v1555_v44 = vsel %vm268_vm0, %v1339_v41, 0.0  ;;  %v1330_v10 = vsel %vm1202_vm11, %v7133_v61, 0.0  ;;  %v7149_v15 = vpop.permute.xlu0 %1117  ;;  %vm1227_vm11 = vcmp.eq.s32.totalorder %v6651_v60, %v6639_v5 }
 0x279   :  { %v7139_v26 = vsub.f32 %v5104_v59, %v10492_v37  ;;  %v7151_v59 = vpop.permute.xlu1 %1090  ;;  %v5106_v37 = vld [vmem:[%s10188_s0 + $0x180] sm:$0xff]  ;;  %v1528_v7 = vsel %vm268_vm0, %v1330_v10, 0.0 }
 0x27b   :  { %10493 = vst [vmem:[#allocation123_spill] sm:$0xff] %v7139_v26  ;;  %v1341_v20 = vsel %vm1213_vm12, %v7139_v26, 0.0  ;;  %vm1218_vm12 = vcmp.eq.s32.totalorder %v6651_v60, %v10535_v14 }
 0x27c   :  { %1523 = vadd.xlane.f32.xlu1 %v1522_v9  ;;  %1556 = vadd.xlane.f32.xlu0 %v1555_v44  ;;  %v10496_v9 = vld [vmem:[#allocation14_spill] sm:$0xff]  ;;  %v10498_v44 = vld [vmem:[#allocation27_spill] sm:$0xff]  ;;  %v1561_v26 = vsel %vm268_vm0, %v1341_v20, 0.0 }
 0x27d   :  { %v7157_v41 = vsub.f32 %v5105_v32, %v10496_v9  ;;  %v7163_v36 = vsub.f32 %v5106_v37, %v10498_v44  ;;  %v10501_v32 = vld [vmem:[#allocation133_spill] sm:$0xff]  ;;  %v5107_v9 = vld [vmem:[%s10188_s0 + $0x138] sm:$0xff]  ;;  %v10502_v37 = vld [vmem:[#allocation16_spill] sm:$0xff]  ;;  %v7187_v0 = vpop.permute.xlu1 %1096 }
 0x27e   :  { %vm1217_vm1 = vcmp.eq.s32.totalorder %v6651_v60, %v10501_v32  ;;  %v7177_v10 = vsub.f32 %v5107_v9, %v10502_v37  ;;  %v5108_v20 = vld [vmem:[%s10188_s0 + $0x190] sm:$0xff] }
 0x27f   :  { %10497 = vst [vmem:[#allocation8_spill] sm:$0xff] %v7157_v41  ;;  %10499 = vst [vmem:[#allocation19_spill] sm:$0xff] %v7163_v36  ;;  %v1332_v61 = vsel %vm1204_vm13, %v7157_v41, 0.0  ;;  %v1343_v29 = vsel %vm1215_vm14, %v7163_v36, 0.0  ;;  %v10506_v41 = vld [vmem:[#allocation115_spill] sm:$0xff] }
 0x280   :  { %1529 = vadd.xlane.f32.xlu1 %v1528_v7  ;;  %1562 = vadd.xlane.f32.xlu0 %v1561_v26  ;;  %10503 = vst [vmem:[#allocation110_spill] sm:$0xff] %v7177_v10  ;;  %v10504_v26 = vld [vmem:[#allocation29_spill] sm:$0xff]  ;;  %v7185_v7 = vpop.permute.xlu0 %1123  ;;  %v1534_v32 = vsel %vm268_vm0, %v1332_v61, 0.0  ;;  %v1567_v36 = vsel %vm268_vm0, %v1343_v29, 0.0  ;;  %v1334_v9 = vsel %vm1206_vm15, %v7177_v10, 0.0  ;;  %vm1208_vm2 = vcmp.eq.s32.totalorder %v6651_v60, %v10506_v41  ;;  %v5110_v29 = vld [vmem:[%s10188_s0 + $0x1a0] sm:$0xff] }
 0x281   :  { %v7183_v44 = vsub.f32 %v5108_v20, %v10504_v26  ;;  %v5109_v20 = vld [vmem:[%s10188_s0 + $0x148] sm:$0xff]  ;;  %v10508_v26 = vld [vmem:[#allocation18_spill] sm:$0xff]  ;;  %vm1231_vm15 = vcmp.eq.s32.totalorder %v6651_v60, %v10542_v23 }
 0x282   :  { %v7201_v61 = vsub.f32 %v5109_v20, %v10508_v26  ;;  %v10513_v20 = vld [vmem:[#allocation137_spill] sm:$0xff] }
 0x283   :  { %10505 = vst [vmem:[#allocation125_spill] sm:$0xff] %v7183_v44  ;;  %v1345_v37 = vsel %vm1217_vm1, %v7183_v44, 0.0  ;;  %v1540_v44 = vsel %vm268_vm0, %v1334_v9, 0.0  ;;  %vm1221_vm5 = vcmp.eq.s32.totalorder %v6651_v60, %v10513_v20  ;;  %v5111_v9 = vld [vmem:[%s10188_s0 + $0x158] sm:$0xff]  ;;  %vm1222_vm1 = vcmp.eq.s32.totalorder %v6651_v60, %v10547_v52 }
 0x284   :  { %1535 = vadd.xlane.f32.xlu1 %v1534_v32  ;;  %1568 = vadd.xlane.f32.xlu0 %v1567_v36  ;;  %10509 = vst [vmem:[#allocation9_spill] sm:$0xff] %v7201_v61  ;;  %v10510_v36 = vld [vmem:[#allocation31_spill] sm:$0xff]  ;;  %v1573_v41 = vsel %vm268_vm0, %v1345_v37, 0.0  ;;  %v1336_v33 = vsel %vm1208_vm2, %v7201_v61, 0.0  ;;  %v7217_v26 = vpop.permute.xlu0 %1129  ;;  %vm1233_vm2 = vcmp.eq.s32.totalorder %v6651_v60, %v6665_v39 }
 0x285   :  { %v7207_v32 = vsub.f32 %v5110_v29, %v10510_v36  ;;  %v7219_v29 = vpop.permute.xlu1 %1102  ;;  %v5112_v36 = vld [vmem:[%s10188_s0 + $0x1b0] sm:$0xff]  ;;  %v1546_v20 = vsel %vm268_vm0, %v1336_v33, 0.0 }
 0x287   :  { %10511 = vst [vmem:[#allocation21_spill] sm:$0xff] %v7207_v32  ;;  %v1347_v10 = vsel %vm1219_vm3, %v7207_v32, 0.0  ;;  %vm1224_vm3 = vcmp.eq.s32.totalorder %v6651_v60, %v10552_v58 }
 0x288   :  { %1541 = vadd.xlane.f32.xlu1 %v1540_v44  ;;  %1574 = vadd.xlane.f32.xlu0 %v1573_v41  ;;  %v10514_v44 = vld [vmem:[#allocation20_spill] sm:$0xff]  ;;  %v10516_v41 = vld [vmem:[#allocation33_spill] sm:$0xff]  ;;  %v1579_v32 = vsel %vm268_vm0, %v1347_v10, 0.0 }
 0x289   :  { %v7225_v37 = vsub.f32 %v5111_v9, %v10514_v44  ;;  %v7231_v24 = vsub.f32 %v5112_v36, %v10516_v41  ;;  %v10519_v9 = vld [vmem:[#allocation139_spill] sm:$0xff]  ;;  %v5113_v44 = vld [vmem:[%s10188_s0 + $0x168] sm:$0xff]  ;;  %v10520_v36 = vld [vmem:[#allocation22_spill] sm:$0xff]  ;;  %v7255_v12 = vpop.permute.xlu1 %1108 }
 0x28a   :  { %vm1223_vm7 = vcmp.eq.s32.totalorder %v6651_v60, %v10519_v9  ;;  %v7245_v33 = vsub.f32 %v5113_v44, %v10520_v36  ;;  %v5114_v10 = vld [vmem:[%s10188_s0 + $0x1c0] sm:$0xff] }
 0x28b   :  { %10515 = vst [vmem:[#allocation111_spill] sm:$0xff] %v7225_v37  ;;  %10517 = vst [vmem:[#allocation127_spill] sm:$0xff] %v7231_v24  ;;  %v1338_v61 = vsel %vm1210_vm4, %v7225_v37, 0.0  ;;  %v1349_v13 = vsel %vm1221_vm5, %v7231_v24, 0.0  ;;  %v10524_v37 = vld [vmem:[#allocation120_spill] sm:$0xff]  ;;  %vm1235_vm4 = vcmp.eq.s32.totalorder %v6651_v60, %v6679_v28 }
 0x28c   :  { %1547 = vadd.xlane.f32.xlu1 %v1546_v20  ;;  %1580 = vadd.xlane.f32.xlu0 %v1579_v32  ;;  %10521 = vst [vmem:[#allocation10_spill] sm:$0xff] %v7245_v33  ;;  %v10522_v32 = vld [vmem:[#allocation35_spill] sm:$0xff]  ;;  %v7253_v20 = vpop.permute.xlu0 %1135  ;;  %v1552_v9 = vsel %vm268_vm0, %v1338_v61, 0.0  ;;  %v1585_v24 = vsel %vm268_vm0, %v1349_v13, 0.0  ;;  %v1340_v44 = vsel %vm1212_vm6, %v7245_v33, 0.0  ;;  %vm1214_vm8 = vcmp.eq.s32.totalorder %v6651_v60, %v10524_v37  ;;  %v5116_v13 = vld [vmem:[%s10188_s0 + $0x1d0] sm:$0xff] }
 0x28d   :  { %v7251_v41 = vsub.f32 %v5114_v10, %v10522_v32  ;;  %v5115_v10 = vld [vmem:[%s10188_s0 + $0x178] sm:$0xff]  ;;  %v10526_v32 = vld [vmem:[#allocation24_spill] sm:$0xff]  ;;  %vm1237_vm6 = vcmp.eq.s32.totalorder %v6651_v60, %v6693_v35 }
 0x28e   :  { %v7269_v61 = vsub.f32 %v5115_v10, %v10526_v32  ;;  %v7287_v32 = vpop.permute.xlu1 %1114 }
 0x28f   :  { %10523 = vst [vmem:[#allocation23_spill] sm:$0xff] %v7251_v41  ;;  %v1351_v36 = vsel %vm1223_vm7, %v7251_v41, 0.0  ;;  %v1558_v41 = vsel %vm268_vm0, %v1340_v44, 0.0  ;;  %v5117_v44 = vld [vmem:[%s10188_s0 + $0x188] sm:$0xff] }
 0x290   :  { %1553 = vadd.xlane.f32.xlu1 %v1552_v9  ;;  %1586 = vadd.xlane.f32.xlu0 %v1585_v24  ;;  %10527 = vst [vmem:[#allocation112_spill] sm:$0xff] %v7269_v61  ;;  %v10528_v24 = vld [vmem:[#allocation37_spill] sm:$0xff]  ;;  %v1591_v37 = vsel %vm268_vm0, %v1351_v36, 0.0  ;;  %v1342_v1 = vsel %vm1214_vm8, %v7269_v61, 0.0  ;;  %v7285_v10 = vpop.permute.xlu0 %1141  ;;  %vm1239_vm8 = vcmp.eq.s32.totalorder %v6651_v60, %v6707_v42 }
 0x291   :  { %v7275_v9 = vsub.f32 %v5116_v13, %v10528_v24  ;;  %v5118_v13 = vld [vmem:[%s10188_s0 + $0x1e0] sm:$0xff]  ;;  %v10533_v24 = vld [vmem:[#allocation39_spill] sm:$0xff]  ;;  %v1564_v5 = vsel %vm268_vm0, %v1342_v1, 0.0 }
 0x292   :  { %v7299_v21 = vsub.f32 %v5118_v13, %v10533_v24  ;;  %v10537_v13 = vld [vmem:[#allocation28_spill] sm:$0xff]  ;;  %v10539_v24 = vld [vmem:[#allocation41_spill] sm:$0xff]  ;;  %v7323_v14 = vpop.permute.xlu1 %1120 }
 0x293   :  { %10529 = vst [vmem:[#allocation129_spill] sm:$0xff] %v7275_v9  ;;  %v1353_v33 = vsel %vm1225_vm9, %v7275_v9, 0.0 }
 0x294   :  { %1559 = vadd.xlane.f32.xlu1 %v1558_v41  ;;  %1592 = vadd.xlane.f32.xlu0 %v1591_v37  ;;  %v10531_v41 = vld [vmem:[#allocation26_spill] sm:$0xff]  ;;  %10534 = vst [vmem:[#allocation25_spill] sm:$0xff] %v7299_v21  ;;  %v1597_v37 = vsel %vm268_vm0, %v1353_v33, 0.0  ;;  %v1355_v61 = vsel %vm1227_vm11, %v7299_v21, 0.0 }
 0x295   :  { %v7293_v36 = vsub.f32 %v5117_v44, %v10531_v41  ;;  %v10536_v44 = vld [vmem:[#allocation144_spill] sm:$0xff]  ;;  %v5119_v41 = vld [vmem:[%s10188_s0 + $0x198] sm:$0xff]  ;;  %v5120_v33 = vld [vmem:[%s10188_s0 + $0x1f0] sm:$0xff]  ;;  %v1603_v21 = vsel %vm268_vm0, %v1355_v61, 0.0 }
 0x296   :  { %vm1229_vm13 = vcmp.eq.s32.totalorder %v6651_v60, %v10536_v44  ;;  %v7313_v1 = vsub.f32 %v5119_v41, %v10537_v13  ;;  %v5122_v61 = vld [vmem:[%s10188_s0 + $0x200] sm:$0xff] }
 0x297   :  { %10532 = vst [vmem:[#allocation12_spill] sm:$0xff] %v7293_v36  ;;  %v1344_v9 = vsel %vm1216_vm10, %v7293_v36, 0.0  ;;  %v10541_v36 = vld [vmem:[#allocation126_spill] sm:$0xff]  ;;  %vm1241_vm10 = vcmp.eq.s32.totalorder %v6651_v60, %v6721_v56 }
 0x298   :  { %1565 = vadd.xlane.f32.xlu1 %v1564_v5  ;;  %1598 = vadd.xlane.f32.xlu0 %v1597_v37  ;;  %10538 = vst [vmem:[#allocation113_spill] sm:$0xff] %v7313_v1  ;;  %v7319_v5 = vsub.f32 %v5120_v33, %v10539_v24  ;;  %v7321_v37 = vpop.permute.xlu0 %1147  ;;  %v1570_v44 = vsel %vm268_vm0, %v1344_v9, 0.0  ;;  %v1346_v41 = vsel %vm1218_vm12, %v7313_v1, 0.0  ;;  %vm1220_vm14 = vcmp.eq.s32.totalorder %v6651_v60, %v10541_v36  ;;  %v5121_v33 = vld [vmem:[%s10188_s0 + $0x1a8] sm:$0xff]  ;;  %v10543_v24 = vld [vmem:[#allocation30_spill] sm:$0xff] }
 0x299   :  { %v7337_v9 = vsub.f32 %v5121_v33, %v10543_v24  ;;  %v7355_v24 = vpop.permute.xlu1 %1126  ;;  %vm1243_vm12 = vcmp.eq.s32.totalorder %v6651_v60, %v6735_v18 }
 0x29a   :  { %10540 = vst [vmem:[#allocation131_spill] sm:$0xff] %v7319_v5  ;;  %v1357_v13 = vsel %vm1229_vm13, %v7319_v5, 0.0  ;;  %v1576_v5 = vsel %vm268_vm0, %v1346_v41, 0.0  ;;  %v5123_v41 = vld [vmem:[%s10188_s0 + $0x1b8] sm:$0xff] }
 0x29b   :  { %10544 = vst [vmem:[#allocation14_spill] sm:$0xff] %v7337_v9  ;;  %v1609_v36 = vsel %vm268_vm0, %v1357_v13, 0.0  ;;  %v1348_v23 = vsel %vm1220_vm14, %v7337_v9, 0.0  ;;  %vm1245_vm14 = vcmp.eq.s32.totalorder %v6651_v60, %v6757_v46 }
 0x29c   :  { %1571 = vadd.xlane.f32.xlu1 %v1570_v44  ;;  %1604 = vadd.xlane.f32.xlu0 %v1603_v21  ;;  %v10545_v21 = vld [vmem:[#allocation43_spill] sm:$0xff]  ;;  %v7353_v33 = vpop.permute.xlu0 %1153  ;;  %v1582_v39 = vsel %vm268_vm0, %v1348_v23, 0.0 }
 0x29d   :  { %v7343_v44 = vsub.f32 %v5122_v61, %v10545_v21  ;;  %v5124_v61 = vld [vmem:[%s10188_s0 + $0x210] sm:$0xff]  ;;  %v10550_v21 = vld [vmem:[#allocation45_spill] sm:$0xff]  ;;  %v7391_v58 = vpop.permute.xlu1 %1132 }
 0x29e   :  { %v7367_v52 = vsub.f32 %v5124_v61, %v10550_v21  ;;  %v10555_v61 = vld [vmem:[#allocation47_spill] sm:$0xff] }
 0x29f   :  { %10546 = vst [vmem:[#allocation27_spill] sm:$0xff] %v7343_v44  ;;  %v1359_v1 = vsel %vm1231_vm15, %v7343_v44, 0.0 }
 0x2a0   :  { %1577 = vadd.xlane.f32.xlu1 %v1576_v5  ;;  %1610 = vadd.xlane.f32.xlu0 %v1609_v36  ;;  %v10548_v5 = vld [vmem:[#allocation32_spill] sm:$0xff]  ;;  %10551 = vst [vmem:[#allocation133_spill] sm:$0xff] %v7367_v52  ;;  %v1615_v36 = vsel %vm268_vm0, %v1359_v1, 0.0  ;;  %v1361_v9 = vsel %vm1233_vm2, %v7367_v52, 0.0 }
 0x2a1   :  { %v7361_v13 = vsub.f32 %v5123_v41, %v10548_v5  ;;  %v5125_v41 = vld [vmem:[%s10188_s0 + $0x1c8] sm:$0xff]  ;;  %v10553_v5 = vld [vmem:[#allocation34_spill] sm:$0xff]  ;;  %v5126_v1 = vld [vmem:[%s10188_s0 + $0x220] sm:$0xff] }
 0x2a2   :  { %v7381_v23 = vsub.f32 %v5125_v41, %v10553_v5  ;;  %v7387_v21 = vsub.f32 %v5126_v1, %v10555_v61  ;;  %v10557_v52 = vld [vmem:[#allocation132_spill] sm:$0xff]  ;;  %v5127_v1 = vld [vmem:[%s10188_s0 + $0x1d8] sm:$0xff] }
 0x2a3   :  { %10549 = vst [vmem:[#allocation114_spill] sm:$0xff] %v7361_v13  ;;  %v1350_v44 = vsel %vm1222_vm1, %v7361_v13, 0.0  ;;  %vm1226_vm5 = vcmp.eq.s32.totalorder %v6651_v60, %v10557_v52  ;;  %v10558_v61 = vld [vmem:[#allocation36_spill] sm:$0xff]  ;;  %v10562_v13 = vld [vmem:[#allocation134_spill] sm:$0xff]  ;;  %vm1247_vm1 = vcmp.eq.s32.totalorder %v6651_v60, %v6781_v11 }
 0x2a4   :  { %1583 = vadd.xlane.f32.xlu1 %v1582_v39  ;;  %1616 = vadd.xlane.f32.xlu0 %v1615_v36  ;;  %10554 = vst [vmem:[#allocation16_spill] sm:$0xff] %v7381_v23  ;;  %10556 = vst [vmem:[#allocation29_spill] sm:$0xff] %v7387_v21  ;;  %v7389_v39 = vpop.permute.xlu0 %1159  ;;  %v1588_v28 = vsel %vm268_vm0, %v1350_v44, 0.0  ;;  %v1621_v36 = vsel %vm268_vm0, %v1361_v9, 0.0  ;;  %v1352_v41 = vsel %vm1224_vm3, %v7381_v23, 0.0  ;;  %v1363_v5 = vsel %vm1235_vm4, %v7387_v21, 0.0 }
 0x2a5   :  { %v7405_v44 = vsub.f32 %v5127_v1, %v10558_v61  ;;  %v5128_v9 = vld [vmem:[%s10188_s0 + $0x230] sm:$0xff]  ;;  %v1594_v21 = vsel %vm268_vm0, %v1352_v41, 0.0  ;;  %v1627_v52 = vsel %vm268_vm0, %v1363_v5, 0.0  ;;  %vm1228_vm7 = vcmp.eq.s32.totalorder %v6651_v60, %v10562_v13  ;;  %v7423_v61 = vpop.permute.xlu1 %1138  ;;  %v5129_v41 = vld [vmem:[%s10188_s0 + $0x1e8] sm:$0xff] }
 0x2a6   :  { %vm1249_vm3 = vcmp.eq.s32.totalorder %v6651_v60, %v6811_v6 }
 0x2a7   :  { %10559 = vst [vmem:[#allocation115_spill] sm:$0xff] %v7405_v44  ;;  %v1354_v35 = vsel %vm1226_vm5, %v7405_v44, 0.0  ;;  %vm1251_vm5 = vcmp.eq.s32.totalorder %v6651_v60, %v6847_v47 }
 0x2a8   :  { %1589 = vadd.xlane.f32.xlu1 %v1588_v28  ;;  %1622 = vadd.xlane.f32.xlu0 %v1621_v36  ;;  %v10560_v28 = vld [vmem:[#allocation49_spill] sm:$0xff]  ;;  %v7421_v1 = vpop.permute.xlu0 %1165  ;;  %v1600_v42 = vsel %vm268_vm0, %v1354_v35, 0.0  ;;  %v5131_v35 = vld [vmem:[%s10188_s0 + $0x1f8] sm:$0xff] }
 0x2a9   :  { %v7411_v36 = vsub.f32 %v5128_v9, %v10560_v28  ;;  %10563 = vst [vmem:[#allocation18_spill] sm:$0xff] %v7421_v1  ;;  %v5130_v9 = vld [vmem:[%s10188_s0 + $0x240] sm:$0xff]  ;;  %v10565_v28 = vld [vmem:[#allocation51_spill] sm:$0xff] }
 0x2aa   :  { %v7435_v13 = vsub.f32 %v5130_v9, %v10565_v28  ;;  %v10567_v1 = vld [vmem:[#allocation136_spill] sm:$0xff]  ;;  %v5132_v9 = vld [vmem:[%s10188_s0 + $0x250] sm:$0xff]  ;;  %v10571_v28 = vld [vmem:[#allocation53_spill] sm:$0xff] }
 0x2ab   :  { %10561 = vst [vmem:[#allocation135_spill] sm:$0xff] %v7411_v36  ;;  %v1365_v23 = vsel %vm1237_vm6, %v7411_v36, 0.0  ;;  %vm1230_vm9 = vcmp.eq.s32.totalorder %v6651_v60, %v10567_v1  ;;  %v7459_v1 = vpop.permute.xlu1 %1144 }
 0x2ac   :  { %1595 = vadd.xlane.f32.xlu1 %v1594_v21  ;;  %1628 = vadd.xlane.f32.xlu0 %v1627_v52  ;;  %v10564_v21 = vld [vmem:[#allocation38_spill] sm:$0xff]  ;;  %10566 = vst [vmem:[#allocation31_spill] sm:$0xff] %v7435_v13  ;;  %v1633_v52 = vsel %vm268_vm0, %v1365_v23, 0.0  ;;  %v1367_v44 = vsel %vm1239_vm8, %v7435_v13, 0.0  ;;  %v10579_v13 = vld [vmem:[#allocation140_spill] sm:$0xff] }
 0x2ad   :  { %v7429_v5 = vsub.f32 %v5129_v41, %v10564_v21  ;;  %v10569_v21 = vld [vmem:[#allocation40_spill] sm:$0xff]  ;;  %vm1234_vm13 = vcmp.eq.s32.totalorder %v6651_v60, %v10579_v13 }
 0x2ae   :  { %v7451_v23 = vsub.f32 %v5131_v35, %v10569_v21  ;;  %v10573_v21 = vld [vmem:[#allocation138_spill] sm:$0xff] }
 0x2af   :  { %v1356_v36 = vsel %vm1228_vm7, %v7429_v5, 0.0  ;;  %vm1232_vm11 = vcmp.eq.s32.totalorder %v6651_v60, %v10573_v21  ;;  %vm1253_vm7 = vcmp.eq.s32.totalorder %v6651_v60, %v6879_v27 }
 0x2b0   :  { %1601 = vadd.xlane.f32.xlu1 %v1600_v42  ;;  %1634 = vadd.xlane.f32.xlu0 %v1633_v52  ;;  %10570 = vst [vmem:[#allocation137_spill] sm:$0xff] %v7451_v23  ;;  %v7457_v42 = vsub.f32 %v5132_v9, %v10571_v28  ;;  %v1606_v56 = vsel %vm268_vm0, %v1356_v36, 0.0  ;;  %v1639_v52 = vsel %vm268_vm0, %v1367_v44, 0.0  ;;  %v5133_v36 = vld [vmem:[%s10188_s0 + $0x208] sm:$0xff]  ;;  %v10575_v28 = vld [vmem:[#allocation42_spill] sm:$0xff] }
 0x2b1   :  { %v7445_v41 = vpop.xlane.xlu0 %1427  ;;  %v7475_v44 = vsub.f32 %v5133_v36, %v10575_v28  ;;  %v7491_v36 = vpop.permute.xlu1 %1150 }
 0x2b2   :  { %10568 = vst [vmem:[#allocation116_spill] sm:$0xff] %v7445_v41  ;;  %10572 = vst [vmem:[#allocation20_spill] sm:$0xff] %v7457_v42  ;;  %v1358_v41 = vsel %vm1230_vm9, %v7451_v23, 0.0  ;;  %v1369_v35 = vsel %vm1241_vm10, %v7457_v42, 0.0  ;;  %vm1255_vm9 = vcmp.eq.s32.totalorder %v6651_v60, %v6915_v16  ;;  %vm1246_vm10 = vcmp.eq.s32.totalorder %v6651_v60, %v6681_v22 }
 0x2b3   :  { %10576 = vst [vmem:[#allocation118_spill] sm:$0xff] %v7475_v44  ;;  %v1612_v21 = vsel %vm268_vm0, %v1358_v41, 0.0  ;;  %v1645_v18 = vsel %vm268_vm0, %v1369_v35, 0.0  ;;  %v5135_v41 = vld [vmem:[%s10188_s0 + $0x218] sm:$0xff]  ;;  %v10581_v35 = vld [vmem:[#allocation44_spill] sm:$0xff] }
 0x2b4   :  { %1607 = vadd.xlane.f32.xlu1 %v1606_v56  ;;  %1640 = vadd.xlane.f32.xlu0 %v1639_v52  ;;  %v5134_v56 = vld [vmem:[%s10188_s0 + $0x260] sm:$0xff]  ;;  %v10577_v52 = vld [vmem:[#allocation55_spill] sm:$0xff] }
 0x2b5   :  { %v7469_v9 = vpop.xlane.xlu0 %1430  ;;  %v7481_v42 = vsub.f32 %v5134_v56, %v10577_v52  ;;  %v7499_v56 = vsub.f32 %v5135_v41, %v10581_v35  ;;  %v5136_v52 = vld [vmem:[%s10188_s0 + $0x270] sm:$0xff] }
 0x2b6   :  { %10574 = vst [vmem:[#allocation33_spill] sm:$0xff] %v7469_v9  ;;  %v1360_v9 = vsel %vm1232_vm11, %v7475_v44, 0.0  ;;  %v10584_v44 = vld [vmem:[#allocation142_spill] sm:$0xff]  ;;  %vm1257_vm11 = vcmp.eq.s32.totalorder %v6651_v60, %v6947_v54 }
 0x2b7   :  { %10578 = vst [vmem:[#allocation139_spill] sm:$0xff] %v7481_v42  ;;  %v1371_v23 = vsel %vm1243_vm12, %v7481_v42, 0.0  ;;  %v1618_v46 = vsel %vm268_vm0, %v1360_v9, 0.0  ;;  %vm1236_vm15 = vcmp.eq.s32.totalorder %v6651_v60, %v10584_v44  ;;  %v5137_v9 = vld [vmem:[%s10188_s0 + $0x228] sm:$0xff]  ;;  %v10586_v35 = vld [vmem:[#allocation46_spill] sm:$0xff]  ;;  %v7529_v44 = vpop.permute.xlu1 %1156  ;;  %vm1248_vm12 = vcmp.eq.s32.totalorder %v6651_v60, %v6695_v8 }
 0x2b8   :  { %1613 = vadd.xlane.f32.xlu1 %v1612_v21  ;;  %1646 = vadd.xlane.f32.xlu0 %v1645_v18  ;;  %v10582_v21 = vld [vmem:[#allocation57_spill] sm:$0xff]  ;;  %v1651_v18 = vsel %vm268_vm0, %v1371_v23, 0.0  ;;  %v7521_v23 = vsub.f32 %v5137_v9, %v10586_v35  ;;  %v10590_v35 = vld [vmem:[#allocation143_spill] sm:$0xff] }
 0x2b9   :  { %v7493_v28 = vpop.xlane.xlu0 %1436  ;;  %v7505_v13 = vsub.f32 %v5136_v52, %v10582_v21  ;;  %v5138_v52 = vld [vmem:[%s10188_s0 + $0x280] sm:$0xff]  ;;  %v10588_v21 = vld [vmem:[#allocation59_spill] sm:$0xff]  ;;  %vm1238_vm2 = vcmp.eq.s32.totalorder %v6651_v60, %v10590_v35 }
 0x2ba   :  { %10580 = vst [vmem:[#allocation22_spill] sm:$0xff] %v7493_v28  ;;  %v1362_v28 = vsel %vm1234_vm13, %v7499_v56, 0.0  ;;  %10587 = vst [vmem:[#allocation141_spill] sm:$0xff] %v7521_v23  ;;  %vm1259_vm13 = vcmp.eq.s32.totalorder %v6651_v60, %v6983_v62 }
 0x2bb   :  { %10583 = vst [vmem:[#allocation35_spill] sm:$0xff] %v7505_v13  ;;  %v1373_v42 = vsel %vm1245_vm14, %v7505_v13, 0.0  ;;  %v1624_v11 = vsel %vm268_vm0, %v1362_v28, 0.0  ;;  %v5139_v28 = vld [vmem:[%s10188_s0 + $0x238] sm:$0xff]  ;;  %v10596_v13 = vld [vmem:[#allocation145_spill] sm:$0xff]  ;;  %vm1250_vm14 = vcmp.eq.s32.totalorder %v6651_v60, %v6709_v2 }
 0x2bc   :  { %1619 = vadd.xlane.f32.xlu1 %v1618_v46  ;;  %1652 = vadd.xlane.f32.xlu0 %v1651_v18  ;;  %v7527_v46 = vsub.f32 %v5138_v52, %v10588_v21  ;;  %v1657_v18 = vsel %vm268_vm0, %v1373_v42, 0.0  ;;  %v10592_v21 = vld [vmem:[#allocation48_spill] sm:$0xff]  ;;  %vm1240_vm4 = vcmp.eq.s32.totalorder %v6651_v60, %v10596_v13 }
 0x2bd   :  { %v7515_v41 = vpop.xlane.xlu0 %1442  ;;  %v7545_v42 = vsub.f32 %v5139_v28, %v10592_v21  ;;  %v7561_v28 = vpop.permute.xlu1 %1162 }
 0x2be   :  { %10585 = vst [vmem:[#allocation120_spill] sm:$0xff] %v7515_v41  ;;  %10589 = vst [vmem:[#allocation24_spill] sm:$0xff] %v7527_v46  ;;  %v1364_v41 = vsel %vm1236_vm15, %v7521_v23, 0.0  ;;  %v1375_v9 = vsel %vm1247_vm1, %v7527_v46, 0.0  ;;  %vm1261_vm15 = vcmp.eq.s32.totalorder %v6651_v60, %v7015_v50  ;;  %vm1252_vm1 = vcmp.eq.s32.totalorder %v6651_v60, %v6723_v53 }
 0x2bf   :  { %10593 = vst [vmem:[#allocation122_spill] sm:$0xff] %v7545_v42  ;;  %v1630_v35 = vsel %vm268_vm0, %v1364_v41, 0.0  ;;  %v1663_v6 = vsel %vm268_vm0, %v1375_v9, 0.0  ;;  %v5141_v41 = vld [vmem:[%s10188_s0 + $0x248] sm:$0xff]  ;;  %v10598_v9 = vld [vmem:[#allocation50_spill] sm:$0xff] }
 0x2c0   :  { %1625 = vadd.xlane.f32.xlu1 %v1624_v11  ;;  %1658 = vadd.xlane.f32.xlu0 %v1657_v18  ;;  %v5140_v11 = vld [vmem:[%s10188_s0 + $0x290] sm:$0xff]  ;;  %v10594_v18 = vld [vmem:[#allocation61_spill] sm:$0xff] }
 0x2c1   :  { %v7539_v52 = vpop.xlane.xlu0 %1448  ;;  %v7551_v46 = vsub.f32 %v5140_v11, %v10594_v18  ;;  %v7569_v11 = vsub.f32 %v5141_v41, %v10598_v9  ;;  %v5142_v18 = vld [vmem:[%s10188_s0 + $0x2a0] sm:$0xff] }
 0x2c2   :  { %10591 = vst [vmem:[#allocation37_spill] sm:$0xff] %v7539_v52  ;;  %v1366_v52 = vsel %vm1238_vm2, %v7545_v42, 0.0  ;;  %v10601_v42 = vld [vmem:[#allocation148_spill] sm:$0xff]  ;;  %vm1263_vm2 = vcmp.eq.s32.totalorder %v6651_v60, %v7051_v63 }
 0x2c3   :  { %10595 = vst [vmem:[#allocation26_spill] sm:$0xff] %v7551_v46  ;;  %v1377_v23 = vsel %vm1249_vm3, %v7551_v46, 0.0  ;;  %v1636_v47 = vsel %vm268_vm0, %v1366_v52, 0.0  ;;  %vm1242_vm6 = vcmp.eq.s32.totalorder %v6651_v60, %v10601_v42  ;;  %v10604_v52 = vld [vmem:[#allocation52_spill] sm:$0xff]  ;;  %vm1254_vm3 = vcmp.eq.s32.totalorder %v6651_v60, %v6742_v38 }
 0x2c4   :  { %1631 = vadd.xlane.f32.xlu1 %v1630_v35  ;;  %1664 = vadd.xlane.f32.xlu0 %v1663_v6  ;;  %v10599_v35 = vld [vmem:[#allocation63_spill] sm:$0xff]  ;;  %v1669_v6 = vsel %vm268_vm0, %v1377_v23, 0.0 }
 0x2c5   :  { %v7563_v21 = vpop.xlane.xlu0 %1454  ;;  %v7575_v13 = vsub.f32 %v5142_v18, %v10599_v35  ;;  %v5143_v23 = vld [vmem:[%s10188_s0 + $0x258] sm:$0xff]  ;;  %v5144_v35 = vld [vmem:[%s10188_s0 + $0x2b0] sm:$0xff] }
 0x2c6   :  { %10597 = vst [vmem:[#allocation39_spill] sm:$0xff] %v7563_v21  ;;  %v1368_v21 = vsel %vm1240_vm4, %v7569_v11, 0.0  ;;  %v7593_v18 = vsub.f32 %v5143_v23, %v10604_v52  ;;  %vm1265_vm4 = vcmp.eq.s32.totalorder %v6651_v60, %v7083_v19 }
 0x2c7   :  { %10600 = vst [vmem:[#allocation124_spill] sm:$0xff] %v7575_v13  ;;  %v1379_v46 = vsel %vm1251_vm5, %v7575_v13, 0.0  ;;  %v1642_v27 = vsel %vm268_vm0, %v1368_v21, 0.0  ;;  %v10606_v13 = vld [vmem:[#allocation150_spill] sm:$0xff]  ;;  %vm1256_vm5 = vcmp.eq.s32.totalorder %v6651_v60, %v6777_v34 }
 0x2c8   :  { %1637 = vadd.xlane.f32.xlu1 %v1636_v47  ;;  %1670 = vadd.xlane.f32.xlu0 %v1669_v6  ;;  %v10605_v47 = vld [vmem:[#allocation65_spill] sm:$0xff]  ;;  %v1675_v6 = vsel %vm268_vm0, %v1379_v46, 0.0  ;;  %vm1244_vm8 = vcmp.eq.s32.totalorder %v6651_v60, %v10606_v13  ;;  %v10609_v21 = vld [vmem:[#allocation54_spill] sm:$0xff] }
 0x2c9   :  { %v7585_v41 = vpop.xlane.xlu1 %1424  ;;  %v7587_v9 = vpop.xlane.xlu0 %1460  ;;  %v7599_v42 = vsub.f32 %v5144_v35, %v10605_v47  ;;  %v5145_v46 = vld [vmem:[%s10188_s0 + $0x268] sm:$0xff]  ;;  %v5146_v47 = vld [vmem:[%s10188_s0 + $0x2c0] sm:$0xff] }
 0x2ca   :  { %10602 = vst [vmem:[#allocation144_spill] sm:$0xff] %v7585_v41  ;;  %10603 = vst [vmem:[#allocation28_spill] sm:$0xff] %v7587_v9  ;;  %v1370_v9 = vsel %vm1242_vm6, %v7593_v18, 0.0  ;;  %v7617_v35 = vsub.f32 %v5145_v46, %v10609_v21  ;;  %vm1267_vm6 = vcmp.eq.s32.totalorder %v6651_v60, %v7119_v43 }
 0x2cb   :  { %v1381_v41 = vsel %vm1253_vm7, %v7599_v42, 0.0  ;;  %v1648_v16 = vsel %vm268_vm0, %v1370_v9, 0.0  ;;  %v10613_v9 = vld [vmem:[#allocation56_spill] sm:$0xff]  ;;  %vm1258_vm7 = vcmp.eq.s32.totalorder %v6651_v60, %v6809_v31 }
 0x2cc   :  { %1643 = vadd.xlane.f32.xlu1 %v1642_v27  ;;  %1676 = vadd.xlane.f32.xlu0 %v1675_v6  ;;  %v10610_v27 = vld [vmem:[#allocation67_spill] sm:$0xff]  ;;  %v1681_v6 = vsel %vm268_vm0, %v1381_v41, 0.0 }
 0x2cd   :  { %v7609_v23 = vpop.xlane.xlu1 %1433  ;;  %v7611_v52 = vpop.xlane.xlu0 %1466  ;;  %v7623_v13 = vsub.f32 %v5146_v47, %v10610_v27  ;;  %v5147_v41 = vld [vmem:[%s10188_s0 + $0x278] sm:$0xff]  ;;  %v5148_v27 = vld [vmem:[%s10188_s0 + $0x2d0] sm:$0xff] }
 0x2ce   :  { %10607 = vst [vmem:[#allocation41_spill] sm:$0xff] %v7609_v23  ;;  %10608 = vst [vmem:[#allocation126_spill] sm:$0xff] %v7611_v52  ;;  %v1372_v52 = vsel %vm1244_vm8, %v7617_v35, 0.0  ;;  %v7641_v47 = vsub.f32 %v5147_v41, %v10613_v9  ;;  %vm1269_vm8 = vcmp.eq.s32.totalorder %v6651_v60, %v7151_v59 }
 0x2cf   :  { %v1383_v23 = vsel %vm1255_vm9, %v7623_v13, 0.0  ;;  %v1654_v54 = vsel %vm268_vm0, %v1372_v52, 0.0  ;;  %v10617_v52 = vld [vmem:[#allocation58_spill] sm:$0xff]  ;;  %vm1260_vm9 = vcmp.eq.s32.totalorder %v6651_v60, %v6845_v25 }
 0x2d0   :  { %1649 = vadd.xlane.f32.xlu1 %v1648_v16  ;;  %1682 = vadd.xlane.f32.xlu0 %v1681_v6  ;;  %v10614_v16 = vld [vmem:[#allocation69_spill] sm:$0xff]  ;;  %v1687_v6 = vsel %vm268_vm0, %v1383_v23, 0.0 }
 0x2d1   :  { %v7633_v46 = vpop.xlane.xlu1 %1439  ;;  %v7635_v21 = vpop.xlane.xlu0 %1472  ;;  %v7647_v22 = vsub.f32 %v5148_v27, %v10614_v16  ;;  %v5149_v23 = vld [vmem:[%s10188_s0 + $0x288] sm:$0xff]  ;;  %v5150_v16 = vld [vmem:[%s10188_s0 + $0x2e0] sm:$0xff] }
 0x2d2   :  { %10611 = vst [vmem:[#allocation147_spill] sm:$0xff] %v7633_v46  ;;  %10612 = vst [vmem:[#allocation30_spill] sm:$0xff] %v7635_v21  ;;  %v1374_v21 = vsel %vm1246_vm10, %v7641_v47, 0.0  ;;  %v7665_v27 = vsub.f32 %v5149_v23, %v10617_v52  ;;  %vm1271_vm10 = vcmp.eq.s32.totalorder %v6651_v60, %v7187_v0 }
 0x2d3   :  { %v1385_v46 = vsel %vm1257_vm11, %v7647_v22, 0.0  ;;  %v1660_v62 = vsel %vm268_vm0, %v1374_v21, 0.0  ;;  %v10621_v21 = vld [vmem:[#allocation60_spill] sm:$0xff]  ;;  %vm1262_vm11 = vcmp.eq.s32.totalorder %v6651_v60, %v6877_v49 }
 0x2d4   :  { %1655 = vadd.xlane.f32.xlu1 %v1654_v54  ;;  %1688 = vadd.xlane.f32.xlu0 %v1687_v6  ;;  %v10618_v54 = vld [vmem:[#allocation71_spill] sm:$0xff]  ;;  %v1693_v6 = vsel %vm268_vm0, %v1385_v46, 0.0 }
 0x2d5   :  { %v7657_v41 = vpop.xlane.xlu1 %1445  ;;  %v7659_v9 = vpop.xlane.xlu0 %1478  ;;  %v7671_v8 = vsub.f32 %v5150_v16, %v10618_v54  ;;  %v5151_v46 = vld [vmem:[%s10188_s0 + $0x298] sm:$0xff]  ;;  %v5152_v54 = vld [vmem:[%s10188_s0 + $0x2f0] sm:$0xff] }
 0x2d6   :  { %10615 = vst [vmem:[#allocation43_spill] sm:$0xff] %v7657_v41  ;;  %10616 = vst [vmem:[#allocation128_spill] sm:$0xff] %v7659_v9  ;;  %v1376_v9 = vsel %vm1248_vm12, %v7665_v27, 0.0  ;;  %v7689_v16 = vsub.f32 %v5151_v46, %v10621_v21  ;;  %vm1273_vm12 = vcmp.eq.s32.totalorder %v6651_v60, %v7219_v29 }
 0x2d7   :  { %v1387_v41 = vsel %vm1259_vm13, %v7671_v8, 0.0  ;;  %v1666_v50 = vsel %vm268_vm0, %v1376_v9, 0.0  ;;  %v10625_v9 = vld [vmem:[#allocation62_spill] sm:$0xff]  ;;  %vm1264_vm13 = vcmp.eq.s32.totalorder %v6651_v60, %v6913_v57 }
 0x2d8   :  { %1661 = vadd.xlane.f32.xlu1 %v1660_v62  ;;  %1694 = vadd.xlane.f32.xlu0 %v1693_v6  ;;  %v10622_v62 = vld [vmem:[#allocation73_spill] sm:$0xff]  ;;  %v1699_v6 = vsel %vm268_vm0, %v1387_v41, 0.0 }
 0x2d9   :  { %v7681_v23 = vpop.xlane.xlu1 %1451  ;;  %v7683_v52 = vpop.xlane.xlu0 %1484  ;;  %v7695_v2 = vsub.f32 %v5152_v54, %v10622_v62  ;;  %v5153_v41 = vld [vmem:[%s10188_s0 + $0x2a8] sm:$0xff]  ;;  %v5154_v62 = vld [vmem:[%s10188_s0 + $0x300] sm:$0xff] }
 0x2da   :  { %10619 = vst [vmem:[#allocation32_spill] sm:$0xff] %v7681_v23  ;;  %10620 = vst [vmem:[#allocation45_spill] sm:$0xff] %v7683_v52  ;;  %v1378_v52 = vsel %vm1250_vm14, %v7689_v16, 0.0  ;;  %v7713_v54 = vsub.f32 %v5153_v41, %v10625_v9  ;;  %vm1275_vm14 = vcmp.eq.s32.totalorder %v6651_v60, %v7255_v12 }
 0x2db   :  { %v1389_v23 = vsel %vm1261_vm15, %v7695_v2, 0.0  ;;  %v1672_v63 = vsel %vm268_vm0, %v1378_v52, 0.0  ;;  %v10629_v52 = vld [vmem:[#allocation64_spill] sm:$0xff]  ;;  %vm1266_vm15 = vcmp.eq.s32.totalorder %v6651_v60, %v6945_v3 }
 0x2dc   :  { %1667 = vadd.xlane.f32.xlu1 %v1666_v50  ;;  %1700 = vadd.xlane.f32.xlu0 %v1699_v6  ;;  %v10626_v50 = vld [vmem:[#allocation75_spill] sm:$0xff]  ;;  %v1705_v6 = vsel %vm268_vm0, %v1389_v23, 0.0 }
 0x2dd   :  { %v7705_v46 = vpop.xlane.xlu1 %1457  ;;  %v7707_v21 = vpop.xlane.xlu0 %1490  ;;  %v7719_v53 = vsub.f32 %v5154_v62, %v10626_v50  ;;  %v5155_v23 = vld [vmem:[%s10188_s0 + $0x2b8] sm:$0xff]  ;;  %v5156_v50 = vld [vmem:[%s10188_s0 + $0x310] sm:$0xff] }
 0x2de   :  { %10623 = vst [vmem:[#allocation130_spill] sm:$0xff] %v7705_v46  ;;  %10624 = vst [vmem:[#allocation34_spill] sm:$0xff] %v7707_v21  ;;  %v1380_v21 = vsel %vm1252_vm1, %v7713_v54, 0.0  ;;  %v7737_v62 = vsub.f32 %v5155_v23, %v10629_v52  ;;  %vm1277_vm1 = vcmp.eq.s32.totalorder %v6651_v60, %v7287_v32 }
 0x2df   :  { %v1391_v46 = vsel %vm1263_vm2, %v7719_v53, 0.0  ;;  %v1678_v19 = vsel %vm268_vm0, %v1380_v21, 0.0  ;;  %v10633_v21 = vld [vmem:[#allocation66_spill] sm:$0xff]  ;;  %vm1268_vm2 = vcmp.eq.s32.totalorder %v6651_v60, %v6981_v48 }
 0x2e0   :  { %1673 = vadd.xlane.f32.xlu1 %v1672_v63  ;;  %1706 = vadd.xlane.f32.xlu0 %v1705_v6  ;;  %v10630_v63 = vld [vmem:[#allocation77_spill] sm:$0xff]  ;;  %v1711_v6 = vsel %vm268_vm0, %v1391_v46, 0.0 }
 0x2e1   :  { %v7729_v41 = vpop.xlane.xlu1 %1463  ;;  %v7731_v9 = vpop.xlane.xlu0 %1496  ;;  %v7743_v38 = vsub.f32 %v5156_v50, %v10630_v63  ;;  %v5157_v46 = vld [vmem:[%s10188_s0 + $0x2c8] sm:$0xff]  ;;  %v5158_v63 = vld [vmem:[%s10188_s0 + $0x320] sm:$0xff] }
 0x2e2   :  { %10627 = vst [vmem:[#allocation47_spill] sm:$0xff] %v7729_v41  ;;  %10628 = vst [vmem:[#allocation132_spill] sm:$0xff] %v7731_v9  ;;  %v1382_v9 = vsel %vm1254_vm3, %v7737_v62, 0.0  ;;  %v7761_v50 = vsub.f32 %v5157_v46, %v10633_v21  ;;  %vm1279_vm3 = vcmp.eq.s32.totalorder %v6651_v60, %v7323_v14 }
 0x2e3   :  { %v1393_v41 = vsel %vm1265_vm4, %v7743_v38, 0.0  ;;  %v1684_v43 = vsel %vm268_vm0, %v1382_v9, 0.0  ;;  %v10637_v9 = vld [vmem:[#allocation68_spill] sm:$0xff]  ;;  %vm1270_vm4 = vcmp.eq.s32.totalorder %v6651_v60, %v7013_v4 }
 0x2e4   :  { %1679 = vadd.xlane.f32.xlu1 %v1678_v19  ;;  %1712 = vadd.xlane.f32.xlu0 %v1711_v6  ;;  %v10634_v19 = vld [vmem:[#allocation79_spill] sm:$0xff]  ;;  %v1717_v6 = vsel %vm268_vm0, %v1393_v41, 0.0 }
 0x2e5   :  { %v7753_v23 = vpop.xlane.xlu1 %1469  ;;  %v7755_v52 = vpop.xlane.xlu0 %1502  ;;  %v7767_v34 = vsub.f32 %v5158_v63, %v10634_v19  ;;  %v5159_v41 = vld [vmem:[%s10188_s0 + $0x2d8] sm:$0xff]  ;;  %v5160_v19 = vld [vmem:[%s10188_s0 + $0x330] sm:$0xff] }
 0x2e6   :  { %10631 = vst [vmem:[#allocation36_spill] sm:$0xff] %v7753_v23  ;;  %10632 = vst [vmem:[#allocation49_spill] sm:$0xff] %v7755_v52  ;;  %v1384_v52 = vsel %vm1256_vm5, %v7761_v50, 0.0  ;;  %v7785_v63 = vsub.f32 %v5159_v41, %v10637_v9  ;;  %vm1281_vm5 = vcmp.eq.s32.totalorder %v6651_v60, %v7355_v24 }
 0x2e7   :  { %v1395_v23 = vsel %vm1267_vm6, %v7767_v34, 0.0  ;;  %v1690_v59 = vsel %vm268_vm0, %v1384_v52, 0.0  ;;  %v10641_v52 = vld [vmem:[#allocation70_spill] sm:$0xff]  ;;  %vm1272_vm6 = vcmp.eq.s32.totalorder %v6651_v60, %v7049_v30 }
 0x2e8   :  { %1685 = vadd.xlane.f32.xlu1 %v1684_v43  ;;  %1718 = vadd.xlane.f32.xlu0 %v1717_v6  ;;  %v10638_v43 = vld [vmem:[#allocation81_spill] sm:$0xff]  ;;  %v1723_v6 = vsel %vm268_vm0, %v1395_v23, 0.0 }
 0x2e9   :  { %v7777_v46 = vpop.xlane.xlu1 %1475  ;;  %v7779_v21 = vpop.xlane.xlu0 %1508  ;;  %v7791_v31 = vsub.f32 %v5160_v19, %v10638_v43  ;;  %v5161_v23 = vld [vmem:[%s10188_s0 + $0x2e8] sm:$0xff]  ;;  %v5162_v43 = vld [vmem:[%s10188_s0 + $0x340] sm:$0xff] }
 0x2ea   :  { %10635 = vst [vmem:[#allocation134_spill] sm:$0xff] %v7777_v46  ;;  %10636 = vst [vmem:[#allocation38_spill] sm:$0xff] %v7779_v21  ;;  %v1386_v21 = vsel %vm1258_vm7, %v7785_v63, 0.0  ;;  %v7809_v19 = vsub.f32 %v5161_v23, %v10641_v52  ;;  %vm1283_vm7 = vcmp.eq.s32.totalorder %v6651_v60, %v7391_v58 }
 0x2eb   :  { %v1397_v46 = vsel %vm1269_vm8, %v7791_v31, 0.0  ;;  %v1696_v0 = vsel %vm268_vm0, %v1386_v21, 0.0  ;;  %v10645_v21 = vld [vmem:[#allocation72_spill] sm:$0xff]  ;;  %vm1274_vm8 = vcmp.eq.s32.totalorder %v6651_v60, %v7081_v55 }
 0x2ec   :  { %1691 = vadd.xlane.f32.xlu1 %v1690_v59  ;;  %1724 = vadd.xlane.f32.xlu0 %v1723_v6  ;;  %v10642_v59 = vld [vmem:[#allocation83_spill] sm:$0xff]  ;;  %v1729_v6 = vsel %vm268_vm0, %v1397_v46, 0.0 }
 0x2ed   :  { %v7801_v41 = vpop.xlane.xlu1 %1481  ;;  %v7803_v9 = vpop.xlane.xlu0 %1514  ;;  %v7815_v25 = vsub.f32 %v5162_v43, %v10642_v59  ;;  %v5163_v46 = vld [vmem:[%s10188_s0 + $0x2f8] sm:$0xff]  ;;  %v5164_v59 = vld [vmem:[%s10188_s0 + $0x350] sm:$0xff] }
 0x2ee   :  { %10639 = vst [vmem:[#allocation51_spill] sm:$0xff] %v7801_v41  ;;  %10640 = vst [vmem:[#allocation136_spill] sm:$0xff] %v7803_v9  ;;  %v1388_v9 = vsel %vm1260_vm9, %v7809_v19, 0.0  ;;  %v7833_v43 = vsub.f32 %v5163_v46, %v10645_v21  ;;  %vm1285_vm9 = vcmp.eq.s32.totalorder %v6651_v60, %v7423_v61 }
 0x2ef   :  { %v1399_v41 = vsel %vm1271_vm10, %v7815_v25, 0.0  ;;  %v1702_v29 = vsel %vm268_vm0, %v1388_v9, 0.0  ;;  %v10649_v9 = vld [vmem:[#allocation74_spill] sm:$0xff]  ;;  %vm1276_vm10 = vcmp.eq.s32.totalorder %v6651_v60, %v7117_v45 }
 0x2f0   :  { %1697 = vadd.xlane.f32.xlu1 %v1696_v0  ;;  %1730 = vadd.xlane.f32.xlu0 %v1729_v6  ;;  %v10646_v0 = vld [vmem:[#allocation85_spill] sm:$0xff]  ;;  %v1735_v6 = vsel %vm268_vm0, %v1399_v41, 0.0 }
 0x2f1   :  { %v7825_v23 = vpop.xlane.xlu1 %1487  ;;  %v7827_v52 = vpop.xlane.xlu0 %1520  ;;  %v7839_v49 = vsub.f32 %v5164_v59, %v10646_v0  ;;  %v5165_v41 = vld [vmem:[%s10188_s0 + $0x308] sm:$0xff]  ;;  %v5166_v0 = vld [vmem:[%s10188_s0 + $0x360] sm:$0xff] }
 0x2f2   :  { %10643 = vst [vmem:[#allocation40_spill] sm:$0xff] %v7825_v23  ;;  %10644 = vst [vmem:[#allocation53_spill] sm:$0xff] %v7827_v52  ;;  %v1390_v52 = vsel %vm1262_vm11, %v7833_v43, 0.0  ;;  %v7857_v59 = vsub.f32 %v5165_v41, %v10649_v9  ;;  %vm1287_vm11 = vcmp.eq.s32.totalorder %v6651_v60, %v7459_v1 }
 0x2f3   :  { %v1401_v23 = vsel %vm1273_vm12, %v7839_v49, 0.0  ;;  %v1708_v12 = vsel %vm268_vm0, %v1390_v52, 0.0  ;;  %v10653_v52 = vld [vmem:[#allocation76_spill] sm:$0xff]  ;;  %vm1278_vm12 = vcmp.eq.s32.totalorder %v6651_v60, %v7149_v15  ;;  %v5180_v15 = vld [vmem:[%s10188_s0 + $0x3d0] sm:$0xff] }
 0x2f4   :  { %1703 = vadd.xlane.f32.xlu1 %v1702_v29  ;;  %1736 = vadd.xlane.f32.xlu0 %v1735_v6  ;;  %v10650_v29 = vld [vmem:[#allocation87_spill] sm:$0xff]  ;;  %v1741_v6 = vsel %vm268_vm0, %v1401_v23, 0.0 }
 0x2f5   :  { %v7849_v46 = vpop.xlane.xlu1 %1493  ;;  %v7851_v21 = vpop.xlane.xlu0 %1526  ;;  %v7863_v57 = vsub.f32 %v5166_v0, %v10650_v29  ;;  %v5167_v23 = vld [vmem:[%s10188_s0 + $0x318] sm:$0xff]  ;;  %v5168_v29 = vld [vmem:[%s10188_s0 + $0x370] sm:$0xff] }
 0x2f6   :  { %10647 = vst [vmem:[#allocation138_spill] sm:$0xff] %v7849_v46  ;;  %10648 = vst [vmem:[#allocation42_spill] sm:$0xff] %v7851_v21  ;;  %v1392_v21 = vsel %vm1264_vm13, %v7857_v59, 0.0  ;;  %v7881_v0 = vsub.f32 %v5167_v23, %v10653_v52  ;;  %vm1289_vm13 = vcmp.eq.s32.totalorder %v6651_v60, %v7491_v36 }
 0x2f7   :  { %v1403_v46 = vsel %vm1275_vm14, %v7863_v57, 0.0  ;;  %v1714_v32 = vsel %vm268_vm0, %v1392_v21, 0.0  ;;  %v10657_v21 = vld [vmem:[#allocation78_spill] sm:$0xff]  ;;  %vm1280_vm14 = vcmp.eq.s32.totalorder %v6651_v60, %v7185_v7  ;;  %v5182_v7 = vld [vmem:[%s10188_s0 + $0x3e0] sm:$0xff] }
 0x2f8   :  { %1709 = vadd.xlane.f32.xlu1 %v1708_v12  ;;  %1742 = vadd.xlane.f32.xlu0 %v1741_v6  ;;  %v10654_v12 = vld [vmem:[#allocation89_spill] sm:$0xff]  ;;  %v1747_v6 = vsel %vm268_vm0, %v1403_v46, 0.0 }
 0x2f9   :  { %v7873_v41 = vpop.xlane.xlu1 %1499  ;;  %v7875_v9 = vpop.xlane.xlu0 %1532  ;;  %v7887_v3 = vsub.f32 %v5168_v29, %v10654_v12  ;;  %v5169_v46 = vld [vmem:[%s10188_s0 + $0x328] sm:$0xff]  ;;  %v5170_v12 = vld [vmem:[%s10188_s0 + $0x380] sm:$0xff] }
 0x2fa   :  { %10651 = vst [vmem:[#allocation55_spill] sm:$0xff] %v7873_v41  ;;  %10652 = vst [vmem:[#allocation140_spill] sm:$0xff] %v7875_v9  ;;  %v1394_v9 = vsel %vm1266_vm15, %v7881_v0, 0.0  ;;  %v7905_v29 = vsub.f32 %v5169_v46, %v10657_v21  ;;  %vm1291_vm15 = vcmp.eq.s32.totalorder %v6651_v60, %v7529_v44 }
 0x2fb   :  { %v1405_v41 = vsel %vm1277_vm1, %v7887_v3, 0.0  ;;  %v1720_v14 = vsel %vm268_vm0, %v1394_v9, 0.0  ;;  %v10661_v9 = vld [vmem:[#allocation80_spill] sm:$0xff]  ;;  %vm1282_vm1 = vcmp.eq.s32.totalorder %v6651_v60, %v7217_v26  ;;  %v5184_v26 = vld [vmem:[%s10188_s0 + $0x3f0] sm:$0xff] }
 0x2fc   :  { %1715 = vadd.xlane.f32.xlu1 %v1714_v32  ;;  %1748 = vadd.xlane.f32.xlu0 %v1747_v6  ;;  %v10658_v32 = vld [vmem:[#allocation91_spill] sm:$0xff]  ;;  %v1753_v6 = vsel %vm268_vm0, %v1405_v41, 0.0 }
 0x2fd   :  { %v7897_v23 = vpop.xlane.xlu1 %1505  ;;  %v7899_v52 = vpop.xlane.xlu0 %1538  ;;  %v7911_v48 = vsub.f32 %v5170_v12, %v10658_v32  ;;  %v5171_v41 = vld [vmem:[%s10188_s0 + $0x338] sm:$0xff]  ;;  %v5172_v32 = vld [vmem:[%s10188_s0 + $0x390] sm:$0xff] }
 0x2fe   :  { %10655 = vst [vmem:[#allocation44_spill] sm:$0xff] %v7897_v23  ;;  %10656 = vst [vmem:[#allocation57_spill] sm:$0xff] %v7899_v52  ;;  %v1396_v52 = vsel %vm1268_vm2, %v7905_v29, 0.0  ;;  %v7929_v12 = vsub.f32 %v5171_v41, %v10661_v9  ;;  %vm1293_vm2 = vcmp.eq.s32.totalorder %v6651_v60, %v7561_v28 }
 0x2ff   :  { %v1407_v23 = vsel %vm1279_vm3, %v7911_v48, 0.0  ;;  %v1726_v24 = vsel %vm268_vm0, %v1396_v52, 0.0  ;;  %v10665_v52 = vld [vmem:[#allocation82_spill] sm:$0xff]  ;;  %vm1284_vm3 = vcmp.eq.s32.totalorder %v6651_v60, %v7253_v20 }
 0x300   :  { %1721 = vadd.xlane.f32.xlu1 %v1720_v14  ;;  %1754 = vadd.xlane.f32.xlu0 %v1753_v6  ;;  %v10662_v14 = vld [vmem:[#allocation93_spill] sm:$0xff]  ;;  %v1759_v6 = vsel %vm268_vm0, %v1407_v23, 0.0 }
 0x301   :  { %v7921_v46 = vpop.xlane.xlu1 %1511  ;;  %v7923_v21 = vpop.xlane.xlu0 %1544  ;;  %v7935_v4 = vsub.f32 %v5172_v32, %v10662_v14  ;;  %v5173_v23 = vld [vmem:[%s10188_s0 + $0x348] sm:$0xff]  ;;  %v5174_v14 = vld [vmem:[%s10188_s0 + $0x3a0] sm:$0xff] }
 0x302   :  { %10659 = vst [vmem:[#allocation142_spill] sm:$0xff] %v7921_v46  ;;  %10660 = vst [vmem:[#allocation46_spill] sm:$0xff] %v7923_v21  ;;  %v1398_v21 = vsel %vm1270_vm4, %v7929_v12, 0.0  ;;  %v7953_v32 = vsub.f32 %v5173_v23, %v10665_v52  ;;  %vm1286_vm4 = vcmp.eq.s32.totalorder %v6651_v60, %v7285_v10 }
 0x303   :  { %v1409_v46 = vsel %vm1281_vm5, %v7935_v4, 0.0  ;;  %v1732_v58 = vsel %vm268_vm0, %v1398_v21, 0.0  ;;  %v10669_v21 = vld [vmem:[#allocation84_spill] sm:$0xff]  ;;  %vm1288_vm5 = vcmp.eq.s32.totalorder %v6651_v60, %v7321_v37 }
 0x304   :  { %1727 = vadd.xlane.f32.xlu1 %v1726_v24  ;;  %1760 = vadd.xlane.f32.xlu0 %v1759_v6  ;;  %v10666_v24 = vld [vmem:[#allocation95_spill] sm:$0xff]  ;;  %v1765_v6 = vsel %vm268_vm0, %v1409_v46, 0.0 }
 0x305   :  { %v7945_v41 = vpop.xlane.xlu1 %1517  ;;  %v7947_v9 = vpop.xlane.xlu0 %1550  ;;  %v7959_v30 = vsub.f32 %v5174_v14, %v10666_v24  ;;  %v5175_v46 = vld [vmem:[%s10188_s0 + $0x358] sm:$0xff]  ;;  %v5176_v24 = vld [vmem:[%s10188_s0 + $0x3b0] sm:$0xff] }
 0x306   :  { %10663 = vst [vmem:[#allocation59_spill] sm:$0xff] %v7945_v41  ;;  %10664 = vst [vmem:[#allocation143_spill] sm:$0xff] %v7947_v9  ;;  %v1400_v9 = vsel %vm1272_vm6, %v7953_v32, 0.0  ;;  %v7977_v14 = vsub.f32 %v5175_v46, %v10669_v21  ;;  %vm1290_vm6 = vcmp.eq.s32.totalorder %v6651_v60, %v7353_v33 }
 0x307   :  { %v1411_v41 = vsel %vm1283_vm7, %v7959_v30, 0.0  ;;  %v1738_v61 = vsel %vm268_vm0, %v1400_v9, 0.0  ;;  %v10673_v9 = vld [vmem:[#allocation86_spill] sm:$0xff]  ;;  %vm1292_vm7 = vcmp.eq.s32.totalorder %v6651_v60, %v7389_v39 }
 0x308   :  { %1733 = vadd.xlane.f32.xlu1 %v1732_v58  ;;  %1766 = vadd.xlane.f32.xlu0 %v1765_v6  ;;  %v10670_v58 = vld [vmem:[#allocation97_spill] sm:$0xff]  ;;  %v1771_v6 = vsel %vm268_vm0, %v1411_v41, 0.0 }
 0x309   :  { %v7969_v23 = vpop.xlane.xlu1 %1523  ;;  %v7971_v52 = vpop.xlane.xlu0 %1556  ;;  %v7983_v55 = vsub.f32 %v5176_v24, %v10670_v58  ;;  %v5177_v41 = vld [vmem:[%s10188_s0 + $0x368] sm:$0xff]  ;;  %v5178_v58 = vld [vmem:[%s10188_s0 + $0x3c0] sm:$0xff] }
 0x30a   :  { %10667 = vst [vmem:[#allocation48_spill] sm:$0xff] %v7969_v23  ;;  %10668 = vst [vmem:[#allocation61_spill] sm:$0xff] %v7971_v52  ;;  %v1402_v52 = vsel %vm1274_vm8, %v7977_v14, 0.0  ;;  %v8001_v24 = vsub.f32 %v5177_v41, %v10673_v9 }
 0x30b   :  { %v1413_v23 = vsel %vm1285_vm9, %v7983_v55, 0.0  ;;  %v1744_v1 = vsel %vm268_vm0, %v1402_v52, 0.0  ;;  %v1807_v52 = vmul.f32 1.442695, %v6748_v40 }
 0x30c   :  { %1739 = vadd.xlane.f32.xlu1 %v1738_v61  ;;  %1772 = vadd.xlane.f32.xlu0 %v1771_v6  ;;  %v10674_v61 = vld [vmem:[#allocation99_spill] sm:$0xff]  ;;  %v1777_v6 = vsel %vm268_vm0, %v1413_v23, 0.0 }
 0x30d   :  { %v7993_v46 = vpop.xlane.xlu1 %1529  ;;  %v7995_v21 = vpop.xlane.xlu0 %1562  ;;  %v8007_v45 = vsub.f32 %v5178_v58, %v10674_v61  ;;  %v5179_v23 = vld [vmem:[%s10188_s0 + $0x378] sm:$0xff]  ;;  %v10677_v58 = vld [vmem:[#allocation88_spill] sm:$0xff]  ;;  %4551 = vpow2.f32 %v1807_v52 }
 0x30e   :  { %10671 = vst [vmem:[#allocation145_spill] sm:$0xff] %v7993_v46  ;;  %10672 = vst [vmem:[#allocation50_spill] sm:$0xff] %v7995_v21  ;;  %v1404_v21 = vsel %vm1276_vm10, %v8001_v24, 0.0  ;;  %v8026_v61 = vsub.f32 %v5179_v23, %v10677_v58 }
 0x30f   :  { %v1415_v46 = vsel %vm1287_vm11, %v8007_v45, 0.0  ;;  %v1750_v36 = vsel %vm268_vm0, %v1404_v21, 0.0 }
 0x310   :  { %1745 = vadd.xlane.f32.xlu1 %v1744_v1  ;;  %1778 = vadd.xlane.f32.xlu0 %v1777_v6  ;;  %v10678_v1 = vld [vmem:[#allocation101_spill] sm:$0xff]  ;;  %v1406_v40 = vsel %vm1278_vm12, %v8026_v61, 0.0 }
 0x311   :  { %v8017_v41 = vpop.xlane.xlu1 %1535  ;;  %v8019_v9 = vpop.xlane.xlu0 %1568  ;;  %v8032_v6 = vsub.f32 %v5180_v15, %v10678_v1  ;;  %v10681_v15 = vld [vmem:[#allocation151_spill] sm:$0xff] }
 0x312   :  { %10675 = vst [vmem:[#allocation63_spill] sm:$0xff] %v8017_v41  ;;  %10676 = vst [vmem:[#allocation148_spill] sm:$0xff] %v8019_v9  ;;  %v1783_v9 = vsel %vm268_vm0, %v1415_v46, 0.0  ;;  %v1811_v21 = vmul.f32 1.442695, %v10681_v15  ;;  %v5181_v46 = vld [vmem:[%s10188_s0 + $0x388] sm:$0xff] }
 0x313   :  { %v1417_v41 = vsel %vm1289_vm13, %v8032_v6, 0.0 }
 0x314   :  { %1751 = vadd.xlane.f32.xlu1 %v1750_v36  ;;  %1784 = vadd.xlane.f32.xlu0 %v1783_v9  ;;  %v10682_v9 = vld [vmem:[#allocation90_spill] sm:$0xff]  ;;  %v10683_v36 = vld [vmem:[#allocation103_spill] sm:$0xff]  ;;  %4553 = vpow2.f32 %v1811_v21 }
 0x315   :  { %v8042_v23 = vpop.xlane.xlu1 %1541  ;;  %v8044_v58 = vpop.xlane.xlu0 %1574  ;;  %v8051_v1 = vsub.f32 %v5181_v46, %v10682_v9  ;;  %v8057_v44 = vsub.f32 %v5182_v7, %v10683_v36  ;;  %v10689_v36 = vld [vmem:[#allocation105_spill] sm:$0xff] }
 0x316   :  { %10679 = vst [vmem:[#allocation52_spill] sm:$0xff] %v8042_v23  ;;  %10680 = vst [vmem:[#allocation65_spill] sm:$0xff] %v8044_v58  ;;  %v1756_v23 = vsel %vm268_vm0, %v1406_v40, 0.0  ;;  %v1789_v58 = vsel %vm268_vm0, %v1417_v41, 0.0  ;;  %v10686_v40 = vld [vmem:[#allocation152_spill] sm:$0xff]  ;;  %v5183_v41 = vld [vmem:[%s10188_s0 + $0x398] sm:$0xff]  ;;  %v8082_v28 = vsub.f32 %v5184_v26, %v10689_v36 }
 0x317   :  { %v1408_v52 = vsel %vm1280_vm14, %v8051_v1, 0.0  ;;  %v1419_v15 = vsel %vm1291_vm15, %v8057_v44, 0.0  ;;  %v1815_v7 = vmul.f32 1.442695, %v10686_v40  ;;  %v10693_v26 = vld [vmem:[#allocation153_spill] sm:$0xff] }
 0x318   :  { %1757 = vadd.xlane.f32.xlu1 %v1756_v23  ;;  %1790 = vadd.xlane.f32.xlu0 %v1789_v58  ;;  %v10687_v23 = vld [vmem:[#allocation92_spill] sm:$0xff]  ;;  %10690 = vst [vmem:[#allocation56_spill] sm:$0xff] %v8082_v28  ;;  %v1795_v21 = vsel %vm268_vm0, %v1419_v15, 0.0  ;;  %v1819_v36 = vmul.f32 1.442695, %v10693_v26  ;;  %v10694_v15 = vld [vmem:[#allocation94_spill] sm:$0xff] }
 0x319   :  { %v8067_v46 = vpop.xlane.xlu1 %1547  ;;  %v8069_v9 = vpop.xlane.xlu0 %1580  ;;  %v8076_v58 = vsub.f32 %v5183_v41, %v10687_v23  ;;  %4555 = vpow2.f32 %v1815_v7 }
 0x31a   :  { %10684 = vst [vmem:[#allocation150_spill] sm:$0xff] %v8067_v46  ;;  %10685 = vst [vmem:[#allocation54_spill] sm:$0xff] %v8069_v9  ;;  %v1762_v46 = vsel %vm268_vm0, %v1408_v52, 0.0  ;;  %v1421_v9 = vsel %vm1293_vm2, %v8082_v28, 0.0  ;;  %v5185_v52 = vld [vmem:[%s10188_s0 + $0x3a8] sm:$0xff]  ;;  %4557 = vpow2.f32 %v1819_v36 }
 0x31b   :  { %10688 = vst [vmem:[#allocation67_spill] sm:$0xff] %v8076_v58  ;;  %v1410_v40 = vsel %vm1282_vm1, %v8076_v58, 0.0  ;;  %v1801_v28 = vsel %vm268_vm0, %v1421_v9, 0.0  ;;  %v4552_v58 = vpop.eup %4551  ;;  %v10697_v9 = vld [vmem:[#allocation96_spill] sm:$0xff] }
 0x31c   :  { %1763 = vadd.xlane.f32.xlu1 %v1762_v46  ;;  %1796 = vadd.xlane.f32.xlu0 %v1795_v21  ;;  %v8099_v46 = vsub.f32 %v5185_v52, %v10694_v15  ;;  %v1768_v21 = vsel %vm268_vm0, %v1410_v40, 0.0  ;;  %v1823_v52 = vmul.f32 1.442695, %v6718_v17  ;;  %v5186_v40 = vld [vmem:[%s10188_s0 + $0x3b8] sm:$0xff] }
 0x31d   :  { %v8090_v41 = vpop.xlane.xlu1 %1553  ;;  %v8092_v23 = vpop.xlane.xlu0 %1586  ;;  %v8115_v15 = vsub.f32 %v5186_v40, %v10697_v9 }
 0x31e   :  { %10691 = vst [vmem:[#allocation69_spill] sm:$0xff] %v8090_v41  ;;  %10692 = vst [vmem:[#allocation58_spill] sm:$0xff] %v8092_v23  ;;  %v1412_v20 = vsel %vm1284_vm3, %v8099_v46, 0.0  ;;  %v4554_v23 = vpop.eup %4553  ;;  %4559 = vpow2.f32 %v1823_v52 }
 0x31f   :  { %v1414_v10 = vsel %vm1286_vm4, %v8115_v15, 0.0 }
 0x320   :  { %1769 = vadd.xlane.f32.xlu1 %v1768_v21  ;;  %1802 = vadd.xlane.f32.xlu0 %v1801_v28  ;;  %v1774_v28 = vsel %vm268_vm0, %v1412_v20, 0.0  ;;  %v2063_v21 = vsel %vm268_vm0, %v4552_v58, 0.0  ;;  %v5187_v20 = vld [vmem:[%s10188_s0 + $0x3c8] sm:$0xff]  ;;  %v10701_v58 = vld [vmem:[#allocation98_spill] sm:$0xff] }
 0x321   :  { %v8106_v7 = vpop.xlane.xlu1 %1559  ;;  %v8108_v26 = vpop.xlane.xlu0 %1592  ;;  %v8131_v9 = vsub.f32 %v5187_v20, %v10701_v58  ;;  %v1831_v20 = vmul.f32 1.442695, %v6754_v51 }
 0x322   :  { %10695 = vst [vmem:[#allocation71_spill] sm:$0xff] %v8106_v7  ;;  %10696 = vst [vmem:[#allocation60_spill] sm:$0xff] %v8108_v26  ;;  %v10700_v26 = vld [vmem:[#allocation154_spill] sm:$0xff] }
 0x323   :  { %v1827_v40 = vmul.f32 1.442695, %v10700_v26  ;;  %v4556_v7 = vpop.eup %4555  ;;  %v1416_v37 = vsel %vm1288_vm5, %v8131_v9, 0.0 }
 0x324   :  { %1775 = vadd.xlane.f32.xlu1 %v1774_v28  ;;  %2064 = vadd.xlane.f32.xlu0 %v2063_v21  ;;  %v1780_v28 = vsel %vm268_vm0, %v1414_v10, 0.0  ;;  %v2069_v21 = vsel %vm268_vm0, %v4554_v23, 0.0  ;;  %v5188_v23 = vld [vmem:[%s10188_s0 + $0x3d8] sm:$0xff]  ;;  %v10705_v10 = vld [vmem:[#allocation100_spill] sm:$0xff] }
 0x325   :  { %v8122_v17 = vpop.xlane.xlu1 %1565  ;;  %v8124_v36 = vpop.xlane.xlu0 %1598  ;;  %4561 = vpow2.f32 %v1827_v40  ;;  %v8148_v58 = vsub.f32 %v5188_v23, %v10705_v10  ;;  %v10709_v23 = vld [vmem:[#allocation156_spill] sm:$0xff]  ;;  %v10710_v10 = vld [vmem:[#allocation102_spill] sm:$0xff] }
 0x326   :  { %10698 = vst [vmem:[#allocation73_spill] sm:$0xff] %v8122_v17  ;;  %10699 = vst [vmem:[#allocation62_spill] sm:$0xff] %v8124_v36  ;;  %v10702_v36 = vld [vmem:[#allocation149_spill] sm:$0xff] }
 0x327   :  { %v1809_v52 = vmul.f32 1.442695, %v10702_v36  ;;  %v2075_v36 = vsel %vm268_vm0, %v4556_v7, 0.0  ;;  %v1418_v33 = vsel %vm1290_vm6, %v8148_v58, 0.0  ;;  %v5189_v7 = vld [vmem:[%s10188_s0 + $0x3e8] sm:$0xff] }
 0x328   :  { %1781 = vadd.xlane.f32.xlu1 %v1780_v28  ;;  %2070 = vadd.xlane.f32.xlu0 %v2069_v21  ;;  %v1786_v28 = vsel %vm268_vm0, %v1416_v37, 0.0  ;;  %v4558_v21 = vpop.eup %4557  ;;  %v1835_v37 = vmul.f32 1.442695, %v10709_v23  ;;  %v10713_v23 = vld [vmem:[#allocation18_spill] sm:$0xff] }
 0x329   :  { %v8139_v26 = vpop.xlane.xlu1 %1571  ;;  %v8141_v17 = vpop.xlane.xlu0 %1604  ;;  %4563 = vpow2.f32 %v1809_v52  ;;  %v2081_v52 = vsel %vm268_vm0, %v4558_v21, 0.0  ;;  %vm1294_vm8 = vcmp.eq.s32.totalorder %v6651_v60, %v10713_v23  ;;  %v5190_v21 = vld [vmem:[%s10188_s0 + $0x3f8] sm:$0xff] }
 0x32a   :  { %10703 = vst [vmem:[#allocation75_spill] sm:$0xff] %v8139_v26  ;;  %10704 = vst [vmem:[#allocation64_spill] sm:$0xff] %v8141_v17  ;;  %v10706_v17 = vld [vmem:[#allocation155_spill] sm:$0xff]  ;;  %4565 = vpow2.f32 %v1831_v20  ;;  %v10712_v20 = vld [vmem:[#allocation157_spill] sm:$0xff] }
 0x32b   :  { %v1813_v40 = vmul.f32 1.442695, %v10706_v17  ;;  %v1792_v17 = vsel %vm268_vm0, %v1418_v33, 0.0 }
 0x32c   :  { %1787 = vadd.xlane.f32.xlu1 %v1786_v28  ;;  %2076 = vadd.xlane.f32.xlu0 %v2075_v36  ;;  %v8165_v28 = vsub.f32 %v5189_v7, %v10710_v10  ;;  %v4560_v36 = vpop.eup %4559  ;;  %v10716_v7 = vld [vmem:[#allocation158_spill] sm:$0xff]  ;;  %v10717_v10 = vld [vmem:[#allocation104_spill] sm:$0xff] }
 0x32d   :  { %v8156_v51 = vpop.xlane.xlu1 %1577  ;;  %v8158_v26 = vpop.xlane.xlu0 %1610  ;;  %4567 = vpow2.f32 %v1813_v40  ;;  %v1839_v33 = vmul.f32 1.442695, %v10716_v7 }
 0x32e   :  { %10707 = vst [vmem:[#allocation77_spill] sm:$0xff] %v8156_v51  ;;  %10708 = vst [vmem:[#allocation66_spill] sm:$0xff] %v8158_v26  ;;  %v1420_v39 = vsel %vm1292_vm7, %v8165_v28, 0.0  ;;  %v1817_v26 = vmul.f32 1.442695, %v10712_v20  ;;  %4569 = vpow2.f32 %v1835_v37  ;;  %v10719_v37 = vld [vmem:[#allocation159_spill] sm:$0xff] }
 0x32f   :  { %10711 = vst [vmem:[#allocation79_spill] sm:$0xff] %v8165_v28  ;;  %v1798_v40 = vsel %vm268_vm0, %v1420_v39, 0.0  ;;  %v4562_v20 = vpop.eup %4561  ;;  %v1821_v60 = vmul.f32 1.442695, %v10719_v37 }
 0x330   :  { %1793 = vadd.xlane.f32.xlu1 %v1792_v17  ;;  %2082 = vadd.xlane.f32.xlu0 %v2081_v52  ;;  %v8182_v17 = vsub.f32 %v5190_v21, %v10717_v10  ;;  %v2087_v52 = vsel %vm268_vm0, %v4560_v36, 0.0  ;;  %4571 = vpow2.f32 %v1817_v26  ;;  %v2093_v36 = vsel %vm268_vm0, %v4562_v20, 0.0  ;;  %v10727_v20 = vld [vmem:[#allocation163_spill] sm:$0xff] }
 0x331   :  { %v8173_v51 = vpop.xlane.xlu1 %1583  ;;  %v8175_v41 = vpop.xlane.xlu0 %1616  ;;  %4573 = vpow2.f32 %v1839_v33 }
 0x332   :  { %10714 = vst [vmem:[#allocation68_spill] sm:$0xff] %v8173_v51  ;;  %10715 = vst [vmem:[#allocation81_spill] sm:$0xff] %v8175_v41  ;;  %v1422_v23 = vsel %vm1294_vm8, %v8182_v17, 0.0  ;;  %v10722_v51 = vld [vmem:[#allocation160_spill] sm:$0xff]  ;;  %4575 = vpow2.f32 %v1821_v60  ;;  %v1829_v60 = vmul.f32 1.442695, %v10727_v20 }
 0x333   :  { %10718 = vst [vmem:[#allocation70_spill] sm:$0xff] %v8182_v17  ;;  %v1843_v21 = vmul.f32 1.442695, %v10722_v51  ;;  %v4564_v10 = vpop.eup %4563  ;;  %v1804_v39 = vsel %vm268_vm0, %v1422_v23, 0.0  ;;  %v10734_v20 = vld [vmem:[#allocation166_spill] sm:$0xff] }
 0x334   :  { %1799 = vadd.xlane.f32.xlu1 %v1798_v40  ;;  %2088 = vadd.xlane.f32.xlu0 %v2087_v52  ;;  %v4566_v28 = vpop.eup %4565  ;;  %v10723_v40 = vld [vmem:[#allocation161_spill] sm:$0xff]  ;;  %v2066_v51 = vsel %vm268_vm0, %v4564_v10, 0.0 }
 0x335   :  { %v8188_v7 = vpop.xlane.xlu1 %1589  ;;  %v8190_v41 = vpop.xlane.xlu0 %1622  ;;  %v1825_v26 = vmul.f32 1.442695, %v10723_v40  ;;  %4577 = vpow2.f32 %v1843_v21  ;;  %v2099_v23 = vsel %vm268_vm0, %v4566_v28, 0.0  ;;  %v10730_v40 = vld [vmem:[#allocation164_spill] sm:$0xff]  ;;  %v10731_v28 = vld [vmem:[#allocation165_spill] sm:$0xff] }
 0x336   :  { %10720 = vst [vmem:[#allocation83_spill] sm:$0xff] %v8188_v7  ;;  %10721 = vst [vmem:[#allocation72_spill] sm:$0xff] %v8190_v41  ;;  %v10726_v41 = vld [vmem:[#allocation162_spill] sm:$0xff]  ;;  %v1851_v21 = vmul.f32 1.442695, %v10730_v40 }
 0x337   :  { %v1847_v33 = vmul.f32 1.442695, %v10726_v41  ;;  %v4568_v7 = vpop.eup %4567  ;;  %4579 = vpow2.f32 %v1825_v26  ;;  %v1833_v26 = vmul.f32 1.442695, %v10731_v28  ;;  %v10738_v28 = vld [vmem:[#allocation168_spill] sm:$0xff] }
 0x338   :  { %1805 = vadd.xlane.f32.xlu1 %v1804_v39  ;;  %2094 = vadd.xlane.f32.xlu0 %v2093_v36  ;;  %v4570_v17 = vpop.eup %4569  ;;  %v2072_v41 = vsel %vm268_vm0, %v4568_v7, 0.0 }
 0x339   :  { %v8196_v52 = vpop.xlane.xlu1 %1595  ;;  %v8198_v37 = vpop.xlane.xlu0 %1628  ;;  %4581 = vpow2.f32 %v1847_v33  ;;  %v2105_v10 = vsel %vm268_vm0, %v4570_v17, 0.0  ;;  %v1855_v33 = vmul.f32 1.442695, %v10734_v20  ;;  %v10735_v17 = vld [vmem:[#allocation167_spill] sm:$0xff] }
 0x33a   :  { %10724 = vst [vmem:[#allocation85_spill] sm:$0xff] %v8196_v52  ;;  %10725 = vst [vmem:[#allocation74_spill] sm:$0xff] %v8198_v37  ;;  %v4572_v37 = vpop.eup %4571  ;;  %4583 = vpow2.f32 %v1829_v60  ;;  %v1837_v60 = vmul.f32 1.442695, %v10735_v17  ;;  %v10742_v17 = vld [vmem:[#allocation170_spill] sm:$0xff] }
 0x33b   :  { %v4574_v52 = vpop.eup %4573  ;;  %4585 = vpow2.f32 %v1851_v21  ;;  %v2078_v40 = vsel %vm268_vm0, %v4572_v37, 0.0  ;;  %v1859_v21 = vmul.f32 1.442695, %v10738_v28 }
 0x33c   :  { %2067 = vadd.xlane.f32.xlu1 %v2066_v51  ;;  %2100 = vadd.xlane.f32.xlu0 %v2099_v23  ;;  %v2111_v7 = vsel %vm268_vm0, %v4574_v52, 0.0  ;;  %4587 = vpow2.f32 %v1833_v26  ;;  %v10739_v52 = vld [vmem:[#allocation169_spill] sm:$0xff] }
 0x33d   :  { %v8204_v39 = vpop.xlane.xlu1 %1601  ;;  %v8206_v36 = vpop.xlane.xlu0 %1634  ;;  %4589 = vpow2.f32 %v1855_v33  ;;  %v1841_v26 = vmul.f32 1.442695, %v10739_v52  ;;  %v1863_v33 = vmul.f32 1.442695, %v10742_v17  ;;  %v10746_v52 = vld [vmem:[#allocation172_spill] sm:$0xff] }
 0x33e   :  { %10728 = vst [vmem:[#allocation87_spill] sm:$0xff] %v8204_v39  ;;  %10729 = vst [vmem:[#allocation76_spill] sm:$0xff] %v8206_v36  ;;  %v4576_v36 = vpop.eup %4575  ;;  %4591 = vpow2.f32 %v1837_v60 }
 0x33f   :  { %v4578_v39 = vpop.eup %4577  ;;  %v2084_v20 = vsel %vm268_vm0, %v4576_v36, 0.0  ;;  %4593 = vpow2.f32 %v1859_v21  ;;  %v1867_v21 = vmul.f32 1.442695, %v10746_v52 }
 0x340   :  { %2073 = vadd.xlane.f32.xlu1 %v2072_v41  ;;  %2106 = vadd.xlane.f32.xlu0 %v2105_v10  ;;  %v2117_v37 = vsel %vm268_vm0, %v4578_v39, 0.0  ;;  %4595 = vpow2.f32 %v1841_v26  ;;  %v10743_v39 = vld [vmem:[#allocation171_spill] sm:$0xff] }
 0x341   :  { %v8212_v51 = vpop.xlane.xlu1 %1607  ;;  %v8214_v23 = vpop.xlane.xlu0 %1640  ;;  %v1845_v60 = vmul.f32 1.442695, %v10743_v39  ;;  %4597 = vpow2.f32 %v1863_v33  ;;  %v10750_v39 = vld [vmem:[#allocation11_spill] sm:$0xff] }
 0x342   :  { %10732 = vst [vmem:[#allocation89_spill] sm:$0xff] %v8212_v51  ;;  %10733 = vst [vmem:[#allocation78_spill] sm:$0xff] %v8214_v23  ;;  %v4580_v23 = vpop.eup %4579  ;;  %v1871_v33 = vmul.f32 1.442695, %v10750_v39 }
 0x343   :  { %v4582_v51 = vpop.eup %4581  ;;  %v2090_v28 = vsel %vm268_vm0, %v4580_v23, 0.0  ;;  %4599 = vpow2.f32 %v1845_v60 }
 0x344   :  { %2079 = vadd.xlane.f32.xlu1 %v2078_v40  ;;  %2112 = vadd.xlane.f32.xlu0 %v2111_v7  ;;  %v2123_v36 = vsel %vm268_vm0, %v4582_v51, 0.0  ;;  %v10747_v51 = vld [vmem:[#allocation173_spill] sm:$0xff]  ;;  %4601 = vpow2.f32 %v1867_v21 }
 0x345   :  { %v8220_v41 = vpop.xlane.xlu1 %1613  ;;  %v8222_v10 = vpop.xlane.xlu0 %1646  ;;  %v1849_v26 = vmul.f32 1.442695, %v10747_v51  ;;  %v10754_v51 = vld [vmem:[#allocation117_spill] sm:$0xff] }
 0x346   :  { %10736 = vst [vmem:[#allocation91_spill] sm:$0xff] %v8220_v41  ;;  %10737 = vst [vmem:[#allocation80_spill] sm:$0xff] %v8222_v10  ;;  %v4584_v10 = vpop.eup %4583  ;;  %v1875_v21 = vmul.f32 1.442695, %v10754_v51 }
 0x347   :  { %v4586_v41 = vpop.eup %4585  ;;  %v2096_v17 = vsel %vm268_vm0, %v4584_v10, 0.0  ;;  %4603 = vpow2.f32 %v1849_v26 }
 0x348   :  { %2085 = vadd.xlane.f32.xlu1 %v2084_v20  ;;  %2118 = vadd.xlane.f32.xlu0 %v2117_v37  ;;  %v2129_v23 = vsel %vm268_vm0, %v4586_v41, 0.0  ;;  %v10751_v41 = vld [vmem:[#allocation106_spill] sm:$0xff]  ;;  %4605 = vpow2.f32 %v1871_v33 }
 0x349   :  { %v8228_v40 = vpop.xlane.xlu1 %1619  ;;  %v8230_v7 = vpop.xlane.xlu0 %1652  ;;  %v1853_v60 = vmul.f32 1.442695, %v10751_v41  ;;  %v10758_v41 = vld [vmem:[#allocation13_spill] sm:$0xff] }
 0x34a   :  { %10740 = vst [vmem:[#allocation93_spill] sm:$0xff] %v8228_v40  ;;  %10741 = vst [vmem:[#allocation82_spill] sm:$0xff] %v8230_v7  ;;  %v4588_v7 = vpop.eup %4587  ;;  %v1879_v33 = vmul.f32 1.442695, %v10758_v41 }
 0x34b   :  { %v4590_v40 = vpop.eup %4589  ;;  %v2102_v52 = vsel %vm268_vm0, %v4588_v7, 0.0  ;;  %4607 = vpow2.f32 %v1853_v60 }
 0x34c   :  { %2091 = vadd.xlane.f32.xlu1 %v2090_v28  ;;  %2124 = vadd.xlane.f32.xlu0 %v2123_v36  ;;  %v2135_v10 = vsel %vm268_vm0, %v4590_v40, 0.0  ;;  %v10755_v40 = vld [vmem:[#allocation5_spill] sm:$0xff]  ;;  %4609 = vpow2.f32 %v1875_v21 }
 0x34d   :  { %v8236_v20 = vpop.xlane.xlu1 %1625  ;;  %v8238_v37 = vpop.xlane.xlu0 %1658  ;;  %v1857_v26 = vmul.f32 1.442695, %v10755_v40  ;;  %v10762_v40 = vld [vmem:[#allocation119_spill] sm:$0xff] }
 0x34e   :  { %10744 = vst [vmem:[#allocation95_spill] sm:$0xff] %v8236_v20  ;;  %10745 = vst [vmem:[#allocation84_spill] sm:$0xff] %v8238_v37  ;;  %v4592_v37 = vpop.eup %4591  ;;  %v1883_v21 = vmul.f32 1.442695, %v10762_v40 }
 0x34f   :  { %v4594_v20 = vpop.eup %4593  ;;  %v2108_v39 = vsel %vm268_vm0, %v4592_v37, 0.0  ;;  %4611 = vpow2.f32 %v1857_v26 }
 0x350   :  { %2097 = vadd.xlane.f32.xlu1 %v2096_v17  ;;  %2130 = vadd.xlane.f32.xlu0 %v2129_v23  ;;  %v2141_v7 = vsel %vm268_vm0, %v4594_v20, 0.0  ;;  %v10759_v20 = vld [vmem:[#allocation107_spill] sm:$0xff]  ;;  %4613 = vpow2.f32 %v1879_v33 }
 0x351   :  { %v8244_v28 = vpop.xlane.xlu1 %1631  ;;  %v8246_v36 = vpop.xlane.xlu0 %1664  ;;  %v1861_v60 = vmul.f32 1.442695, %v10759_v20  ;;  %v10766_v20 = vld [vmem:[#allocation15_spill] sm:$0xff] }
 0x352   :  { %10748 = vst [vmem:[#allocation97_spill] sm:$0xff] %v8244_v28  ;;  %10749 = vst [vmem:[#allocation86_spill] sm:$0xff] %v8246_v36  ;;  %v4596_v36 = vpop.eup %4595  ;;  %v1887_v33 = vmul.f32 1.442695, %v10766_v20 }
 0x353   :  { %v4598_v28 = vpop.eup %4597  ;;  %v2114_v51 = vsel %vm268_vm0, %v4596_v36, 0.0  ;;  %4615 = vpow2.f32 %v1861_v60 }
 0x354   :  { %2103 = vadd.xlane.f32.xlu1 %v2102_v52  ;;  %2136 = vadd.xlane.f32.xlu0 %v2135_v10  ;;  %v2147_v37 = vsel %vm268_vm0, %v4598_v28, 0.0  ;;  %v10763_v28 = vld [vmem:[#allocation6_spill] sm:$0xff]  ;;  %4617 = vpow2.f32 %v1883_v21 }
 0x355   :  { %v8252_v17 = vpop.xlane.xlu1 %1637  ;;  %v8254_v23 = vpop.xlane.xlu0 %1670  ;;  %v1865_v26 = vmul.f32 1.442695, %v10763_v28  ;;  %v10770_v28 = vld [vmem:[#allocation121_spill] sm:$0xff] }
 0x356   :  { %10752 = vst [vmem:[#allocation99_spill] sm:$0xff] %v8252_v17  ;;  %10753 = vst [vmem:[#allocation88_spill] sm:$0xff] %v8254_v23  ;;  %v4600_v23 = vpop.eup %4599  ;;  %v1891_v21 = vmul.f32 1.442695, %v10770_v28 }
 0x357   :  { %v4602_v17 = vpop.eup %4601  ;;  %v2120_v41 = vsel %vm268_vm0, %v4600_v23, 0.0  ;;  %4619 = vpow2.f32 %v1865_v26 }
 0x358   :  { %2109 = vadd.xlane.f32.xlu1 %v2108_v39  ;;  %2142 = vadd.xlane.f32.xlu0 %v2141_v7  ;;  %v2153_v36 = vsel %vm268_vm0, %v4602_v17, 0.0  ;;  %v10767_v17 = vld [vmem:[#allocation108_spill] sm:$0xff]  ;;  %4621 = vpow2.f32 %v1887_v33 }
 0x359   :  { %v8260_v52 = vpop.xlane.xlu1 %1643  ;;  %v8262_v10 = vpop.xlane.xlu0 %1676  ;;  %v1869_v60 = vmul.f32 1.442695, %v10767_v17  ;;  %v10774_v17 = vld [vmem:[#allocation17_spill] sm:$0xff] }
 0x35a   :  { %10756 = vst [vmem:[#allocation101_spill] sm:$0xff] %v8260_v52  ;;  %10757 = vst [vmem:[#allocation151_spill] sm:$0xff] %v8262_v10  ;;  %v4604_v10 = vpop.eup %4603  ;;  %v1895_v33 = vmul.f32 1.442695, %v10774_v17 }
 0x35b   :  { %v4606_v52 = vpop.eup %4605  ;;  %v2126_v40 = vsel %vm268_vm0, %v4604_v10, 0.0  ;;  %4623 = vpow2.f32 %v1869_v60 }
 0x35c   :  { %2115 = vadd.xlane.f32.xlu1 %v2114_v51  ;;  %2148 = vadd.xlane.f32.xlu0 %v2147_v37  ;;  %v2159_v23 = vsel %vm268_vm0, %v4606_v52, 0.0  ;;  %v10771_v52 = vld [vmem:[#allocation7_spill] sm:$0xff]  ;;  %4625 = vpow2.f32 %v1891_v21 }
 0x35d   :  { %v8268_v39 = vpop.xlane.xlu1 %1649  ;;  %v8270_v7 = vpop.xlane.xlu0 %1682  ;;  %v1873_v26 = vmul.f32 1.442695, %v10771_v52  ;;  %v10778_v52 = vld [vmem:[#allocation123_spill] sm:$0xff] }
 0x35e   :  { %10760 = vst [vmem:[#allocation90_spill] sm:$0xff] %v8268_v39  ;;  %10761 = vst [vmem:[#allocation103_spill] sm:$0xff] %v8270_v7  ;;  %v4608_v7 = vpop.eup %4607  ;;  %v1899_v21 = vmul.f32 1.442695, %v10778_v52 }
 0x35f   :  { %v4610_v39 = vpop.eup %4609  ;;  %v2132_v20 = vsel %vm268_vm0, %v4608_v7, 0.0  ;;  %4627 = vpow2.f32 %v1873_v26 }
 0x360   :  { %2121 = vadd.xlane.f32.xlu1 %v2120_v41  ;;  %2154 = vadd.xlane.f32.xlu0 %v2153_v36  ;;  %v2165_v10 = vsel %vm268_vm0, %v4610_v39, 0.0  ;;  %v10775_v39 = vld [vmem:[#allocation109_spill] sm:$0xff]  ;;  %4629 = vpow2.f32 %v1895_v33 }
 0x361   :  { %v8276_v51 = vpop.xlane.xlu1 %1655  ;;  %v8278_v37 = vpop.xlane.xlu0 %1688  ;;  %v1877_v60 = vmul.f32 1.442695, %v10775_v39  ;;  %v10782_v39 = vld [vmem:[#allocation19_spill] sm:$0xff] }
 0x362   :  { %10764 = vst [vmem:[#allocation152_spill] sm:$0xff] %v8276_v51  ;;  %10765 = vst [vmem:[#allocation92_spill] sm:$0xff] %v8278_v37  ;;  %v4612_v37 = vpop.eup %4611  ;;  %v1903_v33 = vmul.f32 1.442695, %v10782_v39 }
 0x363   :  { %v4614_v51 = vpop.eup %4613  ;;  %v2138_v28 = vsel %vm268_vm0, %v4612_v37, 0.0  ;;  %4631 = vpow2.f32 %v1877_v60 }
 0x364   :  { %2127 = vadd.xlane.f32.xlu1 %v2126_v40  ;;  %2160 = vadd.xlane.f32.xlu0 %v2159_v23  ;;  %v2171_v7 = vsel %vm268_vm0, %v4614_v51, 0.0  ;;  %v10779_v51 = vld [vmem:[#allocation8_spill] sm:$0xff]  ;;  %4633 = vpow2.f32 %v1899_v21 }
 0x365   :  { %v8284_v41 = vpop.xlane.xlu1 %1661  ;;  %v8286_v36 = vpop.xlane.xlu0 %1694  ;;  %v1881_v26 = vmul.f32 1.442695, %v10779_v51  ;;  %v10786_v51 = vld [vmem:[#allocation125_spill] sm:$0xff] }
 0x366   :  { %10768 = vst [vmem:[#allocation105_spill] sm:$0xff] %v8284_v41  ;;  %10769 = vst [vmem:[#allocation153_spill] sm:$0xff] %v8286_v36  ;;  %v4616_v36 = vpop.eup %4615  ;;  %v1907_v21 = vmul.f32 1.442695, %v10786_v51 }
 0x367   :  { %v4618_v41 = vpop.eup %4617  ;;  %v2144_v17 = vsel %vm268_vm0, %v4616_v36, 0.0  ;;  %4635 = vpow2.f32 %v1881_v26 }
 0x368   :  { %2133 = vadd.xlane.f32.xlu1 %v2132_v20  ;;  %2166 = vadd.xlane.f32.xlu0 %v2165_v10  ;;  %v2177_v37 = vsel %vm268_vm0, %v4618_v41, 0.0  ;;  %v10783_v41 = vld [vmem:[#allocation110_spill] sm:$0xff]  ;;  %4637 = vpow2.f32 %v1903_v33 }
 0x369   :  { %v8292_v40 = vpop.xlane.xlu1 %1667  ;;  %v8294_v23 = vpop.xlane.xlu0 %1700  ;;  %v1885_v60 = vmul.f32 1.442695, %v10783_v41  ;;  %v10790_v41 = vld [vmem:[#allocation21_spill] sm:$0xff] }
 0x36a   :  { %10772 = vst [vmem:[#allocation94_spill] sm:$0xff] %v8292_v40  ;;  %10773 = vst [vmem:[#allocation96_spill] sm:$0xff] %v8294_v23  ;;  %v4620_v23 = vpop.eup %4619  ;;  %v1911_v33 = vmul.f32 1.442695, %v10790_v41 }
 0x36b   :  { %v4622_v40 = vpop.eup %4621  ;;  %v2150_v52 = vsel %vm268_vm0, %v4620_v23, 0.0  ;;  %4639 = vpow2.f32 %v1885_v60 }
 0x36c   :  { %2139 = vadd.xlane.f32.xlu1 %v2138_v28  ;;  %2172 = vadd.xlane.f32.xlu0 %v2171_v7  ;;  %v2183_v36 = vsel %vm268_vm0, %v4622_v40, 0.0  ;;  %v10787_v40 = vld [vmem:[#allocation9_spill] sm:$0xff]  ;;  %4641 = vpow2.f32 %v1907_v21 }
 0x36d   :  { %v8300_v20 = vpop.xlane.xlu1 %1673  ;;  %v8302_v10 = vpop.xlane.xlu0 %1706  ;;  %v1889_v26 = vmul.f32 1.442695, %v10787_v40  ;;  %v10794_v40 = vld [vmem:[#allocation127_spill] sm:$0xff] }
 0x36e   :  { %10776 = vst [vmem:[#allocation154_spill] sm:$0xff] %v8300_v20  ;;  %10777 = vst [vmem:[#allocation98_spill] sm:$0xff] %v8302_v10  ;;  %v4624_v10 = vpop.eup %4623  ;;  %v1915_v21 = vmul.f32 1.442695, %v10794_v40 }
 0x36f   :  { %v4626_v20 = vpop.eup %4625  ;;  %v2156_v39 = vsel %vm268_vm0, %v4624_v10, 0.0  ;;  %4643 = vpow2.f32 %v1889_v26 }
 0x370   :  { %2145 = vadd.xlane.f32.xlu1 %v2144_v17  ;;  %2178 = vadd.xlane.f32.xlu0 %v2177_v37  ;;  %v2189_v23 = vsel %vm268_vm0, %v4626_v20, 0.0  ;;  %v10791_v20 = vld [vmem:[#allocation111_spill] sm:$0xff]  ;;  %4645 = vpow2.f32 %v1911_v33 }
 0x371   :  { %v8308_v28 = vpop.xlane.xlu1 %1679  ;;  %v8310_v7 = vpop.xlane.xlu0 %1712  ;;  %v1893_v60 = vmul.f32 1.442695, %v10791_v20  ;;  %v10798_v20 = vld [vmem:[#allocation23_spill] sm:$0xff] }
 0x372   :  { %10780 = vst [vmem:[#allocation149_spill] sm:$0xff] %v8308_v28  ;;  %10781 = vst [vmem:[#allocation100_spill] sm:$0xff] %v8310_v7  ;;  %v4628_v7 = vpop.eup %4627  ;;  %v1919_v33 = vmul.f32 1.442695, %v10798_v20 }
 0x373   :  { %v4630_v28 = vpop.eup %4629  ;;  %v2162_v51 = vsel %vm268_vm0, %v4628_v7, 0.0  ;;  %4647 = vpow2.f32 %v1893_v60 }
 0x374   :  { %2151 = vadd.xlane.f32.xlu1 %v2150_v52  ;;  %2184 = vadd.xlane.f32.xlu0 %v2183_v36  ;;  %v2195_v10 = vsel %vm268_vm0, %v4630_v28, 0.0  ;;  %v10795_v28 = vld [vmem:[#allocation10_spill] sm:$0xff]  ;;  %4649 = vpow2.f32 %v1915_v21 }
 0x375   :  { %v8316_v17 = vpop.xlane.xlu1 %1685  ;;  %v8318_v37 = vpop.xlane.xlu0 %1718  ;;  %v1897_v26 = vmul.f32 1.442695, %v10795_v28  ;;  %v10802_v28 = vld [vmem:[#allocation129_spill] sm:$0xff] }
 0x376   :  { %10784 = vst [vmem:[#allocation155_spill] sm:$0xff] %v8316_v17  ;;  %10785 = vst [vmem:[#allocation156_spill] sm:$0xff] %v8318_v37  ;;  %v4632_v37 = vpop.eup %4631  ;;  %v1923_v21 = vmul.f32 1.442695, %v10802_v28 }
 0x377   :  { %v4634_v17 = vpop.eup %4633  ;;  %v2168_v41 = vsel %vm268_vm0, %v4632_v37, 0.0  ;;  %4651 = vpow2.f32 %v1897_v26 }
 0x378   :  { %2157 = vadd.xlane.f32.xlu1 %v2156_v39  ;;  %2190 = vadd.xlane.f32.xlu0 %v2189_v23  ;;  %v2201_v7 = vsel %vm268_vm0, %v4634_v17, 0.0  ;;  %v10799_v17 = vld [vmem:[#allocation112_spill] sm:$0xff]  ;;  %4653 = vpow2.f32 %v1919_v33 }
 0x379   :  { %v8324_v52 = vpop.xlane.xlu1 %1691  ;;  %v8326_v36 = vpop.xlane.xlu0 %1724  ;;  %v1901_v60 = vmul.f32 1.442695, %v10799_v17  ;;  %v10806_v17 = vld [vmem:[#allocation25_spill] sm:$0xff] }
 0x37a   :  { %10788 = vst [vmem:[#allocation102_spill] sm:$0xff] %v8324_v52  ;;  %10789 = vst [vmem:[#allocation157_spill] sm:$0xff] %v8326_v36  ;;  %v4636_v36 = vpop.eup %4635  ;;  %v1927_v33 = vmul.f32 1.442695, %v10806_v17 }
 0x37b   :  { %v4638_v52 = vpop.eup %4637  ;;  %v2174_v40 = vsel %vm268_vm0, %v4636_v36, 0.0  ;;  %4655 = vpow2.f32 %v1901_v60 }
 0x37c   :  { %2163 = vadd.xlane.f32.xlu1 %v2162_v51  ;;  %2196 = vadd.xlane.f32.xlu0 %v2195_v10  ;;  %v2207_v37 = vsel %vm268_vm0, %v4638_v52, 0.0  ;;  %v10803_v52 = vld [vmem:[#allocation12_spill] sm:$0xff]  ;;  %4657 = vpow2.f32 %v1923_v21 }
 0x37d   :  { %v8332_v39 = vpop.xlane.xlu1 %1697  ;;  %v8334_v23 = vpop.xlane.xlu0 %1730  ;;  %v1905_v26 = vmul.f32 1.442695, %v10803_v52  ;;  %v10810_v52 = vld [vmem:[#allocation131_spill] sm:$0xff] }
 0x37e   :  { %10792 = vst [vmem:[#allocation18_spill] sm:$0xff] %v8332_v39  ;;  %10793 = vst [vmem:[#allocation158_spill] sm:$0xff] %v8334_v23  ;;  %v4640_v23 = vpop.eup %4639  ;;  %v1931_v21 = vmul.f32 1.442695, %v10810_v52 }
 0x37f   :  { %v4642_v39 = vpop.eup %4641  ;;  %v2180_v20 = vsel %vm268_vm0, %v4640_v23, 0.0  ;;  %4659 = vpow2.f32 %v1905_v26 }
 0x380   :  { %2169 = vadd.xlane.f32.xlu1 %v2168_v41  ;;  %2202 = vadd.xlane.f32.xlu0 %v2201_v7  ;;  %v2213_v36 = vsel %vm268_vm0, %v4642_v39, 0.0  ;;  %v10807_v39 = vld [vmem:[#allocation113_spill] sm:$0xff]  ;;  %4661 = vpow2.f32 %v1927_v33 }
 0x381   :  { %v8340_v51 = vpop.xlane.xlu1 %1703  ;;  %v8342_v10 = vpop.xlane.xlu0 %1736  ;;  %v1909_v60 = vmul.f32 1.442695, %v10807_v39  ;;  %v10814_v39 = vld [vmem:[#allocation27_spill] sm:$0xff] }
 0x382   :  { %10796 = vst [vmem:[#allocation104_spill] sm:$0xff] %v8340_v51  ;;  %10797 = vst [vmem:[#allocation159_spill] sm:$0xff] %v8342_v10  ;;  %v4644_v10 = vpop.eup %4643  ;;  %v1935_v33 = vmul.f32 1.442695, %v10814_v39 }
 0x383   :  { %v4646_v51 = vpop.eup %4645  ;;  %v2186_v28 = vsel %vm268_vm0, %v4644_v10, 0.0  ;;  %4663 = vpow2.f32 %v1909_v60 }
 0x384   :  { %2175 = vadd.xlane.f32.xlu1 %v2174_v40  ;;  %2208 = vadd.xlane.f32.xlu0 %v2207_v37  ;;  %v2219_v23 = vsel %vm268_vm0, %v4646_v51, 0.0  ;;  %v10811_v51 = vld [vmem:[#allocation14_spill] sm:$0xff]  ;;  %4665 = vpow2.f32 %v1931_v21 }
 0x385   :  { %v8348_v41 = vpop.xlane.xlu1 %1709  ;;  %v8350_v7 = vpop.xlane.xlu0 %1742  ;;  %v1913_v26 = vmul.f32 1.442695, %v10811_v51  ;;  %v10818_v51 = vld [vmem:[#allocation133_spill] sm:$0xff] }
 0x386   :  { %10800 = vst [vmem:[#allocation160_spill] sm:$0xff] %v8348_v41  ;;  %10801 = vst [vmem:[#allocation161_spill] sm:$0xff] %v8350_v7  ;;  %v4648_v7 = vpop.eup %4647  ;;  %v1939_v21 = vmul.f32 1.442695, %v10818_v51 }
 0x387   :  { %v4650_v41 = vpop.eup %4649  ;;  %v2192_v17 = vsel %vm268_vm0, %v4648_v7, 0.0  ;;  %4667 = vpow2.f32 %v1913_v26 }
 0x388   :  { %2181 = vadd.xlane.f32.xlu1 %v2180_v20  ;;  %2214 = vadd.xlane.f32.xlu0 %v2213_v36  ;;  %v2225_v10 = vsel %vm268_vm0, %v4650_v41, 0.0  ;;  %v10815_v41 = vld [vmem:[#allocation114_spill] sm:$0xff]  ;;  %4669 = vpow2.f32 %v1935_v33 }
 0x389   :  { %v8356_v40 = vpop.xlane.xlu1 %1715  ;;  %v8358_v37 = vpop.xlane.xlu0 %1748  ;;  %v1917_v60 = vmul.f32 1.442695, %v10815_v41  ;;  %v10822_v41 = vld [vmem:[#allocation29_spill] sm:$0xff] }
 0x38a   :  { %10804 = vst [vmem:[#allocation162_spill] sm:$0xff] %v8356_v40  ;;  %10805 = vst [vmem:[#allocation163_spill] sm:$0xff] %v8358_v37  ;;  %v4652_v37 = vpop.eup %4651  ;;  %v1943_v33 = vmul.f32 1.442695, %v10822_v41 }
 0x38b   :  { %v4654_v40 = vpop.eup %4653  ;;  %v2198_v52 = vsel %vm268_vm0, %v4652_v37, 0.0  ;;  %4671 = vpow2.f32 %v1917_v60 }
 0x38c   :  { %2187 = vadd.xlane.f32.xlu1 %v2186_v28  ;;  %2220 = vadd.xlane.f32.xlu0 %v2219_v23  ;;  %v2231_v7 = vsel %vm268_vm0, %v4654_v40, 0.0  ;;  %v10819_v40 = vld [vmem:[#allocation16_spill] sm:$0xff]  ;;  %4673 = vpow2.f32 %v1939_v21 }
 0x38d   :  { %v8364_v20 = vpop.xlane.xlu1 %1721  ;;  %v8366_v36 = vpop.xlane.xlu0 %1754  ;;  %v1921_v26 = vmul.f32 1.442695, %v10819_v40  ;;  %v10826_v40 = vld [vmem:[#allocation135_spill] sm:$0xff] }
 0x38e   :  { %10808 = vst [vmem:[#allocation164_spill] sm:$0xff] %v8364_v20  ;;  %10809 = vst [vmem:[#allocation165_spill] sm:$0xff] %v8366_v36  ;;  %v4656_v36 = vpop.eup %4655  ;;  %v1947_v21 = vmul.f32 1.442695, %v10826_v40 }
 0x38f   :  { %v4658_v20 = vpop.eup %4657  ;;  %v2204_v39 = vsel %vm268_vm0, %v4656_v36, 0.0  ;;  %4675 = vpow2.f32 %v1921_v26 }
 0x390   :  { %2193 = vadd.xlane.f32.xlu1 %v2192_v17  ;;  %2226 = vadd.xlane.f32.xlu0 %v2225_v10  ;;  %v2237_v37 = vsel %vm268_vm0, %v4658_v20, 0.0  ;;  %v10823_v20 = vld [vmem:[#allocation115_spill] sm:$0xff]  ;;  %4677 = vpow2.f32 %v1943_v33 }
 0x391   :  { %v8372_v28 = vpop.xlane.xlu1 %1727  ;;  %v8374_v23 = vpop.xlane.xlu0 %1760  ;;  %v1925_v60 = vmul.f32 1.442695, %v10823_v20 }
 0x392   :  { %10812 = vst [vmem:[#allocation166_spill] sm:$0xff] %v8372_v28  ;;  %10813 = vst [vmem:[#allocation167_spill] sm:$0xff] %v8374_v23  ;;  %v4660_v23 = vpop.eup %4659 }
 0x393   :  { %v4662_v28 = vpop.eup %4661  ;;  %v2210_v51 = vsel %vm268_vm0, %v4660_v23, 0.0  ;;  %4679 = vpow2.f32 %v1925_v60 }
 0x394   :  { %2199 = vadd.xlane.f32.xlu1 %v2198_v52  ;;  %2232 = vadd.xlane.f32.xlu0 %v2231_v7  ;;  %v2243_v36 = vsel %vm268_vm0, %v4662_v28, 0.0  ;;  %v1929_v28 = vmul.f32 1.442695, %v7429_v5  ;;  %4681 = vpow2.f32 %v1947_v21 }
 0x395   :  { %v8380_v17 = vpop.xlane.xlu1 %1733  ;;  %v8382_v10 = vpop.xlane.xlu0 %1766 }
 0x396   :  { %10816 = vst [vmem:[#allocation168_spill] sm:$0xff] %v8380_v17  ;;  %10817 = vst [vmem:[#allocation169_spill] sm:$0xff] %v8382_v10  ;;  %v4664_v10 = vpop.eup %4663  ;;  %4683 = vpow2.f32 %v1929_v28 }
 0x397   :  { %v4666_v17 = vpop.eup %4665  ;;  %v2216_v41 = vsel %vm268_vm0, %v4664_v10, 0.0 }
 0x398   :  { %2205 = vadd.xlane.f32.xlu1 %v2204_v39  ;;  %2238 = vadd.xlane.f32.xlu0 %v2237_v37  ;;  %v2249_v23 = vsel %vm268_vm0, %v4666_v17, 0.0  ;;  %v10830_v17 = vld [vmem:[#allocation137_spill] sm:$0xff] }
 0x399   :  { %v8388_v52 = vpop.xlane.xlu1 %1739  ;;  %v8390_v7 = vpop.xlane.xlu0 %1772  ;;  %v1933_v60 = vmul.f32 1.442695, %v10830_v17  ;;  %v10837_v17 = vld [vmem:[#allocation139_spill] sm:$0xff] }
 0x39a   :  { %10820 = vst [vmem:[#allocation170_spill] sm:$0xff] %v8388_v52  ;;  %10821 = vst [vmem:[#allocation171_spill] sm:$0xff] %v8390_v7  ;;  %v4668_v7 = vpop.eup %4667 }
 0x39b   :  { %v4670_v52 = vpop.eup %4669  ;;  %v2222_v40 = vsel %vm268_vm0, %v4668_v7, 0.0 }
 0x39c   :  { %2211 = vadd.xlane.f32.xlu1 %v2210_v51  ;;  %2244 = vadd.xlane.f32.xlu0 %v2243_v36  ;;  %v10829_v36 = vld [vmem:[#allocation31_spill] sm:$0xff]  ;;  %v4672_v20 = vpop.eup %4671  ;;  %v2255_v10 = vsel %vm268_vm0, %v4670_v52, 0.0  ;;  %v10834_v52 = vld [vmem:[#allocation118_spill] sm:$0xff] }
 0x39d   :  { %v8396_v39 = vpop.xlane.xlu1 %1745  ;;  %v8398_v37 = vpop.xlane.xlu0 %1778  ;;  %v1951_v33 = vmul.f32 1.442695, %v10829_v36  ;;  %v2228_v36 = vsel %vm268_vm0, %v4672_v20, 0.0  ;;  %v1937_v28 = vmul.f32 1.442695, %v10834_v52 }
 0x39e   :  { %10824 = vst [vmem:[#allocation172_spill] sm:$0xff] %v8396_v39  ;;  %10825 = vst [vmem:[#allocation173_spill] sm:$0xff] %v8398_v37  ;;  %v4674_v39 = vpop.eup %4673 }
 0x39f   :  { %4685 = vpow2.f32 %v1951_v33  ;;  %v2261_v7 = vsel %vm268_vm0, %v4674_v39, 0.0  ;;  %v1959_v33 = vmul.f32 1.442695, %v10837_v17  ;;  %v1941_v39 = vmul.f32 1.442695, %v7499_v56 }
 0x3a0   :  { %2217 = vadd.xlane.f32.xlu1 %v2216_v41  ;;  %2250 = vadd.xlane.f32.xlu0 %v2249_v23  ;;  %v10833_v23 = vld [vmem:[#allocation20_spill] sm:$0xff]  ;;  %4687 = vpow2.f32 %v1933_v60 }
 0x3a1   :  { %v8404_v26 = vpop.xlane.xlu1 %1751  ;;  %v8406_v51 = vpop.xlane.xlu0 %1784  ;;  %v1955_v21 = vmul.f32 1.442695, %v10833_v23 }
 0x3a2   :  { %10827 = vst [vmem:[#allocation11_spill] sm:$0xff] %v8404_v26  ;;  %10828 = vst [vmem:[#allocation106_spill] sm:$0xff] %v8406_v51  ;;  %v4676_v26 = vpop.eup %4675 }
 0x3a3   :  { %v4678_v51 = vpop.eup %4677  ;;  %4689 = vpow2.f32 %v1955_v21  ;;  %v2234_v23 = vsel %vm268_vm0, %v4676_v26, 0.0 }
 0x3a4   :  { %2223 = vadd.xlane.f32.xlu1 %v2222_v40  ;;  %2256 = vadd.xlane.f32.xlu0 %v2255_v10  ;;  %v2267_v20 = vsel %vm268_vm0, %v4678_v51, 0.0  ;;  %4691 = vpow2.f32 %v1937_v28  ;;  %v10841_v51 = vld [vmem:[#allocation141_spill] sm:$0xff] }
 0x3a5   :  { %v8412_v41 = vpop.xlane.xlu1 %1757  ;;  %v8414_v5 = vpop.xlane.xlu0 %1790  ;;  %4693 = vpow2.f32 %v1959_v33  ;;  %v1945_v28 = vmul.f32 1.442695, %v10841_v51  ;;  %v10846_v51 = vld [vmem:[#allocation26_spill] sm:$0xff] }
 0x3a6   :  { %10831 = vst [vmem:[#allocation117_spill] sm:$0xff] %v8412_v41  ;;  %10832 = vst [vmem:[#allocation5_spill] sm:$0xff] %v8414_v5  ;;  %v4680_v5 = vpop.eup %4679  ;;  %4695 = vpow2.f32 %v1941_v39 }
 0x3a7   :  { %v4682_v41 = vpop.eup %4681  ;;  %v2240_v17 = vsel %vm268_vm0, %v4680_v5, 0.0 }
 0x3a8   :  { %2229 = vadd.xlane.f32.xlu1 %v2228_v36  ;;  %2262 = vadd.xlane.f32.xlu0 %v2261_v7  ;;  %v10840_v7 = vld [vmem:[#allocation35_spill] sm:$0xff]  ;;  %v4684_v52 = vpop.eup %4683  ;;  %v2273_v26 = vsel %vm268_vm0, %v4682_v41, 0.0  ;;  %v10844_v41 = vld [vmem:[#allocation122_spill] sm:$0xff] }
 0x3a9   :  { %v8420_v40 = vpop.xlane.xlu1 %1763  ;;  %v8422_v10 = vpop.xlane.xlu0 %1796  ;;  %v1963_v21 = vmul.f32 1.442695, %v10840_v7  ;;  %v2246_v7 = vsel %vm268_vm0, %v4684_v52, 0.0  ;;  %v1949_v39 = vmul.f32 1.442695, %v10844_v41 }
 0x3aa   :  { %10835 = vst [vmem:[#allocation13_spill] sm:$0xff] %v8420_v40  ;;  %10836 = vst [vmem:[#allocation107_spill] sm:$0xff] %v8422_v10  ;;  %v4686_v10 = vpop.eup %4685 }
 0x3ab   :  { %4697 = vpow2.f32 %v1963_v21  ;;  %v2279_v5 = vsel %vm268_vm0, %v4686_v10, 0.0  ;;  %v1971_v21 = vmul.f32 1.442695, %v10846_v51  ;;  %v1953_v10 = vmul.f32 1.442695, %v7569_v11 }
 0x3ac   :  { %2235 = vadd.xlane.f32.xlu1 %v2234_v23  ;;  %2268 = vadd.xlane.f32.xlu0 %v2267_v20  ;;  %v10843_v20 = vld [vmem:[#allocation24_spill] sm:$0xff]  ;;  %4699 = vpow2.f32 %v1945_v28 }
 0x3ad   :  { %v8428_v60 = vpop.xlane.xlu1 %1769  ;;  %v8430_v36 = vpop.xlane.xlu0 %1802  ;;  %v1967_v33 = vmul.f32 1.442695, %v10843_v20 }
 0x3ae   :  { %10838 = vst [vmem:[#allocation119_spill] sm:$0xff] %v8428_v60  ;;  %10839 = vst [vmem:[#allocation6_spill] sm:$0xff] %v8430_v36  ;;  %v4688_v36 = vpop.eup %4687 }
 0x3af   :  { %v4690_v60 = vpop.eup %4689  ;;  %4701 = vpow2.f32 %v1967_v33  ;;  %v2252_v20 = vsel %vm268_vm0, %v4688_v36, 0.0 }
 0x3b0   :  { %2241 = vadd.xlane.f32.xlu1 %v2240_v17  ;;  %2274 = vadd.xlane.f32.xlu0 %v2273_v26  ;;  %v2285_v52 = vsel %vm268_vm0, %v4690_v60, 0.0  ;;  %4703 = vpow2.f32 %v1949_v39  ;;  %v1957_v60 = vmul.f32 1.442695, %v7593_v18 }
 0x3b1   :  { %v8436_v23 = vpop.xlane.xlu1 %1775  ;;  %v8438_v56 = vpop.xlane.xlu0 %2064  ;;  %4705 = vpow2.f32 %v1971_v21  ;;  %v1979_v21 = vmul.f32 1.442695, %v7599_v42 }
 0x3b2   :  { %10842 = vst [vmem:[#allocation15_spill] sm:$0xff] %v8436_v23  ;;  %v4692_v23 = vpop.eup %4691  ;;  %4707 = vpow2.f32 %v1953_v10 }
 0x3b3   :  { %v4694_v40 = vpop.eup %4693  ;;  %v2258_v51 = vsel %vm268_vm0, %v4692_v23, 0.0 }
 0x3b4   :  { %2247 = vadd.xlane.f32.xlu1 %v2246_v7  ;;  %2280 = vadd.xlane.f32.xlu0 %v2279_v5  ;;  %v10848_v5 = vld [vmem:[#allocation124_spill] sm:$0xff]  ;;  %v4696_v41 = vpop.eup %4695  ;;  %v2291_v36 = vsel %vm268_vm0, %v4694_v40, 0.0  ;;  %v1961_v40 = vmul.f32 1.442695, %v7617_v35 }
 0x3b5   :  { %v8444_v17 = vpop.xlane.xlu1 %1781  ;;  %v8446_v26 = vpop.xlane.xlu0 %2070  ;;  %v1975_v33 = vmul.f32 1.442695, %v10848_v5 }
 0x3b6   :  { %10845 = vst [vmem:[#allocation108_spill] sm:$0xff] %v8444_v17  ;;  %v4698_v17 = vpop.eup %4697 }
 0x3b7   :  { %4709 = vpow2.f32 %v1975_v33  ;;  %v2297_v23 = vsel %vm268_vm0, %v4698_v17, 0.0  ;;  %v1983_v33 = vmul.f32 1.442695, %v7623_v13  ;;  %v1965_v17 = vmul.f32 1.442695, %v7641_v47 }
 0x3b8   :  { %2253 = vadd.xlane.f32.xlu1 %v2252_v20  ;;  %2286 = vadd.xlane.f32.xlu0 %v2285_v52  ;;  %v4700_v20 = vpop.eup %4699  ;;  %v2264_v52 = vsel %vm268_vm0, %v4696_v41, 0.0  ;;  %4711 = vpow2.f32 %v1957_v60 }
 0x3b9   :  { %v8452_v28 = vpop.xlane.xlu1 %1787  ;;  %v8454_v7 = vpop.xlane.xlu0 %2076  ;;  %4713 = vpow2.f32 %v1979_v21  ;;  %v2270_v42 = vsel %vm268_vm0, %v4700_v20, 0.0  ;;  %v1987_v21 = vmul.f32 1.442695, %v7647_v22 }
 0x3ba   :  { %10847 = vst [vmem:[#allocation121_spill] sm:$0xff] %v8452_v28  ;;  %v4702_v5 = vpop.eup %4701  ;;  %4715 = vpow2.f32 %v1961_v40 }
 0x3bb   :  { %v2303_v41 = vsel %vm268_vm0, %v4702_v5, 0.0  ;;  %4717 = vpow2.f32 %v1983_v33  ;;  %v1969_v5 = vmul.f32 1.442695, %v7665_v27  ;;  %v1991_v33 = vmul.f32 1.442695, %v7671_v8 }
 0x3bc   :  { %2259 = vadd.xlane.f32.xlu1 %v2258_v51  ;;  %2292 = vadd.xlane.f32.xlu0 %v2291_v36  ;;  %v4704_v51 = vpop.eup %4703  ;;  %4719 = vpow2.f32 %v1965_v17 }
 0x3bd   :  { %v8460_v39 = vpop.xlane.xlu1 %1793  ;;  %v8462_v11 = vpop.xlane.xlu0 %2082  ;;  %v2276_v13 = vsel %vm268_vm0, %v4704_v51, 0.0  ;;  %4721 = vpow2.f32 %v1987_v21  ;;  %v1995_v21 = vmul.f32 1.442695, %v7695_v2 }
 0x3be   :  { %10849 = vst [vmem:[#allocation7_spill] sm:$0xff] %v8460_v39  ;;  %v4706_v36 = vpop.eup %4705  ;;  %4723 = vpow2.f32 %v1969_v5 }
 0x3bf   :  { %v2309_v20 = vsel %vm268_vm0, %v4706_v36, 0.0  ;;  %v1973_v36 = vmul.f32 1.442695, %v7689_v16  ;;  %4725 = vpow2.f32 %v1991_v33  ;;  %v1999_v33 = vmul.f32 1.442695, %v7719_v53 }
 0x3c0   :  { %2265 = vadd.xlane.f32.xlu1 %v2264_v52  ;;  %2298 = vadd.xlane.f32.xlu0 %v2297_v23  ;;  %v4708_v52 = vpop.eup %4707 }
 0x3c1   :  { %v8468_v10 = vpop.xlane.xlu1 %1799  ;;  %v8470_v18 = vpop.xlane.xlu0 %2088  ;;  %v2282_v22 = vsel %vm268_vm0, %v4708_v52, 0.0  ;;  %4727 = vpow2.f32 %v1973_v36 }
 0x3c2   :  { %10850 = vst [vmem:[#allocation17_spill] sm:$0xff] %v8468_v10  ;;  %v4710_v23 = vpop.eup %4709  ;;  %4729 = vpow2.f32 %v1995_v21  ;;  %v2003_v21 = vmul.f32 1.442695, %v7743_v38 }
 0x3c3   :  { %v2315_v51 = vsel %vm268_vm0, %v4710_v23, 0.0  ;;  %v1977_v23 = vmul.f32 1.442695, %v7713_v54 }
 0x3c4   :  { %2271 = vadd.xlane.f32.xlu1 %v2270_v42  ;;  %2304 = vadd.xlane.f32.xlu0 %v2303_v41  ;;  %v4712_v42 = vpop.eup %4711 }
 0x3c5   :  { %v8476_v60 = vpop.xlane.xlu1 %1805  ;;  %v8478_v35 = vpop.xlane.xlu0 %2094  ;;  %v2288_v8 = vsel %vm268_vm0, %v4712_v42, 0.0  ;;  %4731 = vpow2.f32 %v1977_v23 }
 0x3c6   :  { %10851 = vst [vmem:[#allocation109_spill] sm:$0xff] %v8476_v60  ;;  %v4714_v41 = vpop.eup %4713  ;;  %4733 = vpow2.f32 %v1999_v33  ;;  %v2007_v33 = vmul.f32 1.442695, %v7767_v34 }
 0x3c7   :  { %v2321_v52 = vsel %vm268_vm0, %v4714_v41, 0.0  ;;  %v1981_v41 = vmul.f32 1.442695, %v7737_v62 }
 0x3c8   :  { %2277 = vadd.xlane.f32.xlu1 %v2276_v13  ;;  %2310 = vadd.xlane.f32.xlu0 %v2309_v20  ;;  %v4716_v13 = vpop.eup %4715 }
 0x3c9   :  { %v8484_v40 = vpop.xlane.xlu1 %2067  ;;  %v8486_v47 = vpop.xlane.xlu0 %2100  ;;  %v2294_v2 = vsel %vm268_vm0, %v4716_v13, 0.0  ;;  %4735 = vpow2.f32 %v1981_v41 }
 0x3ca   :  { %v4718_v20 = vpop.eup %4717  ;;  %4737 = vpow2.f32 %v2003_v21  ;;  %v2011_v21 = vmul.f32 1.442695, %v7791_v31 }
 0x3cb   :  { %v2327_v42 = vsel %vm268_vm0, %v4718_v20, 0.0  ;;  %v1985_v20 = vmul.f32 1.442695, %v7761_v50 }
 0x3cc   :  { %2283 = vadd.xlane.f32.xlu1 %v2282_v22  ;;  %2316 = vadd.xlane.f32.xlu0 %v2315_v51  ;;  %v4720_v22 = vpop.eup %4719 }
 0x3cd   :  { %v8492_v17 = vpop.xlane.xlu1 %2073  ;;  %v8494_v27 = vpop.xlane.xlu0 %2106  ;;  %v2300_v53 = vsel %vm268_vm0, %v4720_v22, 0.0  ;;  %4739 = vpow2.f32 %v1985_v20 }
 0x3ce   :  { %v4722_v51 = vpop.eup %4721  ;;  %4741 = vpow2.f32 %v2007_v33  ;;  %v2015_v33 = vmul.f32 1.442695, %v7815_v25 }
 0x3cf   :  { %v2333_v13 = vsel %vm268_vm0, %v4722_v51, 0.0  ;;  %v1989_v51 = vmul.f32 1.442695, %v7785_v63 }
 0x3d0   :  { %2289 = vadd.xlane.f32.xlu1 %v2288_v8  ;;  %2322 = vadd.xlane.f32.xlu0 %v2321_v52  ;;  %v4724_v8 = vpop.eup %4723 }
 0x3d1   :  { %v8500_v5 = vpop.xlane.xlu1 %2079  ;;  %v8502_v16 = vpop.xlane.xlu0 %2112  ;;  %v2306_v38 = vsel %vm268_vm0, %v4724_v8, 0.0  ;;  %4743 = vpow2.f32 %v1989_v51 }
 0x3d2   :  { %v4726_v52 = vpop.eup %4725  ;;  %4745 = vpow2.f32 %v2011_v21  ;;  %v2019_v21 = vmul.f32 1.442695, %v7839_v49 }
 0x3d3   :  { %v2339_v22 = vsel %vm268_vm0, %v4726_v52, 0.0  ;;  %v1993_v52 = vmul.f32 1.442695, %v7809_v19 }
 0x3d4   :  { %2295 = vadd.xlane.f32.xlu1 %v2294_v2  ;;  %2328 = vadd.xlane.f32.xlu0 %v2327_v42  ;;  %v4728_v2 = vpop.eup %4727 }
 0x3d5   :  { %v8508_v36 = vpop.xlane.xlu1 %2085  ;;  %v8510_v54 = vpop.xlane.xlu0 %2118  ;;  %v2312_v34 = vsel %vm268_vm0, %v4728_v2, 0.0  ;;  %4747 = vpow2.f32 %v1993_v52 }
 0x3d6   :  { %v4730_v42 = vpop.eup %4729  ;;  %4749 = vpow2.f32 %v2015_v33  ;;  %v2023_v33 = vmul.f32 1.442695, %v7863_v57 }
 0x3d7   :  { %v2345_v8 = vsel %vm268_vm0, %v4730_v42, 0.0  ;;  %v1997_v42 = vmul.f32 1.442695, %v7833_v43 }
 0x3d8   :  { %2301 = vadd.xlane.f32.xlu1 %v2300_v53  ;;  %2334 = vadd.xlane.f32.xlu0 %v2333_v13  ;;  %v4732_v53 = vpop.eup %4731 }
 0x3d9   :  { %v8516_v23 = vpop.xlane.xlu1 %2091  ;;  %v8518_v62 = vpop.xlane.xlu0 %2124  ;;  %v2318_v31 = vsel %vm268_vm0, %v4732_v53, 0.0  ;;  %4751 = vpow2.f32 %v1997_v42 }
 0x3da   :  { %v4734_v13 = vpop.eup %4733  ;;  %4753 = vpow2.f32 %v2019_v21  ;;  %v2027_v21 = vmul.f32 1.442695, %v7887_v3 }
 0x3db   :  { %v2351_v2 = vsel %vm268_vm0, %v4734_v13, 0.0  ;;  %v2001_v13 = vmul.f32 1.442695, %v7857_v59 }
 0x3dc   :  { %2307 = vadd.xlane.f32.xlu1 %v2306_v38  ;;  %2340 = vadd.xlane.f32.xlu0 %v2339_v22  ;;  %v4736_v38 = vpop.eup %4735 }
 0x3dd   :  { %v8524_v41 = vpop.xlane.xlu1 %2097  ;;  %v8526_v50 = vpop.xlane.xlu0 %2130  ;;  %v2324_v25 = vsel %vm268_vm0, %v4736_v38, 0.0  ;;  %4755 = vpow2.f32 %v2001_v13 }
 0x3de   :  { %v4738_v22 = vpop.eup %4737  ;;  %4757 = vpow2.f32 %v2023_v33  ;;  %v2031_v33 = vmul.f32 1.442695, %v7911_v48 }
 0x3df   :  { %v2357_v53 = vsel %vm268_vm0, %v4738_v22, 0.0  ;;  %v2005_v22 = vmul.f32 1.442695, %v7881_v0 }
 0x3e0   :  { %2313 = vadd.xlane.f32.xlu1 %v2312_v34  ;;  %2346 = vadd.xlane.f32.xlu0 %v2345_v8  ;;  %v4740_v34 = vpop.eup %4739 }
 0x3e1   :  { %v8532_v20 = vpop.xlane.xlu1 %2103  ;;  %v8534_v63 = vpop.xlane.xlu0 %2136  ;;  %v2330_v49 = vsel %vm268_vm0, %v4740_v34, 0.0  ;;  %4759 = vpow2.f32 %v2005_v22 }
 0x3e2   :  { %v4742_v8 = vpop.eup %4741  ;;  %4761 = vpow2.f32 %v2027_v21  ;;  %v2035_v21 = vmul.f32 1.442695, %v7935_v4 }
 0x3e3   :  { %v2363_v38 = vsel %vm268_vm0, %v4742_v8, 0.0  ;;  %v2009_v8 = vmul.f32 1.442695, %v7905_v29 }
 0x3e4   :  { %2319 = vadd.xlane.f32.xlu1 %v2318_v31  ;;  %2352 = vadd.xlane.f32.xlu0 %v2351_v2  ;;  %v4744_v31 = vpop.eup %4743 }
 0x3e5   :  { %v8540_v51 = vpop.xlane.xlu1 %2109  ;;  %v8542_v19 = vpop.xlane.xlu0 %2142  ;;  %v2336_v57 = vsel %vm268_vm0, %v4744_v31, 0.0  ;;  %4763 = vpow2.f32 %v2009_v8 }
 0x3e6   :  { %v4746_v2 = vpop.eup %4745  ;;  %4765 = vpow2.f32 %v2031_v33  ;;  %v2039_v33 = vmul.f32 1.442695, %v7959_v30 }
 0x3e7   :  { %v2369_v34 = vsel %vm268_vm0, %v4746_v2, 0.0  ;;  %v2013_v2 = vmul.f32 1.442695, %v7929_v12 }
 0x3e8   :  { %2325 = vadd.xlane.f32.xlu1 %v2324_v25  ;;  %2358 = vadd.xlane.f32.xlu0 %v2357_v53  ;;  %v4748_v25 = vpop.eup %4747 }
 0x3e9   :  { %v8548_v52 = vpop.xlane.xlu1 %2115  ;;  %v8550_v43 = vpop.xlane.xlu0 %2148  ;;  %v2342_v3 = vsel %vm268_vm0, %v4748_v25, 0.0  ;;  %4767 = vpow2.f32 %v2013_v2 }
 0x3ea   :  { %v4750_v53 = vpop.eup %4749  ;;  %4769 = vpow2.f32 %v2035_v21  ;;  %v2043_v21 = vmul.f32 1.442695, %v7983_v55 }
 0x3eb   :  { %v2375_v31 = vsel %vm268_vm0, %v4750_v53, 0.0  ;;  %v2017_v53 = vmul.f32 1.442695, %v7953_v32 }
 0x3ec   :  { %2331 = vadd.xlane.f32.xlu1 %v2330_v49  ;;  %2364 = vadd.xlane.f32.xlu0 %v2363_v38  ;;  %v4752_v49 = vpop.eup %4751 }
 0x3ed   :  { %v8556_v42 = vpop.xlane.xlu1 %2121  ;;  %v8558_v59 = vpop.xlane.xlu0 %2154  ;;  %v2348_v48 = vsel %vm268_vm0, %v4752_v49, 0.0  ;;  %4771 = vpow2.f32 %v2017_v53 }
 0x3ee   :  { %v4754_v38 = vpop.eup %4753  ;;  %4773 = vpow2.f32 %v2039_v33  ;;  %v2047_v33 = vmul.f32 1.442695, %v8007_v45 }
 0x3ef   :  { %v2381_v25 = vsel %vm268_vm0, %v4754_v38, 0.0  ;;  %v2021_v38 = vmul.f32 1.442695, %v7977_v14 }
 0x3f0   :  { %2337 = vadd.xlane.f32.xlu1 %v2336_v57  ;;  %2370 = vadd.xlane.f32.xlu0 %v2369_v34  ;;  %v4756_v57 = vpop.eup %4755 }
 0x3f1   :  { %v8564_v13 = vpop.xlane.xlu1 %2127  ;;  %v8566_v0 = vpop.xlane.xlu0 %2160  ;;  %v2354_v4 = vsel %vm268_vm0, %v4756_v57, 0.0  ;;  %4775 = vpow2.f32 %v2021_v38 }
 0x3f2   :  { %v4758_v34 = vpop.eup %4757  ;;  %4777 = vpow2.f32 %v2043_v21  ;;  %v2051_v21 = vmul.f32 1.442695, %v8032_v6 }
 0x3f3   :  { %v2387_v49 = vsel %vm268_vm0, %v4758_v34, 0.0  ;;  %v2025_v34 = vmul.f32 1.442695, %v8001_v24 }
 0x3f4   :  { %2343 = vadd.xlane.f32.xlu1 %v2342_v3  ;;  %2376 = vadd.xlane.f32.xlu0 %v2375_v31  ;;  %v4760_v3 = vpop.eup %4759 }
 0x3f5   :  { %v8572_v22 = vpop.xlane.xlu1 %2133  ;;  %v8574_v29 = vpop.xlane.xlu0 %2166  ;;  %v2360_v30 = vsel %vm268_vm0, %v4760_v3, 0.0  ;;  %4779 = vpow2.f32 %v2025_v34 }
 0x3f6   :  { %v4762_v31 = vpop.eup %4761  ;;  %4781 = vpow2.f32 %v2047_v33  ;;  %v2055_v33 = vmul.f32 1.442695, %v8057_v44 }
 0x3f7   :  { %v2393_v57 = vsel %vm268_vm0, %v4762_v31, 0.0  ;;  %v2029_v31 = vmul.f32 1.442695, %v8026_v61 }
 0x3f8   :  { %2349 = vadd.xlane.f32.xlu1 %v2348_v48  ;;  %2382 = vadd.xlane.f32.xlu0 %v2381_v25  ;;  %v4764_v48 = vpop.eup %4763 }
 0x3f9   :  { %v8580_v8 = vpop.xlane.xlu1 %2139  ;;  %v8582_v12 = vpop.xlane.xlu0 %2172  ;;  %v2366_v55 = vsel %vm268_vm0, %v4764_v48, 0.0  ;;  %4783 = vpow2.f32 %v2029_v31 }
 0x3fa   :  { %v4766_v25 = vpop.eup %4765  ;;  %4785 = vpow2.f32 %v2051_v21 }
 0x3fb   :  { %v2399_v3 = vsel %vm268_vm0, %v4766_v25, 0.0  ;;  %v2033_v25 = vmul.f32 1.442695, %v8051_v1 }
 0x3fc   :  { %2355 = vadd.xlane.f32.xlu1 %v2354_v4  ;;  %2388 = vadd.xlane.f32.xlu0 %v2387_v49  ;;  %v4768_v4 = vpop.eup %4767 }
 0x3fd   :  { %v8588_v2 = vpop.xlane.xlu1 %2145  ;;  %v8590_v32 = vpop.xlane.xlu0 %2178  ;;  %v2372_v45 = vsel %vm268_vm0, %v4768_v4, 0.0  ;;  %4787 = vpow2.f32 %v2033_v25 }
 0x3fe   :  { %v4770_v49 = vpop.eup %4769  ;;  %4789 = vpow2.f32 %v2055_v33 }
 0x3ff   :  { %v2405_v48 = vsel %vm268_vm0, %v4770_v49, 0.0  ;;  %v10852_v49 = vld [vmem:[#allocation67_spill] sm:$0xff] }
 0x400   :  { %2361 = vadd.xlane.f32.xlu1 %v2360_v30  ;;  %2394 = vadd.xlane.f32.xlu0 %v2393_v57  ;;  %v4772_v30 = vpop.eup %4771  ;;  %v2037_v31 = vmul.f32 1.442695, %v10852_v49 }
 0x401   :  { %v8596_v53 = vpop.xlane.xlu1 %2151  ;;  %v8598_v14 = vpop.xlane.xlu0 %2184  ;;  %v2378_v6 = vsel %vm268_vm0, %v4772_v30, 0.0 }
 0x402   :  { %v4774_v57 = vpop.eup %4773  ;;  %4791 = vpow2.f32 %v2037_v31  ;;  %v2045_v31 = vmul.f32 1.442695, %v8115_v15 }
 0x403   :  { %v2411_v4 = vsel %vm268_vm0, %v4774_v57, 0.0 }
 0x404   :  { %2367 = vadd.xlane.f32.xlu1 %v2366_v55  ;;  %2400 = vadd.xlane.f32.xlu0 %v2399_v3  ;;  %v4776_v55 = vpop.eup %4775 }
 0x405   :  { %v8604_v38 = vpop.xlane.xlu1 %2157  ;;  %v8606_v24 = vpop.xlane.xlu0 %2190  ;;  %v2384_v44 = vsel %vm268_vm0, %v4776_v55, 0.0 }
 0x406   :  { %v4778_v3 = vpop.eup %4777 }
 0x407   :  { %v4780_v10 = vpop.eup %4779  ;;  %v2417_v30 = vsel %vm268_vm0, %v4778_v3, 0.0 }
 0x408   :  { %2373 = vadd.xlane.f32.xlu1 %v2372_v45  ;;  %2406 = vadd.xlane.f32.xlu0 %v2405_v48  ;;  %v10853_v48 = vld [vmem:[#allocation56_spill] sm:$0xff]  ;;  %v4782_v39 = vpop.eup %4781  ;;  %v2390_v33 = vsel %vm268_vm0, %v4780_v10, 0.0 }
 0x409   :  { %v8612_v34 = vpop.xlane.xlu1 %2163  ;;  %v8614_v61 = vpop.xlane.xlu0 %2196  ;;  %v2059_v21 = vmul.f32 1.442695, %v10853_v48  ;;  %v2423_v49 = vsel %vm268_vm0, %v4782_v39, 0.0 }
 0x40b   :  { %4793 = vpow2.f32 %v2059_v21 }
 0x40c   :  { %2379 = vadd.xlane.f32.xlu1 %v2378_v6  ;;  %2412 = vadd.xlane.f32.xlu0 %v2411_v4  ;;  %v2041_v6 = vmul.f32 1.442695, %v8099_v46  ;;  %v4784_v4 = vpop.eup %4783 }
 0x40d   :  { %v8620_v45 = vpop.xlane.xlu1 %2169  ;;  %v8622_v1 = vpop.xlane.xlu0 %2202 }
 0x40e   :  { %v4786_v48 = vpop.eup %4785  ;;  %4795 = vpow2.f32 %v2041_v6 }
 0x40f   :  { %v2429_v46 = vsel %vm268_vm0, %v4786_v48, 0.0  ;;  %4797 = vpow2.f32 %v2045_v31 }
 0x410   :  { %2385 = vadd.xlane.f32.xlu1 %v2384_v44  ;;  %2418 = vadd.xlane.f32.xlu0 %v2417_v30  ;;  %v4788_v44 = vpop.eup %4787  ;;  %v2396_v30 = vsel %vm268_vm0, %v4784_v4, 0.0  ;;  %4799 = vlog2.f32 %v8438_v56 }
 0x411   :  { %v8627_v57 = vpop.xlane.xlu1 %2175  ;;  %v8629_v25 = vpop.xlane.xlu0 %2208  ;;  %v2402_v6 = vsel %vm268_vm0, %v4788_v44, 0.0 }
 0x412   :  { %v4790_v21 = vpop.eup %4789 }
 0x413   :  { %v2435_v15 = vsel %vm268_vm0, %v4790_v21, 0.0  ;;  %v10856_v21 = vld [vmem:[#allocation79_spill] sm:$0xff] }
 0x414   :  { %2391 = vadd.xlane.f32.xlu1 %v2390_v33  ;;  %2424 = vadd.xlane.f32.xlu0 %v2423_v49  ;;  %v2049_v33 = vmul.f32 1.442695, %v8131_v9  ;;  %v4792_v49 = vpop.eup %4791 }
 0x415   :  { %v8634_v55 = vpop.xlane.xlu1 %2181  ;;  %v8636_v3 = vpop.xlane.xlu0 %2214  ;;  %v2408_v31 = vsel %vm268_vm0, %v4792_v49, 0.0  ;;  %v10858_v49 = vld [vmem:[#allocation70_spill] sm:$0xff] }
 0x416   :  { %v4794_v60 = vpop.eup %4793  ;;  %4801 = vpow2.f32 %v2049_v33 }
 0x417   :  { %v2441_v9 = vsel %vm268_vm0, %v4794_v60, 0.0  ;;  %4803 = vlog2.f32 %v8492_v17 }
 0x418   :  { %2397 = vadd.xlane.f32.xlu1 %v2396_v30  ;;  %2430 = vadd.xlane.f32.xlu0 %v2429_v46  ;;  %v2053_v30 = vmul.f32 1.442695, %v8148_v58  ;;  %v4796_v46 = vpop.eup %4795 }
 0x419   :  { %v8641_v10 = vpop.xlane.xlu1 %2187  ;;  %v8643_v39 = vpop.xlane.xlu0 %2220  ;;  %v2414_v33 = vsel %vm268_vm0, %v4796_v46, 0.0 }
 0x41a   :  { %4805 = vpow2.f32 %v2053_v30 }
 0x41b   :  { %4807 = vlog2.f32 %v8500_v5 }
 0x41c   :  { %2403 = vadd.xlane.f32.xlu1 %v2402_v6  ;;  %2436 = vadd.xlane.f32.xlu0 %v2435_v15  ;;  %v2057_v6 = vmul.f32 1.442695, %v10856_v21  ;;  %v4798_v15 = vpop.eup %4797 }
 0x41d   :  { %v8649_v4 = vpop.xlane.xlu1 %2193  ;;  %v8651_v48 = vpop.xlane.xlu0 %2226 }
 0x41e   :  { %10854 = vst [vmem:[#allocation123_spill] sm:$0xff] %v8651_v48  ;;  %v4800_v17 = vpop.eup %4799  ;;  %4809 = vpow2.f32 %v2057_v6 }
 0x41f   :  { %4811 = vlog2.f32 %v8508_v36  ;;  %v2448_v30 = vmul.f32 0.6931472, %v4800_v17  ;;  %v10861_v36 = vld [vmem:[#allocation144_spill] sm:$0xff] }
 0x420   :  { %2409 = vadd.xlane.f32.xlu1 %v2408_v31  ;;  %2442 = vadd.xlane.f32.xlu0 %v2441_v9  ;;  %v2061_v31 = vmul.f32 1.442695, %v10858_v49  ;;  %v2420_v9 = vsel %vm268_vm0, %v4798_v15, 0.0  ;;  %v4802_v28 = vpop.eup %4801 }
 0x421   :  { %v8657_v44 = vpop.xlane.xlu1 %2199  ;;  %v8659_v56 = vpop.xlane.xlu0 %2232 }
 0x422   :  { %10855 = vst [vmem:[#allocation8_spill] sm:$0xff] %v8659_v56  ;;  %v4804_v5 = vpop.eup %4803  ;;  %4813 = vpow2.f32 %v2061_v31 }
 0x423   :  { %4815 = vlog2.f32 %v8516_v23  ;;  %v2454_v6 = vmul.f32 0.6931472, %v4804_v5 }
 0x424   :  { %2415 = vadd.xlane.f32.xlu1 %v2414_v33  ;;  %v2426_v33 = vsel %vm268_vm0, %v4802_v28, 0.0  ;;  %v4806_v37 = vpop.eup %4805  ;;  %4817 = vlog2.f32 %v8484_v40  ;;  %v5191_v40 = vld [vmem:[%s10189_s1] sm:$0xff] }
 0x425   :  { %v8664_v58 = vpop.xlane.xlu1 %2205  ;;  %v8666_v60 = vpop.xlane.xlu0 %2238  ;;  %4819 = vlog2.f32 %v8524_v41  ;;  %vm2831_vm9 = vcmp.eq.s32.totalorder %v5191_v40, 4294967295  ;;  %v5192_v40 = vld [vmem:[%s10189_s1 + $0x18] sm:$0xff] }
 0x426   :  { %10857 = vst [vmem:[#allocation19_spill] sm:$0xff] %v8666_v60  ;;  %v4808_v17 = vpop.eup %4807  ;;  %4821 = vlog2.f32 %v8446_v26  ;;  %vm2834_vm10 = vcmp.eq.s32.totalorder %v5192_v40, 4294967295 }
 0x427   :  { %v2458_v28 = vmul.f32 0.6931472, %v4808_v17  ;;  %4823 = vlog2.f32 %v8532_v20  ;;  %v10865_v17 = vld [vmem:[#allocation147_spill] sm:$0xff] }
 0x428   :  { %2421 = vadd.xlane.f32.xlu1 %v2420_v9  ;;  %v2703_v9 = vsub.f32 %v2448_v30, %v10861_v36  ;;  %v4810_v60 = vpop.eup %4809  ;;  %4825 = vlog2.f32 %v8454_v7  ;;  %v5193_v7 = vld [vmem:[%s10189_s1 + $0x28] sm:$0xff] }
 0x429   :  { %v8671_v46 = vpop.xlane.xlu1 %2211  ;;  %v8673_v21 = vpop.xlane.xlu0 %2244  ;;  %v2708_v26 = vsub.f32 %v2458_v28, %v10865_v17  ;;  %4827 = vlog2.f32 %v8540_v51 }
 0x42a   :  { %10859 = vst [vmem:[#allocation110_spill] sm:$0xff] %v8673_v21  ;;  %v2432_v21 = vsel %vm268_vm0, %v4806_v37, 0.0  ;;  %v2959_v5 = vmax.f32 %v2703_v9, 0.0  ;;  %v2438_v37 = vsel %vm268_vm0, %v4810_v60, 0.0  ;;  %4829 = vlog2.f32 %v8462_v11 }
 0x42b   :  { %4831 = vlog2.f32 %v8548_v52  ;;  %v10870_v52 = vld [vmem:[#allocation116_spill] sm:$0xff] }
 0x42c   :  { %2427 = vadd.xlane.f32.xlu1 %v2426_v33  ;;  %v10863_v33 = vld [vmem:[#allocation41_spill] sm:$0xff]  ;;  %4833 = vlog2.f32 %v8470_v18 }
 0x42d   :  { %v8677_v49 = vpop.xlane.xlu1 %2217  ;;  %v8679_v15 = vpop.xlane.xlu0 %2250  ;;  %v2706_v56 = vsub.f32 %v2454_v6, %v10863_v33  ;;  %v3087_v6 = vsel %vm2831_vm9, 0.0, %v2959_v5  ;;  %4835 = vlog2.f32 %v8556_v42  ;;  %v5195_v18 = vld [vmem:[%s10189_s1 + $0x48] sm:$0xff] }
 0x42e   :  { %10860 = vst [vmem:[#allocation125_spill] sm:$0xff] %v8679_v15  ;;  %v4812_v15 = vpop.eup %4811  ;;  %4837 = vlog2.f32 %v8478_v35  ;;  %vm2840_vm12 = vcmp.eq.s32.totalorder %v5195_v18, 4294967295  ;;  %v10873_v42 = vld [vmem:[#allocation33_spill] sm:$0xff] }
 0x42f   :  { %v4814_v41 = vpop.eup %4813  ;;  %v2462_v30 = vmul.f32 0.6931472, %v4812_v15  ;;  %v2962_v9 = vmax.f32 %v2706_v56, 0.0  ;;  %4839 = vlog2.f32 %v8564_v13  ;;  %v5197_v13 = vld [vmem:[%s10189_s1 + $0x58] sm:$0xff] }
 0x430   :  { %2433 = vadd.xlane.f32.xlu1 %v2432_v21  ;;  %v4816_v33 = vpop.eup %4815  ;;  %v2444_v20 = vsel %vm268_vm0, %v4814_v41, 0.0  ;;  %vm2836_vm0 = vcmp.eq.s32.totalorder %v5193_v7, 4294967295  ;;  %v5194_v7 = vld [vmem:[%s10189_s1 + $0x38] sm:$0xff]  ;;  %vm2842_vm14 = vcmp.eq.s32.totalorder %v5197_v13, 4294967295  ;;  %4841 = vlog2.f32 %v8486_v47 }
 0x431   :  { %v8685_v31 = vpop.xlane.xlu1 %2223  ;;  %v8687_v23 = vpop.xlane.xlu0 %2256  ;;  %v2466_v15 = vmul.f32 0.6931472, %v4816_v33  ;;  %v3090_v28 = vsel %vm2834_vm10, 0.0, %v2962_v9  ;;  %vm2838_vm11 = vcmp.eq.s32.totalorder %v5194_v7, 4294967295  ;;  %4843 = vlog2.f32 %v8572_v22  ;;  %v5199_v22 = vld [vmem:[%s10189_s1 + $0x68] sm:$0xff] }
 0x432   :  { %10862 = vst [vmem:[#allocation9_spill] sm:$0xff] %v8687_v23  ;;  %v4818_v60 = vpop.eup %4817  ;;  %vm2844_vm1 = vcmp.eq.s32.totalorder %v5199_v22, 4294967295  ;;  %4845 = vlog2.f32 %v8494_v27 }
 0x433   :  { %v2450_v41 = vmul.f32 0.6931472, %v4818_v60  ;;  %4847 = vlog2.f32 %v8580_v8 }
 0x434   :  { %2439 = vadd.xlane.f32.xlu1 %v2438_v37  ;;  %v2964_v37 = vmax.f32 %v2708_v26, 0.0  ;;  %4849 = vlog2.f32 %v8502_v16 }
 0x435   :  { %v8696_v21 = vpop.xlane.xlu1 %2229  ;;  %v8698_v36 = vpop.xlane.xlu0 %2262 }
 0x436   :  { %10864 = vst [vmem:[#allocation21_spill] sm:$0xff] %v8698_v36  ;;  %3472 = vperm.xlu0 %4549, %v3087_v6   ;;  %v10867_v6 = vld [vmem:[#allocation43_spill] sm:$0xff]  ;;  %v4820_v36 = vpop.eup %4819  ;;  %v3092_v26 = vsel %vm2836_vm0, 0.0, %v2964_v37  ;;  %4851 = vlog2.f32 %v8588_v2  ;;  %v5203_v2 = vld [vmem:[%s10189_s1 + $0x88] sm:$0xff] }
 0x437   :  { %v2710_v17 = vsub.f32 %v2462_v30, %v10867_v6  ;;  %v4822_v51 = vpop.eup %4821  ;;  %v2470_v33 = vmul.f32 0.6931472, %v4820_v36  ;;  %v2704_v36 = vsub.f32 %v2450_v41, %v10870_v52  ;;  %4853 = vlog2.f32 %v8510_v54 }
 0x438   :  { %2445 = vadd.xlane.f32.xlu1 %v2444_v20  ;;  %v10869_v20 = vld [vmem:[#allocation32_spill] sm:$0xff]  ;;  %v4824_v6 = vpop.eup %4823  ;;  %v2452_v11 = vmul.f32 0.6931472, %v4822_v51  ;;  %vm2848_vm5 = vcmp.eq.s32.totalorder %v5203_v2, 4294967295  ;;  %4855 = vlog2.f32 %v8596_v53  ;;  %v5205_v53 = vld [vmem:[%s10189_s1 + $0x98] sm:$0xff] }
 0x439   :  { %v8707_v5 = vpop.xlane.xlu1 %2235  ;;  %v8709_v56 = vpop.xlane.xlu0 %2268  ;;  %v2966_v30 = vmax.f32 %v2710_v17, 0.0  ;;  %vm2850_vm7 = vcmp.eq.s32.totalorder %v5205_v53, 4294967295 }
 0x43a   :  { %10866 = vst [vmem:[#allocation111_spill] sm:$0xff] %v8709_v56  ;;  %3481 = vperm.xlu0 %4549, %v3090_v28   ;;  %v2712_v28 = vsub.f32 %v2466_v15, %v10869_v20  ;;  %v4826_v60 = vpop.eup %4825  ;;  %v10872_v20 = vld [vmem:[#allocation130_spill] sm:$0xff]  ;;  %v2705_v51 = vsub.f32 %v2452_v11, %v10873_v42  ;;  %4857 = vlog2.f32 %v8518_v62 }
 0x43b   :  { %v3094_v15 = vsel %vm2838_vm11, 0.0, %v2966_v30  ;;  %v2714_v56 = vsub.f32 %v2470_v33, %v10872_v20  ;;  %v4828_v23 = vpop.eup %4827  ;;  %v2456_v41 = vmul.f32 0.6931472, %v4826_v60  ;;  %v5196_v30 = vld [vmem:[%s10189_s1 + $0x8] sm:$0xff]  ;;  %v2960_v33 = vmax.f32 %v2704_v36, 0.0  ;;  %v10876_v20 = vld [vmem:[#allocation47_spill] sm:$0xff] }
 0x43c   :  { %vm2832_vm13 = vcmp.eq.s32.totalorder %v5196_v30, 4294967295  ;;  %v2961_v36 = vmax.f32 %v2705_v51, 0.0  ;;  %4859 = vlog2.f32 %v8604_v38  ;;  %v5207_v38 = vld [vmem:[%s10189_s1 + $0xa8] sm:$0xff] }
 0x43d   :  { %v8717_v40 = vpop.xlane.xlu1 %2241  ;;  %v8719_v9 = vpop.xlane.xlu0 %2274  ;;  %vm2852_vm9 = vcmp.eq.s32.totalorder %v5207_v38, 4294967295 }
 0x43e   :  { %10868 = vst [vmem:[#allocation127_spill] sm:$0xff] %v8719_v9  ;;  %3487 = vperm.xlu0 %4549, %v3092_v26   ;;  %v2474_v9 = vmul.f32 0.6931472, %v4824_v6  ;;  %v2968_v26 = vmax.f32 %v2712_v28, 0.0  ;;  %v4830_v28 = vpop.eup %4829  ;;  %v2478_v6 = vmul.f32 0.6931472, %v4828_v23  ;;  %4861 = vlog2.f32 %v8526_v50 }
 0x43f   :  { %v4832_v11 = vpop.eup %4831  ;;  %v5198_v23 = vld [vmem:[%s10189_s1 + $0x10] sm:$0xff]  ;;  %v2460_v60 = vmul.f32 0.6931472, %v4830_v28  ;;  %v10879_v28 = vld [vmem:[#allocation120_spill] sm:$0xff]  ;;  %4863 = vlog2.f32 %v8612_v34 }
 0x440   :  { %v3096_v52 = vsel %vm2840_vm12, 0.0, %v2968_v26  ;;  %v2716_v18 = vsub.f32 %v2474_v9, %v10876_v20  ;;  %vm2833_vm15 = vcmp.eq.s32.totalorder %v5198_v23, 4294967295  ;;  %v10877_v9 = vld [vmem:[#allocation22_spill] sm:$0xff]  ;;  %v4834_v42 = vpop.eup %4833  ;;  %4865 = vlog2.f32 %v8534_v63 }
 0x441   :  { %v8728_v37 = vpop.xlane.xlu1 %2247  ;;  %v8730_v17 = vpop.xlane.xlu0 %2280  ;;  %v2707_v26 = vsub.f32 %v2456_v41, %v10877_v9  ;;  %v3089_v51 = vsel %vm2833_vm15, 0.0, %v2961_v36  ;;  %v5200_v41 = vld [vmem:[%s10189_s1 + $0x20] sm:$0xff]  ;;  %v10880_v36 = vld [vmem:[#allocation134_spill] sm:$0xff] }
 0x442   :  { %10871 = vst [vmem:[#allocation10_spill] sm:$0xff] %v8730_v17  ;;  %3493 = vperm.xlu0 %4549, %v3094_v15   ;;  %v2970_v15 = vmax.f32 %v2714_v56, 0.0  ;;  %v3088_v56 = vsel %vm2832_vm13, 0.0, %v2960_v33  ;;  %v10878_v17 = vld [vmem:[#allocation36_spill] sm:$0xff]  ;;  %vm2835_vm2 = vcmp.eq.s32.totalorder %v5200_v41, 4294967295 }
 0x443   :  { %v2718_v48 = vsub.f32 %v2478_v6, %v10878_v17  ;;  %v2464_v33 = vmul.f32 0.6931472, %v4834_v42  ;;  %v2963_v17 = vmax.f32 %v2707_v26, 0.0  ;;  %v2709_v6 = vsub.f32 %v2460_v60, %v10879_v28  ;;  %v5201_v42 = vld [vmem:[%s10189_s1 + $0x78] sm:$0xff]  ;;  %v10881_v60 = vld [vmem:[#allocation37_spill] sm:$0xff]  ;;  %v5204_v41 = vld [vmem:[%s10189_s1 + $0x40] sm:$0xff] }
 0x444   :  { %v3098_v47 = vsel %vm2842_vm14, 0.0, %v2970_v15  ;;  %vm2846_vm3 = vcmp.eq.s32.totalorder %v5201_v42, 4294967295  ;;  %v10882_v28 = vld [vmem:[#allocation51_spill] sm:$0xff]  ;;  %vm2839_vm6 = vcmp.eq.s32.totalorder %v5204_v41, 4294967295 }
 0x445   :  { %v8742_v35 = vpop.xlane.xlu1 %2253  ;;  %v8744_v7 = vpop.xlane.xlu0 %2286  ;;  %v2974_v23 = vmax.f32 %v2718_v48, 0.0  ;;  %v3091_v48 = vsel %vm2835_vm2, 0.0, %v2963_v17  ;;  %v2711_v26 = vsub.f32 %v2464_v33, %v10881_v60  ;;  %v10883_v33 = vld [vmem:[#allocation39_spill] sm:$0xff] }
 0x446   :  { %10874 = vst [vmem:[#allocation23_spill] sm:$0xff] %v8742_v35  ;;  %10875 = vst [vmem:[#allocation112_spill] sm:$0xff] %v8744_v7  ;;  %3499 = vperm.xlu0 %4549, %v3096_v52   ;;  %v2482_v52 = vmul.f32 0.6931472, %v4832_v11  ;;  %v2972_v7 = vmax.f32 %v2716_v18, 0.0  ;;  %v4836_v35 = vpop.eup %4835  ;;  %4867 = vlog2.f32 %v8620_v45  ;;  %v5211_v45 = vld [vmem:[%s10189_s1 + $0xc8] sm:$0xff] }
 0x447   :  { %v4838_v30 = vpop.eup %4837  ;;  %v2486_v15 = vmul.f32 0.6931472, %v4836_v35  ;;  %v5202_v35 = vld [vmem:[%s10189_s1 + $0x30] sm:$0xff]  ;;  %v3102_v16 = vsel %vm2846_vm3, 0.0, %v2974_v23  ;;  %v2967_v23 = vmax.f32 %v2711_v26, 0.0  ;;  %4869 = vlog2.f32 %v8542_v19 }
 0x448   :  { %v3100_v27 = vsel %vm2844_vm1, 0.0, %v2972_v7  ;;  %v4840_v9 = vpop.eup %4839  ;;  %v2468_v8 = vmul.f32 0.6931472, %v4838_v30  ;;  %vm2837_vm4 = vcmp.eq.s32.totalorder %v5202_v35, 4294967295  ;;  %v2965_v7 = vmax.f32 %v2709_v6, 0.0 }
 0x449   :  { %v8757_v20 = vpop.xlane.xlu1 %2259  ;;  %3475 = vperm.xlu1 %4550, %v3088_v56   ;;  %v8759_v13 = vpop.xlane.xlu0 %2292  ;;  %v2720_v56 = vsub.f32 %v2482_v52, %v10880_v36  ;;  %v3095_v26 = vsel %vm2839_vm6, 0.0, %v2967_v23  ;;  %vm2856_vm12 = vcmp.eq.s32.totalorder %v5211_v45, 4294967295  ;;  %4871 = vlog2.f32 %v8627_v57  ;;  %v5213_v57 = vld [vmem:[%s10189_s1 + $0xd8] sm:$0xff] }
 0x44a   :  { %3505 = vperm.xlu0 %4549, %v3098_v47   ;;  %v4842_v52 = vpop.eup %4841  ;;  %v2490_v47 = vmul.f32 0.6931472, %v4840_v9  ;;  %v2713_v17 = vsub.f32 %v2468_v8, %v10883_v33  ;;  %v5206_v8 = vld [vmem:[%s10189_s1 + $0x50] sm:$0xff]  ;;  %vm2858_vm14 = vcmp.eq.s32.totalorder %v5213_v57, 4294967295  ;;  %4873 = vlog2.f32 %v8550_v43 }
 0x44b   :  { %v2976_v30 = vmax.f32 %v2720_v56, 0.0  ;;  %v4844_v36 = vpop.eup %4843  ;;  %v2472_v6 = vmul.f32 0.6931472, %v4842_v52  ;;  %vm2841_vm8 = vcmp.eq.s32.totalorder %v5206_v8, 4294967295  ;;  %v10885_v52 = vld [vmem:[#allocation28_spill] sm:$0xff]  ;;  %4875 = vlog2.f32 %v8634_v55  ;;  %v5215_v55 = vld [vmem:[%s10189_s1 + $0xe8] sm:$0xff] }
 0x44c   :  { %v4846_v54 = vpop.eup %4845  ;;  %v2494_v56 = vmul.f32 0.6931472, %v4844_v36  ;;  %v2969_v35 = vmax.f32 %v2713_v17, 0.0  ;;  %v5208_v17 = vld [vmem:[%s10189_s1 + $0x60] sm:$0xff]  ;;  %vm2860_vm1 = vcmp.eq.s32.totalorder %v5215_v55, 4294967295  ;;  %4877 = vlog2.f32 %v8558_v59 }
 0x44d   :  { %v8772_v18 = vpop.xlane.xlu1 %2265  ;;  %3478 = vperm.xlu1 %4550, %v3089_v51   ;;  %v8774_v11 = vpop.xlane.xlu0 %2298  ;;  %vm2843_vm10 = vcmp.eq.s32.totalorder %v5208_v17, 4294967295  ;;  %v5212_v17 = vld [vmem:[%s10189_s1 + $0x80] sm:$0xff] }
 0x44e   :  { %3511 = vperm.xlu0 %4549, %v3100_v27   ;;  %v2722_v27 = vsub.f32 %v2486_v15, %v10882_v28  ;;  %v3093_v15 = vsel %vm2837_vm4, 0.0, %v2965_v7  ;;  %v4848_v2 = vpop.eup %4847  ;;  %v2476_v7 = vmul.f32 0.6931472, %v4846_v54  ;;  %v3097_v41 = vsel %vm2841_vm8, 0.0, %v2969_v35  ;;  %v10888_v35 = vld [vmem:[#allocation55_spill] sm:$0xff] }
 0x44f   :  { %vm2847_vm13 = vcmp.eq.s32.totalorder %v5212_v17, 4294967295  ;;  %4879 = vlog2.f32 %v8641_v10 }
 0x450   :  { %v2978_v60 = vmax.f32 %v2722_v27, 0.0  ;;  %v2498_v27 = vmul.f32 0.6931472, %v4848_v2 }
 0x451   :  { %v8787_v22 = vpop.xlane.xlu1 %2271  ;;  %3484 = vperm.xlu1 %4550, %v3091_v48   ;;  %v8789_v51 = vpop.xlane.xlu0 %2304  ;;  %v3104_v48 = vsel %vm2848_vm5, 0.0, %v2976_v30 }
 0x452   :  { %3517 = vperm.xlu0 %4549, %v3102_v16   ;;  %v10884_v16 = vld [vmem:[#allocation40_spill] sm:$0xff]  ;;  %v4850_v30 = vpop.eup %4849  ;;  %v3106_v62 = vsel %vm2850_vm7, 0.0, %v2978_v60  ;;  %4881 = vlog2.f32 %v8566_v0 }
 0x453   :  { %v2724_v28 = vsub.f32 %v2490_v47, %v10884_v16  ;;  %v2715_v47 = vsub.f32 %v2472_v6, %v10885_v52  ;;  %v4852_v53 = vpop.eup %4851  ;;  %v2480_v23 = vmul.f32 0.6931472, %v4850_v30  ;;  %v2728_v52 = vsub.f32 %v2498_v27, %v10888_v35  ;;  %v5209_v30 = vld [vmem:[%s10189_s1 + $0xb8] sm:$0xff] }
 0x454   :  { %v4854_v6 = vpop.eup %4853  ;;  %vm2854_vm0 = vcmp.eq.s32.totalorder %v5209_v30, 4294967295  ;;  %4883 = vlog2.f32 %v8649_v4  ;;  %v5219_v4 = vld [vmem:[%s10189_s1 + $0x108] sm:$0xff] }
 0x455   :  { %v8802_v9 = vpop.xlane.xlu1 %2277  ;;  %3490 = vperm.xlu1 %4550, %v3093_v15   ;;  %v8804_v42 = vpop.xlane.xlu0 %2310  ;;  %v2980_v15 = vmax.f32 %v2724_v28, 0.0  ;;  %v2971_v54 = vmax.f32 %v2715_v47, 0.0  ;;  %v2502_v28 = vmul.f32 0.6931472, %v4852_v53  ;;  %v2484_v34 = vmul.f32 0.6931472, %v4854_v6 }
 0x456   :  { %3523 = vperm.xlu0 %4549, %v3104_v48   ;;  %v10886_v48 = vld [vmem:[#allocation138_spill] sm:$0xff]  ;;  %v2984_v6 = vmax.f32 %v2728_v52, 0.0  ;;  %4885 = vlog2.f32 %v8574_v29  ;;  %vm2864_vm5 = vcmp.eq.s32.totalorder %v5219_v4, 4294967295 }
 0x457   :  { %v2726_v16 = vsub.f32 %v2494_v56, %v10886_v48  ;;  %v10887_v56 = vld [vmem:[#allocation126_spill] sm:$0xff]  ;;  %v3108_v50 = vsel %vm2852_vm9, 0.0, %v2980_v15  ;;  %v3099_v47 = vsel %vm2843_vm10, 0.0, %v2971_v54 }
 0x458   :  { %v2717_v60 = vsub.f32 %v2476_v7, %v10887_v56  ;;  %v5210_v7 = vld [vmem:[%s10189_s1 + $0x70] sm:$0xff]  ;;  %v10890_v56 = vld [vmem:[#allocation44_spill] sm:$0xff] }
 0x459   :  { %v8817_v36 = vpop.xlane.xlu1 %2283  ;;  %3496 = vperm.xlu1 %4550, %v3095_v26   ;;  %v8819_v33 = vpop.xlane.xlu0 %2316  ;;  %v2982_v8 = vmax.f32 %v2726_v16, 0.0  ;;  %vm2845_vm11 = vcmp.eq.s32.totalorder %v5210_v7, 4294967295  ;;  %v10889_v15 = vld [vmem:[#allocation30_spill] sm:$0xff] }
 0x45a   :  { %3529 = vperm.xlu0 %4549, %v3106_v62   ;;  %v4856_v62 = vpop.eup %4855  ;;  %v2973_v27 = vmax.f32 %v2717_v60, 0.0  ;;  %v2719_v48 = vsub.f32 %v2480_v23, %v10889_v15  ;;  %v10891_v23 = vld [vmem:[#allocation128_spill] sm:$0xff]  ;;  %4887 = vlog2.f32 %v8657_v44  ;;  %v5221_v44 = vld [vmem:[%s10189_s1 + $0x118] sm:$0xff] }
 0x45b   :  { %v4858_v16 = vpop.eup %4857  ;;  %v2506_v53 = vmul.f32 0.6931472, %v4856_v62  ;;  %v3110_v63 = vsel %vm2854_vm0, 0.0, %v2982_v8  ;;  %v2721_v54 = vsub.f32 %v2484_v34, %v10891_v23  ;;  %v5214_v34 = vld [vmem:[%s10189_s1 + $0x90] sm:$0xff]  ;;  %vm2866_vm7 = vcmp.eq.s32.totalorder %v5221_v44, 4294967295 }
 0x45c   :  { %v4860_v35 = vpop.eup %4859  ;;  %v2488_v60 = vmul.f32 0.6931472, %v4858_v16  ;;  %v2975_v8 = vmax.f32 %v2719_v48, 0.0  ;;  %vm2849_vm15 = vcmp.eq.s32.totalorder %v5214_v34, 4294967295  ;;  %v10893_v16 = vld [vmem:[#allocation45_spill] sm:$0xff]  ;;  %4889 = vlog2.f32 %v8582_v12 }
 0x45d   :  { %v8832_v2 = vpop.xlane.xlu1 %2289  ;;  %3502 = vperm.xlu1 %4550, %v3097_v41   ;;  %v8834_v26 = vpop.xlane.xlu0 %2322  ;;  %v2510_v52 = vmul.f32 0.6931472, %v4860_v35  ;;  %v2977_v7 = vmax.f32 %v2721_v54, 0.0  ;;  %v5216_v54 = vld [vmem:[%s10189_s1 + $0xa0] sm:$0xff]  ;;  %4891 = vlog2.f32 %v8664_v58  ;;  %v5223_v58 = vld [vmem:[%s10189_s1 + $0x128] sm:$0xff] }
 0x45e   :  { %3535 = vperm.xlu0 %4549, %v3108_v50   ;;  %v2730_v50 = vsub.f32 %v2502_v28, %v10890_v56  ;;  %v3101_v28 = vsel %vm2845_vm11, 0.0, %v2973_v27  ;;  %v4862_v19 = vpop.eup %4861  ;;  %v3103_v48 = vsel %vm2847_vm13, 0.0, %v2975_v8  ;;  %vm2851_vm2 = vcmp.eq.s32.totalorder %v5216_v54, 4294967295  ;;  %v5220_v54 = vld [vmem:[%s10189_s1 + $0xc0] sm:$0xff] }
 0x45f   :  { %v4864_v45 = vpop.eup %4863  ;;  %v2492_v27 = vmul.f32 0.6931472, %v4862_v19  ;;  %v3105_v17 = vsel %vm2849_vm15, 0.0, %v2977_v7  ;;  %v10896_v7 = vld [vmem:[#allocation48_spill] sm:$0xff]  ;;  %vm2855_vm6 = vcmp.eq.s32.totalorder %v5220_v54, 4294967295  ;;  %vm2868_vm9 = vcmp.eq.s32.totalorder %v5223_v58, 4294967295 }
 0x460   :  { %v2986_v15 = vmax.f32 %v2730_v50, 0.0  ;;  %v2514_v50 = vmul.f32 0.6931472, %v4864_v45  ;;  %4893 = vlog2.f32 %v8590_v32 }
 0x461   :  { %v8847_v38 = vpop.xlane.xlu1 %2295  ;;  %3508 = vperm.xlu1 %4550, %v3099_v47   ;;  %v8849_v41 = vpop.xlane.xlu0 %2328  ;;  %v3112_v47 = vsel %vm2856_vm12, 0.0, %v2984_v6  ;;  %4895 = vlog2.f32 %v8671_v46 }
 0x462   :  { %3541 = vperm.xlu0 %4549, %v3110_v63   ;;  %v10892_v63 = vld [vmem:[#allocation142_spill] sm:$0xff]  ;;  %v4866_v6 = vpop.eup %4865  ;;  %v3114_v43 = vsel %vm2858_vm14, 0.0, %v2986_v15  ;;  %4897 = vlog2.f32 %v8598_v14 }
 0x463   :  { %v2732_v56 = vsub.f32 %v2506_v53, %v10892_v63  ;;  %v2723_v53 = vsub.f32 %v2488_v60, %v10893_v16  ;;  %v4868_v57 = vpop.eup %4867  ;;  %v2496_v8 = vmul.f32 0.6931472, %v4866_v6  ;;  %v2736_v16 = vsub.f32 %v2514_v50, %v10896_v7  ;;  %v5217_v6 = vld [vmem:[%s10189_s1 + $0xf8] sm:$0xff] }
 0x464   :  { %v4870_v60 = vpop.eup %4869  ;;  %vm2862_vm3 = vcmp.eq.s32.totalorder %v5217_v6, 4294967295  ;;  %4899 = vlog2.f32 %v8677_v49  ;;  %v5227_v49 = vld [vmem:[%s10189_s1 + $0x148] sm:$0xff] }
 0x465   :  { %v8862_v62 = vpop.xlane.xlu1 %2301  ;;  %3514 = vperm.xlu1 %4550, %v3101_v28   ;;  %v8864_v30 = vpop.xlane.xlu0 %2334  ;;  %v2988_v28 = vmax.f32 %v2732_v56, 0.0  ;;  %v2979_v19 = vmax.f32 %v2723_v53, 0.0  ;;  %v2518_v56 = vmul.f32 0.6931472, %v4868_v57  ;;  %v2500_v10 = vmul.f32 0.6931472, %v4870_v60 }
 0x466   :  { %3547 = vperm.xlu0 %4549, %v3112_v47   ;;  %v10894_v47 = vld [vmem:[#allocation59_spill] sm:$0xff]  ;;  %v2992_v60 = vmax.f32 %v2736_v16, 0.0  ;;  %4901 = vlog2.f32 %v8606_v24  ;;  %vm2872_vm12 = vcmp.eq.s32.totalorder %v5227_v49, 4294967295 }
 0x467   :  { %v2734_v63 = vsub.f32 %v2510_v52, %v10894_v47  ;;  %v10895_v52 = vld [vmem:[#allocation34_spill] sm:$0xff]  ;;  %v3116_v59 = vsel %vm2860_vm1, 0.0, %v2988_v28  ;;  %v3107_v53 = vsel %vm2851_vm2, 0.0, %v2979_v19  ;;  %v10897_v28 = vld [vmem:[#allocation132_spill] sm:$0xff] }
 0x468   :  { %v2725_v15 = vsub.f32 %v2492_v27, %v10895_v52  ;;  %v5218_v27 = vld [vmem:[%s10189_s1 + $0xb0] sm:$0xff]  ;;  %v2727_v47 = vsub.f32 %v2496_v8, %v10897_v28  ;;  %v10898_v52 = vld [vmem:[#allocation145_spill] sm:$0xff] }
 0x469   :  { %v8877_v35 = vpop.xlane.xlu1 %2307  ;;  %3520 = vperm.xlu1 %4550, %v3103_v48   ;;  %v8879_v23 = vpop.xlane.xlu0 %2340  ;;  %v2990_v34 = vmax.f32 %v2734_v63, 0.0  ;;  %vm2853_vm4 = vcmp.eq.s32.totalorder %v5218_v27, 4294967295  ;;  %v10899_v8 = vld [vmem:[#allocation49_spill] sm:$0xff] }
 0x46a   :  { %3553 = vperm.xlu0 %4549, %v3114_v43   ;;  %v4872_v43 = vpop.eup %4871  ;;  %v2981_v50 = vmax.f32 %v2725_v15, 0.0  ;;  %v2729_v19 = vsub.f32 %v2500_v10, %v10899_v8  ;;  %v5222_v10 = vld [vmem:[%s10189_s1 + $0xd0] sm:$0xff]  ;;  %4903 = vlog2.f32 %v8685_v31  ;;  %v5229_v31 = vld [vmem:[%s10189_s1 + $0x158] sm:$0xff] }
 0x46b   :  { %v4874_v63 = vpop.eup %4873  ;;  %v2522_v57 = vmul.f32 0.6931472, %v4872_v43  ;;  %v3118_v0 = vsel %vm2862_vm3, 0.0, %v2990_v34  ;;  %v2983_v34 = vmax.f32 %v2727_v47, 0.0  ;;  %vm2857_vm8 = vcmp.eq.s32.totalorder %v5222_v10, 4294967295 }
 0x46c   :  { %v4876_v7 = vpop.eup %4875  ;;  %v2504_v15 = vmul.f32 0.6931472, %v4874_v63  ;;  %v2985_v27 = vmax.f32 %v2729_v19, 0.0  ;;  %v10901_v63 = vld [vmem:[#allocation38_spill] sm:$0xff]  ;;  %v5224_v19 = vld [vmem:[%s10189_s1 + $0xe0] sm:$0xff]  ;;  %vm2874_vm14 = vcmp.eq.s32.totalorder %v5229_v31, 4294967295  ;;  %4905 = vlog2.f32 %v8614_v61 }
 0x46d   :  { %v8892_v45 = vpop.xlane.xlu1 %2313  ;;  %3526 = vperm.xlu1 %4550, %v3105_v17   ;;  %v8894_v48 = vpop.xlane.xlu0 %2346  ;;  %v2526_v16 = vmul.f32 0.6931472, %v4876_v7  ;;  %v3111_v47 = vsel %vm2855_vm6, 0.0, %v2983_v34  ;;  %vm2859_vm10 = vcmp.eq.s32.totalorder %v5224_v19, 4294967295  ;;  %v5228_v19 = vld [vmem:[%s10189_s1 + $0x100] sm:$0xff]  ;;  %4907 = vlog2.f32 %v8696_v21  ;;  %v5231_v21 = vld [vmem:[%s10189_s1 + $0x168] sm:$0xff] }
 0x46e   :  { %3559 = vperm.xlu0 %4549, %v3116_v59   ;;  %v2738_v59 = vsub.f32 %v2518_v56, %v10898_v52  ;;  %v3109_v56 = vsel %vm2853_vm4, 0.0, %v2981_v50  ;;  %v4878_v29 = vpop.eup %4877  ;;  %v3113_v54 = vsel %vm2857_vm8, 0.0, %v2985_v27  ;;  %v10904_v27 = vld [vmem:[#allocation150_spill] sm:$0xff]  ;;  %vm2863_vm13 = vcmp.eq.s32.totalorder %v5228_v19, 4294967295 }
 0x46f   :  { %v4880_v4 = vpop.eup %4879  ;;  %v2508_v50 = vmul.f32 0.6931472, %v4878_v29  ;;  %vm2876_vm1 = vcmp.eq.s32.totalorder %v5231_v21, 4294967295  ;;  %4909 = vlog2.f32 %v8622_v1 }
 0x470   :  { %v2994_v28 = vmax.f32 %v2738_v59, 0.0  ;;  %v2530_v59 = vmul.f32 0.6931472, %v4880_v4  ;;  %4911 = vlog2.f32 %v8707_v5 }
 0x471   :  { %v8907_v55 = vpop.xlane.xlu1 %2319  ;;  %3532 = vperm.xlu1 %4550, %v3107_v53   ;;  %v8909_v17 = vpop.xlane.xlu0 %2352  ;;  %v3120_v53 = vsel %vm2864_vm5, 0.0, %v2992_v60 }
 0x472   :  { %3565 = vperm.xlu0 %4549, %v3118_v0   ;;  %v10900_v0 = vld [vmem:[#allocation63_spill] sm:$0xff]  ;;  %v4882_v60 = vpop.eup %4881  ;;  %v3122_v12 = vsel %vm2866_vm7, 0.0, %v2994_v28  ;;  %4913 = vlog2.f32 %v8629_v25 }
 0x473   :  { %v2740_v52 = vsub.f32 %v2522_v57, %v10900_v0  ;;  %v2731_v57 = vsub.f32 %v2504_v15, %v10901_v63  ;;  %v4884_v44 = vpop.eup %4883  ;;  %v2512_v34 = vmul.f32 0.6931472, %v4882_v60  ;;  %v2744_v63 = vsub.f32 %v2530_v59, %v10904_v27  ;;  %v5225_v60 = vld [vmem:[%s10189_s1 + $0x138] sm:$0xff] }
 0x474   :  { %v4886_v15 = vpop.eup %4885  ;;  %vm2870_vm0 = vcmp.eq.s32.totalorder %v5225_v60, 4294967295  ;;  %4915 = vlog2.f32 %v8717_v40  ;;  %v5235_v40 = vld [vmem:[%s10189_s1 + $0x188] sm:$0xff] }
 0x475   :  { %v8922_v43 = vpop.xlane.xlu1 %2325  ;;  %3538 = vperm.xlu1 %4550, %v3109_v56   ;;  %v8924_v6 = vpop.xlane.xlu0 %2358  ;;  %v2996_v56 = vmax.f32 %v2740_v52, 0.0  ;;  %v2987_v29 = vmax.f32 %v2731_v57, 0.0  ;;  %v2534_v52 = vmul.f32 0.6931472, %v4884_v44  ;;  %v2516_v46 = vmul.f32 0.6931472, %v4886_v15 }
 0x476   :  { %3571 = vperm.xlu0 %4549, %v3120_v53   ;;  %v10902_v53 = vld [vmem:[#allocation52_spill] sm:$0xff]  ;;  %v3000_v15 = vmax.f32 %v2744_v63, 0.0  ;;  %4917 = vlog2.f32 %v8636_v3  ;;  %vm2880_vm5 = vcmp.eq.s32.totalorder %v5235_v40, 4294967295 }
 0x477   :  { %v2742_v0 = vsub.f32 %v2526_v16, %v10902_v53  ;;  %v10903_v16 = vld [vmem:[#allocation136_spill] sm:$0xff]  ;;  %v3124_v32 = vsel %vm2868_vm9, 0.0, %v2996_v56  ;;  %v3115_v57 = vsel %vm2859_vm10, 0.0, %v2987_v29  ;;  %v10905_v56 = vld [vmem:[#allocation53_spill] sm:$0xff] }
 0x478   :  { %v2733_v28 = vsub.f32 %v2508_v50, %v10903_v16  ;;  %v5226_v50 = vld [vmem:[%s10189_s1 + $0xf0] sm:$0xff]  ;;  %v2735_v53 = vsub.f32 %v2512_v34, %v10905_v56  ;;  %v10906_v16 = vld [vmem:[#allocation69_spill] sm:$0xff] }
 0x479   :  { %v8937_v7 = vpop.xlane.xlu1 %2331  ;;  %3544 = vperm.xlu1 %4550, %v3111_v47   ;;  %v8939_v8 = vpop.xlane.xlu0 %2364  ;;  %v2998_v10 = vmax.f32 %v2742_v0, 0.0  ;;  %vm2861_vm11 = vcmp.eq.s32.totalorder %v5226_v50, 4294967295  ;;  %v10907_v34 = vld [vmem:[#allocation42_spill] sm:$0xff] }
 0x47a   :  { %3577 = vperm.xlu0 %4549, %v3122_v12   ;;  %v4888_v12 = vpop.eup %4887  ;;  %v2989_v59 = vmax.f32 %v2733_v28, 0.0  ;;  %v2737_v29 = vsub.f32 %v2516_v46, %v10907_v34  ;;  %v5230_v46 = vld [vmem:[%s10189_s1 + $0x110] sm:$0xff]  ;;  %4919 = vlog2.f32 %v8728_v37  ;;  %v5237_v37 = vld [vmem:[%s10189_s1 + $0x198] sm:$0xff] }
 0x47b   :  { %v4890_v0 = vpop.eup %4889  ;;  %v2538_v44 = vmul.f32 0.6931472, %v4888_v12  ;;  %v3126_v14 = vsel %vm2870_vm0, 0.0, %v2998_v10  ;;  %v2991_v10 = vmax.f32 %v2735_v53, 0.0  ;;  %vm2865_vm15 = vcmp.eq.s32.totalorder %v5230_v46, 4294967295 }
 0x47c   :  { %v4892_v27 = vpop.eup %4891  ;;  %v2520_v28 = vmul.f32 0.6931472, %v4890_v0  ;;  %v2993_v50 = vmax.f32 %v2737_v29, 0.0  ;;  %v10909_v0 = vld [vmem:[#allocation140_spill] sm:$0xff]  ;;  %vm2882_vm7 = vcmp.eq.s32.totalorder %v5237_v37, 4294967295  ;;  %4921 = vlog2.f32 %v8643_v39 }
 0x47d   :  { %v8952_v4 = vpop.xlane.xlu1 %2337  ;;  %3550 = vperm.xlu1 %4550, %v3113_v54   ;;  %v8954_v47 = vpop.xlane.xlu0 %2370  ;;  %v2542_v63 = vmul.f32 0.6931472, %v4892_v27  ;;  %v3119_v53 = vsel %vm2863_vm13, 0.0, %v2991_v10  ;;  %v5232_v29 = vld [vmem:[%s10189_s1 + $0x120] sm:$0xff] }
 0x47e   :  { %3583 = vperm.xlu0 %4549, %v3124_v32   ;;  %v2746_v32 = vsub.f32 %v2534_v52, %v10906_v16  ;;  %v3117_v52 = vsel %vm2861_vm11, 0.0, %v2989_v59  ;;  %v4894_v24 = vpop.eup %4893  ;;  %v3121_v19 = vsel %vm2865_vm15, 0.0, %v2993_v50  ;;  %vm2867_vm2 = vcmp.eq.s32.totalorder %v5232_v29, 4294967295  ;;  %v10914_v50 = vld [vmem:[#allocation75_spill] sm:$0xff]  ;;  %v5236_v29 = vld [vmem:[%s10189_s1 + $0x140] sm:$0xff] }
 0x47f   :  { %v4896_v49 = vpop.eup %4895  ;;  %v2524_v59 = vmul.f32 0.6931472, %v4894_v24  ;;  %vm2871_vm6 = vcmp.eq.s32.totalorder %v5236_v29, 4294967295  ;;  %v5239_v29 = vld [vmem:[%s10189_s1 + $0x1a8] sm:$0xff] }
 0x480   :  { %v3002_v56 = vmax.f32 %v2746_v32, 0.0  ;;  %v2546_v32 = vmul.f32 0.6931472, %v4896_v49  ;;  %vm2884_vm9 = vcmp.eq.s32.totalorder %v5239_v29, 4294967295 }
 0x481   :  { %v8967_v58 = vpop.xlane.xlu1 %2343  ;;  %3556 = vperm.xlu1 %4550, %v3115_v57   ;;  %v8969_v54 = vpop.xlane.xlu0 %2376  ;;  %v3128_v57 = vsel %vm2872_vm12, 0.0, %v3000_v15 }
 0x482   :  { %3589 = vperm.xlu0 %4549, %v3126_v14   ;;  %v10908_v14 = vld [vmem:[#allocation71_spill] sm:$0xff]  ;;  %v4898_v15 = vpop.eup %4897  ;;  %v3130_v61 = vsel %vm2874_vm14, 0.0, %v3002_v56 }
 0x483   :  { %v2748_v16 = vsub.f32 %v2538_v44, %v10908_v14  ;;  %v2739_v44 = vsub.f32 %v2520_v28, %v10909_v0  ;;  %v4900_v31 = vpop.eup %4899  ;;  %v2528_v10 = vmul.f32 0.6931472, %v4898_v15  ;;  %v2752_v0 = vsub.f32 %v2546_v32, %v10914_v50  ;;  %v5233_v15 = vld [vmem:[%s10189_s1 + $0x178] sm:$0xff] }
 0x484   :  { %v4902_v28 = vpop.eup %4901  ;;  %vm2878_vm3 = vcmp.eq.s32.totalorder %v5233_v15, 4294967295 }
 0x485   :  { %v8982_v12 = vpop.xlane.xlu1 %2349  ;;  %3562 = vperm.xlu1 %4550, %v3117_v52   ;;  %v8984_v60 = vpop.xlane.xlu0 %2382  ;;  %v3004_v52 = vmax.f32 %v2748_v16, 0.0  ;;  %v2995_v24 = vmax.f32 %v2739_v44, 0.0  ;;  %v2550_v16 = vmul.f32 0.6931472, %v4900_v31  ;;  %v2532_v5 = vmul.f32 0.6931472, %v4902_v28 }
 0x486   :  { %3595 = vperm.xlu0 %4549, %v3128_v57   ;;  %v10911_v57 = vld [vmem:[#allocation73_spill] sm:$0xff]  ;;  %v3008_v28 = vmax.f32 %v2752_v0, 0.0 }
 0x487   :  { %v2750_v14 = vsub.f32 %v2542_v63, %v10911_v57  ;;  %v10912_v63 = vld [vmem:[#allocation57_spill] sm:$0xff]  ;;  %v3132_v1 = vsel %vm2876_vm1, 0.0, %v3004_v52  ;;  %v3123_v44 = vsel %vm2867_vm2, 0.0, %v2995_v24  ;;  %v10915_v52 = vld [vmem:[#allocation46_spill] sm:$0xff] }
 0x488   :  { %v2741_v56 = vsub.f32 %v2524_v59, %v10912_v63  ;;  %v5234_v59 = vld [vmem:[%s10189_s1 + $0x130] sm:$0xff]  ;;  %v2743_v57 = vsub.f32 %v2528_v10, %v10915_v52  ;;  %v10916_v63 = vld [vmem:[#allocation77_spill] sm:$0xff]  ;;  %v10917_v10 = vld [vmem:[#allocation143_spill] sm:$0xff] }
 0x489   :  { %v8997_v27 = vpop.xlane.xlu1 %2355  ;;  %3568 = vperm.xlu1 %4550, %v3119_v53   ;;  %v8999_v34 = vpop.xlane.xlu0 %2388  ;;  %v3006_v46 = vmax.f32 %v2750_v14, 0.0  ;;  %vm2869_vm4 = vcmp.eq.s32.totalorder %v5234_v59, 4294967295  ;;  %v2745_v24 = vsub.f32 %v2532_v5, %v10917_v10  ;;  %v5238_v5 = vld [vmem:[%s10189_s1 + $0x150] sm:$0xff] }
 0x48a   :  { %10910 = vst [vmem:[#allocation129_spill] sm:$0xff] %v8999_v34  ;;  %3601 = vperm.xlu0 %4549, %v3130_v61   ;;  %v4904_v61 = vpop.eup %4903  ;;  %v2997_v32 = vmax.f32 %v2741_v56, 0.0  ;;  %vm2873_vm8 = vcmp.eq.s32.totalorder %v5238_v5, 4294967295  ;;  %v10930_v34 = vld [vmem:[#allocation19_spill] sm:$0xff] }
 0x48b   :  { %v4906_v14 = vpop.eup %4905  ;;  %v2554_v31 = vmul.f32 0.6931472, %v4904_v61  ;;  %v3134_v25 = vsel %vm2878_vm3, 0.0, %v3006_v46  ;;  %v2999_v46 = vmax.f32 %v2743_v57, 0.0  ;;  %v3001_v59 = vmax.f32 %v2745_v24, 0.0  ;;  %v10919_v57 = vld [vmem:[#allocation23_spill] sm:$0xff] }
 0x48c   :  { %v4908_v50 = vpop.eup %4907  ;;  %v2536_v56 = vmul.f32 0.6931472, %v4906_v14  ;;  %4923 = vlog2.f32 %v10919_v57  ;;  %v10922_v24 = vld [vmem:[#allocation123_spill] sm:$0xff] }
 0x48d   :  { %v9012_v49 = vpop.xlane.xlu1 %2361  ;;  %3574 = vperm.xlu1 %4550, %v3121_v19   ;;  %v9014_v53 = vpop.xlane.xlu0 %2394  ;;  %v2558_v0 = vmul.f32 0.6931472, %v4908_v50  ;;  %v3127_v14 = vsel %vm2871_vm6, 0.0, %v2999_v46  ;;  %4925 = vlog2.f32 %v10922_v24  ;;  %v5240_v46 = vld [vmem:[%s10189_s1 + $0x160] sm:$0xff] }
 0x48e   :  { %10913 = vst [vmem:[#allocation12_spill] sm:$0xff] %v9014_v53  ;;  %3607 = vperm.xlu0 %4549, %v3132_v1   ;;  %v2754_v1 = vsub.f32 %v2550_v16, %v10916_v63  ;;  %v3125_v16 = vsel %vm2869_vm4, 0.0, %v2997_v32  ;;  %v4910_v3 = vpop.eup %4909  ;;  %vm2875_vm10 = vcmp.eq.s32.totalorder %v5240_v46, 4294967295  ;;  %4927 = vlog2.f32 %v8757_v20  ;;  %v5244_v46 = vld [vmem:[%s10189_s1 + $0x180] sm:$0xff] }
 0x48f   :  { %v4912_v40 = vpop.eup %4911  ;;  %v2540_v32 = vmul.f32 0.6931472, %v4910_v3  ;;  %vm2879_vm13 = vcmp.eq.s32.totalorder %v5244_v46, 4294967295 }
 0x490   :  { %v3010_v52 = vmax.f32 %v2754_v1, 0.0  ;;  %v4914_v1 = vpop.eup %4913  ;;  %v2562_v50 = vmul.f32 0.6931472, %v4912_v40 }
 0x491   :  { %v9027_v21 = vpop.xlane.xlu1 %2367  ;;  %3580 = vperm.xlu1 %4550, %v3123_v44   ;;  %v9029_v19 = vpop.xlane.xlu0 %2400  ;;  %v3136_v44 = vsel %vm2880_vm5, 0.0, %v3008_v28 }
 0x492   :  { %3613 = vperm.xlu0 %4549, %v3134_v25   ;;  %v10918_v25 = vld [vmem:[#allocation68_spill] sm:$0xff]  ;;  %v3138_v39 = vsel %vm2882_vm7, 0.0, %v3010_v52  ;;  %v4916_v53 = vpop.eup %4915  ;;  %v2544_v52 = vmul.f32 0.6931472, %v4914_v1  ;;  %v5241_v1 = vld [vmem:[%s10189_s1 + $0x1b8] sm:$0xff] }
 0x493   :  { %v2756_v63 = vsub.f32 %v2554_v31, %v10918_v25  ;;  %v10920_v31 = vld [vmem:[#allocation61_spill] sm:$0xff]  ;;  %v10921_v25 = vld [vmem:[#allocation83_spill] sm:$0xff]  ;;  %v4918_v3 = vpop.eup %4917  ;;  %v2566_v57 = vmul.f32 0.6931472, %v4916_v53  ;;  %vm2886_vm0 = vcmp.eq.s32.totalorder %v5241_v1, 4294967295  ;;  %v5242_v53 = vld [vmem:[%s10189_s1 + $0x170] sm:$0xff] }
 0x494   :  { %v2747_v28 = vsub.f32 %v2536_v56, %v10920_v31  ;;  %v2758_v37 = vsub.f32 %v2558_v0, %v10921_v25  ;;  %v3129_v56 = vsel %vm2873_vm8, 0.0, %v3001_v59  ;;  %v4920_v29 = vpop.eup %4919  ;;  %v2548_v20 = vmul.f32 0.6931472, %v4918_v3  ;;  %v10929_v1 = vld [vmem:[#allocation87_spill] sm:$0xff] }
 0x495   :  { %v9042_v61 = vpop.xlane.xlu1 %2373  ;;  %3586 = vperm.xlu1 %4550, %v3125_v16   ;;  %v9044_v15 = vpop.xlane.xlu0 %2406  ;;  %vm2877_vm11 = vcmp.eq.s32.totalorder %v5242_v53, 4294967295 }
 0x496   :  { %3619 = vperm.xlu0 %4549, %v3136_v44   ;;  %v3012_v44 = vmax.f32 %v2756_v63, 0.0  ;;  %v3003_v0 = vmax.f32 %v2747_v28, 0.0  ;;  %v10923_v63 = vld [vmem:[#allocation50_spill] sm:$0xff]  ;;  %v3014_v59 = vmax.f32 %v2758_v37, 0.0  ;;  %v10926_v28 = vld [vmem:[#allocation8_spill] sm:$0xff]  ;;  %v4922_v24 = vpop.eup %4921 }
 0x497   :  { %v2749_v40 = vsub.f32 %v2540_v32, %v10923_v63  ;;  %4929 = vlog2.f32 %v10926_v28  ;;  %v2762_v28 = vsub.f32 %v2566_v57, %v10929_v1  ;;  %v10934_v1 = vld [vmem:[#allocation89_spill] sm:$0xff] }
 0x498   :  { %v3140_v5 = vsel %vm2884_vm9, 0.0, %v3012_v44  ;;  %4931 = vlog2.f32 %v8772_v18  ;;  %v3131_v32 = vsel %vm2875_vm10, 0.0, %v3003_v0  ;;  %v10927_v44 = vld [vmem:[#allocation148_spill] sm:$0xff]  ;;  %v5243_v18 = vld [vmem:[%s10189_s1 + $0x1c8] sm:$0xff] }
 0x499   :  { %v9057_v10 = vpop.xlane.xlu1 %2379  ;;  %3592 = vperm.xlu1 %4550, %v3127_v14   ;;  %v9059_v16 = vpop.xlane.xlu0 %2412  ;;  %v2751_v37 = vsub.f32 %v2544_v52, %v10927_v44  ;;  %4933 = vlog2.f32 %v10930_v34  ;;  %vm2888_vm12 = vcmp.eq.s32.totalorder %v5243_v18, 4294967295  ;;  %v10931_v52 = vld [vmem:[#allocation65_spill] sm:$0xff] }
 0x49a   :  { %3625 = vperm.xlu0 %4549, %v3138_v39   ;;  %v10925_v39 = vld [vmem:[#allocation85_spill] sm:$0xff]  ;;  %v2753_v0 = vsub.f32 %v2548_v20, %v10931_v52  ;;  %4935 = vlog2.f32 %v8787_v22  ;;  %v5245_v22 = vld [vmem:[%s10189_s1 + $0x1d8] sm:$0xff]  ;;  %v10935_v20 = vld [vmem:[#allocation110_spill] sm:$0xff] }
 0x49b   :  { %v2760_v25 = vsub.f32 %v2562_v50, %v10925_v39  ;;  %v3005_v50 = vmax.f32 %v2749_v40, 0.0  ;;  %v2552_v40 = vmul.f32 0.6931472, %v4922_v24  ;;  %vm2890_vm14 = vcmp.eq.s32.totalorder %v5245_v22, 4294967295  ;;  %v10936_v24 = vld [vmem:[#allocation54_spill] sm:$0xff] }
 0x49c   :  { %4937 = vlog2.f32 %v10935_v20  ;;  %v3009_v53 = vmax.f32 %v2753_v0, 0.0  ;;  %v5247_v0 = vld [vmem:[%s10189_s1 + $0x1e8] sm:$0xff] }
 0x49d   :  { %v9072_v14 = vpop.xlane.xlu1 %2385  ;;  %3598 = vperm.xlu1 %4550, %v3129_v56   ;;  %v9074_v31 = vpop.xlane.xlu0 %2418  ;;  %v2570_v56 = vmul.f32 0.6931472, %v4920_v29  ;;  %v3016_v39 = vmax.f32 %v2760_v25, 0.0  ;;  %v3133_v57 = vsel %vm2877_vm11, 0.0, %v3005_v50  ;;  %4939 = vlog2.f32 %v8802_v9  ;;  %v10938_v9 = vld [vmem:[#allocation125_spill] sm:$0xff] }
 0x49e   :  { %10924 = vst [vmem:[#allocation25_spill] sm:$0xff] %v9072_v14  ;;  %3631 = vperm.xlu0 %4549, %v3140_v5   ;;  %v3142_v5 = vsel %vm2886_vm0, 0.0, %v3014_v59  ;;  %v4924_v14 = vpop.eup %4923  ;;  %v3007_v59 = vmax.f32 %v2751_v37, 0.0  ;;  %vm2892_vm1 = vcmp.eq.s32.totalorder %v5247_v0, 4294967295  ;;  %4941 = vlog2.f32 %v10938_v9  ;;  %v5249_v9 = vld [vmem:[%s10189_s1 + $0x1f8] sm:$0xff] }
 0x49f   :  { %v4926_v34 = vpop.eup %4925  ;;  %v2574_v25 = vmul.f32 0.6931472, %v4924_v14  ;;  %v3144_v44 = vsel %vm2888_vm12, 0.0, %v3016_v39  ;;  %v2764_v18 = vsub.f32 %v2570_v56, %v10934_v1  ;;  %v5246_v14 = vld [vmem:[%s10189_s1 + $0x190] sm:$0xff]  ;;  %v2755_v56 = vsub.f32 %v2552_v40, %v10936_v24  ;;  %v10937_v1 = vld [vmem:[#allocation91_spill] sm:$0xff]  ;;  %v5248_v40 = vld [vmem:[%s10189_s1 + $0x1a0] sm:$0xff] }
 0x4a0   :  { %vm2881_vm15 = vcmp.eq.s32.totalorder %v5246_v14, 4294967295  ;;  %v2556_v50 = vmul.f32 0.6931472, %v4926_v34  ;;  %v3135_v37 = vsel %vm2879_vm13, 0.0, %v3007_v59  ;;  %vm2883_vm2 = vcmp.eq.s32.totalorder %v5248_v40, 4294967295  ;;  %v10941_v14 = vld [vmem:[#allocation93_spill] sm:$0xff] }
 0x4a1   :  { %v9087_v63 = vpop.xlane.xlu1 %2391  ;;  %3604 = vperm.xlu1 %4550, %v3131_v32   ;;  %v9089_v3 = vpop.xlane.xlu0 %2424  ;;  %v2766_v22 = vsub.f32 %v2574_v25, %v10937_v1  ;;  %4943 = vlog2.f32 %v8817_v36  ;;  %v3011_v25 = vmax.f32 %v2755_v56, 0.0  ;;  %vm2894_vm3 = vcmp.eq.s32.totalorder %v5249_v9, 4294967295  ;;  %v10942_v36 = vld [vmem:[#allocation9_spill] sm:$0xff]  ;;  %v10946_v9 = vld [vmem:[#allocation95_spill] sm:$0xff]  ;;  %v5252_v40 = vld [vmem:[%s10189_s1 + $0x1c0] sm:$0xff] }
 0x4a2   :  { %10928 = vst [vmem:[#allocation113_spill] sm:$0xff] %v9087_v63  ;;  %3637 = vperm.xlu0 %4549, %v3142_v5   ;;  %v3018_v5 = vmax.f32 %v2762_v28, 0.0  ;;  %v4928_v63 = vpop.eup %4927  ;;  %4945 = vlog2.f32 %v10942_v36  ;;  %vm2887_vm6 = vcmp.eq.s32.totalorder %v5252_v40, 4294967295  ;;  %v10957_v40 = vld [vmem:[#allocation127_spill] sm:$0xff] }
 0x4a3   :  { %v4930_v39 = vpop.eup %4929  ;;  %v2578_v28 = vmul.f32 0.6931472, %v4928_v63  ;;  %v3137_v63 = vsel %vm2881_vm15, 0.0, %v3009_v53  ;;  %v3022_v1 = vmax.f32 %v2766_v22, 0.0  ;;  %4947 = vlog2.f32 %v8832_v2  ;;  %v5251_v2 = vld [vmem:[%s10189_s1 + $0x208] sm:$0xff] }
 0x4a4   :  { %v4932_v20 = vpop.eup %4931  ;;  %v2560_v34 = vmul.f32 0.6931472, %v4930_v39  ;;  %v3139_v56 = vsel %vm2883_vm2, 0.0, %v3011_v25  ;;  %vm2896_vm5 = vcmp.eq.s32.totalorder %v5251_v2, 4294967295 }
 0x4a5   :  { %v9102_v29 = vpop.xlane.xlu1 %2397  ;;  %3610 = vperm.xlu1 %4550, %v3133_v57   ;;  %v9104_v32 = vpop.xlane.xlu0 %2430  ;;  %v3146_v57 = vsel %vm2890_vm14, 0.0, %v3018_v5  ;;  %v10940_v5 = vld [vmem:[#allocation58_spill] sm:$0xff]  ;;  %v2768_v53 = vsub.f32 %v2578_v28, %v10941_v14 }
 0x4a6   :  { %10932 = vst [vmem:[#allocation131_spill] sm:$0xff] %v9102_v29  ;;  %10933 = vst [vmem:[#allocation14_spill] sm:$0xff] %v9104_v32  ;;  %3643 = vperm.xlu0 %4549, %v3144_v44   ;;  %v3020_v44 = vmax.f32 %v2764_v18, 0.0  ;;  %v4934_v59 = vpop.eup %4933  ;;  %v2757_v18 = vsub.f32 %v2556_v50, %v10940_v5  ;;  %v5250_v50 = vld [vmem:[%s10189_s1 + $0x1b0] sm:$0xff]  ;;  %v10947_v32 = vld [vmem:[#allocation21_spill] sm:$0xff] }
 0x4a7   :  { %v4936_v0 = vpop.eup %4935  ;;  %v2564_v39 = vmul.f32 0.6931472, %v4934_v59  ;;  %vm2885_vm4 = vcmp.eq.s32.totalorder %v5250_v50, 4294967295  ;;  %v3150_v59 = vsel %vm2894_vm3, 0.0, %v3022_v1  ;;  %v3024_v14 = vmax.f32 %v2768_v53, 0.0 }
 0x4a8   :  { %v3013_v28 = vmax.f32 %v2757_v18, 0.0  ;;  %4949 = vlog2.f32 %v10947_v32 }
 0x4a9   :  { %v9117_v52 = vpop.xlane.xlu1 %2403  ;;  %3616 = vperm.xlu1 %4550, %v3135_v37   ;;  %v9124_v46 = vpop.xlane.xlu0 %2436  ;;  %v2582_v37 = vmul.f32 0.6931472, %v4932_v20  ;;  %4951 = vlog2.f32 %v8847_v38  ;;  %v5253_v38 = vld [vmem:[%s10189_s1 + $0x218] sm:$0xff] }
 0x4aa   :  { %3649 = vperm.xlu0 %4549, %v3146_v57   ;;  %10939 = vst [vmem:[#allocation27_spill] sm:$0xff] %v9124_v46  ;;  %v3148_v57 = vsel %vm2892_vm1, 0.0, %v3020_v44  ;;  %v10943_v44 = vld [vmem:[#allocation60_spill] sm:$0xff]  ;;  %v4938_v20 = vpop.eup %4937  ;;  %vm2898_vm7 = vcmp.eq.s32.totalorder %v5253_v38, 4294967295  ;;  %v10956_v38 = vld [vmem:[#allocation99_spill] sm:$0xff] }
 0x4ab   :  { %v2759_v22 = vsub.f32 %v2560_v34, %v10943_v44  ;;  %v2770_v36 = vsub.f32 %v2582_v37, %v10946_v9  ;;  %v4940_v46 = vpop.eup %4939  ;;  %v10948_v34 = vld [vmem:[#allocation62_spill] sm:$0xff]  ;;  %v2568_v18 = vmul.f32 0.6931472, %v4938_v20  ;;  %v3141_v37 = vsel %vm2885_vm4, 0.0, %v3013_v28  ;;  %v10951_v9 = vld [vmem:[#allocation97_spill] sm:$0xff]  ;;  %v10953_v20 = vld [vmem:[#allocation64_spill] sm:$0xff] }
 0x4ac   :  { %v2761_v25 = vsub.f32 %v2564_v39, %v10948_v34  ;;  %v4942_v32 = vpop.eup %4941  ;;  %v2590_v53 = vmul.f32 0.6931472, %v4940_v46  ;;  %v3152_v44 = vsel %vm2896_vm5, 0.0, %v3024_v14  ;;  %v10952_v39 = vld [vmem:[#allocation111_spill] sm:$0xff]  ;;  %v5254_v46 = vld [vmem:[%s10189_s1 + $0x1d0] sm:$0xff] }
 0x4ad   :  { %v9132_v24 = vpop.xlane.xlu1 %2409  ;;  %3622 = vperm.xlu1 %4550, %v3137_v63   ;;  %v2586_v63 = vmul.f32 0.6931472, %v4936_v0  ;;  %v9145_v5 = vpop.xlane.xlu0 %2442  ;;  %v3015_v1 = vmax.f32 %v2759_v22, 0.0  ;;  %4953 = vlog2.f32 %v10952_v39  ;;  %vm2889_vm8 = vcmp.eq.s32.totalorder %v5254_v46, 4294967295 }
 0x4ae   :  { %3655 = vperm.xlu0 %4549, %v3148_v57   ;;  %10944 = vst [vmem:[#allocation114_spill] sm:$0xff] %v9145_v5  ;;  %v4944_v5 = vpop.eup %4943  ;;  %v3017_v50 = vmax.f32 %v2761_v25, 0.0  ;;  %v2572_v28 = vmul.f32 0.6931472, %v4942_v32  ;;  %4955 = vlog2.f32 %v8862_v62  ;;  %v2774_v39 = vsub.f32 %v2590_v53, %v10956_v38  ;;  %v5255_v62 = vld [vmem:[%s10189_s1 + $0x228] sm:$0xff]  ;;  %v5256_v25 = vld [vmem:[%s10189_s1 + $0x1e0] sm:$0xff] }
 0x4af   :  { %v2772_v2 = vsub.f32 %v2586_v63, %v10951_v9  ;;  %v3143_v22 = vsel %vm2887_vm6, 0.0, %v3015_v1  ;;  %v2763_v63 = vsub.f32 %v2568_v18, %v10953_v20  ;;  %v4946_v14 = vpop.eup %4945  ;;  %vm2900_vm9 = vcmp.eq.s32.totalorder %v5255_v62, 4294967295  ;;  %v10958_v53 = vld [vmem:[#allocation66_spill] sm:$0xff] }
 0x4b0   :  { %4957 = vlog2.f32 %v10957_v40  ;;  %vm2891_vm10 = vcmp.eq.s32.totalorder %v5256_v25, 4294967295  ;;  %v2576_v1 = vmul.f32 0.6931472, %v4946_v14  ;;  %v5257_v14 = vld [vmem:[%s10189_s1 + $0x238] sm:$0xff]  ;;  %v5260_v25 = vld [vmem:[%s10189_s1 + $0x200] sm:$0xff] }
 0x4b1   :  { %v9147_v57 = vpop.xlane.xlu1 %2415  ;;  %3628 = vperm.xlu1 %4550, %v3139_v56   ;;  %v3028_v9 = vmax.f32 %v2772_v2, 0.0  ;;  %4959 = vlog2.f32 %v8877_v35  ;;  %v3019_v32 = vmax.f32 %v2763_v63, 0.0  ;;  %vm2902_vm0 = vcmp.eq.s32.totalorder %v5257_v14, 4294967295  ;;  %v10962_v63 = vld [vmem:[#allocation10_spill] sm:$0xff] }
 0x4b2   :  { %10945 = vst [vmem:[#allocation133_spill] sm:$0xff] %v9147_v57  ;;  %3661 = vperm.xlu0 %4549, %v3150_v59   ;;  %v3026_v59 = vmax.f32 %v2770_v36, 0.0  ;;  %v2594_v36 = vmul.f32 0.6931472, %v4944_v5  ;;  %v3145_v5 = vsel %vm2889_vm8, 0.0, %v3017_v50  ;;  %v3030_v50 = vmax.f32 %v2774_v39, 0.0 }
 0x4b3   :  { %v3156_v46 = vsel %vm2900_vm9, 0.0, %v3028_v9  ;;  %4961 = vlog2.f32 %v10962_v63  ;;  %v10963_v9 = vld [vmem:[#allocation81_spill] sm:$0xff]  ;;  %v10966_v14 = vld [vmem:[#allocation90_spill] sm:$0xff]  ;;  %vm2895_vm13 = vcmp.eq.s32.totalorder %v5260_v25, 4294967295  ;;  %v5264_v25 = vld [vmem:[%s10189_s1 + $0x220] sm:$0xff] }
 0x4b4   :  { %4963 = vlog2.f32 %v8892_v45  ;;  %v2767_v39 = vsub.f32 %v2576_v1, %v10963_v9  ;;  %v5259_v45 = vld [vmem:[%s10189_s1 + $0x248] sm:$0xff]  ;;  %v10968_v1 = vld [vmem:[#allocation72_spill] sm:$0xff]  ;;  %vm2899_vm2 = vcmp.eq.s32.totalorder %v5264_v25, 4294967295 }
 0x4b5   :  { %v9160_v0 = vpop.xlane.xlu1 %2421  ;;  %3634 = vperm.xlu1 %4550, %v3141_v37   ;;  %v9162_v56 = vpop.permute.xlu0 %3472  ;;  %vm2904_vm12 = vcmp.eq.s32.totalorder %v5259_v45, 4294967295  ;;  %v5268_v25 = vld [vmem:[%s10189_s1 + $0x240] sm:$0xff] }
 0x4b6   :  { %10949 = vst [vmem:[#allocation16_spill] sm:$0xff] %v9160_v0  ;;  %10950 = vst [vmem:[#allocation29_spill] sm:$0xff] %v9162_v56  ;;  %3667 = vperm.xlu0 %4549, %v3152_v44   ;;  %v3154_v44 = vsel %vm2898_vm7, 0.0, %v3026_v59  ;;  %v4948_v0 = vpop.eup %4947  ;;  %v2765_v59 = vsub.f32 %v2572_v28, %v10958_v53  ;;  %v3147_v28 = vsel %vm2891_vm10, 0.0, %v3019_v32  ;;  %vm2903_vm6 = vcmp.eq.s32.totalorder %v5268_v25, 4294967295  ;;  %v11004_v56 = vld [vmem:[#allocation164_spill] sm:$0xff] }
 0x4b7   :  { %v4950_v18 = vpop.eup %4949  ;;  %v2598_v2 = vmul.f32 0.6931472, %v4948_v0  ;;  %v5258_v0 = vld [vmem:[%s10189_s1 + $0x1f0] sm:$0xff] }
 0x4b8   :  { %v4952_v62 = vpop.eup %4951  ;;  %v2580_v35 = vmul.f32 0.6931472, %v4950_v18  ;;  %vm2893_vm11 = vcmp.eq.s32.totalorder %v5258_v0, 4294967295 }
 0x4b9   :  { %v9175_v34 = vpop.xlane.xlu1 %2427  ;;  %3640 = vperm.xlu1 %4550, %v3143_v22   ;;  %v9177_v37 = vpop.permute.xlu0 %3481  ;;  %v2778_v63 = vsub.f32 %v2598_v2, %v10966_v14  ;;  %v10971_v14 = vld [vmem:[#allocation152_spill] sm:$0xff] }
 0x4ba   :  { %10954 = vst [vmem:[#allocation115_spill] sm:$0xff] %v9175_v34  ;;  %10955 = vst [vmem:[#allocation135_spill] sm:$0xff] %v9177_v37  ;;  %3673 = vperm.xlu0 %4549, %v3154_v44   ;;  %v10961_v44 = vld [vmem:[#allocation101_spill] sm:$0xff]  ;;  %v4954_v40 = vpop.eup %4953  ;;  %v10967_v34 = vld [vmem:[#allocation112_spill] sm:$0xff]  ;;  %v2769_v32 = vsub.f32 %v2580_v35, %v10968_v1 }
 0x4bb   :  { %v2776_v38 = vsub.f32 %v2594_v36, %v10961_v44  ;;  %v3021_v36 = vmax.f32 %v2765_v59, 0.0  ;;  %4965 = vlog2.f32 %v10967_v34  ;;  %v2584_v59 = vmul.f32 0.6931472, %v4954_v40  ;;  %v10995_v37 = vld [vmem:[#allocation18_spill] sm:$0xff] }
 0x4bc   :  { %4967 = vlog2.f32 %v8907_v55  ;;  %v5261_v55 = vld [vmem:[%s10189_s1 + $0x258] sm:$0xff]  ;;  %v3025_v35 = vmax.f32 %v2769_v32, 0.0 }
 0x4bd   :  { %v9190_v22 = vpop.xlane.xlu1 %2433  ;;  %3646 = vperm.xlu1 %4550, %v3145_v5   ;;  %v9192_v20 = vpop.permute.xlu0 %3487  ;;  %v2602_v5 = vmul.f32 0.6931472, %v4952_v62  ;;  %v3032_v44 = vmax.f32 %v2776_v38, 0.0  ;;  %v3149_v2 = vsel %vm2893_vm11, 0.0, %v3021_v36  ;;  %vm2906_vm14 = vcmp.eq.s32.totalorder %v5261_v55, 4294967295 }
 0x4be   :  { %10959 = vst [vmem:[#allocation31_spill] sm:$0xff] %v9190_v22  ;;  %10960 = vst [vmem:[#allocation137_spill] sm:$0xff] %v9192_v20  ;;  %3679 = vperm.xlu0 %4549, %v3156_v46   ;;  %v3158_v46 = vsel %vm2902_vm0, 0.0, %v3030_v50  ;;  %v4956_v22 = vpop.eup %4955  ;;  %v3023_v50 = vmax.f32 %v2767_v39, 0.0  ;;  %4969 = vlog2.f32 %v8759_v13  ;;  %v10972_v39 = vld [vmem:[#allocation74_spill] sm:$0xff] }
 0x4bf   :  { %v4958_v34 = vpop.eup %4957  ;;  %v2606_v38 = vmul.f32 0.6931472, %v4956_v22  ;;  %v3160_v9 = vsel %vm2904_vm12, 0.0, %v3032_v44  ;;  %v2780_v45 = vsub.f32 %v2602_v5, %v10971_v14  ;;  %v5262_v22 = vld [vmem:[%s10189_s1 + $0x210] sm:$0xff]  ;;  %4971 = vlog2.f32 %v8922_v43  ;;  %v5263_v43 = vld [vmem:[%s10189_s1 + $0x268] sm:$0xff] }
 0x4c0   :  { %vm2897_vm15 = vcmp.eq.s32.totalorder %v5262_v22, 4294967295  ;;  %v2588_v0 = vmul.f32 0.6931472, %v4958_v34  ;;  %v3151_v36 = vsel %vm2895_vm13, 0.0, %v3023_v50  ;;  %v2771_v40 = vsub.f32 %v2584_v59, %v10972_v39  ;;  %v10975_v34 = vld [vmem:[#allocation76_spill] sm:$0xff] }
 0x4c1   :  { %v9205_v53 = vpop.xlane.xlu1 %2439  ;;  %3652 = vperm.xlu1 %4550, %v3147_v28   ;;  %v9207_v18 = vpop.permute.xlu0 %3493  ;;  %vm2908_vm1 = vcmp.eq.s32.totalorder %v5263_v43, 4294967295  ;;  %4973 = vlog2.f32 %v8774_v11 }
 0x4c2   :  { %10964 = vst [vmem:[#allocation20_spill] sm:$0xff] %v9205_v53  ;;  %10965 = vst [vmem:[#allocation118_spill] sm:$0xff] %v9207_v18  ;;  %3685 = vperm.xlu0 %4549, %v3158_v46   ;;  %v3034_v46 = vmax.f32 %v2778_v63, 0.0  ;;  %v4960_v53 = vpop.eup %4959  ;;  %4975 = vlog2.f32 %v8937_v7  ;;  %v3027_v50 = vmax.f32 %v2771_v40, 0.0 }
 0x4c3   :  { %v4962_v5 = vpop.eup %4961  ;;  %v2610_v44 = vmul.f32 0.6931472, %v4960_v53  ;;  %v3153_v53 = vsel %vm2897_vm15, 0.0, %v3025_v35  ;;  %v10977_v35 = vld [vmem:[#allocation94_spill] sm:$0xff]  ;;  %4977 = vlog2.f32 %v8789_v51 }
 0x4c4   :  { %v3162_v13 = vsel %vm2906_vm14, 0.0, %v3034_v46  ;;  %v4964_v55 = vpop.eup %4963  ;;  %v2592_v59 = vmul.f32 0.6931472, %v4962_v5  ;;  %v5265_v5 = vld [vmem:[%s10189_s1 + $0x278] sm:$0xff]  ;;  %4979 = vlog2.f32 %v8952_v4  ;;  %v3155_v40 = vsel %vm2899_vm2, 0.0, %v3027_v50  ;;  %v5267_v4 = vld [vmem:[%s10189_s1 + $0x288] sm:$0xff] }
 0x4c5   :  { %v9220_v62 = vpop.xlane.xlu1 %2445  ;;  %3658 = vperm.xlu1 %4550, %v3149_v2   ;;  %v9222_v28 = vpop.permute.xlu0 %3499  ;;  %v3036_v2 = vmax.f32 %v2780_v45, 0.0  ;;  %v2614_v46 = vmul.f32 0.6931472, %v4964_v55  ;;  %v2784_v39 = vsub.f32 %v2610_v44, %v10977_v35  ;;  %vm2910_vm3 = vcmp.eq.s32.totalorder %v5265_v5, 4294967295 }
 0x4c6   :  { %10969 = vst [vmem:[#allocation139_spill] sm:$0xff] %v9220_v62  ;;  %10970 = vst [vmem:[#allocation35_spill] sm:$0xff] %v9222_v28  ;;  %3691 = vperm.xlu0 %4549, %v3160_v9   ;;  %v10974_v9 = vld [vmem:[#allocation105_spill] sm:$0xff]  ;;  %v4966_v32 = vpop.eup %4965  ;;  %4981 = vlog2.f32 %v8804_v42  ;;  %vm2912_vm5 = vcmp.eq.s32.totalorder %v5267_v4, 4294967295  ;;  %v10989_v62 = vld [vmem:[#allocation155_spill] sm:$0xff] }
 0x4c7   :  { %v2782_v14 = vsub.f32 %v2606_v38, %v10974_v9  ;;  %v2773_v38 = vsub.f32 %v2588_v0, %v10975_v34  ;;  %v3164_v11 = vsel %vm2908_vm1, 0.0, %v3036_v2  ;;  %v2596_v7 = vmul.f32 0.6931472, %v4966_v32  ;;  %v5266_v0 = vld [vmem:[%s10189_s1 + $0x230] sm:$0xff] }
 0x4c8   :  { %vm2901_vm4 = vcmp.eq.s32.totalorder %v5266_v0, 4294967295  ;;  %v10978_v2 = vld [vmem:[#allocation78_spill] sm:$0xff]  ;;  %v3040_v32 = vmax.f32 %v2784_v39, 0.0  ;;  %4983 = vlog2.f32 %v8819_v33  ;;  %v5271_v0 = vld [vmem:[%s10189_s1 + $0x2a8] sm:$0xff] }
 0x4c9   :  { %v9235_v63 = vpop.permute.xlu1 %3475  ;;  %3664 = vperm.xlu1 %4550, %v3151_v36   ;;  %v9237_v1 = vpop.permute.xlu0 %3505  ;;  %v3038_v22 = vmax.f32 %v2782_v14, 0.0  ;;  %v3029_v44 = vmax.f32 %v2773_v38, 0.0  ;;  %v2775_v9 = vsub.f32 %v2592_v59, %v10978_v2  ;;  %v10981_v34 = vld [vmem:[#allocation154_spill] sm:$0xff]  ;;  %v10982_v59 = vld [vmem:[#allocation80_spill] sm:$0xff]  ;;  %4985 = vlog2.f32 %v8967_v58  ;;  %v10984_v2 = vld [vmem:[#allocation149_spill] sm:$0xff] }
 0x4ca   :  { %10973 = vst [vmem:[#allocation141_spill] sm:$0xff] %v9237_v1  ;;  %3697 = vperm.xlu0 %4549, %v3162_v13   ;;  %v4968_v13 = vpop.eup %4967  ;;  %v2777_v50 = vsub.f32 %v2596_v7, %v10982_v59  ;;  %v5269_v38 = vld [vmem:[%s10189_s1 + $0x250] sm:$0xff]  ;;  %v3168_v7 = vsel %vm2912_vm5, 0.0, %v3040_v32  ;;  %v10985_v59 = vlaneseq  ;;  %v5270_v58 = vld [vmem:[%s10189_s1 + $0x298] sm:$0xff]  ;;  %vm2916_vm9 = vcmp.eq.s32.totalorder %v5271_v0, 4294967295 }
 0x4cb   :  { %v4970_v14 = vpop.eup %4969  ;;  %v2618_v55 = vmul.f32 0.6931472, %v4968_v13  ;;  %v3166_v51 = vsel %vm2910_vm3, 0.0, %v3038_v22  ;;  %vm2905_vm7 = vcmp.eq.s32.totalorder %v5269_v38, 4294967295  ;;  %v3031_v22 = vmax.f32 %v2775_v9, 0.0  ;;  %v10986_v9 = vld [vmem:[#allocation146_spill] sm:$0xff] }
 0x4cc   :  { %v4972_v35 = vpop.eup %4971  ;;  %v2600_v42 = vmul.f32 0.6931472, %v4970_v14  ;;  %v9291_v14 = vshrl.u32 %v10985_v59, 7  ;;  %vm2914_vm8 = vcmp.eq.s32.totalorder %v5270_v58, 4294967295  ;;  %v3887_v32 = vadd.s32 4294967256, %v10986_v9  ;;  %v10990_v58 = vld [vmem:[#allocation84_spill] sm:$0xff] }
 0x4cd   :  { %v9250_v45 = vpop.permute.xlu1 %3478  ;;  %3670 = vperm.xlu1 %4550, %v3153_v53   ;;  %v9252_v36 = vpop.permute.xlu0 %3511  ;;  %v2622_v33 = vmul.f32 0.6931472, %v4972_v35  ;;  %v9307_v35 = vld [vmem:[%s10189_s1 + $0x2b8] sm:$0xff]  ;;  %4987 = vlog2.f32 %v8982_v12  ;;  %v9322_v12 = vld [vmem:[%s10189_s1 + $0x270] sm:$0xff]  ;;  %vm3864_vm3 = vcmask 130112   ;;  %vm10280_vm5 = vcmask 195712  }
 0x4ce   :  { %10976 = vst [vmem:[#allocation24_spill] sm:$0xff] %v9252_v36  ;;  %3703 = vperm.xlu0 %4549, %v3164_v11   ;;  %v2786_v11 = vsub.f32 %v2614_v46, %v10981_v34  ;;  %v3157_v46 = vsel %vm2901_vm4, 0.0, %v3029_v44  ;;  %v4974_v39 = vpop.eup %4973  ;;  %v5272_v44 = vld [vmem:[%s10189_s1 + $0x260] sm:$0xff]  ;;  %vm2918_vm0 = vcmp.eq.s32.totalorder %v9307_v35, 4294967295  ;;  %vm2909_vm11 = vcmp.eq.s32.totalorder %v9322_v12, 4294967295 }
 0x4cf   :  { %v4976_v34 = vpop.eup %4975  ;;  %vm2907_vm10 = vcmp.eq.s32.totalorder %v5272_v44, 4294967295  ;;  %v2604_v4 = vmul.f32 0.6931472, %v4974_v39  ;;  %v2790_v18 = vsub.f32 %v2622_v33, %v10989_v62  ;;  %4989 = vlog2.f32 %v8834_v26  ;;  %v9334_v62 = vld [vmem:[%s10189_s1 + $0x2c8] sm:$0xff]  ;;  %v9389_v44 = vld [vmem:[%s10189_s1 + $0x290] sm:$0xff] }
 0x4d0   :  { %v4978_v59 = vpop.eup %4977  ;;  %vm2920_vm12 = vcmp.eq.s32.totalorder %v9334_v62, 4294967295  ;;  %v9341_v33 = vsub.s32 %v3887_v32, %v9291_v14  ;;  %v3915_v26 = vadd.s32 4294967224, %v10986_v9  ;;  %4991 = vlog2.f32 %v8997_v27 }
 0x4d1   :  { %v9265_v43 = vpop.permute.xlu1 %3484  ;;  %3676 = vperm.xlu1 %4550, %v3155_v40   ;;  %v9267_v53 = vpop.permute.xlu0 %3517  ;;  %v3042_v40 = vmax.f32 %v2786_v11, 0.0  ;;  %v3033_v11 = vmax.f32 %v2777_v50, 0.0  ;;  %v3046_v29 = vmax.f32 %v2790_v18, 0.0  ;;  %4993 = vlog2.f32 %v8849_v41  ;;  %v9368_v18 = vld [vmem:[%s10189_s1 + $0x2d8] sm:$0xff] }
 0x4d2   :  { %10979 = vst [vmem:[#allocation122_spill] sm:$0xff] %v9265_v43  ;;  %10980 = vst [vmem:[#allocation26_spill] sm:$0xff] %v9267_v53  ;;  %3709 = vperm.xlu0 %4549, %v3166_v51   ;;  %v2788_v51 = vsub.f32 %v2618_v55, %v10984_v2  ;;  %v3873_v55 = vadd.s32 4294967272, %v10986_v9  ;;  %v2626_v53 = vmul.f32 0.6931472, %v4976_v34  ;;  %v4980_v25 = vpop.eup %4979  ;;  %vm2922_vm14 = vcmp.eq.s32.totalorder %v9368_v18, 4294967295 }
 0x4d3   :  { %v3170_v1 = vsel %vm2914_vm8, 0.0, %v3042_v40  ;;  %v3161_v40 = vsel %vm2905_vm7, 0.0, %v3033_v11  ;;  %v2608_v34 = vmul.f32 0.6931472, %v4978_v59  ;;  %v9356_v11 = vld [vmem:[%s10189_s1 + $0x280] sm:$0xff]  ;;  %4995 = vlog2.f32 %v9012_v49 }
 0x4d4   :  { %v3044_v28 = vmax.f32 %v2788_v51, 0.0  ;;  %v9338_v39 = vsub.s32 %v3873_v55, %v9291_v14  ;;  %v4982_v51 = vpop.eup %4981  ;;  %vm2911_vm13 = vcmp.eq.s32.totalorder %v9356_v11, 4294967295  ;;  %v3866_v41 = vadd.s32 4294967280, %v10986_v9  ;;  %v11000_v11 = vld [vmem:[#allocation160_spill] sm:$0xff] }
 0x4d5   :  { %v9284_v13 = vpop.permute.xlu1 %3490  ;;  %3682 = vperm.xlu1 %4550, %v3157_v46   ;;  %v9286_v5 = vpop.permute.xlu0 %3523  ;;  %v3159_v46 = vsel %vm2903_vm6, 0.0, %v3031_v22  ;;  %v3901_v22 = vadd.s32 4294967240, %v10986_v9  ;;  %v2612_v0 = vmul.f32 0.6931472, %v4982_v51  ;;  %v3174_v49 = vsel %vm2918_vm0, 0.0, %v3046_v29  ;;  %v9402_v29 = vld [vmem:[%s10189_s1 + $0x2e8] sm:$0xff] }
 0x4d6   :  { %10983 = vst [vmem:[#allocation124_spill] sm:$0xff] %v9284_v13  ;;  %3715 = vperm.xlu0 %4549, %v3168_v7   ;;  %v10987_v7 = vld [vmem:[#allocation82_spill] sm:$0xff]  ;;  %v3172_v32 = vsel %vm2916_vm9, 0.0, %v3044_v28  ;;  %v3929_v28 = vadd.s32 4294967208, %v10986_v9  ;;  %vm2913_vm15 = vcmp.eq.s32.totalorder %v9389_v44, 4294967295  ;;  %4997 = vlog2.f32 %v8864_v30 }
 0x4d7   :  { %v2779_v2 = vsub.f32 %v2600_v42, %v10987_v7  ;;  %v9328_v42 = vsub.s32 %v10986_v9, %v9291_v14  ;;  %v4984_v7 = vpop.eup %4983  ;;  %v10992_v13 = vld [vmem:[#allocation102_spill] sm:$0xff]  ;;  %vm2924_vm1 = vcmp.eq.s32.totalorder %v9402_v29, 4294967295  ;;  %4999 = vlog2.f32 %v8879_v23 }
 0x4d8   :  { %v2792_v38 = vsub.f32 %v2626_v53, %v10992_v13  ;;  %v4986_v27 = vpop.eup %4985  ;;  %v9373_v53 = vsub.s32 %v3915_v26, %v9291_v14  ;;  %v3943_v13 = vadd.s32 4294967192, %v10986_v9  ;;  %v9397_v35 = vsub.s32 %v3929_v28, %v9291_v14 }
 0x4d9   :  { %v9313_v36 = vpop.permute.xlu1 %3496  ;;  %3688 = vperm.xlu1 %4550, %v3159_v46   ;;  %v9315_v50 = vpop.permute.xlu0 %3529  ;;  %v2781_v46 = vsub.f32 %v2604_v4, %v10990_v58  ;;  %v9361_v4 = vsub.s32 %v3901_v22, %v9291_v14  ;;  %v10993_v22 = vld [vmem:[#allocation86_spill] sm:$0xff]  ;;  %v2634_v58 = vmul.f32 0.6931472, %v4986_v27  ;;  %5001 = vlog2.f32 %v9027_v21  ;;  %v10996_v27 = vld [vmem:[#allocation88_spill] sm:$0xff] }
 0x4da   :  { %10988 = vst [vmem:[#allocation67_spill] sm:$0xff] %v9313_v36  ;;  %3721 = vperm.xlu0 %4549, %v3170_v1   ;;  %v3035_v1 = vmax.f32 %v2779_v2, 0.0  ;;  %v2630_v36 = vmul.f32 0.6931472, %v4980_v25  ;;  %v3859_v2 = vadd.s32 4294967288, %v10986_v9  ;;  %v3048_v26 = vmax.f32 %v2792_v38, 0.0  ;;  %v4988_v51 = vpop.eup %4987 }
 0x4db   :  { %v3037_v25 = vmax.f32 %v2781_v46, 0.0  ;;  %v9410_v30 = vsub.s32 %v3943_v13, %v9291_v14  ;;  %v9416_v46 = vld [vmem:[%s10189_s1 + $0x2a0] sm:$0xff]  ;;  %v2638_v28 = vmul.f32 0.6931472, %v4988_v51  ;;  %5003 = vlog2.f32 %v8894_v48 }
 0x4dc   :  { %v3163_v59 = vsel %vm2907_vm10, 0.0, %v3035_v1  ;;  %v2794_v57 = vsub.f32 %v2630_v36, %v10995_v37  ;;  %v9394_v1 = vsub.s32 %v3859_v2, %v9291_v14  ;;  %v9407_v37 = vsub.s32 %v3866_v41, %v9291_v14 }
 0x4dd   :  { %v9347_v20 = vpop.permute.xlu1 %3502  ;;  %3694 = vperm.xlu1 %4550, %v3161_v40   ;;  %v9349_v55 = vpop.permute.xlu0 %3535  ;;  %v2783_v40 = vsub.f32 %v2608_v34, %v10993_v22  ;;  %v2616_v34 = vmul.f32 0.6931472, %v4984_v7  ;;  %v3880_v36 = vadd.s32 4294967264, %v10986_v9  ;;  %vm2915_vm2 = vcmp.eq.s32.totalorder %v9416_v46, 4294967295 }
 0x4de   :  { %10991 = vst [vmem:[#allocation56_spill] sm:$0xff] %v9347_v20  ;;  %3727 = vperm.xlu0 %4549, %v3172_v32   ;;  %v4990_v7 = vpop.eup %4989  ;;  %v3165_v23 = vsel %vm2909_vm11, 0.0, %v3037_v25  ;;  %v2785_v2 = vsub.f32 %v2612_v0, %v10996_v27  ;;  %v3050_v22 = vmax.f32 %v2794_v57, 0.0  ;;  %v3957_v21 = vadd.s32 4294967176, %v10986_v9  ;;  %v10999_v0 = vld [vmem:[#allocation151_spill] sm:$0xff] }
 0x4df   :  { %v3039_v38 = vmax.f32 %v2783_v40, 0.0  ;;  %v4992_v43 = vpop.eup %4991  ;;  %v3894_v12 = vadd.s32 4294967248, %v10986_v9  ;;  %v2787_v25 = vsub.f32 %v2616_v34, %v10999_v0  ;;  %v9437_v40 = vld [vmem:[%s10189_s1 + $0x2f8] sm:$0xff]  ;;  %v2620_v57 = vmul.f32 0.6931472, %v4990_v7  ;;  %v9452_v7 = vld [vmem:[%s10189_s1 + $0x2b0] sm:$0xff] }
 0x4e0   :  { %vm2926_vm4 = vcmp.eq.s32.totalorder %v9437_v40, 4294967295  ;;  %5005 = vlog2.f32 %v8909_v17  ;;  %v9442_v48 = vsub.s32 %v3880_v36, %v9291_v14  ;;  %v3908_v62 = vadd.s32 4294967232, %v10986_v9  ;;  %v9470_v0 = vld [vmem:[%s10189_s1 + $0x308] sm:$0xff] }
 0x4e1   :  { %v9379_v32 = vpop.permute.xlu1 %3508  ;;  %3700 = vperm.xlu1 %4550, %v3163_v59   ;;  %v9381_v20 = vpop.permute.xlu0 %3541  ;;  %v3176_v59 = vsel %vm2920_vm12, 0.0, %v3048_v26  ;;  %5007 = vlog2.f32 %v9042_v61  ;;  %v3922_v26 = vadd.s32 4294967216, %v10986_v9  ;;  %v3167_v51 = vsel %vm2911_vm13, 0.0, %v3039_v38 }
 0x4e2   :  { %10994 = vst [vmem:[#allocation79_spill] sm:$0xff] %v9379_v32  ;;  %3733 = vperm.xlu0 %4549, %v3174_v49   ;;  %v10998_v49 = vld [vmem:[#allocation104_spill] sm:$0xff]  ;;  %v3041_v34 = vmax.f32 %v2785_v2, 0.0  ;;  %vm2917_vm6 = vcmp.eq.s32.totalorder %v9452_v7, 4294967295  ;;  %v2642_v36 = vmul.f32 0.6931472, %v4992_v43  ;;  %v2798_v38 = vsub.f32 %v2638_v28, %v11000_v11 }
 0x4e3   :  { %v2796_v32 = vsub.f32 %v2634_v58, %v10998_v49  ;;  %v4994_v58 = vpop.eup %4993  ;;  %v3178_v61 = vsel %vm2922_vm14, 0.0, %v3050_v22  ;;  %5009 = vlog2.f32 %v8924_v6  ;;  %vm10275_vm7 = vcmask 261312   ;;  %v11001_v28 = vld [vmem:[#allocation103_spill] sm:$0xff]  ;;  %v11002_v11 = vld [vmem:[#allocation162_spill] sm:$0xff] }
 0x4e4   :  { %v4996_v17 = vpop.eup %4995  ;;  %v9462_v2 = vsub.s32 %v3957_v21, %v9291_v14  ;;  %v9465_v49 = vsub.s32 %v3894_v12, %v9291_v14  ;;  %v3043_v43 = vmax.f32 %v2787_v25, 0.0  ;;  %vm2928_vm8 = vcmp.eq.s32.totalorder %v9470_v0, 4294967295  ;;  %v9578_v0 = vld [vmem:[%s10189_s1 + $0x338] sm:$0xff] }
 0x4e5   :  { %v9423_v41 = vpop.permute.xlu1 %3514  ;;  %3706 = vperm.xlu1 %4550, %v3165_v23   ;;  %v9425_v13 = vpop.permute.xlu0 %3547  ;;  %v2624_v18 = vmul.f32 0.6931472, %v4994_v58  ;;  %vm10272_vm9 = vcmask 326912   ;;  %v9474_v6 = vsub.s32 %v3908_v62, %v9291_v14  ;;  %v2789_v22 = vsub.f32 %v2620_v57, %v11001_v28  ;;  %v11003_v28 = vld [vmem:[#allocation92_spill] sm:$0xff] }
 0x4e6   :  { %10997 = vst [vmem:[#allocation70_spill] sm:$0xff] %v9423_v41  ;;  %3739 = vperm.xlu0 %4549, %v3176_v59   ;;  %v3052_v59 = vmax.f32 %v2796_v32, 0.0  ;;  %v4998_v21 = vpop.eup %4997  ;;  %v9478_v12 = vmul.f32 0.6931472, %v4996_v17  ;;  %5011 = vlog2.f32 %v9057_v10  ;;  %v9482_v25 = vsub.s32 %v3922_v26, %v9291_v14  ;;  %v9496_v26 = vld [vmem:[%s10189_s1 + $0x2c0] sm:$0xff] }
 0x4e7   :  { %v5000_v58 = vpop.eup %4999  ;;  %v3971_v62 = vrot.slane %v9286_v5, %v9394_v1  ;;  %v3054_v17 = vmax.f32 %v2798_v38, 0.0  ;;  %v2800_v10 = vsub.f32 %v2642_v36, %v11002_v11  ;;  %vm2919_vm10 = vcmp.eq.s32.totalorder %v9496_v26, 4294967295  ;;  %v9502_v5 = vld [vmem:[%s10189_s1 + $0x318] sm:$0xff]  ;;  %v9605_v26 = vld [vmem:[%s10189_s1 + $0x310] sm:$0xff] }
 0x4e8   :  { %v3180_v57 = vsel %vm2924_vm1, 0.0, %v3052_v59  ;;  %vm2930_vm0 = vcmp.eq.s32.totalorder %v9502_v5, 4294967295  ;;  %v5002_v44 = vpop.eup %5001  ;;  %5013 = vlog2.f32 %v8939_v8  ;;  %vm10274_vm11 = vcmask 392512  }
 0x4e9   :  { %v3521_v23 = vpop.permute.xlu1 %3520  ;;  %3712 = vperm.xlu1 %4550, %v3167_v51   ;;  %v9455_v27 = vpop.permute.xlu0 %3553  ;;  %v3169_v51 = vsel %vm2913_vm15, 0.0, %v3041_v34  ;;  %v3936_v29 = vadd.s32 4294967200, %v10986_v9  ;;  %v3171_v36 = vsel %vm2915_vm2, 0.0, %v3043_v43  ;;  %5015 = vlog2.f32 %v9029_v19 }
 0x4ea   :  { %3745 = vperm.xlu0 %4549, %v3178_v61   ;;  %v3967_v32 = vrot.slane %v3521_v23, %v9328_v42  ;;  %vm10273_vm12 = vcmask 458112   ;;  %v3045_v38 = vmax.f32 %v2789_v22, 0.0  ;;  %v5004_v11 = vpop.eup %5003  ;;  %v2628_v41 = vmul.f32 0.6931472, %v4998_v21 }
 0x4eb   :  { %5017 = vlog2.f32 %v8954_v47  ;;  %v9517_v46 = vmul.f32 0.6931472, %v5002_v44  ;;  %v3981_v19 = vrot.slane %v9315_v50, %v9338_v39  ;;  %v3056_v22 = vmax.f32 %v2800_v10, 0.0  ;;  %v9528_v47 = vld [vmem:[%s10189_s1 + $0x2d0] sm:$0xff] }
 0x4ec   :  { %v3972_v59 = vsel %vm3864_vm3, %v3971_v62, %v3967_v32  ;;  %vm2921_vm13 = vcmp.eq.s32.totalorder %v9528_v47, 4294967295  ;;  %v9531_v21 = vmul.f32 0.6931472, %v5000_v58  ;;  %vm10277_vm14 = vcmask 523712   ;;  %v9541_v62 = vld [vmem:[%s10189_s1 + $0x328] sm:$0xff] }
 0x4ed   :  { %v3527_v61 = vpop.permute.xlu1 %3526  ;;  %3718 = vperm.xlu1 %4550, %v3169_v51   ;;  %v9488_v23 = vpop.permute.xlu0 %3559  ;;  %v2791_v51 = vsub.f32 %v2624_v18, %v11003_v28  ;;  %v3182_v18 = vsel %vm2926_vm4, 0.0, %v3054_v17  ;;  %v9534_v50 = vsub.s32 %v3936_v29, %v9291_v14  ;;  %vm2932_vm15 = vcmp.eq.s32.totalorder %v9541_v62, 4294967295  ;;  %v11013_v62 = vld [vmem:[#allocation129_spill] sm:$0xff] }
 0x4ee   :  { %v3976_v34 = vrot.slane %v3527_v61, %v9407_v37  ;;  %3751 = vperm.xlu0 %4549, %v3180_v57   ;;  %v2802_v61 = vsub.f32 %v9478_v12, %v11004_v56  ;;  %v5006_v57 = vpop.eup %5005  ;;  %v3950_v12 = vadd.s32 4294967184, %v10986_v9  ;;  %5019 = vlog2.f32 %v8969_v54  ;;  %v9551_v9 = vld [vmem:[%s10189_s1 + $0x2e0] sm:$0xff] }
 0x4ef   :  { %v5008_v56 = vpop.eup %5007  ;;  %vm10276_vm1 = vcmask 589312   ;;  %v3173_v17 = vsel %vm2917_vm6, 0.0, %v3045_v38  ;;  %v3047_v10 = vmax.f32 %v2791_v51, 0.0  ;;  %vm2923_vm2 = vcmp.eq.s32.totalorder %v9551_v9, 4294967295 }
 0x4f0   :  { %v3977_v8 = vsel %vm10280_vm5, %v3976_v34, %v3972_v59  ;;  %v5010_v44 = vpop.eup %5009  ;;  %5021 = vlog2.f32 %v9044_v15  ;;  %v3058_v54 = vmax.f32 %v2802_v61, 0.0  ;;  %v11005_v34 = vld [vmem:[#allocation153_spill] sm:$0xff]  ;;  %v9557_v59 = vmul.f32 0.6931472, %v5008_v56 }
 0x4f1   :  { %v3533_v43 = vpop.permute.xlu1 %3532  ;;  %3724 = vperm.xlu1 %4550, %v3171_v36   ;;  %v9521_v32 = vpop.permute.xlu0 %3565  ;;  %v3982_v58 = vsel %vm10275_vm7, %v3981_v19, %v3977_v8  ;;  %v2793_v36 = vsub.f32 %v2628_v41, %v11005_v34  ;;  %v3991_v7 = vrot.slane %v9349_v55, %v9341_v33  ;;  %v3184_v51 = vsel %vm2928_vm8, 0.0, %v3056_v22  ;;  %v11006_v8 = vld [vmem:[#allocation166_spill] sm:$0xff]  ;;  %v11007_v55 = vld [vmem:[#allocation96_spill] sm:$0xff] }
 0x4f2   :  { %v3986_v40 = vrot.slane %v3533_v43, %v9442_v48  ;;  %3757 = vperm.xlu0 %4549, %v3182_v18   ;;  %v2804_v15 = vsub.f32 %v9517_v46, %v11006_v8  ;;  %v5012_v19 = vpop.eup %5011  ;;  %v9567_v43 = vmul.f32 0.6931472, %v5004_v11  ;;  %vm10278_vm4 = vcmask 654912  }
 0x4f3   :  { %v9570_v41 = vsub.s32 %v3950_v12, %v9291_v14  ;;  %v2795_v18 = vsub.f32 %v9531_v21, %v11007_v55  ;;  %vm2934_vm6 = vcmp.eq.s32.totalorder %v9578_v0, 4294967295  ;;  %v9581_v46 = vmul.f32 0.6931472, %v5006_v57  ;;  %v5014_v22 = vpop.eup %5013  ;;  %v9593_v57 = vld [vmem:[%s10189_s1 + $0x2f0] sm:$0xff] }
 0x4f4   :  { %v3987_v29 = vsel %vm10272_vm9, %v3986_v40, %v3982_v58  ;;  %v2644_v11 = vmul.f32 0.6931472, %v5010_v44  ;;  %5023 = vlog2.f32 %v9059_v16  ;;  %vm10279_vm8 = vcmask 720512   ;;  %v9599_v16 = vld [vmem:[%s10189_s1 + $0x300] sm:$0xff]  ;;  %v5016_v5 = vpop.eup %5015 }
 0x4f5   :  { %v3539_v38 = vpop.permute.xlu1 %3538  ;;  %3730 = vperm.xlu1 %4550, %v3173_v17   ;;  %v9561_v28 = vpop.permute.xlu0 %3571  ;;  %v3992_v14 = vsel %vm10274_vm11, %v3991_v7, %v3987_v29  ;;  %v3175_v21 = vsel %vm2919_vm10, 0.0, %v3047_v10  ;;  %v3186_v12 = vsel %vm2930_vm0, 0.0, %v3058_v54  ;;  %v3049_v40 = vmax.f32 %v2793_v36, 0.0  ;;  %v11008_v54 = vld [vmem:[#allocation168_spill] sm:$0xff] }
 0x4f6   :  { %v3996_v61 = vrot.slane %v3539_v38, %v9465_v49  ;;  %3763 = vperm.xlu0 %4549, %v3184_v51   ;;  %vm2925_vm9 = vcmp.eq.s32.totalorder %v9593_v57, 4294967295  ;;  %vm2929_vm10 = vcmp.eq.s32.totalorder %v9605_v26, 4294967295  ;;  %v9608_v58 = vmul.f32 0.6931472, %v5012_v19  ;;  %v5018_v36 = vpop.eup %5017  ;;  %v11009_v51 = vld [vmem:[#allocation98_spill] sm:$0xff]  ;;  %v11011_v19 = vld [vmem:[#allocation156_spill] sm:$0xff] }
 0x4f7   :  { %v4001_v17 = vrot.slane %v9381_v20, %v9361_v4  ;;  %v3060_v29 = vmax.f32 %v2804_v15, 0.0  ;;  %v2806_v34 = vsub.f32 %v9557_v59, %v11008_v54  ;;  %5025 = vlog2.f32 %v8984_v60  ;;  %v9623_v20 = vld [vmem:[%s10189_s1 + $0x348] sm:$0xff]  ;;  %v11010_v59 = vld [vmem:[#allocation100_spill] sm:$0xff] }
 0x4f8   :  { %v3997_v56 = vsel %vm10273_vm12, %v3996_v61, %v3992_v14  ;;  %vm2927_vm12 = vcmp.eq.s32.totalorder %v9599_v16, 4294967295  ;;  %vm3934_vm0 = vcmask 786112   ;;  %v3051_v38 = vmax.f32 %v2795_v18, 0.0  ;;  %v9650_v54 = vld [vmem:[%s10189_s1 + $0x380] sm:$0xff] }
 0x4f9   :  { %v3545_v10 = vpop.permute.xlu1 %3544  ;;  %3736 = vperm.xlu1 %4550, %v3175_v21   ;;  %v9612_v44 = vpop.permute.xlu0 %3577  ;;  %v2797_v8 = vsub.f32 %v9567_v43, %v11009_v51  ;;  %vm2936_vm11 = vcmp.eq.s32.totalorder %v9623_v20, 4294967295  ;;  %5027 = vlog2.f32 %v9074_v31  ;;  %vm3941_vm7 = vcmask 851712  }
 0x4fa   :  { %v4006_v7 = vrot.slane %v3545_v10, %v9474_v6  ;;  %3769 = vperm.xlu0 %4549, %v3186_v12   ;;  %v4002_v60 = vsel %vm10277_vm14, %v4001_v17, %v3997_v56  ;;  %v2799_v15 = vsub.f32 %v9581_v46, %v11010_v59  ;;  %v2801_v61 = vsub.f32 %v2644_v11, %v11011_v19  ;;  %v5020_v21 = vpop.eup %5019 }
 0x4fb   :  { %v2648_v55 = vmul.f32 0.6931472, %v5014_v22  ;;  %v9631_v18 = vmul.f32 0.6931472, %v5016_v5  ;;  %v3177_v14 = vsel %vm2921_vm13, 0.0, %v3049_v40  ;;  %v4011_v31 = vrot.slane %v9425_v13, %v9373_v53  ;;  %v11012_v22 = vld [vmem:[#allocation170_spill] sm:$0xff]  ;;  %v5022_v17 = vpop.eup %5021 }
 0x4fc   :  { %v4007_v43 = vsel %vm10276_vm1, %v4006_v7, %v4002_v60  ;;  %v3188_v46 = vsel %vm2932_vm15, 0.0, %v3060_v29  ;;  %v3062_v11 = vmax.f32 %v2806_v34, 0.0  ;;  %v2808_v5 = vsub.f32 %v9608_v58, %v11012_v22  ;;  %v9669_v60 = vld [vmem:[%s10189_s1 + $0x330] sm:$0xff] }
 0x4fd   :  { %v3551_v12 = vpop.permute.xlu1 %3550  ;;  %3742 = vperm.xlu1 %4550, %v3177_v14   ;;  %v9638_v56 = vpop.permute.xlu0 %3583  ;;  %v2652_v10 = vmul.f32 0.6931472, %v5018_v36  ;;  %vm3948_vm1 = vcmask 917312   ;;  %v3179_v13 = vsel %vm2923_vm2, 0.0, %v3051_v38  ;;  %v3053_v40 = vmax.f32 %v2797_v8, 0.0  ;;  %v11014_v36 = vld [vmem:[#allocation167_spill] sm:$0xff] }
 0x4fe   :  { %v4016_v47 = vrot.slane %v3551_v12, %v9482_v25  ;;  %3775 = vperm.xlu0 %4549, %v3188_v46   ;;  %vm2943_vm13 = vcmp.eq.s32.totalorder %v9650_v54, 4294967295  ;;  %5029 = vlog2.f32 %v11013_v62  ;;  %vm3955_vm15 = vcmask 982912   ;;  %v11015_v38 = vld [vmem:[#allocation157_spill] sm:$0xff]  ;;  %v9663_v8 = vld [vmem:[%s10189_s1 + $0x320] sm:$0xff]  ;;  %v9683_v12 = vld [vmem:[%s10189_s1 + $0x390] sm:$0xff] }
 0x4ff   :  { %v4012_v58 = vsel %vm10278_vm4, %v4011_v31, %v4007_v43  ;;  %v3055_v29 = vmax.f32 %v2799_v15, 0.0  ;;  %v3057_v34 = vmax.f32 %v2801_v61, 0.0  ;;  %5031 = vlog2.f32 %v9089_v3  ;;  %v5024_v3 = vpop.eup %5023  ;;  %v11016_v14 = vld [vmem:[#allocation25_spill] sm:$0xff] }
 0x500   :  { %vm3962_vm14 = vcmask 1048512   ;;  %v4017_v9 = vsel %vm10279_vm8, %v4016_v47, %v4012_v58  ;;  %v2815_v7 = vsub.f32 %v9631_v18, %v11014_v36  ;;  %v2803_v51 = vsub.f32 %v2648_v55, %v11015_v38  ;;  %v9712_v36 = vld [vmem:[%s10189_s1 + $0x3a0] sm:$0xff]  ;;  %v11020_v38 = vld [vmem:[#allocation113_spill] sm:$0xff] }
 0x501   :  { %vm2931_vm2 = vcmp.eq.s32.totalorder %v9663_v8, 4294967295  ;;  %vm2933_vm4 = vcmp.eq.s32.totalorder %v9669_v60, 4294967295  ;;  %v2676_v59 = vmul.f32 0.6931472, %v5022_v17  ;;  %v4021_v15 = vrot.slane %v9455_v27, %v9397_v35  ;;  %v3557_v19 = vpop.permute.xlu1 %3556  ;;  %3748 = vperm.xlu1 %4550, %v3179_v13   ;;  %v9674_v61 = vpop.permute.xlu0 %3589  ;;  %v11017_v27 = vld [vmem:[#allocation158_spill] sm:$0xff]  ;;  %v11018_v17 = vld [vmem:[#allocation12_spill] sm:$0xff] }
 0x502   :  { %v3190_v55 = vsel %vm2934_vm6, 0.0, %v3062_v11  ;;  %v3064_v18 = vmax.f32 %v2808_v5, 0.0  ;;  %v2656_v43 = vmul.f32 0.6931472, %v5020_v21  ;;  %5033 = vlog2.f32 %v11016_v14  ;;  %v5026_v5 = vpop.eup %5025  ;;  %v11022_v14 = vld [vmem:[#allocation171_spill] sm:$0xff]  ;;  %v11026_v8 = vld [vmem:[#allocation122_spill] sm:$0xff] }
 0x503   :  { %v4026_v31 = vrot.slane %v3557_v19, %v9534_v50  ;;  %3781 = vperm.xlu0 %4549, %v3190_v55   ;;  %vm2945_vm8 = vcmp.eq.s32.totalorder %v9683_v12, 4294967295  ;;  %v2805_v46 = vsub.f32 %v2652_v10, %v11017_v27  ;;  %v4022_v22 = vsel %vm3934_vm0, %v4021_v15, %v4017_v9  ;;  %v9699_v10 = vld [vmem:[%s10189_s1 + $0x340] sm:$0xff]  ;;  %v5028_v57 = vpop.eup %5027 }
 0x504   :  { %v3181_v0 = vsel %vm2925_vm9, 0.0, %v3053_v40  ;;  %v3183_v21 = vsel %vm2927_vm12, 0.0, %v3055_v29  ;;  %v3185_v11 = vsel %vm2929_vm10, 0.0, %v3057_v34  ;;  %5035 = vlog2.f32 %v11018_v17  ;;  %v11019_v34 = vld [vmem:[#allocation169_spill] sm:$0xff] }
 0x505   :  { %v2680_v47 = vmul.f32 0.6931472, %v5024_v3  ;;  %v4027_v13 = vsel %vm3941_vm7, %v4026_v31, %v4022_v22  ;;  %v3059_v62 = vmax.f32 %v2803_v51, 0.0  ;;  %vm2935_vm9 = vcmp.eq.s32.totalorder %v9699_v10, 4294967295  ;;  %v3563_v26 = vpop.permute.xlu1 %3562  ;;  %3754 = vperm.xlu1 %4550, %v3181_v0   ;;  %v9704_v40 = vpop.permute.xlu0 %3595  ;;  %v11021_v3 = vld [vmem:[#allocation159_spill] sm:$0xff] }
 0x506   :  { %v4031_v16 = vrot.slane %v9488_v23, %v9410_v30  ;;  %v3192_v58 = vsel %vm2936_vm11, 0.0, %v3064_v18  ;;  %v3071_v29 = vmax.f32 %v2815_v7, 0.0  ;;  %v2817_v9 = vsub.f32 %v2676_v59, %v11019_v34 }
 0x507   :  { %vm2947_vm12 = vcmp.eq.s32.totalorder %v9712_v36, 4294967295  ;;  %5037 = vlog2.f32 %v11020_v38  ;;  %v4036_v23 = vrot.slane %v3563_v26, %v9570_v41  ;;  %3787 = vperm.xlu0 %4549, %v3192_v58   ;;  %v3061_v51 = vmax.f32 %v2805_v46, 0.0 }
 0x508   :  { %v2807_v15 = vsub.f32 %v2656_v43, %v11021_v3  ;;  %v2660_v20 = vmul.f32 0.6931472, %v5026_v5  ;;  %5039 = vlog2.f32 %v9117_v52  ;;  %v4041_v7 = vrot.slane %v9521_v32, %v9462_v2  ;;  %v5030_v27 = vpop.eup %5029 }
 0x509   :  { %v4032_v59 = vsel %vm3948_vm1, %v4031_v16, %v4027_v13  ;;  %v2684_v19 = vmul.f32 0.6931472, %v5028_v57  ;;  %v3863_v55 = vrot.slane %v9235_v63, %v9394_v1  ;;  %v2819_v31 = vsub.f32 %v2680_v47, %v11022_v14  ;;  %v3569_v52 = vpop.permute.xlu1 %3568  ;;  %3760 = vperm.xlu1 %4550, %v3183_v21   ;;  %v9731_v32 = vpop.permute.xlu0 %3601  ;;  %v9738_v63 = vld [vmem:[%s10189_s1 + $0x3b0] sm:$0xff]  ;;  %v11024_v16 = vld [vmem:[#allocation161_spill] sm:$0xff] }
 0x50a   :  { %v4037_v18 = vsel %vm3955_vm15, %v4036_v23, %v4032_v59  ;;  %v3870_v43 = vrot.slane %v9250_v45, %v9407_v37  ;;  %v3199_v22 = vsel %vm2943_vm13, 0.0, %v3071_v29  ;;  %v3073_v0 = vmax.f32 %v2817_v9, 0.0  ;;  %v5032_v5 = vpop.eup %5031  ;;  %v11023_v45 = vld [vmem:[#allocation29_spill] sm:$0xff]  ;;  %v11028_v59 = vld [vmem:[#allocation135_spill] sm:$0xff] }
 0x50b   :  { %v9729_v46 = vsel %vm3962_vm14, %v4041_v7, %v4037_v18  ;;  %vm2949_vm11 = vcmp.eq.s32.totalorder %v9738_v63, 4294967295  ;;  %5041 = vlog2.f32 %v9132_v24  ;;  %v3858_v17 = vrot.slane %v11023_v45, %v9328_v42  ;;  %3808 = vperm.xlu0 %4549, %v3199_v22   ;;  %v11027_v7 = vld [vmem:[#allocation133_spill] sm:$0xff]  ;;  %v9771_v18 = vld [vmem:[%s10189_s1 + $0x3c0] sm:$0xff] }
 0x50c   :  { %v4050_v21 = vrot.slane %v9561_v28, %v9394_v1  ;;  %v4046_v54 = vrot.slane %v3569_v52, %v9328_v42  ;;  %v3187_v47 = vsel %vm2931_vm2, 0.0, %v3059_v62  ;;  %v9751_v13 = vsel %vm2933_vm4, 0.0, %v3061_v51  ;;  %v5034_v24 = vpop.eup %5033  ;;  %v11025_v28 = vld [vmem:[#allocation173_spill] sm:$0xff]  ;;  %v11031_v45 = vld [vmem:[#allocation124_spill] sm:$0xff] }
 0x50d   :  { %v3063_v57 = vmax.f32 %v2807_v15, 0.0  ;;  %v2809_v26 = vsub.f32 %v2660_v20, %v11024_v16  ;;  %v3865_v58 = vsel %vm3864_vm3, %v3863_v55, %v3858_v17  ;;  %v3075_v34 = vmax.f32 %v2819_v31, 0.0  ;;  %v3575_v60 = vpop.permute.xlu1 %3574  ;;  %3766 = vperm.xlu1 %4550, %v3185_v11   ;;  %v9760_v51 = vpop.permute.xlu0 %3607 }
 0x50e   :  { %v4051_v29 = vsel %vm3864_vm3, %v4050_v21, %v4046_v54  ;;  %v2821_v9 = vsub.f32 %v2684_v19, %v11025_v28  ;;  %v2688_v38 = vmul.f32 0.6931472, %v5032_v5  ;;  %v3872_v23 = vsel %vm10280_vm5, %v3870_v43, %v3865_v58  ;;  %v5036_v15 = vpop.eup %5035  ;;  %v9789_v5 = vld [vmem:[%s10189_s1 + $0x350] sm:$0xff]  ;;  %v11035_v58 = vld [vmem:[#allocation137_spill] sm:$0xff]  ;;  %v11036_v28 = vld [vmem:[#allocation163_spill] sm:$0xff] }
 0x50f   :  { %v3884_v62 = vrot.slane %v11026_v8, %v9442_v48  ;;  %v3201_v3 = vsel %vm2945_vm8, 0.0, %v3073_v0  ;;  %v2664_v20 = vmul.f32 0.6931472, %v5030_v27  ;;  %5043 = vlog2.f32 %v11027_v7 }
 0x510   :  { %v3877_v19 = vrot.slane %v11028_v59, %v9338_v39  ;;  %v4055_v55 = vrot.slane %v3575_v60, %v9407_v37  ;;  %3814 = vperm.xlu0 %4549, %v3201_v3   ;;  %vm2951_vm4 = vcmp.eq.s32.totalorder %v9771_v18, 4294967295  ;;  %v2662_v11 = vmul.f32 0.6931472, %v5034_v24  ;;  %v11034_v24 = vld [vmem:[#allocation131_spill] sm:$0xff] }
 0x511   :  { %v4060_v12 = vrot.slane %v9612_v44, %v9338_v39  ;;  %v9778_v14 = vsel %vm2935_vm9, 0.0, %v3063_v57  ;;  %v9780_v31 = vmax.f32 %v2809_v26, 0.0  ;;  %v5038_v27 = vpop.eup %5037  ;;  %vm11029_vm6 = vcmask 261312   ;;  %v3581_v21 = vpop.permute.xlu1 %3580  ;;  %3772 = vperm.xlu1 %4550, %v3187_v47   ;;  %v11033_v57 = vld [vmem:[#allocation106_spill] sm:$0xff]  ;;  %v9802_v26 = vld [vmem:[%s10189_s1 + $0x360] sm:$0xff]  ;;  %v9812_v47 = vld [vmem:[%s10189_s1 + $0x358] sm:$0xff] }
 0x512   :  { %v3879_v43 = vsel %vm11029_vm6, %v3877_v19, %v3872_v23  ;;  %v4056_v52 = vsel %vm10280_vm5, %v4055_v55, %v4051_v29  ;;  %v3203_v22 = vsel %vm2947_vm12, 0.0, %v3075_v34  ;;  %v3077_v0 = vmax.f32 %v2821_v9, 0.0  ;;  %v5040_v44 = vpop.eup %5039  ;;  %vm11032_vm13 = vmmov %vm11029_vm6  ;;  %v9796_v36 = vpop.permute.xlu0 %3613  ;;  %v11037_v23 = vld [vmem:[#allocation16_spill] sm:$0xff]  ;;  %v11055_v18 = vld [vmem:[#allocation119_spill] sm:$0xff] }
 0x513   :  { %vm2937_vm8 = vcmp.eq.s32.totalorder %v9789_v5, 4294967295  ;;  %vm11030_vm10 = vcmask 326912   ;;  %v3898_v17 = vrot.slane %v11031_v45, %v9465_v49  ;;  %v4061_v54 = vsel %vm11032_vm13, %v4060_v12, %v4056_v52 }
 0x514   :  { %v3886_v10 = vsel %vm11030_vm10, %v3884_v62, %v3879_v43  ;;  %v2823_v16 = vsub.f32 %v2688_v38, %v11033_v57  ;;  %vm2939_vm2 = vcmp.eq.s32.totalorder %v9802_v26, 4294967295  ;;  %5045 = vlog2.f32 %v11034_v24  ;;  %3820 = vperm.xlu0 %4549, %v3203_v22   ;;  %v11038_v62 = vld [vmem:[#allocation172_spill] sm:$0xff]  ;;  %vm11040_vm6 = vmmov %vm11030_vm10  ;;  %v9836_v22 = vld [vmem:[%s10189_s1 + $0x388] sm:$0xff] }
 0x515   :  { %v3891_v29 = vrot.slane %v11035_v58, %v9341_v33  ;;  %v4065_v34 = vrot.slane %v3581_v21, %v9442_v48  ;;  %vm2938_vm9 = vcmp.eq.s32.totalorder %v9812_v47, 4294967295  ;;  %v2811_v9 = vsub.f32 %v2664_v20, %v11036_v28  ;;  %v5042_v3 = vpop.eup %5041  ;;  %v3587_v43 = vpop.permute.xlu1 %3586  ;;  %3778 = vperm.xlu1 %4550, %v9751_v13   ;;  %v11045_v13 = vld [vmem:[#allocation115_spill] sm:$0xff]  ;;  %v11049_v58 = vld [vmem:[#allocation13_spill] sm:$0xff] }
 0x516   :  { %v9816_v38 = vmul.f32 0.6931472, %v5036_v15  ;;  %5047 = vlog2.f32 %v11037_v23  ;;  %v4070_v8 = vrot.slane %v9638_v56, %v9341_v33  ;;  %v2810_v60 = vsub.f32 %v2662_v11, %v11038_v62  ;;  %v11042_v15 = vld [vmem:[#allocation67_spill] sm:$0xff]  ;;  %v9831_v56 = vpop.permute.xlu0 %3619 }
 0x517   :  { %v2674_v7 = vmul.f32 0.6931472, %v5040_v44  ;;  %vm11039_vm12 = vcmask 392512   ;;  %v4066_v19 = vsel %vm11040_vm6, %v4065_v34, %v4061_v54  ;;  %v3205_v55 = vsel %vm2949_vm11, 0.0, %v3077_v0  ;;  %v11044_v0 = vld [vmem:[#allocation118_spill] sm:$0xff]  ;;  %v9852_v34 = vld [vmem:[%s10189_s1 + $0x398] sm:$0xff] }
 0x518   :  { %v3893_v59 = vsel %vm11039_vm12, %v3891_v29, %v3886_v10  ;;  %vm11041_vm10 = vcmask 458112   ;;  %v3912_v12 = vrot.slane %v11042_v15, %v9474_v6  ;;  %vm11043_vm13 = vmmov %vm11039_vm12  ;;  %v3079_v11 = vmax.f32 %v2823_v16, 0.0  ;;  %3826 = vperm.xlu0 %4549, %v3205_v55   ;;  %v11046_v16 = vld [vmem:[#allocation139_spill] sm:$0xff] }
 0x519   :  { %v3900_v20 = vsel %vm11041_vm10, %v3898_v17, %v3893_v59  ;;  %v4071_v52 = vsel %vm11043_vm13, %v4070_v8, %v4066_v19  ;;  %vm2944_vm11 = vcmp.eq.s32.totalorder %v9836_v22, 4294967295  ;;  %v2666_v63 = vmul.f32 0.6931472, %v5038_v27  ;;  %v5044_v57 = vpop.eup %5043  ;;  %vm11048_vm6 = vmmov %vm11041_vm10  ;;  %v3593_v8 = vpop.permute.xlu1 %3592  ;;  %3784 = vperm.xlu1 %4550, %v9778_v14   ;;  %v11053_v59 = vld [vmem:[#allocation35_spill] sm:$0xff] }
 0x51a   :  { %v3905_v44 = vrot.slane %v11044_v0, %v9361_v4  ;;  %v4075_v10 = vrot.slane %v3587_v43, %v9465_v49  ;;  %v3067_v45 = vmax.f32 %v2811_v9, 0.0  ;;  %v2678_v17 = vmul.f32 0.6931472, %v5042_v3  ;;  %v11051_v9 = vld [vmem:[#allocation56_spill] sm:$0xff] }
 0x51b   :  { %5049 = vlog2.f32 %v11045_v13  ;;  %v4080_v21 = vrot.slane %v9674_v61, %v9361_v4  ;;  %v3066_v54 = vmax.f32 %v2810_v60, 0.0  ;;  %vm11047_vm12 = vcmask 523712   ;;  %v9858_v61 = vld [vmem:[%s10189_s1 + $0x368] sm:$0xff]  ;;  %v9866_v60 = vpop.permute.xlu0 %3625  ;;  %v11059_v13 = vld [vmem:[#allocation79_spill] sm:$0xff] }
 0x51c   :  { %5051 = vlog2.f32 %v11046_v16  ;;  %v3907_v24 = vsel %vm11047_vm12, %v3905_v44, %v3900_v20  ;;  %v4076_v27 = vsel %vm11048_vm6, %v4075_v10, %v4071_v52  ;;  %v2816_v29 = vsub.f32 %v2674_v7, %v11049_v58  ;;  %v11052_v7 = vld [vmem:[#allocation14_spill] sm:$0xff]  ;;  %v11054_v20 = vld [vmem:[#allocation11_spill] sm:$0xff] }
 0x51d   :  { %vm2946_vm10 = vcmp.eq.s32.totalorder %v9852_v34, 4294967295  ;;  %vm2940_vm13 = vcmp.eq.s32.totalorder %v9858_v61, 4294967295  ;;  %vm11050_vm5 = vcmask 589312   ;;  %v3926_v23 = vrot.slane %v11051_v9, %v9482_v25  ;;  %v11069_v61 = vld [vmem:[#allocation117_spill] sm:$0xff] }
 0x51e   :  { %v3914_v28 = vsel %vm11050_vm5, %v3912_v12, %v3907_v24  ;;  %v4081_v62 = vsel %vm11047_vm12, %v4080_v21, %v4076_v27  ;;  %v3207_v3 = vsel %vm2951_vm4, 0.0, %v3079_v11  ;;  %5053 = vlog2.f32 %v11052_v7  ;;  %v9884_v11 = vld [vmem:[%s10189_s1 + $0x370] sm:$0xff]  ;;  %v5046_v0 = vpop.eup %5045 }
 0x51f   :  { %v3919_v19 = vrot.slane %v11053_v59, %v9373_v53  ;;  %v4085_v55 = vrot.slane %v3593_v8, %v9474_v6  ;;  %3832 = vperm.xlu0 %4549, %v3207_v3   ;;  %v2812_v15 = vsub.f32 %v2666_v63, %v11054_v20  ;;  %v2682_v12 = vmul.f32 0.6931472, %v5044_v57  ;;  %v3599_v57 = vpop.permute.xlu1 %3598  ;;  %v9901_v24 = vpop.permute.xlu0 %3631  ;;  %v11063_v3 = vld [vmem:[#allocation15_spill] sm:$0xff] }
 0x520   :  { %v4090_v43 = vrot.slane %v9704_v40, %v9373_v53  ;;  %v3193_v14 = vsel %vm2937_vm8, 0.0, %v9780_v31  ;;  %v2818_v52 = vsub.f32 %v2678_v17, %v11055_v18  ;;  %vm2941_vm5 = vcmp.eq.s32.totalorder %v9884_v11, 4294967295  ;;  %v9894_v31 = vld [vmem:[%s10189_s1 + $0x3a8] sm:$0xff]  ;;  %v5048_v5 = vpop.eup %5047  ;;  %v5310_v18 = vld [vmem:[%s10189_s1 + $0x3b8] sm:$0xff] }
 0x521   :  { %vm11056_vm4 = vcmask 654912   ;;  %vm11057_vm6 = vcmask 589312   ;;  %v3072_v10 = vmax.f32 %v2816_v29, 0.0  ;;  %v3195_v40 = vsel %vm2939_vm2, 0.0, %v3067_v45  ;;  %3790 = vperm.xlu1 %4550, %v3193_v14   ;;  %v11060_v45 = vld [vmem:[#allocation141_spill] sm:$0xff] }
 0x522   :  { %v3921_v63 = vsel %vm11056_vm4, %v3919_v19, %v3914_v28  ;;  %v4086_v44 = vsel %vm11057_vm6, %v4085_v55, %v4081_v62  ;;  %vm2948_vm8 = vcmp.eq.s32.totalorder %v9894_v31, 4294967295  ;;  %vm11058_vm12 = vcmask 720512   ;;  %v11061_v28 = vld [vmem:[#allocation165_spill] sm:$0xff] }
 0x523   :  { %v3928_v17 = vsel %vm11058_vm12, %v3926_v23, %v3921_v63  ;;  %v3940_v21 = vrot.slane %v11059_v13, %v9534_v50  ;;  %v4091_v16 = vsel %vm11056_vm4, %v4090_v43, %v4086_v44  ;;  %v3194_v26 = vsel %vm2938_vm9, 0.0, %v3066_v54  ;;  %v11062_v23 = vld [vmem:[#allocation31_spill] sm:$0xff]  ;;  %vm11064_vm9 = vmmov %vm11058_vm12  ;;  %v3605_v14 = vpop.permute.xlu1 %3604  ;;  %v11073_v31 = vld [vmem:[#allocation109_spill] sm:$0xff] }
 0x524   :  { %v3933_v27 = vrot.slane %v11060_v45, %v9397_v35  ;;  %vm4517_vm2 = vcmask 1041409   ;;  %v4095_v58 = vrot.slane %v3599_v57, %v9482_v25  ;;  %3793 = vperm.xlu0 %4549, %v3194_v26   ;;  %v3068_v29 = vmax.f32 %v2812_v15, 0.0  ;;  %v11065_v15 = vld [vmem:[#allocation70_spill] sm:$0xff] }
 0x525   :  { %v2813_v9 = vsub.f32 %v9816_v38, %v11061_v28  ;;  %5055 = vlog2.f32 %v11062_v23  ;;  %v4100_v8 = vrot.slane %v9731_v32, %v9397_v35  ;;  %v3074_v62 = vmax.f32 %v2818_v52, 0.0  ;;  %v5050_v55 = vpop.eup %5049  ;;  %v11066_v52 = vld [vmem:[#allocation27_spill] sm:$0xff] }
 0x526   :  { %v2820_v47 = vsub.f32 %v2682_v12, %v11063_v3  ;;  %v2686_v54 = vmul.f32 0.6931472, %v5048_v5  ;;  %v3935_v7 = vsel %vm3934_vm0, %v3933_v27, %v3928_v17  ;;  %v4096_v59 = vsel %vm11064_vm9, %v4095_v58, %v4091_v16  ;;  %v9922_v12 = vpop.permute.xlu0 %3637  ;;  %v5052_v22 = vpop.eup %5051  ;;  %v5311_v5 = vld [vmem:[%s10189_s1 + $0x378] sm:$0xff]  ;;  %v11068_v27 = vld [vmem:[#allocation108_spill] sm:$0xff] }
 0x527   :  { %v3200_v19 = vsel %vm2944_vm11, 0.0, %v3072_v10  ;;  %v2670_v20 = vmul.f32 0.6931472, %v5046_v0  ;;  %v3942_v38 = vsel %vm3941_vm7, %v3940_v21, %v3935_v7  ;;  %v3954_v43 = vrot.slane %v11065_v15, %v9570_v41  ;;  %v11067_v0 = vld [vmem:[#allocation24_spill] sm:$0xff]  ;;  %v3611_v23 = vpop.permute.xlu1 %3610  ;;  %v11072_v15 = vld [vmem:[#allocation121_spill] sm:$0xff] }
 0x528   :  { %v4101_v32 = vsel %vm3934_vm0, %v4100_v8, %v4096_v59  ;;  %3811 = vperm.xlu1 %4550, %v3200_v19   ;;  %vm2950_vm6 = vcmp.eq.s32.totalorder %v5310_v18, 4294967295  ;;  %5057 = vlog2.f32 %v11066_v52  ;;  %v3947_v63 = vrot.slane %v11067_v0, %v9410_v30  ;;  %3796 = vperm.xlu0 %4549, %v3195_v40   ;;  %v5054_v16 = vpop.eup %5053  ;;  %v11070_v8 = vld [vmem:[#allocation26_spill] sm:$0xff]  ;;  %v11071_v7 = vld [vmem:[#allocation20_spill] sm:$0xff]  ;;  %v5313_v18 = vld [vmem:[%s10189_s1 + $0x3f8] sm:$0xff] }
 0x529   :  { %v4105_v44 = vrot.slane %v3605_v14, %v9534_v50  ;;  %v3069_v10 = vmax.f32 %v2813_v9, 0.0  ;;  %vm2942_vm11 = vcmp.eq.s32.totalorder %v5311_v5, 4294967295  ;;  %v4110_v17 = vrot.slane %v9760_v51, %v9410_v30  ;;  %v5314_v5 = vld [vmem:[%s10189_s1 + $0x3d0] sm:$0xff] }
 0x52a   :  { %v3202_v13 = vsel %vm2946_vm10, 0.0, %v3074_v62  ;;  %v3196_v21 = vsel %vm2940_vm13, 0.0, %v3068_v29  ;;  %v3076_v57 = vmax.f32 %v2820_v47, 0.0  ;;  %v2690_v26 = vmul.f32 0.6931472, %v5050_v55  ;;  %v9945_v34 = vpop.permute.xlu0 %3643 }
 0x52b   :  { %v3949_v40 = vsel %vm3948_vm1, %v3947_v63, %v3942_v38  ;;  %v4106_v45 = vsel %vm3941_vm7, %v4105_v44, %v4101_v32  ;;  %v2822_v58 = vsub.f32 %v2686_v54, %v11068_v27  ;;  %v2702_v28 = vmul.f32 0.6931472, %v5052_v22  ;;  %v3617_v22 = vpop.permute.xlu1 %3616  ;;  %v11074_v63 = vld [vmem:[#allocation114_spill] sm:$0xff] }
 0x52c   :  { %v3956_v9 = vsel %vm3955_vm15, %v3954_v43, %v3949_v40  ;;  %v4111_v51 = vsel %vm3948_vm1, %v4110_v17, %v4106_v45  ;;  %3817 = vperm.xlu1 %4550, %v3202_v13   ;;  %v2814_v29 = vsub.f32 %v2670_v20, %v11069_v61  ;;  %v3961_v62 = vrot.slane %v11070_v8, %v9462_v2 }
 0x52d   :  { %vm4519_vm10 = vcmask 1042434   ;;  %v4115_v3 = vrot.slane %v3611_v23, %v9570_v41  ;;  %3799 = vperm.xlu0 %4549, %v3196_v21   ;;  %v3197_v47 = vsel %vm2941_vm5, 0.0, %v3069_v10  ;;  %v2692_v54 = vmul.f32 0.6931472, %v5054_v16 }
 0x52e   :  { %5059 = vlog2.f32 %v11071_v7  ;;  %v4120_v59 = vrot.slane %v9796_v36, %v9462_v2  ;;  %v3204_v19 = vsel %vm2948_vm8, 0.0, %v3076_v57  ;;  %v3963_v55 = vsel %vm3962_vm14, %v3961_v62, %v3956_v9  ;;  %v9964_v52 = vpop.permute.xlu0 %3649  ;;  %v11077_v62 = vld [vmem:[#allocation7_spill] sm:$0xff] }
 0x52f   :  { %v4116_v20 = vsel %vm3955_vm15, %v4115_v3, %v4111_v51  ;;  %v3078_v38 = vmax.f32 %v2822_v58, 0.0  ;;  %v2824_v43 = vsub.f32 %v2690_v26, %v11072_v15  ;;  %v5056_v14 = vpop.eup %5055  ;;  %v4518_v11 = vsel %vm4517_vm2, %v9729_v46, %v3963_v55  ;;  %v11075_v46 = vld [vmem:[#allocation5_spill] sm:$0xff]  ;;  %v3623_v45 = vpop.permute.xlu1 %3622 }
 0x530   :  { %v4121_v32 = vsel %vm3962_vm14, %v4120_v59, %v4116_v20  ;;  %3823 = vperm.xlu1 %4550, %v3204_v19   ;;  %v3070_v36 = vmax.f32 %v2814_v29, 0.0  ;;  %v2830_v0 = vsub.f32 %v2702_v28, %v11073_v31  ;;  %5061 = vlog2.f32 %v11074_v63  ;;  %v5312_v58 = vld [vmem:[%s10189_s1 + $0x3c8] sm:$0xff] }
 0x531   :  { %v4129_v44 = vrot.slane %v9831_v56, %v9394_v1  ;;  %v9971_v10 = vsel %vm4519_vm10, %v4121_v32, %v4518_v11  ;;  %v4125_v17 = vrot.slane %v3617_v22, %v9328_v42  ;;  %3802 = vperm.xlu0 %4549, %v3197_v47   ;;  %v2825_v13 = vsub.f32 %v2692_v54, %v11075_v46  ;;  %v11080_v11 = vld [vmem:[#allocation107_spill] sm:$0xff] }
 0x532   :  { %v5058_v21 = vpop.eup %5057  ;;  %v2694_v57 = vmul.f32 0.6931472, %v5056_v14  ;;  %v3206_v26 = vsel %vm2950_vm6, 0.0, %v3078_v38  ;;  %v3080_v40 = vmax.f32 %v2824_v43, 0.0  ;;  %v9977_v27 = vpop.permute.xlu0 %3655  ;;  %v3198_v56 = vsel %vm2942_vm11, 0.0, %v3070_v36 }
 0x533   :  { %v4130_v16 = vsel %vm3864_vm3, %v4129_v44, %v4125_v17  ;;  %vm2952_vm13 = vcmp.eq.s32.totalorder %v5312_v58, 4294967295  ;;  %v3086_v28 = vmax.f32 %v2830_v0, 0.0  ;;  %v4134_v9 = vrot.slane %v3623_v45, %v9407_v37  ;;  %v3629_v54 = vpop.permute.xlu1 %3628  ;;  %v5315_v0 = vld [vmem:[%s10189_s1 + $0x3d8] sm:$0xff]  ;;  %v5316_v45 = vld [vmem:[%s10189_s1 + $0x3e0] sm:$0xff] }
 0x534   :  { %3829 = vperm.xlu1 %4550, %v3206_v26   ;;  %vm2958_vm5 = vcmp.eq.s32.totalorder %v5313_v18, 4294967295  ;;  %v4139_v23 = vrot.slane %v9866_v60, %v9338_v39  ;;  %vm2953_vm8 = vcmp.eq.s32.totalorder %v5314_v5, 4294967295  ;;  %v3081_v51 = vmax.f32 %v2825_v13, 0.0  ;;  %v11086_v18 = vld [vmem:[#allocation6_spill] sm:$0xff] }
 0x535   :  { %3805 = vperm.xlu0 %4549, %v3198_v56   ;;  %v2696_v61 = vmul.f32 0.6931472, %v5058_v21  ;;  %vm11076_vm12 = vcmask 195712   ;;  %v3208_v8 = vsel %vm2952_vm13, 0.0, %v3080_v40  ;;  %v2826_v3 = vsub.f32 %v2694_v57, %v11077_v62  ;;  %v11083_v21 = vld [vmem:[#allocation17_spill] sm:$0xff] }
 0x536   :  { %v4135_v29 = vsel %vm11076_vm12, %v4134_v9, %v4130_v16  ;;  %vm11078_vm4 = vcmask 261312   ;;  %v9995_v59 = vpop.permute.xlu0 %3661  ;;  %v3214_v60 = vsel %vm2958_vm5, 0.0, %v3086_v28  ;;  %v4144_v19 = vrot.slane %v3629_v54, %v9442_v48 }
 0x537   :  { %v4140_v7 = vsel %vm11078_vm4, %v4139_v23, %v4135_v29  ;;  %v4149_v55 = vrot.slane %v9901_v24, %v9341_v33  ;;  %v3209_v20 = vsel %vm2953_vm8, 0.0, %v3081_v51  ;;  %vm11079_vm2 = vcmask 326912   ;;  %v3635_v22 = vpop.permute.xlu1 %3634  ;;  %v5317_v29 = vld [vmem:[%s10189_s1 + $0x3e8] sm:$0xff] }
 0x538   :  { %v5060_v47 = vpop.eup %5059  ;;  %3835 = vperm.xlu1 %4550, %v3208_v8   ;;  %v4145_v43 = vsel %vm11079_vm2, %v4144_v19, %v4140_v7  ;;  %v3082_v14 = vmax.f32 %v2826_v3, 0.0  ;;  %v2827_v32 = vsub.f32 %v2696_v61, %v11080_v11  ;;  %vm11081_vm9 = vcmask 392512   ;;  %v5318_v19 = vld [vmem:[%s10189_s1 + $0x3f0] sm:$0xff]  ;;  %s5344_s1 = smov [#allocation2]  }
 0x539   :  { %3853 = vperm.xlu0 %4549, %v3214_v60   ;;  %v2698_v15 = vmul.f32 0.6931472, %v5060_v47  ;;  %v4150_v36 = vsel %vm11081_vm9, %v4149_v55, %v4145_v43  ;;  %vm2954_vm6 = vcmp.eq.s32.totalorder %v5315_v0, 4294967295  ;;  %v4154_v24 = vrot.slane %v3635_v22, %v9465_v49  ;;  %s4539_s16 = sshll.u32 %s5344_s1, 4  ;;  %s4540_s16 = int_to_ptr.vmem [resolvable:$true] %s4539_s16 }
 0x53a   :  { %v5062_v38 = vpop.eup %5061  ;;  %v3668_v31 = vpop.permute.xlu0 %3667  ;;  %v4159_v44 = vrot.slane %v9922_v12, %v9361_v4  ;;  %vm11082_vm11 = vcmask 458112   ;;  %v3210_v46 = vsel %vm2954_vm6, 0.0, %v3082_v14  ;;  %v3083_v13 = vmax.f32 %v2827_v32, 0.0  ;;  %s5319_s17 = scalar_lea.vmem %s4540_s16, 128  ;;  %p5324_p1 = scmp.lt.s32.totalorder %s4540_s16, %s4540_s16 }
 0x53b   :  { %v2700_v63 = vmul.f32 0.6931472, %v5062_v38  ;;  %v4155_v17 = vsel %vm11082_vm11, %v4154_v24, %v4150_v36  ;;  %v2828_v57 = vsub.f32 %v2698_v15, %v11083_v21  ;;  %v3641_v16 = vpop.permute.xlu1 %3640  ;;  %vm11084_vm10 = vcmask 523712   ;;  %p5320_p0 = scmp.ne.s32.totalorder %s4540_s16, %s5319_s17  ;;  %p5325_p2 = scmp.lt.s32.totalorder %s5319_s17, %s5319_s17 }
 0x53c   :  { %3838 = vperm.xlu1 %4550, %v3209_v20   ;;  %v4160_v26 = vsel %vm11084_vm10, %v4159_v44, %v4155_v17  ;;  %vm2955_vm13 = vcmp.eq.s32.totalorder %v5316_v45, 4294967295  ;;  %v4164_v56 = vrot.slane %v3641_v16, %v9474_v6  ;;  %v4169_v12 = vrot.slane %v9945_v34, %v9373_v53 }
 0x53d   :  { %vm11085_vm5 = vcmask 589312   ;;  %v3211_v28 = vsel %vm2955_vm13, 0.0, %v3083_v13  ;;  %v3084_v9 = vmax.f32 %v2828_v57, 0.0  ;;  %v2829_v23 = vsub.f32 %v2700_v63, %v11086_v18  ;;  %p5326_p3 = por %p5325_p2, %p5324_p1 }
 0x53e   :  { %v3674_v40 = vpop.permute.xlu0 %3673  ;;  %v4165_v58 = vsel %vm11085_vm5, %v4164_v56, %v4160_v26  ;;  %vm11087_vm8 = vcmask 654912   ;;  %vm2956_vm12 = vcmp.eq.s32.totalorder %v5317_v29, 4294967295  ;;  %v4179_v34 = vrot.slane %v9964_v52, %v9397_v35 }
 0x53f   :  { %v3647_v5 = vpop.permute.xlu1 %3646  ;;  %v4170_v51 = vsel %vm11087_vm8, %v4169_v12, %v4165_v58  ;;  %vm11088_vm4 = vcmask 720512   ;;  %v3212_v3 = vsel %vm2956_vm12, 0.0, %v3084_v9  ;;  %v3085_v47 = vmax.f32 %v2829_v23, 0.0  ;;  %p5327_p4 = pnand %p5326_p3, %p5320_p0 }
 0x540   :  { %3841 = vperm.xlu1 %4550, %v3210_v46   ;;  %v4174_v8 = vrot.slane %v3647_v5, %v9482_v25  ;;  %vm2957_vm2 = vcmp.eq.s32.totalorder %v5318_v19, 4294967295  ;;  %v4189_v20 = vrot.slane %v9977_v27, %v9410_v30  ;;  %v4199_v32 = vrot.slane %v9995_v59, %v9462_v2 }
 0x541   :  { %v3213_v38 = vsel %vm2957_vm2, 0.0, %v3085_v47  ;;  %vm4521_vm9 = vcmask 1043459   ;;  %v4208_v24 = vrot.slane %v3668_v31, %v9394_v1  ;;  %v4218_v59 = vrot.slane %v3674_v40, %v9338_v39 }
 0x542   :  { %v3680_v61 = vpop.permute.xlu0 %3679  ;;  %v4175_v62 = vsel %vm11088_vm4, %v4174_v8, %v4170_v51  ;;  %vm11089_vm6 = vcmask 195712   ;;  %vm11090_vm11 = vcmask 261312   ;;  %vm11091_vm10 = vcmask 326912  }
 0x543   :  { %v3653_v54 = vpop.permute.xlu1 %3652  ;;  %v4180_v7 = vsel %vm3934_vm0, %v4179_v34, %v4175_v62  ;;  %vm11092_vm13 = vcmask 392512   ;;  %vm11093_vm5 = vcmask 458112   ;;  %vm11094_vm8 = vcmask 523712  }
 0x544   :  { %3844 = vperm.xlu1 %4550, %v3211_v28   ;;  %v4184_v55 = vrot.slane %v3653_v54, %v9534_v50  ;;  %vm11095_vm12 = vcmask 589312   ;;  %vm11096_vm4 = vcmask 654912   ;;  %vm11097_vm2 = vcmask 720512  }
 0x546   :  { %v3686_v60 = vpop.permute.xlu0 %3685  ;;  %v4185_v52 = vsel %vm3941_vm7, %v4184_v55, %v4180_v7 }
 0x547   :  { %v3659_v15 = vpop.permute.xlu1 %3658  ;;  %v4190_v43 = vsel %vm3948_vm1, %v4189_v20, %v4185_v52  ;;  %v4238_v40 = vrot.slane %v3686_v60, %v9361_v4 }
 0x548   :  { %3847 = vperm.xlu1 %4550, %v3212_v3   ;;  %v4194_v11 = vrot.slane %v3659_v15, %v9570_v41 }
 0x54a   :  { %v3692_v14 = vpop.permute.xlu0 %3691  ;;  %v4195_v22 = vsel %vm3955_vm15, %v4194_v11, %v4190_v43 }
 0x54b   :  { %v4200_v36 = vsel %vm3962_vm14, %v4199_v32, %v4195_v22  ;;  %v3665_v0 = vpop.permute.xlu1 %3664 }
 0x54c   :  { %3850 = vperm.xlu1 %4550, %v3213_v38   ;;  %v4522_v63 = vsel %vm4521_vm9, %v4200_v36, %v9971_v10  ;;  %v4204_v44 = vrot.slane %v3665_v0, %v9328_v42  ;;  %v4228_v10 = vrot.slane %v3680_v61, %v9341_v33  ;;  %v4248_v61 = vrot.slane %v3692_v14, %v9373_v53 }
 0x54d   :  { %vm4523_vm9 = vcmask 1044484  }
 0x54e   :  { %v3698_v27 = vpop.permute.xlu0 %3697  ;;  %v4209_v17 = vsel %vm3864_vm3, %v4208_v24, %v4204_v44 }
 0x54f   :  { %v3671_v46 = vpop.permute.xlu1 %3670  ;;  %v4258_v54 = vrot.slane %v3698_v27, %v9397_v35 }
 0x550   :  { %v4213_v21 = vrot.slane %v3671_v46, %v9407_v37 }
 0x552   :  { %v3704_v13 = vpop.permute.xlu0 %3703  ;;  %v4214_v57 = vsel %vm11089_vm6, %v4213_v21, %v4209_v17 }
 0x553   :  { %v3677_v16 = vpop.permute.xlu1 %3676  ;;  %v4219_v26 = vsel %vm11090_vm11, %v4218_v59, %v4214_v57  ;;  %v4268_v52 = vrot.slane %v3704_v13, %v9410_v30 }
 0x554   :  { %v4223_v31 = vrot.slane %v3677_v16, %v9442_v48 }
 0x556   :  { %v3710_v45 = vpop.permute.xlu0 %3709  ;;  %v4224_v56 = vsel %vm11091_vm10, %v4223_v31, %v4219_v26 }
 0x557   :  { %v3683_v12 = vpop.permute.xlu1 %3682  ;;  %v4229_v58 = vsel %vm11092_vm13, %v4228_v10, %v4224_v56  ;;  %v4278_v32 = vrot.slane %v3710_v45, %v9462_v2 }
 0x558   :  { %v4233_v9 = vrot.slane %v3683_v12, %v9465_v49 }
 0x55a   :  { %v3716_v28 = vpop.permute.xlu0 %3715  ;;  %v4234_v18 = vsel %vm11093_vm5, %v4233_v9, %v4229_v58 }
 0x55b   :  { %v3689_v23 = vpop.permute.xlu1 %3688  ;;  %v4239_v5 = vsel %vm11094_vm8, %v4238_v40, %v4234_v18  ;;  %v4287_v24 = vrot.slane %v3716_v28, %v9394_v1 }
 0x55c   :  { %v4243_v29 = vrot.slane %v3689_v23, %v9474_v6 }
 0x55e   :  { %v3722_v51 = vpop.permute.xlu0 %3721  ;;  %v4244_v8 = vsel %vm11095_vm12, %v4243_v29, %v4239_v5 }
 0x55f   :  { %v3695_v34 = vpop.permute.xlu1 %3694  ;;  %v4249_v62 = vsel %vm11096_vm4, %v4248_v61, %v4244_v8  ;;  %v4297_v57 = vrot.slane %v3722_v51, %v9338_v39 }
 0x560   :  { %v4253_v47 = vrot.slane %v3695_v34, %v9482_v25 }
 0x562   :  { %v3728_v3 = vpop.permute.xlu0 %3727  ;;  %v4254_v7 = vsel %vm11097_vm2, %v4253_v47, %v4249_v62 }
 0x563   :  { %v3701_v60 = vpop.permute.xlu1 %3700  ;;  %v4259_v19 = vsel %vm3934_vm0, %v4258_v54, %v4254_v7  ;;  %v4307_v56 = vrot.slane %v3728_v3, %v9341_v33 }
 0x564   :  { %v4263_v20 = vrot.slane %v3701_v60, %v9534_v50 }
 0x566   :  { %v3734_v55 = vpop.permute.xlu0 %3733  ;;  %v4264_v38 = vsel %vm3941_vm7, %v4263_v20, %v4259_v19 }
 0x567   :  { %v3707_v15 = vpop.permute.xlu1 %3706  ;;  %v4269_v43 = vsel %vm3948_vm1, %v4268_v52, %v4264_v38  ;;  %v4317_v40 = vrot.slane %v3734_v55, %v9361_v4 }
 0x568   :  { %v4273_v11 = vrot.slane %v3707_v15, %v9570_v41 }
 0x56a   :  { %v3740_v14 = vpop.permute.xlu0 %3739  ;;  %v4274_v22 = vsel %vm3955_vm15, %v4273_v11, %v4269_v43 }
 0x56b   :  { %v4279_v36 = vsel %vm3962_vm14, %v4278_v32, %v4274_v22  ;;  %v3713_v0 = vpop.permute.xlu1 %3712  ;;  %v4327_v61 = vrot.slane %v3740_v14, %v9373_v53 }
 0x56c   :  { %v4283_v44 = vrot.slane %v3713_v0, %v9328_v42  ;;  %v4524_v17 = vsel %vm4523_vm9, %v4279_v36, %v4522_v63  ;;  %vm4525_vm9 = vcmask 1045509  }
 0x56e   :  { %v3746_v27 = vpop.permute.xlu0 %3745  ;;  %v4288_v46 = vsel %vm3864_vm3, %v4287_v24, %v4283_v44 }
 0x56f   :  { %v3719_v13 = vpop.permute.xlu1 %3718  ;;  %v4337_v54 = vrot.slane %v3746_v27, %v9397_v35 }
 0x570   :  { %v4292_v59 = vrot.slane %v3719_v13, %v9407_v37 }
 0x572   :  { %v3752_v21 = vpop.permute.xlu0 %3751  ;;  %v4293_v16 = vsel %vm11089_vm6, %v4292_v59, %v4288_v46 }
 0x573   :  { %v3725_v26 = vpop.permute.xlu1 %3724  ;;  %v4298_v45 = vsel %vm11090_vm11, %v4297_v57, %v4293_v16  ;;  %v4347_v52 = vrot.slane %v3752_v21, %v9410_v30 }
 0x574   :  { %v4302_v10 = vrot.slane %v3725_v26, %v9442_v48 }
 0x576   :  { %v3758_v31 = vpop.permute.xlu0 %3757  ;;  %v4303_v63 = vsel %vm11091_vm10, %v4302_v10, %v4298_v45 }
 0x577   :  { %v3731_v12 = vpop.permute.xlu1 %3730  ;;  %v4308_v58 = vsel %vm11092_vm13, %v4307_v56, %v4303_v63  ;;  %v4357_v32 = vrot.slane %v3758_v31, %v9462_v2 }
 0x578   :  { %v4312_v9 = vrot.slane %v3731_v12, %v9465_v49 }
 0x57a   :  { %v3764_v28 = vpop.permute.xlu0 %3763  ;;  %v4313_v18 = vsel %vm11093_vm5, %v4312_v9, %v4308_v58  ;;  %vm11098_vm5 = vmmov %vm11089_vm6 }
 0x57b   :  { %v3737_v23 = vpop.permute.xlu1 %3736  ;;  %v4318_v5 = vsel %vm11094_vm8, %v4317_v40, %v4313_v18  ;;  %vm11099_vm8 = vcmask 458112  }
 0x57c   :  { %v4322_v29 = vrot.slane %v3737_v23, %v9474_v6 }
 0x57e   :  { %v3770_v51 = vpop.permute.xlu0 %3769  ;;  %v4323_v8 = vsel %vm11095_vm12, %v4322_v29, %v4318_v5  ;;  %vm11100_vm12 = vmmov %vm11090_vm11 }
 0x57f   :  { %v3743_v34 = vpop.permute.xlu1 %3742  ;;  %v4328_v62 = vsel %vm11096_vm4, %v4327_v61, %v4323_v8  ;;  %v4376_v61 = vrot.slane %v3770_v51, %v9338_v39  ;;  %vm11102_vm4 = vmmov %vm11091_vm10 }
 0x580   :  { %v4332_v47 = vrot.slane %v3743_v34, %v9482_v25 }
 0x582   :  { %v3776_v3 = vpop.permute.xlu0 %3775  ;;  %v4333_v7 = vsel %vm11097_vm2, %v4332_v47, %v4328_v62  ;;  %vm11103_vm2 = vcmask 589312  }
 0x583   :  { %v3749_v60 = vpop.permute.xlu1 %3748  ;;  %v4338_v19 = vsel %vm3934_vm0, %v4337_v54, %v4333_v7 }
 0x584   :  { %v4342_v20 = vrot.slane %v3749_v60, %v9534_v50 }
 0x586   :  { %v3782_v55 = vpop.permute.xlu0 %3781  ;;  %v4343_v38 = vsel %vm3941_vm7, %v4342_v20, %v4338_v19  ;;  %v4386_v19 = vrot.slane %v3776_v3, %v9341_v33 }
 0x587   :  { %v3755_v15 = vpop.permute.xlu1 %3754  ;;  %v4348_v43 = vsel %vm3948_vm1, %v4347_v52, %v4343_v38 }
 0x588   :  { %v4352_v11 = vrot.slane %v3755_v15, %v9570_v41 }
 0x58a   :  { %v10101_v14 = vpop.permute.xlu0 %3787  ;;  %v4353_v22 = vsel %vm3955_vm15, %v4352_v11, %v4348_v43  ;;  %v4396_v11 = vrot.slane %v3782_v55, %v9361_v4 }
 0x58b   :  { %v4358_v36 = vsel %vm3962_vm14, %v4357_v32, %v4353_v22  ;;  %v3761_v0 = vpop.permute.xlu1 %3760 }
 0x58c   :  { %v10107_v24 = vsel %vm4525_vm9, %v4358_v36, %v4524_v17  ;;  %v4362_v12 = vrot.slane %v3761_v0, %v9328_v42  ;;  %v4366_v17 = vrot.slane %v3764_v28, %v9394_v1  ;;  %vm11104_vm9 = vmmov %vm11092_vm13 }
 0x58e   :  { %v3809_v27 = vpop.permute.xlu0 %3808  ;;  %v4367_v18 = vsel %vm3864_vm3, %v4366_v17, %v4362_v12 }
 0x58f   :  { %v3767_v44 = vpop.permute.xlu1 %3766  ;;  %v4441_v8 = vrot.slane %v3809_v27, %v9328_v42 }
 0x590   :  { %v4371_v58 = vrot.slane %v3767_v44, %v9407_v37 }
 0x592   :  { %v3815_v46 = vpop.permute.xlu0 %3814  ;;  %v4372_v23 = vsel %vm11089_vm6, %v4371_v58, %v4367_v18  ;;  %vm11105_vm6 = vcmask 654912  }
 0x593   :  { %v3773_v13 = vpop.permute.xlu1 %3772  ;;  %v4377_v62 = vsel %vm11090_vm11, %v4376_v61, %v4372_v23  ;;  %vm11106_vm11 = vmmov %vm11099_vm8 }
 0x594   :  { %v4381_v5 = vrot.slane %v3773_v13, %v9442_v48 }
 0x596   :  { %v3821_v21 = vpop.permute.xlu0 %3820  ;;  %v4382_v28 = vsel %vm11091_vm10, %v4381_v5, %v4377_v62  ;;  %vm11107_vm10 = vcmask 720512  }
 0x597   :  { %v3779_v59 = vpop.permute.xlu1 %3778  ;;  %v4387_v51 = vsel %vm11092_vm13, %v4386_v19, %v4382_v28 }
 0x598   :  { %v4391_v54 = vrot.slane %v3779_v59, %v9465_v49 }
 0x59a   :  { %v3827_v16 = vpop.permute.xlu0 %3826  ;;  %v4392_v52 = vsel %vm11099_vm8, %v4391_v54, %v4387_v51  ;;  %vm11110_vm8 = vmmov %vm11105_vm6 }
 0x59b   :  { %v3785_v57 = vpop.permute.xlu1 %3784  ;;  %v4470_v55 = vrot.slane %v3827_v16, %v9465_v49 }
 0x59c   :  { %v4401_v38 = vrot.slane %v3785_v57, %v9474_v6 }
 0x59e   :  { %v10109_v45 = vpop.permute.xlu0 %3832 }
 0x5a0   :  { %v3791_v26 = vpop.permute.xlu1 %3790 }
 0x5a1   :  { %v4411_v0 = vrot.slane %v3791_v26, %v9482_v25 }
 0x5a3   :  { %v3794_v56 = vpop.permute.xlu0 %3793 }
 0x5a4   :  { %v4416_v13 = vrot.slane %v3794_v56, %v9397_v35 }
 0x5a7   :  { %v3812_v31 = vpop.permute.xlu1 %3811  ;;  %v3797_v9 = vpop.permute.xlu0 %3796 }
 0x5a8   :  { %v4445_v29 = vrot.slane %v3812_v31, %v9394_v1  ;;  %v4450_v1 = vrot.slane %v3815_v46, %v9407_v37  ;;  %v4421_v26 = vrot.slane %v3797_v9, %v9534_v50 }
 0x5aa   :  { %v4446_v7 = vsel %vm3864_vm3, %v4445_v29, %v4441_v8  ;;  %vm11101_vm3 = vcmask 523712  }
 0x5ab   :  { %v3818_v10 = vpop.permute.xlu1 %3817  ;;  %v4451_v42 = vsel %vm11098_vm5, %v4450_v1, %v4446_v7  ;;  %v4397_v37 = vsel %vm11101_vm3, %v4396_v11, %v4392_v52  ;;  %vm11108_vm13 = vmmov %vm11101_vm3  ;;  %vm4527_vm3 = vcmask 1046534  }
 0x5ac   :  { %v3800_v47 = vpop.permute.xlu0 %3799  ;;  %v4455_v60 = vrot.slane %v3818_v10, %v9338_v39  ;;  %v4460_v39 = vrot.slane %v3821_v21, %v9442_v48  ;;  %v4402_v36 = vsel %vm11103_vm2, %v4401_v38, %v4397_v37  ;;  %vm11109_vm5 = vmmov %vm11103_vm2 }
 0x5ad   :  { %v4426_v49 = vrot.slane %v3800_v47, %v9410_v30 }
 0x5ae   :  { %v4456_v15 = vsel %vm11100_vm12, %v4455_v60, %v4451_v42  ;;  %vm11111_vm12 = vmmov %vm11107_vm10 }
 0x5af   :  { %v3824_v63 = vpop.permute.xlu1 %3823  ;;  %v4461_v22 = vsel %vm11102_vm4, %v4460_v39, %v4456_v15  ;;  %vm4529_vm4 = vcmask 1047559  }
 0x5b0   :  { %v4465_v43 = vrot.slane %v3824_v63, %v9341_v33  ;;  %v3803_v3 = vpop.permute.xlu0 %3802  ;;  %v4406_v33 = vrot.slane %v10101_v14, %v9373_v53  ;;  %v4480_v14 = vrot.slane %v10109_v45, %v9474_v6 }
 0x5b1   :  { %v4431_v10 = vrot.slane %v3803_v3, %v9570_v41 }
 0x5b2   :  { %v4466_v27 = vsel %vm11104_vm9, %v4465_v43, %v4461_v22  ;;  %v4407_v46 = vsel %vm11105_vm6, %v4406_v33, %v4402_v36 }
 0x5b3   :  { %v3830_v40 = vpop.permute.xlu1 %3829  ;;  %v4471_v21 = vsel %vm11106_vm11, %v4470_v55, %v4466_v27  ;;  %v4412_v57 = vsel %vm11107_vm10, %v4411_v0, %v4407_v46 }
 0x5b4   :  { %v4475_v44 = vrot.slane %v3830_v40, %v9361_v4  ;;  %v3806_v59 = vpop.permute.xlu0 %3805  ;;  %v4417_v12 = vsel %vm3934_vm0, %v4416_v13, %v4412_v57 }
 0x5b5   :  { %v4436_v58 = vrot.slane %v3806_v59, %v9462_v2  ;;  %v4422_v9 = vsel %vm3941_vm7, %v4421_v26, %v4417_v12 }
 0x5b6   :  { %v4476_v31 = vsel %vm11108_vm13, %v4475_v44, %v4471_v21 }
 0x5b7   :  { %v3836_v34 = vpop.permute.xlu1 %3835  ;;  %v4481_v17 = vsel %vm11109_vm5, %v4480_v14, %v4476_v31 }
 0x5b8   :  { %v4485_v4 = vrot.slane %v3836_v34, %v9373_v53  ;;  %v3854_v40 = vpop.permute.xlu0 %3853 }
 0x5ba   :  { %v4486_v6 = vsel %vm11110_vm8, %v4485_v4, %v4481_v17 }
 0x5bb   :  { %v3839_v20 = vpop.permute.xlu1 %3838 }
 0x5bc   :  { %v4490_v16 = vrot.slane %v3839_v20, %v9482_v25  ;;  %v4427_v25 = vsel %vm3948_vm1, %v4426_v49, %v4422_v9 }
 0x5bd   :  { %v4432_v18 = vsel %vm3955_vm15, %v4431_v10, %v4427_v25 }
 0x5be   :  { %v4437_v29 = vsel %vm3962_vm14, %v4436_v58, %v4432_v18 }
 0x5bf   :  { %v3842_v32 = vpop.permute.xlu1 %3841  ;;  %v4528_v47 = vsel %vm4527_vm3, %v4437_v29, %v10107_v24 }
 0x5c0   :  { %v4495_v56 = vrot.slane %v3842_v32, %v9397_v35  ;;  %v4491_v35 = vsel %vm11111_vm12, %v4490_v16, %v4486_v6 }
 0x5c2   :  { %v4496_v23 = vsel %vm3934_vm0, %v4495_v56, %v4491_v35 }
 0x5c3   :  { %v3845_v48 = vpop.permute.xlu1 %3844 }
 0x5c4   :  { %v4500_v53 = vrot.slane %v3845_v48, %v9534_v50 }
 0x5c6   :  { %v4501_v50 = vsel %vm3941_vm7, %v4500_v53, %v4496_v23 }
 0x5c7   :  { %v3848_v63 = vpop.permute.xlu1 %3847 }
 0x5c8   :  { %v4505_v45 = vrot.slane %v3848_v63, %v9410_v30  ;;  %v4515_v30 = vrot.slane %v3854_v40, %v9462_v2 }
 0x5ca   :  { %v4506_v8 = vsel %vm3948_vm1, %v4505_v45, %v4501_v50 }
 0x5cb   :  { %v3851_v5 = vpop.permute.xlu1 %3850 }
 0x5cc   :  { %v4510_v61 = vrot.slane %v3851_v5, %v9570_v41 }
 0x5ce   :  { %v4511_v34 = vsel %vm3955_vm15, %v4510_v61, %v4506_v8 }
 0x5cf   :  { %v4516_v62 = vsel %vm3962_vm14, %v4515_v30, %v4511_v34 }
 0x5d0   :  { %v4530_v28 = vsel %vm4529_vm4, %v4516_v62, %v4528_v47 }
 0x5d1   :  { %4532 = vst [vmem:[#allocation2] sm:$0xff] %v4530_v28 }
 0x5d2   :  { %5330 = shalt.err (!%p5327_p4)
}
 0x5d3   :  { %s5331_s20 = scalar_lea.hbm %s10190_s2, 128 }
 0x5d4   :  { %p5332_p5 = scmp.ne.s32.totalorder %s10190_s2, %s5331_s20  ;;  %p5335_p6 = scmp.lt.u32.totalorder %s5331_s20, %s10190_s2 }
 0x5d6   :  { %p5337_p7 = pnand %p5335_p6, %p5332_p5 }
 0x5d8   :  { %5340 = shalt.err (!%p5337_p7)
}
 0x5d9   :  { %4542 = dma.vmem_to_hbm [thread:$0]  %s4540_s16, 128, %s10190_s2, [#allocation3]  }
 0x5da   :  { %5341 = dma.done.wait [#allocation3], 128  }
 0x5db   :  { %5342 = vsyncadd [#allocation3], 4294967168 }
 0x5dc   :  { %4546 = vsyncpa [#allocation3], 1 }

</bundles_post_ra>
